<compile_context>
chip_gen: v7x
topology: tpu7x:2x2x1
jax: 0.10.0
libtpu: 0.0.40
codegen_flags: <defaults>
</compile_context>

<pallas_src>
import functools

import jax
import jax.numpy as jnp
from jax.experimental import pallas as pl
from jax.experimental.pallas import tpu as pltpu

# Layer dims: 784 -> 28 -> 250 -> 10 -> 250 -> 500 -> 784
DIMS = [784, 28, 250, 10, 250, 500, 784]


def autoencoder_kernel(x_ref,
                       w1_ref, b1_ref,
                       w2_ref, b2_ref,
                       w3_ref, b3_ref,
                       w4_ref, b4_ref,
                       w5_ref, b5_ref,
                       w6_ref, b6_ref,
                       out_ref):
    def dense(h, w_ref, b_ref):
        # bf16 operands on the MXU, f32 accumulation, f32 bias add.
        return jnp.dot(h.astype(jnp.bfloat16), w_ref[...],
                       preferred_element_type=jnp.float32) + b_ref[...]

    h = x_ref[...]                                          # (TB, 784) bf16

    # encoder
    h = jnp.maximum(dense(h, w1_ref, b1_ref), 0.0)          # relu(e1)
    h = jnp.maximum(dense(h, w2_ref, b2_ref), 0.0)          # relu(e2)
    h = dense(h, w3_ref, b3_ref)
    h = 1.0 / (1.0 + jnp.exp(-h))                           # exact sigmoid(lv), (TB,10)

    # decoder
    h = jnp.maximum(dense(h, w4_ref, b4_ref), 0.0)          # relu(d1)
    h = jnp.maximum(dense(h, w5_ref, b5_ref), 0.0)          # relu(d2)
    h = dense(h, w6_ref, b6_ref)                            # output_layer

    out_ref[...] = h.astype(out_ref.dtype)                  # (TB, 784) f32


def make_params(key):
    """Deterministic init mimicking PyTorch nn.Linear default U(-1/sqrt(in), 1/sqrt(in))."""
    params = []
    for i in range(len(DIMS) - 1):
        fan_in, fan_out = DIMS[i], DIMS[i + 1]
        key, kw, kb = jax.random.split(key, 3)
        bound = 1.0 / jnp.sqrt(jnp.float32(fan_in))
        # stored already transposed: (in, out)
        w = jax.random.uniform(kw, (fan_in, fan_out), jnp.float32, -bound, bound)
        b = jax.random.uniform(kb, (1, fan_out), jnp.float32, -bound, bound)
        params.append((w, b))
    return params


def prepare_params(params):
    """One-time param prep (hoisted out of the hot path):
    bf16 weights (MXU-native, half the DMA bytes), f32 (1, out) biases."""
    flat = []
    for w, b in params:
        flat.append(jnp.asarray(w, jnp.bfloat16))
        flat.append(jnp.asarray(b, jnp.float32).reshape(1, -1))
    return tuple(flat)


def _pick_tile(batch, tb_max):
    """Largest sane batch tile: whole (8-rounded) batch if it fits, else tb_max."""
    tb_max = max(8, min(int(tb_max), 1024))
    if batch <= tb_max:
        return max(8, ((batch + 7) // 8) * 8)
    return tb_max


@functools.partial(jax.jit, static_argnames=("tb",))
def _autoencoder_pallas(x, flat, tb):
    B = x.shape[0]
    n_tiles = pl.cdiv(B, tb)
    Bp = n_tiles * tb

    # bf16 x: halves the x HBM->VMEM DMA, removes the in-kernel f32->bf16 cast.
    x = x.astype(jnp.bfloat16)
    if Bp != B:
        x = jnp.pad(x, ((0, Bp - B), (0, 0)))

    x_spec = pl.BlockSpec((tb, DIMS[0]), lambda i: (i, 0))
    out_spec = pl.BlockSpec((tb, DIMS[-1]), lambda i: (i, 0))
    # Constant index_map -> weights/biases fetched once, kept resident in VMEM.
    param_specs = [pl.BlockSpec(a.shape, lambda i: (0, 0)) for a in flat]

    flops = 2 * Bp * sum(DIMS[i] * DIMS[i + 1] for i in range(len(DIMS) - 1))
    bytes_accessed = (Bp * DIMS[0] * 2                                # x read (bf16)
                      + sum(a.size * a.dtype.itemsize for a in flat)  # params
                      + Bp * DIMS[-1] * 4)                            # out write (f32)

    out = pl.pallas_call(
        autoencoder_kernel,
        out_shape=jax.ShapeDtypeStruct((Bp, DIMS[-1]), jnp.float32),
        grid=(n_tiles,),
        in_specs=[x_spec] + param_specs,
        out_specs=out_spec,
        compiler_params=pltpu.CompilerParams(
            dimension_semantics=("parallel",),
            vmem_limit_bytes=32 * 1024 * 1024,
        ),
        cost_estimate=pl.CostEstimate(
            flops=flops,
            transcendentals=Bp * DIMS[3],   # exp in the bottleneck sigmoid
            bytes_accessed=bytes_accessed,
        ),
    )(x, *flat)

    # Batch slice stays inside the same jit (a no-op when Bp == B).
    return out[:B]


def autoencoder_forward(x, flat_params, *, tb=512):
    """x: (B, 784) f32.  flat_params: output of prepare_params()."""
    tb = _pick_tile(x.shape[0], tb)
    return _autoencoder_pallas(x, flat_params, tb)


def reference_forward(x, params):
    h = x
    acts = ["relu", "relu", "sigmoid", "relu", "relu", "none"]
    for (w, b), act in zip(params, acts):
        h = h @ w + b
        if act == "relu":
            h = jnp.maximum(h, 0.0)
        elif act == "sigmoid":
            h = jax.nn.sigmoid(h)
    return h


if __name__ == "__main__":
    key = jax.random.PRNGKey(0)
    kx, kp = jax.random.split(key)

    B = 256
    x = jax.random.normal(kx, (B, 784), jnp.float32)
    params = make_params(kp)
    flat = prepare_params(params)   # one-time prep, hoisted out of the hot path

    out = jax.block_until_ready(autoencoder_forward(x, flat, tb=512))

    ref = reference_forward(x, params)
    assert out.shape == (B, 784), out.shape
    max_err = float(jnp.max(jnp.abs(out - ref)))
    # bf16 MXU operands => looser tolerance than pure f32.
    assert jnp.allclose(out, ref, atol=3e-2, rtol=3e-2), f"max abs err {max_err}"

    print("KERNEL_OK")
</pallas_src>

<mosaic_0001>
module attributes {stable_mosaic.version = 11 : i64} {
  func.func @autoencoder_kernel(%arg0: i32, %arg1: memref<256x784xbf16, #tpu.memory_space<vmem>>, %arg2: memref<784x28xbf16, #tpu.memory_space<vmem>>, %arg3: memref<1x28xf32, #tpu.memory_space<vmem>>, %arg4: memref<28x250xbf16, #tpu.memory_space<vmem>>, %arg5: memref<1x250xf32, #tpu.memory_space<vmem>>, %arg6: memref<250x10xbf16, #tpu.memory_space<vmem>>, %arg7: memref<1x10xf32, #tpu.memory_space<vmem>>, %arg8: memref<10x250xbf16, #tpu.memory_space<vmem>>, %arg9: memref<1x250xf32, #tpu.memory_space<vmem>>, %arg10: memref<250x500xbf16, #tpu.memory_space<vmem>>, %arg11: memref<1x500xf32, #tpu.memory_space<vmem>>, %arg12: memref<500x784xbf16, #tpu.memory_space<vmem>>, %arg13: memref<1x784xf32, #tpu.memory_space<vmem>>, %arg14: memref<256x784xf32, #tpu.memory_space<vmem>>) attributes {dimension_semantics = [#tpu.dimension_semantics<parallel>], iteration_bounds = array<i64: 1>, scalar_prefetch = 0 : i64, scratch_operands = 0 : i64, tpu.core_type = #tpu.core_type<tc>, window_params = [{transform_indices = @transform_0, window_bounds = array<i64: 256, 784>}, {pipeline_mode = #tpu.pipeline_mode<synchronous>, transform_indices = @transform_1, window_bounds = array<i64: 784, 28>}, {pipeline_mode = #tpu.pipeline_mode<synchronous>, transform_indices = @transform_2, window_bounds = array<i64: 1, 28>}, {pipeline_mode = #tpu.pipeline_mode<synchronous>, transform_indices = @transform_3, window_bounds = array<i64: 28, 250>}, {pipeline_mode = #tpu.pipeline_mode<synchronous>, transform_indices = @transform_4, window_bounds = array<i64: 1, 250>}, {pipeline_mode = #tpu.pipeline_mode<synchronous>, transform_indices = @transform_5, window_bounds = array<i64: 250, 10>}, {pipeline_mode = #tpu.pipeline_mode<synchronous>, transform_indices = @transform_6, window_bounds = array<i64: 1, 10>}, {pipeline_mode = #tpu.pipeline_mode<synchronous>, transform_indices = @transform_7, window_bounds = array<i64: 10, 250>}, {pipeline_mode = #tpu.pipeline_mode<synchronous>, transform_indices = @transform_8, window_bounds = array<i64: 1, 250>}, {pipeline_mode = #tpu.pipeline_mode<synchronous>, transform_indices = @transform_9, window_bounds = array<i64: 250, 500>}, {pipeline_mode = #tpu.pipeline_mode<synchronous>, transform_indices = @transform_10, window_bounds = array<i64: 1, 500>}, {pipeline_mode = #tpu.pipeline_mode<synchronous>, transform_indices = @transform_11, window_bounds = array<i64: 500, 784>}, {pipeline_mode = #tpu.pipeline_mode<synchronous>, transform_indices = @transform_12, window_bounds = array<i64: 1, 784>}, {transform_indices = @transform_13, window_bounds = array<i64: 256, 784>}]} {
    %c0 = arith.constant 0 : index
    %c0_0 = arith.constant 0 : index
    %0 = vector.load %arg1[%c0, %c0_0] : memref<256x784xbf16, #tpu.memory_space<vmem>>, vector<256x784xbf16>
    %c0_1 = arith.constant 0 : index
    %c0_2 = arith.constant 0 : index
    %1 = vector.load %arg2[%c0_1, %c0_2] : memref<784x28xbf16, #tpu.memory_space<vmem>>, vector<784x28xbf16>
    %cst = arith.constant dense<0.000000e+00> : vector<256x28xf32>
    %2 = tpu.matmul %0, %1, %cst {dimension_numbers = #tpu.dot_dimension_numbers<[1], [0], [0], [1], [0, 0, 1, 1], [], []>} : vector<256x784xbf16>, vector<784x28xbf16>, vector<256x28xf32> -> vector<256x28xf32>
    %c0_3 = arith.constant 0 : index
    %c0_4 = arith.constant 0 : index
    %3 = vector.load %arg3[%c0_3, %c0_4] : memref<1x28xf32, #tpu.memory_space<vmem>>, vector<1x28xf32>
    %4 = vector.broadcast %3 : vector<1x28xf32> to vector<256x28xf32>
    %5 = arith.addf %2, %4 : vector<256x28xf32>
    %cst_5 = arith.constant 0.000000e+00 : f32
    %6 = vector.broadcast %cst_5 : f32 to vector<256x28xf32>
    %7 = arith.maximumf %5, %6 : vector<256x28xf32>
    %8 = arith.truncf %7 : vector<256x28xf32> to vector<256x28xbf16>
    %c0_6 = arith.constant 0 : index
    %c0_7 = arith.constant 0 : index
    %9 = vector.load %arg4[%c0_6, %c0_7] : memref<28x250xbf16, #tpu.memory_space<vmem>>, vector<28x250xbf16>
    %cst_8 = arith.constant dense<0.000000e+00> : vector<256x250xf32>
    %10 = tpu.matmul %8, %9, %cst_8 {dimension_numbers = #tpu.dot_dimension_numbers<[1], [0], [0], [1], [0, 0, 1, 1], [], []>} : vector<256x28xbf16>, vector<28x250xbf16>, vector<256x250xf32> -> vector<256x250xf32>
    %c0_9 = arith.constant 0 : index
    %c0_10 = arith.constant 0 : index
    %11 = vector.load %arg5[%c0_9, %c0_10] : memref<1x250xf32, #tpu.memory_space<vmem>>, vector<1x250xf32>
    %12 = vector.broadcast %11 : vector<1x250xf32> to vector<256x250xf32>
    %13 = arith.addf %10, %12 : vector<256x250xf32>
    %cst_11 = arith.constant 0.000000e+00 : f32
    %14 = vector.broadcast %cst_11 : f32 to vector<256x250xf32>
    %15 = arith.maximumf %13, %14 : vector<256x250xf32>
    %16 = arith.truncf %15 : vector<256x250xf32> to vector<256x250xbf16>
    %c0_12 = arith.constant 0 : index
    %c0_13 = arith.constant 0 : index
    %17 = vector.load %arg6[%c0_12, %c0_13] : memref<250x10xbf16, #tpu.memory_space<vmem>>, vector<250x10xbf16>
    %cst_14 = arith.constant dense<0.000000e+00> : vector<256x10xf32>
    %18 = tpu.matmul %16, %17, %cst_14 {dimension_numbers = #tpu.dot_dimension_numbers<[1], [0], [0], [1], [0, 0, 1, 1], [], []>} : vector<256x250xbf16>, vector<250x10xbf16>, vector<256x10xf32> -> vector<256x10xf32>
    %c0_15 = arith.constant 0 : index
    %c0_16 = arith.constant 0 : index
    %19 = vector.load %arg7[%c0_15, %c0_16] : memref<1x10xf32, #tpu.memory_space<vmem>>, vector<1x10xf32>
    %20 = vector.broadcast %19 : vector<1x10xf32> to vector<256x10xf32>
    %21 = arith.addf %18, %20 : vector<256x10xf32>
    %cst_17 = arith.constant 0.000000e+00 : f32
    %22 = vector.broadcast %cst_17 : f32 to vector<256x10xf32>
    %23 = arith.subf %22, %21 : vector<256x10xf32>
    %24 = math.exp %23 : vector<256x10xf32>
    %cst_18 = arith.constant 1.000000e+00 : f32
    %25 = vector.broadcast %cst_18 : f32 to vector<256x10xf32>
    %26 = arith.addf %25, %24 : vector<256x10xf32>
    %cst_19 = arith.constant 1.000000e+00 : f32
    %27 = vector.broadcast %cst_19 : f32 to vector<256x10xf32>
    %28 = arith.divf %27, %26 : vector<256x10xf32>
    %29 = arith.truncf %28 : vector<256x10xf32> to vector<256x10xbf16>
    %c0_20 = arith.constant 0 : index
    %c0_21 = arith.constant 0 : index
    %30 = vector.load %arg8[%c0_20, %c0_21] : memref<10x250xbf16, #tpu.memory_space<vmem>>, vector<10x250xbf16>
    %cst_22 = arith.constant dense<0.000000e+00> : vector<256x250xf32>
    %31 = tpu.matmul %29, %30, %cst_22 {dimension_numbers = #tpu.dot_dimension_numbers<[1], [0], [0], [1], [0, 0, 1, 1], [], []>} : vector<256x10xbf16>, vector<10x250xbf16>, vector<256x250xf32> -> vector<256x250xf32>
    %c0_23 = arith.constant 0 : index
    %c0_24 = arith.constant 0 : index
    %32 = vector.load %arg9[%c0_23, %c0_24] : memref<1x250xf32, #tpu.memory_space<vmem>>, vector<1x250xf32>
    %33 = vector.broadcast %32 : vector<1x250xf32> to vector<256x250xf32>
    %34 = arith.addf %31, %33 : vector<256x250xf32>
    %cst_25 = arith.constant 0.000000e+00 : f32
    %35 = vector.broadcast %cst_25 : f32 to vector<256x250xf32>
    %36 = arith.maximumf %34, %35 : vector<256x250xf32>
    %37 = arith.truncf %36 : vector<256x250xf32> to vector<256x250xbf16>
    %c0_26 = arith.constant 0 : index
    %c0_27 = arith.constant 0 : index
    %38 = vector.load %arg10[%c0_26, %c0_27] : memref<250x500xbf16, #tpu.memory_space<vmem>>, vector<250x500xbf16>
    %cst_28 = arith.constant dense<0.000000e+00> : vector<256x500xf32>
    %39 = tpu.matmul %37, %38, %cst_28 {dimension_numbers = #tpu.dot_dimension_numbers<[1], [0], [0], [1], [0, 0, 1, 1], [], []>} : vector<256x250xbf16>, vector<250x500xbf16>, vector<256x500xf32> -> vector<256x500xf32>
    %c0_29 = arith.constant 0 : index
    %c0_30 = arith.constant 0 : index
    %40 = vector.load %arg11[%c0_29, %c0_30] : memref<1x500xf32, #tpu.memory_space<vmem>>, vector<1x500xf32>
    %41 = vector.broadcast %40 : vector<1x500xf32> to vector<256x500xf32>
    %42 = arith.addf %39, %41 : vector<256x500xf32>
    %cst_31 = arith.constant 0.000000e+00 : f32
    %43 = vector.broadcast %cst_31 : f32 to vector<256x500xf32>
    %44 = arith.maximumf %42, %43 : vector<256x500xf32>
    %45 = arith.truncf %44 : vector<256x500xf32> to vector<256x500xbf16>
    %c0_32 = arith.constant 0 : index
    %c0_33 = arith.constant 0 : index
    %46 = vector.load %arg12[%c0_32, %c0_33] : memref<500x784xbf16, #tpu.memory_space<vmem>>, vector<500x784xbf16>
    %cst_34 = arith.constant dense<0.000000e+00> : vector<256x784xf32>
    %47 = tpu.matmul %45, %46, %cst_34 {dimension_numbers = #tpu.dot_dimension_numbers<[1], [0], [0], [1], [0, 0, 1, 1], [], []>} : vector<256x500xbf16>, vector<500x784xbf16>, vector<256x784xf32> -> vector<256x784xf32>
    %c0_35 = arith.constant 0 : index
    %c0_36 = arith.constant 0 : index
    %48 = vector.load %arg13[%c0_35, %c0_36] : memref<1x784xf32, #tpu.memory_space<vmem>>, vector<1x784xf32>
    %49 = vector.broadcast %48 : vector<1x784xf32> to vector<256x784xf32>
    %50 = arith.addf %47, %49 : vector<256x784xf32>
    %c0_37 = arith.constant 0 : index
    %c0_38 = arith.constant 0 : index
    %51 = vector.load %arg14[%c0_37, %c0_38] : memref<256x784xf32, #tpu.memory_space<vmem>>, vector<256x784xf32>
    tpu.vector_store %arg14[%c0_37, %c0_38], %50 {strides = array<i32>} : memref<256x784xf32, #tpu.memory_space<vmem>>, vector<256x784xf32>,
    return
  }
  func.func @transform_0(%arg0: i32) -> (i32, i32) {
    %c0_i32 = arith.constant 0 : i32
    %c0_i32_0 = arith.constant 0 : i32
    return %arg0, %c0_i32 : i32, i32
  }
  func.func @transform_1(%arg0: i32) -> (i32, i32) {
    %c0_i32 = arith.constant 0 : i32
    %c0_i32_0 = arith.constant 0 : i32
    %c0_i32_1 = arith.constant 0 : i32
    return %c0_i32, %c0_i32_0 : i32, i32
  }
  func.func @transform_2(%arg0: i32) -> (i32, i32) {
    %c0_i32 = arith.constant 0 : i32
    %c0_i32_0 = arith.constant 0 : i32
    %c0_i32_1 = arith.constant 0 : i32
    return %c0_i32, %c0_i32_0 : i32, i32
  }
  func.func @transform_3(%arg0: i32) -> (i32, i32) {
    %c0_i32 = arith.constant 0 : i32
    %c0_i32_0 = arith.constant 0 : i32
    %c0_i32_1 = arith.constant 0 : i32
    return %c0_i32, %c0_i32_0 : i32, i32
  }
  func.func @transform_4(%arg0: i32) -> (i32, i32) {
    %c0_i32 = arith.constant 0 : i32
    %c0_i32_0 = arith.constant 0 : i32
    %c0_i32_1 = arith.constant 0 : i32
    return %c0_i32, %c0_i32_0 : i32, i32
  }
  func.func @transform_5(%arg0: i32) -> (i32, i32) {
    %c0_i32 = arith.constant 0 : i32
    %c0_i32_0 = arith.constant 0 : i32
    %c0_i32_1 = arith.constant 0 : i32
    return %c0_i32, %c0_i32_0 : i32, i32
  }
  func.func @transform_6(%arg0: i32) -> (i32, i32) {
    %c0_i32 = arith.constant 0 : i32
    %c0_i32_0 = arith.constant 0 : i32
    %c0_i32_1 = arith.constant 0 : i32
    return %c0_i32, %c0_i32_0 : i32, i32
  }
  func.func @transform_7(%arg0: i32) -> (i32, i32) {
    %c0_i32 = arith.constant 0 : i32
    %c0_i32_0 = arith.constant 0 : i32
    %c0_i32_1 = arith.constant 0 : i32
    return %c0_i32, %c0_i32_0 : i32, i32
  }
  func.func @transform_8(%arg0: i32) -> (i32, i32) {
    %c0_i32 = arith.constant 0 : i32
    %c0_i32_0 = arith.constant 0 : i32
    %c0_i32_1 = arith.constant 0 : i32
    return %c0_i32, %c0_i32_0 : i32, i32
  }
  func.func @transform_9(%arg0: i32) -> (i32, i32) {
    %c0_i32 = arith.constant 0 : i32
    %c0_i32_0 = arith.constant 0 : i32
    %c0_i32_1 = arith.constant 0 : i32
    return %c0_i32, %c0_i32_0 : i32, i32
  }
  func.func @transform_10(%arg0: i32) -> (i32, i32) {
    %c0_i32 = arith.constant 0 : i32
    %c0_i32_0 = arith.constant 0 : i32
    %c0_i32_1 = arith.constant 0 : i32
    return %c0_i32, %c0_i32_0 : i32, i32
  }
  func.func @transform_11(%arg0: i32) -> (i32, i32) {
    %c0_i32 = arith.constant 0 : i32
    %c0_i32_0 = arith.constant 0 : i32
    %c0_i32_1 = arith.constant 0 : i32
    return %c0_i32, %c0_i32_0 : i32, i32
  }
  func.func @transform_12(%arg0: i32) -> (i32, i32) {
    %c0_i32 = arith.constant 0 : i32
    %c0_i32_0 = arith.constant 0 : i32
    %c0_i32_1 = arith.constant 0 : i32
    return %c0_i32, %c0_i32_0 : i32, i32
  }
  func.func @transform_13(%arg0: i32) -> (i32, i32) {
    %c0_i32 = arith.constant 0 : i32
    %c0_i32_0 = arith.constant 0 : i32
    return %arg0, %c0_i32 : i32, i32
  }
}

</mosaic_0001>

<bundles_post_ra>
// kernel: _autoencoder_pallas.1
= control target key start
LH: loop header
LB: loop body
LE: loop exit
PB: predicated region body
PF: predicated region fallthrough
CT: control target
= control target key end

     0   :  { %vm1132_vm0 = vcmask 130048   ;;  %vm1956_vm1 = vcmask 1045504   ;;  %vm1907_vm2 = vcmask 228352   ;;  %vm2435_vm3 = vcmask 1044480   ;;  %s13668_s1 = inlined_call_operand.vmem [shape: bf16[784,28], index: 1, kind: input, shape index: {}]   ;;  %s13669_s0 = inlined_call_operand.vmem [shape: bf16[256,784], index: 0, kind: input, shape index: {}]   ;;  %s13670_s3 = inlined_call_operand.vmem [shape: bf16[28,250], index: 3, kind: input, shape index: {}]   ;;  %s13671_s2 = inlined_call_operand.vmem [shape: f32[1,28], index: 2, kind: input, shape index: {}]   ;;  %s13672_s5 = inlined_call_operand.vmem [shape: bf16[250,10], index: 5, kind: input, shape index: {}]   ;;  %s13673_s4 = inlined_call_operand.vmem [shape: f32[1,250], index: 4, kind: input, shape index: {}]   ;;  %s13674_s7 = inlined_call_operand.vmem [shape: bf16[10,250], index: 7, kind: input, shape index: {}]   ;;  %s13675_s6 = inlined_call_operand.vmem [shape: f32[1,10], index: 6, kind: input, shape index: {}]   ;;  %s13676_s9 = inlined_call_operand.vmem [shape: bf16[250,500], index: 9, kind: input, shape index: {}]   ;;  %s13677_s11 = inlined_call_operand.vmem [shape: bf16[500,784], index: 11, kind: input, shape index: {}]   ;;  %s13678_s8 = inlined_call_operand.vmem [shape: f32[1,250], index: 8, kind: input, shape index: {}]   ;;  %s13679_s10 = inlined_call_operand.vmem [shape: f32[1,500], index: 10, kind: input, shape index: {}]   ;;  %s13680_s12 = inlined_call_operand.vmem [shape: f32[1,784], index: 12, kind: input, shape index: {}]   ;;  %s13681_s13 = inlined_call_operand.vmem [shape: f32[256,784], index: 13, kind: output, shape index: {}]  }
   0x1   :  { %v9182_v0 = vld [vmem:[%s13668_s1 + $0x40] sm:$0xff]   ;;  %v9184_v2 = vld [vmem:[%s13668_s1 + $0x48] sm:$0xff]   ;;  %v9186_v4 = vld [vmem:[%s13668_s1 + $0x50] sm:$0xff]   ;;  %vm2386_vm4 = vcmask 998400   ;;  %vm2830_vm5 = vcmask 80896   ;;  %vm5686_vm6 = vcmask 1041408  }
   0x2   :  { %v9183_v1 = vld [vmem:[%s13668_s1] sm:$0xff]   ;;  %8056 = vmatprep.subr.bf16.mxu0 %v9182_v0  ;;  %v9185_v3 = vld [vmem:[%s13668_s1 + $0x8] sm:$0xff]   ;;  %v9187_v5 = vld [vmem:[%s13668_s1 + $0x10] sm:$0xff]   ;;  %vm5637_vm7 = vcmask 949248  }
   0x3   :  { %8057 = vmatpush3.bf16.msra.mxu0 %v9183_v1  ;;  %v9188_v6 = vld [vmem:[%s13668_s1 + $0x58] sm:$0xff]   ;;  %v9190_v8 = vld [vmem:[%s13668_s1 + $0x60] sm:$0xff]   ;;  %v9192_v10 = vld [vmem:[%s13668_s1 + $0x68] sm:$0xff]  }
   0x4   :  { %8058 = vmatprep.subr.bf16.mxu0 %v9184_v2  ;;  %v9189_v7 = vld [vmem:[%s13668_s1 + $0x18] sm:$0xff]   ;;  %v9191_v9 = vld [vmem:[%s13668_s1 + $0x20] sm:$0xff]   ;;  %v9193_v11 = vld [vmem:[%s13668_s1 + $0x28] sm:$0xff]  }
   0x5   :  { %v9200_v12 = vld [vmem:[%s13669_s0 + $0x4] ss:$28 sps:$4 sm:$0xff]   ;;  %v9194_v13 = vld [vmem:[%s13668_s1 + $0x70] sm:$0xff]   ;;  %v9203_v16 = vld [vmem:[%s13668_s1 + $0xc8] sm:$0xff]  }
   0x6   :  { %v9201_v14 = vld [vmem:[%s13668_s1 + $0xc0] sm:$0xff]   ;;  %1213 = vmatprep.mubr.bf16.mxu0 %v9200_v12  ;;  %v9195_v17 = vld [vmem:[%s13668_s1 + $0x30] sm:$0xff]   ;;  %v9206_v18 = vld [vmem:[%s13668_s1 + $0x88] sm:$0xff]  }
   0x7   :  { %8059 = vmatpush3.bf16.msra.mxu0 %v9185_v3  ;;  %v9202_v15 = vld [vmem:[%s13668_s1 + $0x80] sm:$0xff]   ;;  %8779 = vmatprep.subr.bf16.mxu1 %v9201_v14  ;;  %v9208_v19 = vld [vmem:[%s13668_s1 + $0xd0] sm:$0xff]   ;;  %v9196_v20 = vld [vmem:[%s13668_s1 + $0x78] sm:$0xff]  }
   0x8   :  { %8060 = vmatprep.subr.bf16.mxu0 %v9186_v4  ;;  %8787 = vmatpush3.bf16.msra.mxu1 %v9202_v15  ;;  %v9209_v21 = vld [vmem:[%s13668_s1 + $0x90] sm:$0xff]   ;;  %v9210_v22 = vld [vmem:[%s13668_s1 + $0xd8] sm:$0xff]   ;;  %v9215_v26 = vld [vmem:[%s13668_s1 + $0xe0] sm:$0xff]  }
   0x9   :  { %8780 = vmatprep.subr.bf16.mxu1 %v9203_v16  ;;  %v9197_v23 = vld [vmem:[%s13668_s1 + $0x38] sm:$0xff]   ;;  %v9216_v28 = vld [vmem:[%s13668_s1 + $0xa0] sm:$0xff]   ;;  %v9217_v29 = vld [vmem:[%s13668_s1 + $0xe8] sm:$0xff]  }
   0xa   :  { %v9198_v24 = vld [vmem:[%s13669_s0] ss:$28 sps:$4 sm:$0xff]   ;;  %v9220_v30 = vld [vmem:[%s13668_s1 + $0xa8] sm:$0xff]   ;;  %v9207_v31 = vld [vmem:[%s13669_s0 + $0x38] ss:$28 sps:$4 sm:$0xff]  }
   0xb   :  { %8061 = vmatpush3.bf16.msra.mxu0 %v9187_v5  ;;  %v9213_v25 = vld [vmem:[%s13668_s1 + $0x98] sm:$0xff]   ;;  %v9222_v32 = vld [vmem:[%s13668_s1 + $0xf0] sm:$0xff]   ;;  %v9231_v34 = vld [vmem:[%s13669_s0 + $0xec] ss:$28 sps:$4 sm:$0xff]  }
   0xc   :  { %8062 = vmatprep.subr.bf16.mxu0 %v9188_v6  ;;  %8788 = vmatpush3.bf16.msra.mxu1 %v9206_v18  ;;  %v9204_v27 = vld [vmem:[%s13669_s0 + $0x3c] ss:$28 sps:$4 sm:$0xff]   ;;  %v9211_v33 = vld [vmem:[%s13669_s0 + $0x74] ss:$28 sps:$4 sm:$0xff]   ;;  %v9218_v39 = vld [vmem:[%s13669_s0 + $0xac] ss:$28 sps:$4 sm:$0xff]  }
   0xd   :  { %8781 = vmatprep.subr.bf16.mxu1 %v9208_v19  ;;  %v9223_v35 = vld [vmem:[%s13668_s1 + $0xb0] sm:$0xff]   ;;  %1406 = vmatprep.mubr.bf16.mxu1 %v9231_v34  ;;  %v9224_v36 = vld [vmem:[%s13668_s1 + $0xf8] sm:$0xff]   ;;  %v9229_v40 = vld [vmem:[%s13669_s0 + $0xe8] ss:$28 sps:$4 sm:$0xff]  }
   0xe   :  { %v9227_v37 = vld [vmem:[%s13668_s1 + $0xb8] sm:$0xff]   ;;  %v9214_v38 = vld [vmem:[%s13669_s0 + $0x70] ss:$28 sps:$4 sm:$0xff]   ;;  %v9235_v41 = vld [vmem:[%s13669_s0 + $0x124] ss:$28 sps:$4 sm:$0xff]  }
   0xf   :  { %8063 = vmatpush3.bf16.msra.mxu0 %v9189_v7  ;;  %v9256_v42 = vld [vmem:[%s13668_s1 + $0x180] sm:$0xff]   ;;  %v9241_v46 = vld [vmem:[%s13669_s0 + $0x15c] ss:$28 sps:$4 sm:$0xff]   ;;  %v9247_v50 = vld [vmem:[%s13669_s0 + $0x194] ss:$28 sps:$4 sm:$0xff]  }
  0x10   :  { %8064 = vmatprep.subr.bf16.mxu0 %v9190_v8  ;;  %8789 = vmatpush3.bf16.msra.mxu1 %v9209_v21  ;;  %v9221_v43 = vld [vmem:[%s13669_s0 + $0xa8] ss:$28 sps:$4 sm:$0xff]   ;;  %v9237_v45 = vld [vmem:[%s13669_s0 + $0x120] ss:$28 sps:$4 sm:$0xff]   ;;  %v9243_v49 = vld [vmem:[%s13669_s0 + $0x158] ss:$28 sps:$4 sm:$0xff]  }
  0x11   :  { %8782 = vmatprep.subr.bf16.mxu1 %v9210_v22  ;;  %v9225_v44 = vld [vmem:[%s13669_s0 + $0xe4] ss:$28 sps:$4 sm:$0xff]   ;;  %v9232_v48 = vld [vmem:[%s13669_s0 + $0x11c] ss:$28 sps:$4 sm:$0xff]   ;;  %v9238_v52 = vld [vmem:[%s13669_s0 + $0x154] ss:$28 sps:$4 sm:$0xff]  }
  0x12   :  { %v9228_v47 = vld [vmem:[%s13669_s0 + $0xe0] ss:$28 sps:$4 sm:$0xff]   ;;  %v9234_v51 = vld [vmem:[%s13669_s0 + $0x118] ss:$28 sps:$4 sm:$0xff]   ;;  %v9249_v53 = vld [vmem:[%s13669_s0 + $0x190] ss:$28 sps:$4 sm:$0xff]  }
  0x13   :  { %8065 = vmatpush3.bf16.msra.mxu0 %v9191_v9  ;;  %v9302_v54 = vld [vmem:[%s13668_s1 + $0x140] sm:$0xff]   ;;  %v9253_v55 = vld [vmem:[%s13669_s0 + $0x1cc] ss:$28 sps:$4 sm:$0xff]   ;;  %v9266_v63 = vld [vmem:[%s13669_s0 + $0x23c] ss:$28 sps:$4 sm:$0xff]  }
  0x14   :  { %8066 = vmatprep.subr.bf16.mxu0 %v9192_v10  ;;  %8790 = vmatpush3.bf16.msra.mxu1 %v9213_v25  ;;  %v9240_v56 = vld [vmem:[%s13669_s0 + $0x150] ss:$28 sps:$4 sm:$0xff]   ;;  %v9255_v58 = vld [vmem:[%s13669_s0 + $0x1c8] ss:$28 sps:$4 sm:$0xff]   ;;  %v9262_v62 = vld [vmem:[%s13669_s0 + $0x200] ss:$28 sps:$4 sm:$0xff]  }
  0x15   :  { %8783 = vmatprep.subr.bf16.mxu1 %v9215_v26  ;;  %v9244_v57 = vld [vmem:[%s13669_s0 + $0x18c] ss:$28 sps:$4 sm:$0xff]   ;;  %v9260_v59 = vld [vmem:[%s13669_s0 + $0x204] ss:$28 sps:$4 sm:$0xff]   ;;  %v9257_v1 = vld [vmem:[%s13669_s0 + $0x1fc] ss:$28 sps:$4 sm:$0xff]  }
  0x16   :  { %v9246_v60 = vld [vmem:[%s13669_s0 + $0x188] ss:$28 sps:$4 sm:$0xff]   ;;  %v9252_v0 = vld [vmem:[%s13669_s0 + $0x1c0] ss:$28 sps:$4 sm:$0xff]   ;;  %v9268_v2 = vld [vmem:[%s13669_s0 + $0x238] ss:$28 sps:$4 sm:$0xff]  }
  0x17   :  { %8067 = vmatpush3.bf16.msra.mxu0 %v9193_v11  ;;  %v9250_v61 = vld [vmem:[%s13669_s0 + $0x1c4] ss:$28 sps:$4 sm:$0xff]   ;;  %v9272_v3 = vld [vmem:[%s13669_s0 + $0x274] ss:$28 sps:$4 sm:$0xff]   ;;  %v9278_v7 = vld [vmem:[%s13669_s0 + $0x2ac] ss:$28 sps:$4 sm:$0xff]  }
  0x18   :  { %8068 = vmatprep.subr.bf16.mxu0 %v9194_v13  ;;  %8791 = vmatpush3.bf16.msra.mxu1 %v9216_v28  ;;  %v9259_v4 = vld [vmem:[%s13669_s0 + $0x1f8] ss:$28 sps:$4 sm:$0xff]   ;;  %v9274_v6 = vld [vmem:[%s13669_s0 + $0x270] ss:$28 sps:$4 sm:$0xff]   ;;  %v9280_v10 = vld [vmem:[%s13669_s0 + $0x2a8] ss:$28 sps:$4 sm:$0xff]  }
  0x19   :  { %8784 = vmatprep.subr.bf16.mxu1 %v9217_v29  ;;  %v9263_v5 = vld [vmem:[%s13669_s0 + $0x234] ss:$28 sps:$4 sm:$0xff]   ;;  %v9269_v9 = vld [vmem:[%s13669_s0 + $0x26c] ss:$28 sps:$4 sm:$0xff]   ;;  %v9284_v11 = vld [vmem:[%s13669_s0 + $0x2e4] ss:$28 sps:$4 sm:$0xff]  }
  0x1a   :  { %v9265_v8 = vld [vmem:[%s13669_s0 + $0x230] ss:$28 sps:$4 sm:$0xff]   ;;  %v9271_v12 = vld [vmem:[%s13669_s0 + $0x268] ss:$28 sps:$4 sm:$0xff]  }
  0x1b   :  { %8069 = vmatpush3.bf16.msra.mxu0 %v9195_v17  ;;  %v9275_v13 = vld [vmem:[%s13669_s0 + $0x2a4] ss:$28 sps:$4 sm:$0xff]   ;;  %v9281_v17 = vld [vmem:[%s13669_s0 + $0x2dc] ss:$28 sps:$4 sm:$0xff]  }
  0x1c   :  { %8070 = vmatprep.subr.bf16.mxu0 %v9196_v20  ;;  %8792 = vmatpush3.bf16.msra.mxu1 %v9220_v30  ;;  %v9283_v20 = vld [vmem:[%s13669_s0 + $0x2d8] ss:$28 sps:$4 sm:$0xff]   ;;  %v9306_v34 = vld [vmem:[%s13669_s0 + $0x44] ss:$28 sps:$4 sm:$0xff]  }
  0x1d   :  { %8785 = vmatprep.subr.bf16.mxu1 %v9222_v32 }
  0x1f   :  { %8071 = vmatpush3.bf16.msra.mxu0 %v9197_v23  ;;  %v9330_v23 = vld [vmem:[%s13669_s0 + $0x18] ss:$28 sps:$4 sm:$0xff]  }
  0x20   :  { %8168 = vmatprep.subr.bf16.mxu0 %v9201_v14  ;;  %8793 = vmatpush3.bf16.msra.mxu1 %v9223_v35  ;;  %v9286_v14 = vld [vmem:[%s13669_s0 + $0x2e0] ss:$28 sps:$4 sm:$0xff]  }
  0x21   :  { %8786 = vmatprep.subr.bf16.mxu1 %v9224_v36 }
  0x22   :  { %1214 = vmatmul.mubr.bf16.vlgmr.msra.gmra.mrb[0].mxu0 %v9198_v24  ;;  %v9289_v24 = vld [vmem:[%s13669_s0 + $0x310] ss:$28 sps:$4 sm:$0xff]  }
  0x23   :  { %8169 = vmatpush3.bf16.msra.mxu0 %v9202_v15  ;;  %1221 = vmatprep.mubr.bf16.mxu0 %v9204_v27  ;;  %v9290_v15 = vld [vmem:[%s13669_s0 + $0x31c] ss:$28 sps:$4 sm:$0xff]   ;;  %v9338_v27 = vld [vmem:[%s13669_s0 + $0x88] ss:$28 sps:$4 sm:$0xff]  }
  0x24   :  { %8170 = vmatprep.subr.bf16.mxu0 %v9203_v16  ;;  %8794 = vmatpush3.bf16.msra.mxu1 %v9227_v37  ;;  %v9277_v16 = vld [vmem:[%s13669_s0 + $0x2a0] ss:$28 sps:$4 sm:$0xff]  }
  0x25   :  { %8745 = vmatprep.subr.bf16.mxu1 %v9256_v42 }
  0x27   :  { %8171 = vmatpush3.bf16.msra.mxu0 %v9206_v18  ;;  %1407 = vmatmul.mubr.bf16.vlgmr.msra.gmra.mrb[0].mxu1 %v9229_v40  ;;  %v9292_v18 = vld [vmem:[%s13669_s0 + $0x318] ss:$28 sps:$4 sm:$0xff]   ;;  %v9308_v40 = vld [vmem:[%s13669_s0 + $0x40] ss:$28 sps:$4 sm:$0xff]  }
  0x28   :  { %8172 = vmatprep.subr.bf16.mxu0 %v9208_v19  ;;  %1414 = vmatprep.mubr.bf16.mxu1 %v9235_v41  ;;  %v9296_v19 = vld [vmem:[%s13669_s0 + $0x354] ss:$28 sps:$4 sm:$0xff]  }
  0x29   :  { %8746 = vmatpush3.bf16.msra.mxu1 %v9256_v42  ;;  %v9310_v41 = vld [vmem:[%s13668_s1 + $0x110] sm:$0xff]   ;;  %v9313_v42 = vld [vmem:[%s13669_s0 + $0x7c] ss:$28 sps:$4 sm:$0xff]  }
  0x2a   :  { %1222 = vmatmul.mubr.bf16.gmra.mrb[4].mxu0 %v9207_v31  ;;  %v9346_v31 = vld [vmem:[%s13669_s0 + $0xf8] ss:$28 sps:$4 sm:$0xff]  }
  0x2b   :  { %1229 = vmatprep.mubr.bf16.mxu0 %v9211_v33  ;;  %8173 = vmatpush3.bf16.msra.mxu0 %v9209_v21  ;;  %v9287_v21 = vld [vmem:[%s13669_s0 + $0x314] ss:$28 sps:$4 sm:$0xff]   ;;  %v9303_v33 = vld [vmem:[%s13668_s1 + $0x100] sm:$0xff]  }
  0x2c   :  { %8174 = vmatprep.subr.bf16.mxu0 %v9210_v22  ;;  %v9298_v22 = vld [vmem:[%s13669_s0 + $0x350] ss:$28 sps:$4 sm:$0xff]  }
  0x2f   :  { %8175 = vmatpush3.bf16.msra.mxu0 %v9213_v25  ;;  %1415 = vmatmul.mubr.bf16.gmra.mrb[4].mxu1 %v9237_v45  ;;  %v9293_v25 = vld [vmem:[%s13669_s0 + $0x34c] ss:$28 sps:$4 sm:$0xff]   ;;  %v9362_v45 = vld [vmem:[%s13669_s0 + $0x1d8] ss:$28 sps:$4 sm:$0xff]  }
  0x30   :  { %8176 = vmatprep.subr.bf16.mxu0 %v9215_v26  ;;  %1422 = vmatprep.mubr.bf16.mxu1 %v9241_v46  ;;  %v9331_v26 = vld [vmem:[%s13669_s0 + $0x50] ss:$28 sps:$4 sm:$0xff]   ;;  %v9312_v46 = vld [vmem:[%s13668_s1 + $0x118] sm:$0xff]  }
  0x32   :  { %1230 = vmatmul.mubr.bf16.gmra.mrb[8].mxu0 %v9214_v38  ;;  %v9305_v38 = vld [vmem:[%s13668_s1 + $0x108] sm:$0xff]  }
  0x33   :  { %1237 = vmatprep.mubr.bf16.mxu0 %v9218_v39  ;;  %8177 = vmatpush3.bf16.msra.mxu0 %v9216_v28  ;;  %v9295_v28 = vld [vmem:[%s13669_s0 + $0x348] ss:$28 sps:$4 sm:$0xff]   ;;  %v9309_v39 = vld [vmem:[%s13668_s1 + $0x150] sm:$0xff]  }
  0x34   :  { %8178 = vmatprep.subr.bf16.mxu0 %v9217_v29  ;;  %v9301_v29 = vld [vmem:[%s13669_s0 + $0xc] ss:$28 sps:$4 sm:$0xff]  }
  0x37   :  { %8179 = vmatpush3.bf16.msra.mxu0 %v9220_v30  ;;  %1423 = vmatmul.mubr.bf16.gmra.mrb[8].mxu1 %v9243_v49  ;;  %v9339_v30 = vld [vmem:[%s13669_s0 + $0xc0] ss:$28 sps:$4 sm:$0xff]  }
  0x38   :  { %8180 = vmatprep.subr.bf16.mxu0 %v9222_v32  ;;  %1430 = vmatprep.mubr.bf16.mxu1 %v9247_v50  ;;  %v9299_v32 = vld [vmem:[%s13669_s0 + $0x8] ss:$28 sps:$4 sm:$0xff]   ;;  %v9320_v50 = vld [vmem:[%s13669_s0 + $0xb4] ss:$28 sps:$4 sm:$0xff]  }
  0x39   :  { %v9317_v49 = vld [vmem:[%s13668_s1 + $0x120] sm:$0xff]  }
  0x3a   :  { %1238 = vmatmul.mubr.bf16.gmra.mrb[12].mxu0 %v9221_v43  ;;  %v9311_v43 = vld [vmem:[%s13668_s1 + $0x158] sm:$0xff]  }
  0x3b   :  { %1245 = vmatprep.mubr.bf16.mxu0 %v9225_v44  ;;  %8181 = vmatpush3.bf16.msra.mxu0 %v9223_v35  ;;  %v9304_v35 = vld [vmem:[%s13668_s1 + $0x148] sm:$0xff]   ;;  %v9355_v44 = vld [vmem:[%s13669_s0 + $0x1a0] ss:$28 sps:$4 sm:$0xff]  }
  0x3c   :  { %8182 = vmatprep.subr.bf16.mxu0 %v9224_v36  ;;  %v9347_v36 = vld [vmem:[%s13669_s0 + $0x130] ss:$28 sps:$4 sm:$0xff]  }
  0x3f   :  { %8183 = vmatpush3.bf16.msra.mxu0 %v9227_v37  ;;  %1431 = vmatmul.mubr.bf16.gmra.mrb[12].mxu1 %v9249_v53  ;;  %v9354_v37 = vld [vmem:[%s13669_s0 + $0x168] ss:$28 sps:$4 sm:$0xff]  }
  0x40   :  { %8280 = vmatprep.subr.bf16.mxu0 %v9302_v54  ;;  %1438 = vmatprep.mubr.bf16.mxu1 %v9253_v55  ;;  %v9370_v53 = vld [vmem:[%s13669_s0 + $0x248] ss:$28 sps:$4 sm:$0xff]   ;;  %v9323_v55 = vld [vmem:[%s13668_s1 + $0x170] sm:$0xff]  }
  0x41   :  { %v9319_v54 = vld [vmem:[%s13668_s1 + $0x128] sm:$0xff]  }
  0x42   :  { %1246 = vmatmul.mubr.bf16.gmra.mrb[16].mxu0 %v9228_v47  ;;  %v9316_v47 = vld [vmem:[%s13668_s1 + $0x160] sm:$0xff]  }
  0x43   :  { %1253 = vmatprep.mubr.bf16.mxu0 %v9232_v48  ;;  %v9315_v48 = vld [vmem:[%s13669_s0 + $0x78] ss:$28 sps:$4 sm:$0xff]  }
  0x47   :  { %1439 = vmatmul.mubr.bf16.gmra.mrb[16].mxu1 %v9255_v58  ;;  %v9329_v58 = vld [vmem:[%s13669_s0 + $0x14] ss:$28 sps:$4 sm:$0xff]  }
  0x48   :  { %1446 = vmatprep.mubr.bf16.mxu1 %v9260_v59  ;;  %v9325_v59 = vld [vmem:[%s13668_s1 + $0x178] sm:$0xff]  }
  0x4a   :  { %1254 = vmatmul.mubr.bf16.gmra.mrb[20].mxu0 %v9234_v51  ;;  %v9318_v51 = vld [vmem:[%s13668_s1 + $0x168] sm:$0xff]  }
  0x4b   :  { %1261 = vmatprep.mubr.bf16.mxu0 %v9238_v52  ;;  %v9363_v52 = vld [vmem:[%s13669_s0 + $0x210] ss:$28 sps:$4 sm:$0xff]  }
  0x4f   :  { %1447 = vmatmul.mubr.bf16.gmra.mrb[20].mxu1 %v9262_v62  ;;  %v9326_v62 = vld [vmem:[%s13668_s1 + $0x138] sm:$0xff]  }
  0x50   :  { %1454 = vmatprep.mubr.bf16.mxu1 %v9266_v63  ;;  %v9327_v63 = vld [vmem:[%s13669_s0 + $0x10] ss:$28 sps:$4 sm:$0xff]  }
  0x52   :  { %1262 = vmatmul.mubr.bf16.gmra.mrb[24].mxu0 %v9240_v56  ;;  %v9322_v56 = vld [vmem:[%s13669_s0 + $0xb0] ss:$28 sps:$4 sm:$0xff]  }
  0x53   :  { %1269 = vmatprep.mubr.bf16.mxu0 %v9244_v57  ;;  %v9324_v57 = vld [vmem:[%s13668_s1 + $0x130] sm:$0xff]  }
  0x57   :  { %1455 = vmatmul.mubr.bf16.gmra.mrb[24].mxu1 %v9268_v2  ;;  %v9386_v2 = vld [vmem:[%s13669_s0 + $0x328] ss:$28 sps:$4 sm:$0xff]  }
  0x58   :  { %1462 = vmatprep.mubr.bf16.mxu1 %v9272_v3  ;;  %v9334_v3 = vld [vmem:[%s13669_s0 + $0x48] ss:$28 sps:$4 sm:$0xff]  }
  0x5a   :  { %1270 = vmatmul.mubr.bf16.gmra.mrb[28].mxu0 %v9246_v60  ;;  %v9371_v60 = vld [vmem:[%s13669_s0 + $0x280] ss:$28 sps:$4 sm:$0xff]  }
  0x5b   :  { %1277 = vmatprep.mubr.bf16.mxu0 %v9250_v61  ;;  %v9378_v61 = vld [vmem:[%s13669_s0 + $0x2b8] ss:$28 sps:$4 sm:$0xff]  }
  0x5f   :  { %1463 = vmatmul.mubr.bf16.gmra.mrb[28].mxu1 %v9274_v6  ;;  %v9337_v6 = vld [vmem:[%s13669_s0 + $0x80] ss:$28 sps:$4 sm:$0xff]  }
  0x60   :  { %1470 = vmatprep.mubr.bf16.mxu1 %v9278_v7  ;;  %v9340_v7 = vld [vmem:[%s13669_s0 + $0xbc] ss:$28 sps:$4 sm:$0xff]  }
  0x62   :  { %1278 = vmatmul.mubr.bf16.gmra.mrb[32].mxu0 %v9252_v0  ;;  %v9332_v0 = vld [vmem:[%s13669_s0 + $0x4c] ss:$28 sps:$4 sm:$0xff]  }
  0x63   :  { %1285 = vmatprep.mubr.bf16.mxu0 %v9257_v1  ;;  %v9379_v1 = vld [vmem:[%s13669_s0 + $0x2f0] ss:$28 sps:$4 sm:$0xff]  }
  0x67   :  { %1471 = vmatmul.mubr.bf16.gmra.mrb[32].mxu1 %v9280_v10  ;;  %v9345_v10 = vld [vmem:[%s13669_s0 + $0xf0] ss:$28 sps:$4 sm:$0xff]  }
  0x68   :  { %1478 = vmatprep.mubr.bf16.mxu1 %v9284_v11  ;;  %v9348_v11 = vld [vmem:[%s13669_s0 + $0x12c] ss:$28 sps:$4 sm:$0xff]  }
  0x6a   :  { %1286 = vmatmul.mubr.bf16.gmra.mrb[36].mxu0 %v9259_v4  ;;  %v9335_v4 = vld [vmem:[%s13669_s0 + $0x84] ss:$28 sps:$4 sm:$0xff]  }
  0x6b   :  { %1293 = vmatprep.mubr.bf16.mxu0 %v9263_v5  ;;  %v9387_v5 = vld [vmem:[%s13669_s0 + $0x360] ss:$28 sps:$4 sm:$0xff]  }
  0x6f   :  { %1479 = vmatmul.mubr.bf16.gmra.mrb[36].mxu1 %v9286_v14  ;;  %v9391_v14 = vld [vmem:[%s13670_s3] ss:$8 sps:$4 sm:$0xff]  }
  0x70   :  { %1486 = vmatprep.mubr.bf16.mxu1 %v9290_v15  ;;  %v9393_v15 = vld [vmem:[%s13670_s3 + $0x4] ss:$8 sps:$4 sm:$0xff]  }
  0x71   :  { %1963 = vmatprep.subr.bf16.mxu1 %v9393_v15 }
  0x72   :  { %1294 = vmatmul.mubr.bf16.gmra.mrb[40].mxu0 %v9265_v8  ;;  %v9342_v8 = vld [vmem:[%s13669_s0 + $0xb8] ss:$28 sps:$4 sm:$0xff]  }
  0x73   :  { %1301 = vmatprep.mubr.bf16.mxu0 %v9269_v9  ;;  %v9343_v9 = vld [vmem:[%s13669_s0 + $0xf4] ss:$28 sps:$4 sm:$0xff]  }
  0x77   :  { %1487 = vmatmul.mubr.bf16.gmra.mrb[40].mxu1 %v9292_v18 }
  0x78   :  { %1494 = vmatprep.mubr.bf16.mxu1 %v9296_v19 }
  0x7a   :  { %1302 = vmatmul.mubr.bf16.gmra.mrb[44].mxu0 %v9271_v12  ;;  %v9350_v12 = vld [vmem:[%s13669_s0 + $0x128] ss:$28 sps:$4 sm:$0xff]  }
  0x7b   :  { %1309 = vmatprep.mubr.bf16.mxu0 %v9275_v13  ;;  %v9351_v13 = vld [vmem:[%s13669_s0 + $0x164] ss:$28 sps:$4 sm:$0xff]  }
  0x7f   :  { %1495 = vmatmul.mubr.bf16.gmra.mrb[44].mxu1 %v9298_v22 }
  0x80   :  { %8747 = vmatprep.mubr.msk.bf16.mxu1 %vm1132_vm0, %v9330_v23  ;;  %v9359_v23 = vld [vmem:[%s13669_s0 + $0x1d4] ss:$28 sps:$4 sm:$0xff]  }
  0x82   :  { %1310 = vmatmul.mubr.bf16.gmra.mrb[48].mxu0 %v9277_v16  ;;  %v9353_v16 = vld [vmem:[%s13669_s0 + $0x160] ss:$28 sps:$4 sm:$0xff]  }
  0x83   :  { %1317 = vmatprep.mubr.bf16.mxu0 %v9281_v17  ;;  %v9356_v17 = vld [vmem:[%s13669_s0 + $0x19c] ss:$28 sps:$4 sm:$0xff]  }
  0x87   :  { %8748 = vmatmul.mubr.msk.bf16.vlgmr.msra.gmra.mrb[48].mxu1 %vm1132_vm0, %v9331_v26 }
  0x88   :  { %8751 = vmatprep.mubr.msk.bf16.mxu1 %vm1132_vm0, %v9338_v27  ;;  %1964 = vmatpush1.bf16.msra.mxu1 %v9391_v14 }
  0x8a   :  { %1318 = vmatmul.mubr.bf16.gmra.mrb[52].mxu0 %v9283_v20  ;;  %v9358_v20 = vld [vmem:[%s13669_s0 + $0x198] ss:$28 sps:$4 sm:$0xff]  }
  0x8b   :  { %1325 = vmatprep.mubr.bf16.mxu0 %v9287_v21 }
  0x8f   :  { %8752 = vmatmul.mubr.msk.bf16.gmra.mrb[52].mxu1 %vm1132_vm0, %v9339_v30 }
  0x90   :  { %8755 = vmatprep.mubr.msk.bf16.mxu1 %vm1132_vm0, %v9346_v31  ;;  %v9364_v31 = vld [vmem:[%s13669_s0 + $0x20c] ss:$28 sps:$4 sm:$0xff]  }
  0x92   :  { %1326 = vmatmul.mubr.bf16.gmra.mrb[56].mxu0 %v9289_v24 }
  0x93   :  { %1333 = vmatprep.mubr.bf16.mxu0 %v9293_v25 }
  0x97   :  { %8756 = vmatmul.mubr.msk.bf16.gmra.mrb[56].mxu1 %vm1132_vm0, %v9347_v36 }
  0x98   :  { %8759 = vmatprep.mubr.msk.bf16.mxu1 %vm1132_vm0, %v9354_v37 }
  0x9a   :  { %1334 = vmatmul.mubr.bf16.gmra.mrb[60].mxu0 %v9295_v28  ;;  %v9361_v28 = vld [vmem:[%s13669_s0 + $0x1d0] ss:$28 sps:$4 sm:$0xff]  }
  0x9b   :  { %1374 = vmatprep.mubr.bf16.mxu0 %v9301_v29 }
  0x9f   :  { %8760 = vmatmul.mubr.msk.bf16.gmra.mrb[60].mxu1 %vm1132_vm0, %v9355_v44 }
  0xa0   :  { %8763 = vmatprep.mubr.msk.bf16.mxu1 %vm1132_vm0, %v9362_v45 }
  0xa2   :  { %1375 = vmatmul.mubr.bf16.vlgmr.msra.gmra.mrb[64].mxu0 %v9299_v32 }
  0xa3   :  { %8281 = vmatpush3.bf16.msra.mxu0 %v9303_v33  ;;  %1382 = vmatprep.mubr.bf16.mxu0 %v9306_v34  ;;  %v9394_v34 = vld [vmem:[%s13670_s3 + $0x14] ss:$8 sps:$4 sm:$0x3f]  }
  0xa4   :  { %8282 = vmatprep.subr.bf16.mxu0 %v9304_v35  ;;  %v9396_v35 = vld [vmem:[%s13670_s3 + $0x10] ss:$8 sps:$4 sm:$0x3f]   ;;  %7598 = vmatprep.subr.msk.bf16.mxu1 %vm1956_vm1, %v9394_v34 }
  0xa7   :  { %8283 = vmatpush3.bf16.msra.mxu0 %v9305_v38  ;;  %8764 = vmatmul.mubr.msk.bf16.gmra.mrb[64].mxu1 %vm1132_vm0, %v9363_v52  ;;  %v9366_v38 = vld [vmem:[%s13669_s0 + $0x208] ss:$28 sps:$4 sm:$0xff]  }
  0xa8   :  { %8284 = vmatprep.subr.bf16.mxu0 %v9309_v39  ;;  %8767 = vmatprep.mubr.msk.bf16.mxu1 %vm1132_vm0, %v9370_v53  ;;  %v1958_v39 = vsel %vm1956_vm1, %v9396_v35, 0  ;;  %v9369_v53 = vld [vmem:[%s13669_s0 + $0x240] ss:$28 sps:$4 sm:$0xff]  }
  0xa9   :  { %1966 = vmatpush1.bf16.msra.mxu1 %v1958_v39 }
  0xaa   :  { %1383 = vmatmul.mubr.bf16.gmra.mrb[68].mxu0 %v9308_v40 }
  0xab   :  { %8285 = vmatpush3.bf16.msra.mxu0 %v9310_v41  ;;  %1390 = vmatprep.mubr.bf16.mxu0 %v9313_v42  ;;  %v9367_v42 = vld [vmem:[%s13669_s0 + $0x244] ss:$28 sps:$4 sm:$0xff]  }
  0xac   :  { %8286 = vmatprep.subr.bf16.mxu0 %v9311_v43 }
  0xaf   :  { %8287 = vmatpush3.bf16.msra.mxu0 %v9312_v46  ;;  %8768 = vmatmul.mubr.msk.bf16.gmra.mrb[68].mxu1 %vm1132_vm0, %v9371_v60 }
  0xb0   :  { %8288 = vmatprep.subr.bf16.mxu0 %v9316_v47  ;;  %8771 = vmatprep.mubr.msk.bf16.mxu1 %vm1132_vm0, %v9378_v61 }
  0xb2   :  { %1391 = vmatmul.mubr.bf16.gmra.mrb[72].mxu0 %v9315_v48 }
  0xb3   :  { %8289 = vmatpush3.bf16.msra.mxu0 %v9317_v49  ;;  %1398 = vmatprep.mubr.bf16.mxu0 %v9320_v50 }
  0xb4   :  { %8290 = vmatprep.subr.bf16.mxu0 %v9318_v51 }
  0xb7   :  { %8291 = vmatpush3.bf16.msra.mxu0 %v9319_v54  ;;  %8772 = vmatmul.mubr.msk.bf16.gmra.mrb[72].mxu1 %vm1132_vm0, %v9379_v1 }
  0xb8   :  { %8292 = vmatprep.subr.bf16.mxu0 %v9323_v55  ;;  %8775 = vmatprep.mubr.msk.bf16.mxu1 %vm1132_vm0, %v9386_v2 }
  0xba   :  { %1399 = vmatmul.mubr.bf16.gmra.mrb[76].mxu0 %v9322_v56  ;;  %v9372_v56 = vld [vmem:[%s13669_s0 + $0x27c] ss:$28 sps:$4 sm:$0xff]  }
  0xbb   :  { %8293 = vmatpush3.bf16.msra.mxu0 %v9324_v57  ;;  %1535 = vmatprep.mubr.bf16.mxu0 %v9329_v58 }
  0xbc   :  { %8294 = vmatprep.subr.bf16.mxu0 %v9325_v59 }
  0xbf   :  { %8295 = vmatpush3.bf16.msra.mxu0 %v9326_v62  ;;  %8776 = vmatmul.mubr.msk.bf16.gmra.mrb[76].mxu1 %vm1132_vm0, %v9387_v5 }
  0xc2   :  { %1536 = vmatmul.mubr.bf16.vlgmr.msra.gmra.mrb[80].mxu0 %v9327_v63 }
  0xc3   :  { %1543 = vmatprep.mubr.bf16.mxu0 %v9332_v0 }
  0xca   :  { %1544 = vmatmul.mubr.bf16.gmra.mrb[84].mxu0 %v9334_v3  ;;  %v9374_v3 = vld [vmem:[%s13669_s0 + $0x278] ss:$28 sps:$4 sm:$0xff]  }
  0xcb   :  { %1551 = vmatprep.mubr.bf16.mxu0 %v9335_v4 }
  0xd2   :  { %1552 = vmatmul.mubr.bf16.gmra.mrb[88].mxu0 %v9337_v6  ;;  %v9375_v6 = vld [vmem:[%s13669_s0 + $0x2b4] ss:$28 sps:$4 sm:$0xff]  }
  0xd3   :  { %1559 = vmatprep.mubr.bf16.mxu0 %v9340_v7 }
  0xda   :  { %1560 = vmatmul.mubr.bf16.gmra.mrb[92].mxu0 %v9342_v8  ;;  %v10539_v8 = vld [vmem:[%s13671_s2] ss:$0 sm:$0xff] }
  0xdb   :  { %1567 = vmatprep.mubr.bf16.mxu0 %v9343_v9 }
  0xe2   :  { %1568 = vmatmul.mubr.bf16.gmra.mrb[96].mxu0 %v9345_v10 }
  0xe3   :  { %1575 = vmatprep.mubr.bf16.mxu0 %v9348_v11 }
  0xea   :  { %1576 = vmatmul.mubr.bf16.gmra.mrb[100].mxu0 %v9350_v12 }
  0xeb   :  { %1583 = vmatprep.mubr.bf16.mxu0 %v9351_v13 }
  0xf2   :  { %1584 = vmatmul.mubr.bf16.gmra.mrb[104].mxu0 %v9353_v16 }
  0xf3   :  { %1591 = vmatprep.mubr.bf16.mxu0 %v9356_v17 }
  0xf5   :  { %v8072_v18 = vpop.f32.mrb[0].mxu0 }
  0xf6   :  { %v8073_v19 = vpop.f32.mrb[1].mxu0 }
  0xf7   :  { %v10487_v21 = vadd.f32 %v8073_v19, %v8072_v18  ;;  %v8075_v22 = vpop.f32.mrb[2].mxu0 }
  0xf8   :  { %v8076_v24 = vpop.f32.mrb[3].mxu0 }
  0xf9   :  { %v10492_v25 = vadd.f32 %v8076_v24, %v8075_v22 }
  0xfa   :  { %1592 = vmatmul.mubr.bf16.gmra.mrb[108].mxu0 %v9358_v20  ;;  %v8208_v43 = vpop.f32.mrb[0].mxu1 }
  0xfb   :  { %1599 = vmatprep.mubr.bf16.mxu0 %v9359_v23  ;;  %v8209_v45 = vpop.f32.mrb[1].mxu1  ;;  %v9377_v23 = vld [vmem:[%s13669_s0 + $0x2b0] ss:$28 sps:$4 sm:$0xff]  }
  0xfc   :  { %v8210_v47 = vadd.f32 %v8209_v45, %v8208_v43  ;;  %v8211_v48 = vpop.f32.mrb[2].mxu1 }
  0xfd   :  { %v8078_v26 = vpop.f32.mrb[4].mxu0  ;;  %v8212_v49 = vpop.f32.mrb[3].mxu1 }
  0xfe   :  { %v8079_v27 = vpop.f32.mrb[5].mxu0  ;;  %v8213_v50 = vadd.f32 %v8212_v49, %v8211_v48 }
  0xff   :  { %v10497_v29 = vadd.f32 %v8079_v27, %v8078_v26  ;;  %v8081_v30 = vpop.f32.mrb[6].mxu0  ;;  %v9380_v27 = vld [vmem:[%s13669_s0 + $0x2ec] ss:$28 sps:$4 sm:$0xff]  }
 0x100   :  { %v8082_v32 = vpop.f32.mrb[7].mxu0 }
 0x101   :  { %v10502_v33 = vadd.f32 %v8082_v32, %v8081_v30 }
 0x102   :  { %1600 = vmatmul.mubr.bf16.gmra.mrb[112].mxu0 %v9361_v28  ;;  %v8214_v57 = vpop.f32.mrb[4].mxu1 }
 0x103   :  { %1607 = vmatprep.mubr.bf16.mxu0 %v9364_v31  ;;  %v8215_v59 = vpop.f32.mrb[5].mxu1 }
 0x104   :  { %v8216_v61 = vadd.f32 %v8215_v59, %v8214_v57  ;;  %v8217_v62 = vpop.f32.mrb[6].mxu1 }
 0x105   :  { %v8084_v36 = vpop.f32.mrb[8].mxu0  ;;  %v8218_v63 = vpop.f32.mrb[7].mxu1 }
 0x106   :  { %v8085_v37 = vpop.f32.mrb[9].mxu0  ;;  %v8219_v0 = vadd.f32 %v8218_v63, %v8217_v62 }
 0x107   :  { %v10513_v40 = vadd.f32 %v8085_v37, %v8084_v36  ;;  %v8087_v41 = vpop.f32.mrb[10].mxu0 }
 0x108   :  { %v8088_v44 = vpop.f32.mrb[11].mxu0 }
 0x109   :  { %v10518_v46 = vadd.f32 %v8088_v44, %v8087_v41 }
 0x10a   :  { %1608 = vmatmul.mubr.bf16.gmra.mrb[116].mxu0 %v9366_v38  ;;  %v8220_v7 = vpop.f32.mrb[8].mxu1  ;;  %v13682_v38 = vmov 0  }
 0x10b   :  { %1615 = vmatprep.mubr.bf16.mxu0 %v9367_v42  ;;  %v8221_v10 = vpop.f32.mrb[9].mxu1  ;;  %1995 = vmatprep.mubr.bf16.mxu1 %v13682_v38 }
 0x10c   :  { %v8222_v13 = vadd.f32 %v8221_v10, %v8220_v7  ;;  %v8223_v14 = vpop.f32.mrb[10].mxu1 }
 0x10d   :  { %v8090_v51 = vpop.f32.mrb[12].mxu0  ;;  %v8224_v15 = vpop.f32.mrb[11].mxu1 }
 0x10e   :  { %v8091_v52 = vpop.f32.mrb[13].mxu0  ;;  %v8225_v18 = vadd.f32 %v8224_v15, %v8223_v14 }
 0x10f   :  { %v10523_v54 = vadd.f32 %v8091_v52, %v8090_v51  ;;  %v8093_v55 = vpop.f32.mrb[14].mxu0 }
 0x110   :  { %v8094_v58 = vpop.f32.mrb[15].mxu0 }
 0x111   :  { %v10528_v60 = vadd.f32 %v8094_v58, %v8093_v55 }
 0x112   :  { %1616 = vmatmul.mubr.bf16.gmra.mrb[120].mxu0 %v9369_v53  ;;  %v8226_v28 = vpop.f32.mrb[12].mxu1 }
 0x113   :  { %1623 = vmatprep.mubr.bf16.mxu0 %v9372_v56  ;;  %v8227_v31 = vpop.f32.mrb[13].mxu1 }
 0x114   :  { %v8228_v35 = vadd.f32 %v8227_v31, %v8226_v28  ;;  %v8229_v36 = vpop.f32.mrb[14].mxu1 }
 0x115   :  { %v8096_v1 = vpop.f32.mrb[16].mxu0  ;;  %v8230_v37 = vpop.f32.mrb[15].mxu1 }
 0x116   :  { %v8097_v2 = vpop.f32.mrb[17].mxu0  ;;  %v8231_v42 = vadd.f32 %v8230_v37, %v8229_v36 }
 0x117   :  { %v8098_v4 = vadd.f32 %v8097_v2, %v8096_v1  ;;  %v8099_v5 = vpop.f32.mrb[18].mxu0 }
 0x118   :  { %v8100_v9 = vpop.f32.mrb[19].mxu0 }
 0x119   :  { %v8101_v11 = vadd.f32 %v8100_v9, %v8099_v5  ;;  %v1248_v12 = vadd.f32 %v8098_v4, %v10539_v8 }
 0x11a   :  { %1624 = vmatmul.mubr.bf16.gmra.mrb[124].mxu0 %v9374_v3  ;;  %v8232_v51 = vpop.f32.mrb[16].mxu1  ;;  %v9385_v3 = vld [vmem:[%s13669_s0 + $0x320] ss:$28 sps:$4 sm:$0xff]  }
 0x11b   :  { %v10542_v16 = vadd.f32 %v8210_v47, %v1248_v12  ;;  %v1251_v17 = vadd.f32 %v8101_v11, %v10539_v8  ;;  %1631 = vmatprep.mubr.bf16.mxu0 %v9375_v6  ;;  %v9382_v47 = vld [vmem:[%s13669_s0 + $0x2e8] ss:$28 sps:$4 sm:$0xff]   ;;  %v8233_v53 = vpop.f32.mrb[17].mxu1  ;;  %v9388_v6 = vld [vmem:[%s13669_s0 + $0x35c] ss:$28 sps:$4 sm:$0xff]  }
 0x11c   :  { %v8234_v57 = vadd.f32 %v8233_v53, %v8232_v51  ;;  %v8235_v58 = vpop.f32.mrb[18].mxu1 }
 0x11d   :  { %v10545_v19 = vadd.f32 %v8213_v50, %v1251_v17  ;;  %v8102_v20 = vpop.f32.mrb[20].mxu0  ;;  %v9383_v50 = vld [vmem:[%s13669_s0 + $0x324] ss:$28 sps:$4 sm:$0xff]   ;;  %v8236_v59 = vpop.f32.mrb[19].mxu1 }
 0x11e   :  { %v8103_v22 = vpop.f32.mrb[21].mxu0  ;;  %v8237_v63 = vadd.f32 %v8236_v59, %v8235_v58 }
 0x11f   :  { %v8104_v24 = vadd.f32 %v8103_v22, %v8102_v20  ;;  %v8105_v26 = vpop.f32.mrb[22].mxu0 }
 0x120   :  { %v8106_v30 = vpop.f32.mrb[23].mxu0 }
 0x121   :  { %v8107_v32 = vadd.f32 %v8106_v30, %v8105_v26  ;;  %v1256_v34 = vadd.f32 %v8104_v24, %v10539_v8  ;;  %v9390_v26 = vld [vmem:[%s13669_s0 + $0x358] ss:$28 sps:$4 sm:$0xff]  }
 0x122   :  { %1632 = vmatmul.mubr.bf16.gmra.mrb[128].mxu0 %v9377_v23  ;;  %v8238_v7 = vpop.f32.mrb[20].mxu1 }
 0x123   :  { %v10555_v39 = vadd.f32 %v8216_v61, %v1256_v34  ;;  %v1259_v41 = vadd.f32 %v8107_v32, %v10539_v8  ;;  %1639 = vmatprep.mubr.bf16.mxu0 %v9380_v27  ;;  %v8239_v10 = vpop.f32.mrb[21].mxu1 }
 0x124   :  { %v8241_v14 = vpop.f32.mrb[22].mxu1 }
 0x125   :  { %v10558_v43 = vadd.f32 %v8219_v0, %v1259_v41  ;;  %v8108_v44 = vpop.f32.mrb[24].mxu0  ;;  %v8242_v15 = vpop.f32.mrb[23].mxu1 }
 0x126   :  { %v8109_v45 = vpop.f32.mrb[25].mxu0  ;;  %v8243_v20 = vadd.f32 %v8242_v15, %v8241_v14 }
 0x127   :  { %v8110_v48 = vadd.f32 %v8109_v45, %v8108_v44  ;;  %v8111_v49 = vpop.f32.mrb[26].mxu0 }
 0x128   :  { %v8112_v52 = vpop.f32.mrb[27].mxu0 }
 0x129   :  { %v8113_v55 = vadd.f32 %v8112_v52, %v8111_v49  ;;  %v1264_v56 = vadd.f32 %v8110_v48, %v10539_v8 }
 0x12a   :  { %1640 = vmatmul.mubr.bf16.gmra.mrb[132].mxu0 %v9382_v47  ;;  %v8244_v30 = vpop.f32.mrb[24].mxu1 }
 0x12b   :  { %v10567_v61 = vadd.f32 %v8222_v13, %v1264_v56  ;;  %v1267_v62 = vadd.f32 %v8113_v55, %v10539_v8  ;;  %1647 = vmatprep.mubr.bf16.mxu0 %v9383_v50  ;;  %v8240_v13 = vadd.f32 %v8239_v10, %v8238_v7  ;;  %v8245_v32 = vpop.f32.mrb[25].mxu1 }
 0x12c   :  { %v8246_v36 = vadd.f32 %v8245_v32, %v8244_v30  ;;  %v8247_v37 = vpop.f32.mrb[26].mxu1 }
 0x12d   :  { %v10570_v0 = vadd.f32 %v8225_v18, %v1267_v62  ;;  %v8114_v1 = vpop.f32.mrb[28].mxu0  ;;  %v8248_v41 = vpop.f32.mrb[27].mxu1 }
 0x12e   :  { %v8115_v2 = vpop.f32.mrb[29].mxu0  ;;  %v8249_v45 = vadd.f32 %v8248_v41, %v8247_v37 }
 0x12f   :  { %v8116_v4 = vadd.f32 %v8115_v2, %v8114_v1  ;;  %v8117_v5 = vpop.f32.mrb[30].mxu0 }
 0x130   :  { %v8118_v9 = vpop.f32.mrb[31].mxu0 }
 0x131   :  { %v8119_v11 = vadd.f32 %v8118_v9, %v8117_v5  ;;  %v1272_v12 = vadd.f32 %v8116_v4, %v10539_v8 }
 0x132   :  { %1648 = vmatmul.mubr.bf16.gmra.mrb[136].mxu0 %v9385_v3  ;;  %v8250_v52 = vpop.f32.mrb[28].mxu1 }
 0x133   :  { %v10579_v17 = vadd.f32 %v8228_v35, %v1272_v12  ;;  %v1275_v18 = vadd.f32 %v8119_v11, %v10539_v8  ;;  %1655 = vmatprep.mubr.bf16.mxu0 %v9388_v6  ;;  %v8251_v55 = vpop.f32.mrb[29].mxu1 }
 0x134   :  { %v8252_v59 = vadd.f32 %v8251_v55, %v8250_v52  ;;  %v8253_v62 = vpop.f32.mrb[30].mxu1 }
 0x135   :  { %v10582_v22 = vadd.f32 %v8231_v42, %v1275_v18  ;;  %v8120_v23 = vpop.f32.mrb[32].mxu0  ;;  %v8254_v1 = vpop.f32.mrb[31].mxu1 }
 0x136   :  { %v8121_v24 = vpop.f32.mrb[33].mxu0  ;;  %v8255_v3 = vadd.f32 %v8254_v1, %v8253_v62 }
 0x137   :  { %v8122_v27 = vadd.f32 %v8121_v24, %v8120_v23  ;;  %v8123_v28 = vpop.f32.mrb[34].mxu0 }
 0x138   :  { %v8124_v31 = vpop.f32.mrb[35].mxu0 }
 0x139   :  { %v1280_v34 = vadd.f32 %v8122_v27, %v10539_v8  ;;  %v8125_v35 = vadd.f32 %v8124_v31, %v8123_v28 }
 0x13a   :  { %1656 = vmatmul.mubr.bf16.gmra.mrb[140].mxu0 %v9390_v26  ;;  %v8256_v9 = vpop.f32.mrb[32].mxu1 }
 0x13b   :  { %v1283_v42 = vadd.f32 %v8125_v35, %v10539_v8  ;;  %v10589_v44 = vadd.f32 %v8234_v57, %v1280_v34  ;;  %v8257_v11 = vpop.f32.mrb[33].mxu1 }
 0x13c   :  { %v8258_v15 = vadd.f32 %v8257_v11, %v8256_v9  ;;  %v8259_v18 = vpop.f32.mrb[34].mxu1 }
 0x13d   :  { %v10591_v47 = vadd.f32 %v8237_v63, %v1283_v42  ;;  %v8126_v48 = vpop.f32.mrb[36].mxu0  ;;  %v8260_v23 = vpop.f32.mrb[35].mxu1 }
 0x13e   :  { %v8127_v49 = vpop.f32.mrb[37].mxu0  ;;  %v8261_v26 = vadd.f32 %v8260_v23, %v8259_v18 }
 0x13f   :  { %v8128_v50 = vadd.f32 %v8127_v49, %v8126_v48  ;;  %v8129_v51 = vpop.f32.mrb[38].mxu0 }
 0x140   :  { %v8130_v53 = vpop.f32.mrb[39].mxu0 }
 0x141   :  { %v1288_v56 = vadd.f32 %v8128_v50, %v10539_v8  ;;  %v8131_v58 = vadd.f32 %v8130_v53, %v8129_v51 }
 0x142   :  { %v8262_v32 = vpop.f32.mrb[36].mxu1 }
 0x143   :  { %v1291_v2 = vadd.f32 %v8131_v58, %v10539_v8  ;;  %v10595_v57 = vadd.f32 %v8240_v13, %v1288_v56  ;;  %v8263_v35 = vpop.f32.mrb[37].mxu1 }
 0x144   :  { %v8264_v42 = vadd.f32 %v8263_v35, %v8262_v32  ;;  %v8265_v48 = vpop.f32.mrb[38].mxu1 }
 0x145   :  { %v10597_v63 = vadd.f32 %v8243_v20, %v1291_v2  ;;  %v8132_v4 = vpop.f32.mrb[40].mxu0  ;;  %v8266_v49 = vpop.f32.mrb[39].mxu1 }
 0x146   :  { %v8133_v5 = vpop.f32.mrb[41].mxu0  ;;  %v8267_v51 = vadd.f32 %v8266_v49, %v8265_v48 }
 0x147   :  { %v8134_v6 = vadd.f32 %v8133_v5, %v8132_v4  ;;  %v8135_v7 = vpop.f32.mrb[42].mxu0 }
 0x148   :  { %v8136_v10 = vpop.f32.mrb[43].mxu0 }
 0x149   :  { %v1296_v12 = vadd.f32 %v8134_v6, %v10539_v8  ;;  %v8137_v14 = vadd.f32 %v8136_v10, %v8135_v7 }
 0x14a   :  { %v8268_v58 = vpop.f32.mrb[40].mxu1 }
 0x14b   :  { %v1299_v24 = vadd.f32 %v8137_v14, %v10539_v8  ;;  %v10601_v13 = vadd.f32 %v8246_v36, %v1296_v12  ;;  %v8269_v1 = vpop.f32.mrb[41].mxu1 }
 0x14c   :  { %v8270_v5 = vadd.f32 %v8269_v1, %v8268_v58  ;;  %v8271_v6 = vpop.f32.mrb[42].mxu1 }
 0x14d   :  { %v10603_v20 = vadd.f32 %v8249_v45, %v1299_v24  ;;  %v8138_v27 = vpop.f32.mrb[44].mxu0  ;;  %v8272_v7 = vpop.f32.mrb[43].mxu1 }
 0x14e   :  { %v8139_v28 = vpop.f32.mrb[45].mxu0  ;;  %v8273_v10 = vadd.f32 %v8272_v7, %v8271_v6 }
 0x14f   :  { %v8140_v30 = vadd.f32 %v8139_v28, %v8138_v27  ;;  %v8141_v31 = vpop.f32.mrb[46].mxu0 }
 0x150   :  { %v8142_v34 = vpop.f32.mrb[47].mxu0 }
 0x151   :  { %v1304_v37 = vadd.f32 %v8140_v30, %v10539_v8  ;;  %v8143_v41 = vadd.f32 %v8142_v34, %v8141_v31 }
 0x152   :  { %v8274_v23 = vpop.f32.mrb[44].mxu1 }
 0x153   :  { %v1307_v50 = vadd.f32 %v8143_v41, %v10539_v8  ;;  %v10607_v36 = vadd.f32 %v8252_v59, %v1304_v37  ;;  %v8275_v27 = vpop.f32.mrb[45].mxu1 }
 0x154   :  { %v8276_v31 = vadd.f32 %v8275_v27, %v8274_v23  ;;  %v8277_v32 = vpop.f32.mrb[46].mxu1 }
 0x155   :  { %v10609_v45 = vadd.f32 %v8255_v3, %v1307_v50  ;;  %v8144_v52 = vpop.f32.mrb[48].mxu0  ;;  %v8278_v34 = vpop.f32.mrb[47].mxu1 }
 0x156   :  { %v8145_v53 = vpop.f32.mrb[49].mxu0  ;;  %v8279_v37 = vadd.f32 %v8278_v34, %v8277_v32  ;;  %v1216_v34 = vadd.f32 %v10487_v21, %v10539_v8 }
 0x157   :  { %v8146_v55 = vadd.f32 %v8145_v53, %v8144_v52  ;;  %v8147_v56 = vpop.f32.mrb[50].mxu0 }
 0x158   :  { %v8148_v62 = vpop.f32.mrb[51].mxu0 }
 0x159   :  { %v1312_v2 = vadd.f32 %v8146_v55, %v10539_v8  ;;  %v8149_v4 = vadd.f32 %v8148_v62, %v8147_v56 }
 0x15a   :  { %v10623_v52 = vpop.f32.mrb[48].mxu1 }
 0x15b   :  { %v1315_v9 = vadd.f32 %v8149_v4, %v10539_v8  ;;  %v10613_v59 = vadd.f32 %v8258_v15, %v1312_v2  ;;  %v10625_v55 = vpop.f32.mrb[49].mxu1 }
 0x15c   :  { %v10628_v62 = vpop.f32.mrb[50].mxu1 }
 0x15d   :  { %v10615_v3 = vadd.f32 %v8261_v26, %v1315_v9  ;;  %v8150_v11 = vpop.f32.mrb[52].mxu0  ;;  %v10630_v1 = vpop.f32.mrb[51].mxu1 }
 0x15e   :  { %v8151_v12 = vpop.f32.mrb[53].mxu0 }
 0x15f   :  { %13730 = vst [vmem:[#allocation2_spill] sm:$0xff] %v10615_v3  ;;  %v8152_v14 = vadd.f32 %v8151_v12, %v8150_v11  ;;  %v8153_v18 = vpop.f32.mrb[54].mxu0 }
 0x160   :  { %v8154_v24 = vpop.f32.mrb[55].mxu0 }
 0x161   :  { %v1320_v28 = vadd.f32 %v8152_v14, %v10539_v8  ;;  %v8155_v30 = vadd.f32 %v8154_v24, %v8153_v18 }
 0x162   :  { %v10637_v11 = vpop.f32.mrb[52].mxu1 }
 0x163   :  { %v1323_v35 = vadd.f32 %v8155_v30, %v10539_v8  ;;  %v10619_v15 = vadd.f32 %v8264_v42, %v1320_v28  ;;  %v10639_v14 = vpop.f32.mrb[53].mxu1 }
 0x164   :  { %v10642_v24 = vpop.f32.mrb[54].mxu1 }
 0x165   :  { %13731 = vst [vmem:[#allocation3_spill] sm:$0xff] %v10619_v15  ;;  %v10621_v26 = vadd.f32 %v8267_v51, %v1323_v35  ;;  %v8156_v41 = vpop.f32.mrb[56].mxu0  ;;  %v10644_v27 = vpop.f32.mrb[55].mxu1 }
 0x166   :  { %v8157_v48 = vpop.f32.mrb[57].mxu0 }
 0x167   :  { %13732 = vst [vmem:[#allocation4_spill] sm:$0xff] %v10621_v26  ;;  %v8158_v49 = vadd.f32 %v8157_v48, %v8156_v41  ;;  %v8159_v50 = vpop.f32.mrb[58].mxu0 }
 0x168   :  { %v8160_v53 = vpop.f32.mrb[59].mxu0 }
 0x169   :  { %v1328_v56 = vadd.f32 %v8158_v49, %v10539_v8  ;;  %v8161_v58 = vadd.f32 %v8160_v53, %v8159_v50  ;;  %v1219_v53 = vadd.f32 %v10492_v25, %v10539_v8 }
 0x16a   :  { %v10653_v48 = vpop.f32.mrb[56].mxu1 }
 0x16b   :  { %v1331_v42 = vadd.f32 %v8161_v58, %v10539_v8  ;;  %v10633_v51 = vadd.f32 %v8270_v5, %v1328_v56  ;;  %v10655_v50 = vpop.f32.mrb[57].mxu1 }
 0x16d   :  { %13733 = vst [vmem:[#allocation5_spill] sm:$0xff] %v10633_v51  ;;  %v10635_v2 = vadd.f32 %v8273_v10, %v1331_v42  ;;  %v8162_v4 = vpop.f32.mrb[60].mxu0 }
 0x16e   :  { %v8163_v6 = vpop.f32.mrb[61].mxu0 }
 0x16f   :  { %13734 = vst [vmem:[#allocation6_spill] sm:$0xff] %v10635_v2  ;;  %v8164_v7 = vadd.f32 %v8163_v6, %v8162_v4  ;;  %v8165_v9 = vpop.f32.mrb[62].mxu0  ;;  %v1224_v6 = vadd.f32 %v10497_v29, %v10539_v8 }
 0x170   :  { %v8166_v12 = vpop.f32.mrb[63].mxu0 }
 0x171   :  { %v1336_v18 = vadd.f32 %v8164_v7, %v10539_v8  ;;  %v8167_v23 = vadd.f32 %v8166_v12, %v8165_v9 }
 0x173   :  { %v1339_v5 = vadd.f32 %v8167_v23, %v10539_v8  ;;  %v10647_v10 = vadd.f32 %v8276_v31, %v1336_v18  ;;  %v1227_v23 = vadd.f32 %v10502_v33, %v10539_v8 }
 0x175   :  { %13735 = vst [vmem:[#allocation7_spill] sm:$0xff] %v10647_v10  ;;  %v10649_v28 = vadd.f32 %v8279_v37, %v1339_v5  ;;  %v8184_v30 = vpop.f32.mrb[64].mxu0  ;;  %v10661_v37 = vpop.f32.mrb[58].mxu1 }
 0x176   :  { %v8185_v32 = vpop.f32.mrb[65].mxu0  ;;  %v10663_v58 = vpop.f32.mrb[59].mxu1 }
 0x177   :  { %13736 = vst [vmem:[#allocation8_spill] sm:$0xff] %v10649_v28  ;;  %v8186_v35 = vadd.f32 %v8185_v32, %v8184_v30  ;;  %v8187_v41 = vpop.f32.mrb[66].mxu0  ;;  %v10669_v12 = vpop.f32.mrb[60].mxu1 }
 0x178   :  { %v8188_v49 = vpop.f32.mrb[67].mxu0  ;;  %v10671_v25 = vpop.f32.mrb[61].mxu1 }
 0x179   :  { %v10659_v56 = vadd.f32 %v8186_v35, %v1216_v34  ;;  %v8189_v31 = vadd.f32 %v8188_v49, %v8187_v41  ;;  %v10677_v32 = vpop.f32.mrb[62].mxu1  ;;  %v9397_v49 = vld [vmem:[%s13672_s5 + $0x40] sm:$0xff]  }
 0x17a   :  { %v10679_v34 = vpop.f32.mrb[63].mxu1  ;;  %8409 = vmatprep.subr.bf16.mxu0 %v9397_v49  ;;  %v1240_v49 = vadd.f32 %v10523_v54, %v10539_v8 }
 0x17b   :  { %v10665_v42 = vadd.f32 %v8189_v31, %v1219_v53  ;;  %v1232_v53 = vadd.f32 %v10513_v40, %v10539_v8 }
 0x17d   :  { %v8190_v21 = vpop.f32.mrb[68].mxu0 }
 0x17e   :  { %v8191_v4 = vpop.f32.mrb[69].mxu0 }
 0x17f   :  { %v8192_v7 = vadd.f32 %v8191_v4, %v8190_v21  ;;  %v8193_v9 = vpop.f32.mrb[70].mxu0  ;;  %v10688_v21 = vpop.f32.mrb[64].mxu1 }
 0x180   :  { %v8194_v18 = vpop.f32.mrb[71].mxu0 }
 0x181   :  { %v10675_v5 = vadd.f32 %v8192_v7, %v1224_v6  ;;  %v8195_v30 = vadd.f32 %v8194_v18, %v8193_v9  ;;  %v10690_v6 = vpop.f32.mrb[65].mxu1  ;;  %v9398_v7 = vld [vmem:[%s13672_s5] sm:$0xff]   ;;  %v1235_v9 = vadd.f32 %v10518_v46, %v10539_v8 }
 0x182   :  { %8410 = vmatpush3.bf16.msra.mxu0 %v9398_v7 }
 0x183   :  { %v10681_v35 = vadd.f32 %v8195_v30, %v1227_v23  ;;  %v10699_v30 = vpop.f32.mrb[66].mxu1 }
 0x184   :  { %v10701_v40 = vpop.f32.mrb[67].mxu1 }
 0x185   :  { %v8196_v29 = vpop.f32.mrb[72].mxu0  ;;  %v10707_v2 = vpop.f32.mrb[68].mxu1 }
 0x186   :  { %v8197_v41 = vpop.f32.mrb[73].mxu0 }
 0x187   :  { %v8198_v31 = vadd.f32 %v8197_v41, %v8196_v29  ;;  %v8199_v33 = vpop.f32.mrb[74].mxu0 }
 0x188   :  { %v8200_v4 = vpop.f32.mrb[75].mxu0 }
 0x189   :  { %v10697_v18 = vadd.f32 %v8198_v31, %v1232_v53  ;;  %v8201_v23 = vadd.f32 %v8200_v4, %v8199_v33  ;;  %v10709_v53 = vpop.f32.mrb[69].mxu1  ;;  %v1243_v31 = vadd.f32 %v10528_v60, %v10539_v8 }
 0x18a   :  { %v10715_v7 = vpop.f32.mrb[70].mxu1 }
 0x18b   :  { %v10703_v29 = vadd.f32 %v8201_v23, %v1235_v9  ;;  %v10717_v9 = vpop.f32.mrb[71].mxu1 }
 0x18d   :  { %v8202_v41 = vpop.f32.mrb[76].mxu0 }
 0x18e   :  { %v8203_v38 = vpop.f32.mrb[77].mxu0 }
 0x18f   :  { %v8204_v28 = vadd.f32 %v8203_v38, %v8202_v41  ;;  %v8205_v10 = vpop.f32.mrb[78].mxu0  ;;  %v9399_v38 = vld [vmem:[%s13672_s5 + $0x48] sm:$0xff]  }
 0x190   :  { %v8206_v46 = vpop.f32.mrb[79].mxu0  ;;  %v9400_v41 = vld [vmem:[%s13672_s5 + $0x8] sm:$0xff]   ;;  %8411 = vmatprep.subr.bf16.mxu0 %v9399_v38 }
 0x191   :  { %v10713_v33 = vadd.f32 %v8204_v28, %v1240_v49  ;;  %v8207_v4 = vadd.f32 %v8206_v46, %v8205_v10  ;;  %v10727_v28 = vpop.f32.mrb[72].mxu1  ;;  %8412 = vmatpush3.bf16.msra.mxu0 %v9400_v41 }
 0x192   :  { %13737 = vst [vmem:[#allocation9_spill] sm:$0xff] %v10727_v28  ;;  %v10729_v49 = vpop.f32.mrb[73].mxu1 }
 0x193   :  { %v10719_v23 = vadd.f32 %v8207_v4, %v1243_v31  ;;  %v10732_v4 = vpop.f32.mrb[74].mxu1 }
 0x194   :  { %13738 = vst [vmem:[#allocation10_spill] sm:$0xff] %v10732_v4  ;;  %v10734_v26 = vpop.f32.mrb[75].mxu1  ;;  %v9405_v4 = vld [vmem:[%s13672_s5 + $0x60] sm:$0xff]  }
 0x195   :  { %v8296_v54 = vpop.f32.mrb[80].mxu0  ;;  %13739 = vst [vmem:[#allocation11_spill] sm:$0xff] %v10734_v26 }
 0x196   :  { %v8297_v51 = vpop.f32.mrb[81].mxu0 }
 0x197   :  { %v8298_v60 = vadd.f32 %v8297_v51, %v8296_v54  ;;  %v8299_v8 = vpop.f32.mrb[82].mxu0  ;;  %v9401_v51 = vld [vmem:[%s13672_s5 + $0x50] sm:$0xff]  }
 0x198   :  { %v8300_v10 = vpop.f32.mrb[83].mxu0  ;;  %v9402_v54 = vld [vmem:[%s13672_s5 + $0x10] sm:$0xff]   ;;  %8413 = vmatprep.subr.bf16.mxu0 %v9401_v51 }
 0x199   :  { %v8301_v46 = vadd.f32 %v8300_v10, %v8299_v8  ;;  %v1538_v31 = vadd.f32 %v8298_v60, %v10659_v56  ;;  %v9403_v56 = vld [vmem:[%s13672_s5 + $0x58] sm:$0xff]   ;;  %8414 = vmatpush3.bf16.msra.mxu0 %v9402_v54 }
 0x19a   :  { %8415 = vmatprep.subr.bf16.mxu0 %v9403_v56  ;;  %v9406_v56 = vld [vmem:[%s13672_s5 + $0x20] sm:$0xff]  }
 0x19b   :  { %v1699_v15 = vadd.f32 %v10625_v55, %v1538_v31  ;;  %v1541_v3 = vadd.f32 %v8301_v46, %v10665_v42  ;;  %v9404_v55 = vld [vmem:[%s13672_s5 + $0x18] sm:$0xff]   ;;  %v10751_v31 = vpop.f32.mrb[76].mxu1 }
 0x19d   :  { %v1702_v38 = vadd.f32 %v10630_v1, %v1541_v3  ;;  %v8302_v41 = vpop.f32.mrb[84].mxu0  ;;  %v1825_v42 = vmax.f32 %v1699_v15, 0.0  ;;  %v10756_v1 = vpop.f32.mrb[77].mxu1  ;;  %8416 = vmatpush3.bf16.msra.mxu0 %v9404_v55 }
 0x19e   :  { %v8303_v60 = vpop.f32.mrb[85].mxu0  ;;  %v10759_v26 = vpop.f32.mrb[78].mxu1  ;;  %8417 = vmatprep.subr.bf16.mxu0 %v9405_v4  ;;  %v9409_v4 = vld [vmem:[%s13672_s5 + $0x70] sm:$0xff]  }
 0x19f   :  { %v1826_v8 = vmax.f32 %v1702_v38, 0.0  ;;  %v8304_v10 = vadd.f32 %v8303_v60, %v8302_v41  ;;  %v8305_v46 = vpop.f32.mrb[86].mxu0  ;;  %v10761_v15 = vpop.f32.mrb[79].mxu1  ;;  %v13740_v60 = vmov 0  }
 0x1a0   :  { %v8306_v3 = vpop.f32.mrb[87].mxu0 }
 0x1a1   :  { %v1857_v51 = vpack.c.bf16 %v1826_v8, %v1825_v42  ;;  %v1546_v54 = vadd.f32 %v8304_v10, %v10675_v5  ;;  %v8307_v28 = vadd.f32 %v8306_v3, %v8305_v46  ;;  %v9407_v5 = vld [vmem:[%s13672_s5 + $0x68] sm:$0xff]   ;;  %8418 = vmatpush3.bf16.msra.mxu0 %v9406_v56  ;;  %v9410_v56 = vld [vmem:[%s13672_s5 + $0x30] sm:$0xff]  }
 0x1a2   :  { %8419 = vmatprep.subr.bf16.mxu0 %v9407_v5  ;;  %v9411_v5 = vld [vmem:[%s13672_s5 + $0x78] sm:$0x1f]  }
 0x1a3   :  { %v1707_v38 = vadd.f32 %v10623_v52, %v1546_v54  ;;  %v1549_v41 = vadd.f32 %v8307_v28, %v10681_v35  ;;  %7599 = vmatmul.mubr.msk.bf16.vlgmr.msra.gmra.mrb[80].mxu1 %vm1907_vm2, %v1857_v51  ;;  %v9408_v52 = vld [vmem:[%s13672_s5 + $0x28] sm:$0xff]  }
 0x1a4   :  { %2005 = vmatprep.mubr.bf16.mxu1 %v13740_v60 }
 0x1a5   :  { %v1710_v42 = vadd.f32 %v10628_v62, %v1549_v41  ;;  %v8308_v55 = vpop.f32.mrb[88].mxu0  ;;  %v1827_v28 = vmax.f32 %v1707_v38, 0.0  ;;  %8420 = vmatpush3.bf16.msra.mxu0 %v9408_v52 }
 0x1a6   :  { %v8309_v8 = vpop.f32.mrb[89].mxu0  ;;  %8421 = vmatprep.subr.bf16.mxu0 %v9409_v4 }
 0x1a7   :  { %v8310_v10 = vadd.f32 %v8309_v8, %v8308_v55  ;;  %v8311_v35 = vpop.f32.mrb[90].mxu0  ;;  %v1828_v46 = vmax.f32 %v1710_v42, 0.0 }
 0x1a8   :  { %v8312_v3 = vpop.f32.mrb[91].mxu0 }
 0x1a9   :  { %v8313_v51 = vadd.f32 %v8312_v3, %v8311_v35  ;;  %v1554_v62 = vadd.f32 %v8310_v10, %v10697_v18  ;;  %v1858_v54 = vpack.c.bf16 %v1828_v46, %v1827_v28  ;;  %8422 = vmatpush3.bf16.msra.mxu0 %v9410_v56 }
 0x1aa   :  { %9179 = vmatprep.subr.msk.bf16.mxu0 %vm2435_vm3, %v9411_v5 }
 0x1ab   :  { %v1715_v41 = vadd.f32 %v10639_v14, %v1554_v62  ;;  %v1557_v38 = vadd.f32 %v8313_v51, %v10703_v29  ;;  %7600 = vmatmul.mubr.msk.bf16.gmra.mrb[84].mxu1 %vm1907_vm2, %v1858_v54  ;;  %v9412_v14 = vld [vmem:[%s13672_s5 + $0x38] sm:$0xff]  }
 0x1ac   :  { %2015 = vmatprep.mubr.bf16.mxu1 %v13740_v60 }
 0x1ad   :  { %v1718_v18 = vadd.f32 %v10644_v27, %v1557_v38  ;;  %v8314_v42 = vpop.f32.mrb[92].mxu0  ;;  %v1829_v29 = vmax.f32 %v1715_v41, 0.0  ;;  %8424 = vmatpush3.bf16.msra.mxu0 %v9412_v14 }
 0x1ae   :  { %v8315_v55 = vpop.f32.mrb[93].mxu0 }
 0x1af   :  { %v1830_v8 = vmax.f32 %v1718_v18, 0.0  ;;  %v8316_v52 = vadd.f32 %v8315_v55, %v8314_v42  ;;  %v8317_v10 = vpop.f32.mrb[94].mxu0 }
 0x1b0   :  { %v8318_v35 = vpop.f32.mrb[95].mxu0 }
 0x1b1   :  { %v1562_v28 = vadd.f32 %v8316_v52, %v10713_v33  ;;  %v8319_v46 = vadd.f32 %v8318_v35, %v8317_v10  ;;  %v1859_v4 = vpack.c.bf16 %v1830_v8, %v1829_v29 }
 0x1b3   :  { %v1723_v27 = vadd.f32 %v10637_v11, %v1562_v28  ;;  %v1565_v3 = vadd.f32 %v8319_v46, %v10719_v23  ;;  %7601 = vmatmul.mubr.msk.bf16.gmra.mrb[88].mxu1 %vm1907_vm2, %v1859_v4 }
 0x1b4   :  { %2025 = vmatprep.mubr.bf16.mxu1 %v13740_v60 }
 0x1b5   :  { %v1726_v51 = vadd.f32 %v10642_v24, %v1565_v3  ;;  %v8320_v62 = vpop.f32.mrb[96].mxu0  ;;  %v1831_v38 = vmax.f32 %v1723_v27, 0.0 }
 0x1b6   :  { %v8321_v54 = vpop.f32.mrb[97].mxu0 }
 0x1b7   :  { %v8322_v56 = vadd.f32 %v8321_v54, %v8320_v62  ;;  %v8323_v41 = vpop.f32.mrb[98].mxu0  ;;  %v1832_v5 = vmax.f32 %v1726_v51, 0.0 }
 0x1b8   :  { %v8324_v33 = vpop.f32.mrb[99].mxu0 }
 0x1b9   :  { %v8325_v18 = vadd.f32 %v8324_v33, %v8323_v41  ;;  %v1570_v42 = vadd.f32 %v8322_v56, %v10542_v16  ;;  %v1860_v55 = vpack.c.bf16 %v1832_v5, %v1831_v38 }
 0x1bb   :  { %v1731_v11 = vadd.f32 %v10655_v50, %v1570_v42  ;;  %v1573_v23 = vadd.f32 %v8325_v18, %v10545_v19  ;;  %7602 = vmatmul.mubr.msk.bf16.gmra.mrb[92].mxu1 %vm1907_vm2, %v1860_v55 }
 0x1bc   :  { %2035 = vmatprep.mubr.bf16.mxu1 %v13740_v60 }
 0x1bd   :  { %v1734_v24 = vadd.f32 %v10663_v58, %v1573_v23  ;;  %v8326_v14 = vpop.f32.mrb[100].mxu0  ;;  %v1833_v8 = vmax.f32 %v1731_v11, 0.0 }
 0x1be   :  { %v8327_v29 = vpop.f32.mrb[101].mxu0 }
 0x1bf   :  { %v1834_v52 = vmax.f32 %v1734_v24, 0.0  ;;  %v8328_v10 = vadd.f32 %v8327_v29, %v8326_v14  ;;  %v8329_v35 = vpop.f32.mrb[102].mxu0 }
 0x1c0   :  { %v8330_v28 = vpop.f32.mrb[103].mxu0 }
 0x1c1   :  { %v1578_v16 = vadd.f32 %v8328_v10, %v10555_v39  ;;  %v8331_v46 = vadd.f32 %v8330_v28, %v8329_v35  ;;  %v1861_v4 = vpack.c.bf16 %v1834_v52, %v1833_v8 }
 0x1c3   :  { %v1739_v50 = vadd.f32 %v10653_v48, %v1578_v16  ;;  %v1581_v19 = vadd.f32 %v8331_v46, %v10558_v43  ;;  %7603 = vmatmul.mubr.msk.bf16.gmra.mrb[96].mxu1 %vm1907_vm2, %v1861_v4 }
 0x1c4   :  { %2045 = vmatprep.mubr.bf16.mxu1 %v13740_v60 }
 0x1c5   :  { %v1742_v58 = vadd.f32 %v10661_v37, %v1581_v19  ;;  %v8332_v27 = vpop.f32.mrb[104].mxu0  ;;  %v1835_v54 = vmax.f32 %v1739_v50, 0.0 }
 0x1c6   :  { %v8333_v3 = vpop.f32.mrb[105].mxu0 }
 0x1c7   :  { %v8334_v51 = vadd.f32 %v8333_v3, %v8332_v27  ;;  %v8335_v62 = vpop.f32.mrb[106].mxu0  ;;  %v1836_v56 = vmax.f32 %v1742_v58, 0.0 }
 0x1c8   :  { %v8336_v41 = vpop.f32.mrb[107].mxu0 }
 0x1c9   :  { %v8337_v39 = vadd.f32 %v8336_v41, %v8335_v62  ;;  %v1586_v38 = vadd.f32 %v8334_v51, %v10567_v61  ;;  %v1862_v5 = vpack.c.bf16 %v1836_v56, %v1835_v54 }
 0x1cb   :  { %v1747_v48 = vadd.f32 %v10671_v25, %v1586_v38  ;;  %v1589_v43 = vadd.f32 %v8337_v39, %v10570_v0  ;;  %7604 = vmatmul.mubr.msk.bf16.gmra.mrb[100].mxu1 %vm1907_vm2, %v1862_v5 }
 0x1cc   :  { %2055 = vmatprep.mubr.bf16.mxu1 %v13740_v60 }
 0x1cd   :  { %v1750_v37 = vadd.f32 %v10679_v34, %v1589_v43  ;;  %v8338_v33 = vpop.f32.mrb[108].mxu0  ;;  %v1837_v42 = vmax.f32 %v1747_v48, 0.0 }
 0x1ce   :  { %v8339_v18 = vpop.f32.mrb[109].mxu0 }
 0x1cf   :  { %v1838_v55 = vmax.f32 %v1750_v37, 0.0  ;;  %v8340_v11 = vadd.f32 %v8339_v18, %v8338_v33  ;;  %v8341_v23 = vpop.f32.mrb[110].mxu0 }
 0x1d0   :  { %v8342_v24 = vpop.f32.mrb[111].mxu0 }
 0x1d1   :  { %v1594_v61 = vadd.f32 %v8340_v11, %v10579_v17  ;;  %v8343_v14 = vadd.f32 %v8342_v24, %v8341_v23  ;;  %v1863_v29 = vpack.c.bf16 %v1838_v55, %v1837_v42 }
 0x1d3   :  { %v1755_v25 = vadd.f32 %v10669_v12, %v1594_v61  ;;  %v1597_v0 = vadd.f32 %v8343_v14, %v10582_v22  ;;  %7605 = vmatmul.mubr.msk.bf16.gmra.mrb[104].mxu1 %vm1907_vm2, %v1863_v29 }
 0x1d4   :  { %2065 = vmatprep.mubr.bf16.mxu1 %v13740_v60 }
 0x1d5   :  { %v1758_v34 = vadd.f32 %v10677_v32, %v1597_v0  ;;  %v8344_v8 = vpop.f32.mrb[112].mxu0  ;;  %v1839_v28 = vmax.f32 %v1755_v25, 0.0 }
 0x1d6   :  { %v8345_v52 = vpop.f32.mrb[113].mxu0 }
 0x1d7   :  { %v8346_v10 = vadd.f32 %v8345_v52, %v8344_v8  ;;  %v8347_v35 = vpop.f32.mrb[114].mxu0  ;;  %v1840_v16 = vmax.f32 %v1758_v34, 0.0 }
 0x1d8   :  { %v8348_v46 = vpop.f32.mrb[115].mxu0 }
 0x1d9   :  { %v8349_v17 = vadd.f32 %v8348_v46, %v8347_v35  ;;  %v1602_v4 = vadd.f32 %v8346_v10, %v10589_v44  ;;  %v1864_v50 = vpack.c.bf16 %v1840_v16, %v1839_v28 }
 0x1db   :  { %v1763_v12 = vadd.f32 %v10690_v6, %v1602_v4  ;;  %v1605_v22 = vadd.f32 %v8349_v17, %v10591_v47  ;;  %7606 = vmatmul.mubr.msk.bf16.gmra.mrb[108].mxu1 %vm1907_vm2, %v1864_v50 }
 0x1dc   :  { %2075 = vmatprep.mubr.bf16.mxu1 %v13740_v60 }
 0x1dd   :  { %v1766_v32 = vadd.f32 %v10701_v40, %v1605_v22  ;;  %v8350_v19 = vpop.f32.mrb[116].mxu0  ;;  %v1841_v27 = vmax.f32 %v1763_v12, 0.0 }
 0x1de   :  { %v8351_v58 = vpop.f32.mrb[117].mxu0 }
 0x1df   :  { %v1842_v3 = vmax.f32 %v1766_v32, 0.0  ;;  %v8352_v51 = vadd.f32 %v8351_v58, %v8350_v19  ;;  %v8353_v62 = vpop.f32.mrb[118].mxu0 }
 0x1e0   :  { %v8354_v54 = vpop.f32.mrb[119].mxu0 }
 0x1e1   :  { %v1610_v44 = vadd.f32 %v8352_v51, %v10595_v57  ;;  %v8355_v56 = vadd.f32 %v8354_v54, %v8353_v62  ;;  %v1865_v41 = vpack.c.bf16 %v1842_v3, %v1841_v27  ;;  %v13743_v51 = vld [vmem:[#allocation3_spill] sm:$0xff] }
 0x1e3   :  { %v1771_v6 = vadd.f32 %v10688_v21, %v1610_v44  ;;  %v1613_v47 = vadd.f32 %v8355_v56, %v10597_v63  ;;  %7607 = vmatmul.mubr.msk.bf16.gmra.mrb[112].mxu1 %vm1907_vm2, %v1865_v41  ;;  %v13745_v56 = vld [vmem:[#allocation4_spill] sm:$0xff] }
 0x1e4   :  { %2085 = vmatprep.mubr.bf16.mxu1 %v13740_v60 }
 0x1e5   :  { %v1774_v40 = vadd.f32 %v10699_v30, %v1613_v47  ;;  %v8356_v39 = vpop.f32.mrb[120].mxu0  ;;  %v1843_v43 = vmax.f32 %v1771_v6, 0.0  ;;  %v13746_v6 = vld [vmem:[#allocation10_spill] sm:$0xff] }
 0x1e6   :  { %v8357_v38 = vpop.f32.mrb[121].mxu0 }
 0x1e7   :  { %v8358_v5 = vadd.f32 %v8357_v38, %v8356_v39  ;;  %v8359_v48 = vpop.f32.mrb[122].mxu0  ;;  %v1844_v37 = vmax.f32 %v1774_v40, 0.0 }
 0x1e8   :  { %v8360_v33 = vpop.f32.mrb[123].mxu0 }
 0x1e9   :  { %v8361_v57 = vadd.f32 %v8360_v33, %v8359_v48  ;;  %v1618_v18 = vadd.f32 %v8358_v5, %v10601_v13  ;;  %v1866_v42 = vpack.c.bf16 %v1844_v37, %v1843_v43 }
 0x1eb   :  { %v1779_v21 = vadd.f32 %v10709_v53, %v1618_v18  ;;  %v1621_v63 = vadd.f32 %v8361_v57, %v10603_v20  ;;  %7608 = vmatmul.mubr.msk.bf16.gmra.mrb[116].mxu1 %vm1907_vm2, %v1866_v42  ;;  %v13747_v57 = vld [vmem:[#allocation5_spill] sm:$0xff] }
 0x1ec   :  { %2095 = vmatprep.mubr.bf16.mxu1 %v13740_v60 }
 0x1ed   :  { %v1782_v30 = vadd.f32 %v10717_v9, %v1621_v63  ;;  %v8362_v55 = vpop.f32.mrb[124].mxu0  ;;  %v1845_v23 = vmax.f32 %v1779_v21, 0.0  ;;  %v13748_v63 = vld [vmem:[#allocation6_spill] sm:$0xff] }
 0x1ee   :  { %v8363_v11 = vpop.f32.mrb[125].mxu0 }
 0x1ef   :  { %v1846_v24 = vmax.f32 %v1782_v30, 0.0  ;;  %v8364_v61 = vadd.f32 %v8363_v11, %v8362_v55  ;;  %v8365_v14 = vpop.f32.mrb[126].mxu0 }
 0x1f0   :  { %v8366_v29 = vpop.f32.mrb[127].mxu0 }
 0x1f1   :  { %v1626_v13 = vadd.f32 %v8364_v61, %v10607_v36  ;;  %v8367_v25 = vadd.f32 %v8366_v29, %v8365_v14  ;;  %v1867_v0 = vpack.c.bf16 %v1846_v24, %v1845_v23 }
 0x1f3   :  { %v1787_v53 = vadd.f32 %v10707_v2, %v1626_v13  ;;  %v1629_v20 = vadd.f32 %v8367_v25, %v10609_v45  ;;  %7609 = vmatmul.mubr.msk.bf16.gmra.mrb[120].mxu1 %vm1907_vm2, %v1867_v0  ;;  %v13741_v45 = vld [vmem:[#allocation2_spill] sm:$0xff]  ;;  %v13749_v25 = vld [vmem:[#allocation7_spill] sm:$0xff] }
 0x1f4   :  { %2105 = vmatprep.mubr.bf16.mxu1 %v13740_v60 }
 0x1f5   :  { %v1790_v9 = vadd.f32 %v10715_v7, %v1629_v20  ;;  %v8368_v34 = vpop.f32.mrb[128].mxu0  ;;  %v1847_v35 = vmax.f32 %v1787_v53, 0.0  ;;  %v13742_v7 = vld [vmem:[#allocation11_spill] sm:$0xff] }
 0x1f6   :  { %v8369_v8 = vpop.f32.mrb[129].mxu0 }
 0x1f7   :  { %v8370_v52 = vadd.f32 %v8369_v8, %v8368_v34  ;;  %v8371_v10 = vpop.f32.mrb[130].mxu0  ;;  %v1848_v28 = vmax.f32 %v1790_v9, 0.0  ;;  %v13750_v9 = vld [vmem:[#allocation8_spill] sm:$0xff] }
 0x1f8   :  { %v8372_v16 = vpop.f32.mrb[131].mxu0 }
 0x1f9   :  { %v8373_v36 = vadd.f32 %v8372_v16, %v8371_v10  ;;  %v1634_v46 = vadd.f32 %v8370_v52, %v10613_v59  ;;  %v1868_v17 = vpack.c.bf16 %v1848_v28, %v1847_v35  ;;  %v1879_v35 = vlaneseq  ;;  %v1877_v16 = vld [vmem:[%s13673_s4] sm:$0x3] }
 0x1fb   :  { %v1795_v2 = vadd.f32 %v10729_v49, %v1634_v46  ;;  %v1637_v4 = vadd.f32 %v8373_v36, %v13741_v45  ;;  %7610 = vmatmul.mubr.msk.bf16.gmra.mrb[124].mxu1 %vm1907_vm2, %v1868_v17  ;;  %v13744_v49 = vld [vmem:[#allocation9_spill] sm:$0xff]  ;;  %v10876_v28 = vshrl.u32 %v1879_v35, 7 }
 0x1fc   :  { %2115 = vmatprep.mubr.bf16.mxu1 %v13740_v60 }
 0x1fd   :  { %v1798_v50 = vadd.f32 %v13742_v7, %v1637_v4  ;;  %v8374_v12 = vpop.f32.mrb[132].mxu0  ;;  %v1849_v32 = vmax.f32 %v1795_v2, 0.0  ;;  %13751 = vst [vmem:[#allocation2_spill] sm:$0xff] %v10876_v28  ;;  %v10885_v36 = vsub.s32 1, %v10876_v28 }
 0x1fe   :  { %v8375_v22 = vpop.f32.mrb[133].mxu0 }
 0x1ff   :  { %v1850_v19 = vmax.f32 %v1798_v50, 0.0  ;;  %v8376_v58 = vadd.f32 %v8375_v22, %v8374_v12  ;;  %v8377_v27 = vpop.f32.mrb[134].mxu0  ;;  %13753 = vst [vmem:[#allocation3_spill] sm:$0xff] %v10885_v36  ;;  %v10891_v46 = vrot.slane %v1877_v16, %v10885_v36 }
 0x200   :  { %v8378_v3 = vpop.f32.mrb[135].mxu0 }
 0x201   :  { %v1642_v59 = vadd.f32 %v8376_v58, %v13743_v51  ;;  %v8379_v62 = vadd.f32 %v8378_v3, %v8377_v27  ;;  %v1869_v54 = vpack.c.bf16 %v1850_v19, %v1849_v32  ;;  %v9413_v58 = vld [vmem:[%s13674_s7 + $0x4] ss:$8 sps:$4 sm:$0x1f]   ;;  %v9415_v51 = vld [vmem:[%s13674_s7] ss:$8 sps:$4 sm:$0x1f]  }
 0x202   :  { %7650 = vmatprep.subr.msk.bf16.mxu1 %vm2435_vm3, %v9413_v58 }
 0x203   :  { %v1803_v44 = vadd.f32 %v13744_v49, %v1642_v59  ;;  %v1645_v41 = vadd.f32 %v8379_v62, %v13745_v56  ;;  %7611 = vmatmul.mubr.msk.bf16.gmra.mrb[128].mxu1 %vm1907_vm2, %v1869_v54  ;;  %v2880_v49 = vsel %vm2435_vm3, %v9415_v51, 0 }
 0x204   :  { %2125 = vmatprep.mubr.bf16.mxu1 %v13740_v60  ;;  %2886 = vmatpush1.bf16.msra.mxu1 %v2880_v49 }
 0x205   :  { %v1806_v47 = vadd.f32 %v13746_v6, %v1645_v41  ;;  %v8380_v40 = vpop.f32.mrb[136].mxu0  ;;  %v1851_v48 = vmax.f32 %v1803_v44, 0.0 }
 0x206   :  { %v8381_v39 = vpop.f32.mrb[137].mxu0 }
 0x207   :  { %v8382_v38 = vadd.f32 %v8381_v39, %v8380_v40  ;;  %v8383_v5 = vpop.f32.mrb[138].mxu0  ;;  %v1852_v43 = vmax.f32 %v1806_v47, 0.0 }
 0x208   :  { %v8384_v37 = vpop.f32.mrb[139].mxu0 }
 0x209   :  { %v8385_v33 = vadd.f32 %v8384_v37, %v8383_v5  ;;  %v1650_v18 = vadd.f32 %v8382_v38, %v13747_v57  ;;  %v1870_v42 = vpack.c.bf16 %v1852_v43, %v1851_v48 }
 0x20b   :  { %v1811_v21 = vadd.f32 %v10756_v1, %v1650_v18  ;;  %v1653_v30 = vadd.f32 %v8385_v33, %v13748_v63  ;;  %7612 = vmatmul.mubr.msk.bf16.gmra.mrb[132].mxu1 %vm1907_vm2, %v1870_v42 }
 0x20c   :  { %2135 = vmatprep.mubr.bf16.mxu1 %v13740_v60 }
 0x20d   :  { %v1814_v55 = vadd.f32 %v10761_v15, %v1653_v30  ;;  %v8386_v11 = vpop.f32.mrb[140].mxu0  ;;  %v1853_v24 = vmax.f32 %v1811_v21, 0.0 }
 0x20e   :  { %v8387_v23 = vpop.f32.mrb[141].mxu0 }
 0x20f   :  { %v1854_v61 = vmax.f32 %v1814_v55, 0.0  ;;  %v8388_v14 = vadd.f32 %v8387_v23, %v8386_v11  ;;  %v8389_v29 = vpop.f32.mrb[142].mxu0 }
 0x210   :  { %v8390_v13 = vpop.f32.mrb[143].mxu0 }
 0x211   :  { %v1658_v0 = vadd.f32 %v8388_v14, %v13749_v25  ;;  %v8391_v53 = vadd.f32 %v8390_v13, %v8389_v29  ;;  %v1871_v20 = vpack.c.bf16 %v1854_v61, %v1853_v24 }
 0x213   :  { %v1819_v1 = vadd.f32 %v10751_v31, %v1658_v0  ;;  %v1661_v34 = vadd.f32 %v8391_v53, %v13750_v9  ;;  %7613 = vmatmul.mubr.msk.bf16.gmra.mrb[136].mxu1 %vm1907_vm2, %v1871_v20  ;;  %v10879_v31 = vsub.s32 0, %v10876_v28 }
 0x214   :  { %2145 = vmatprep.mubr.bf16.mxu1 %v13740_v60 }
 0x215   :  { %v1822_v15 = vadd.f32 %v10759_v26, %v1661_v34  ;;  %v1855_v8 = vmax.f32 %v1819_v1, 0.0  ;;  %13752 = vst [vmem:[#allocation11_spill] sm:$0xff] %v10879_v31  ;;  %v10888_v26 = vrot.slane %v1877_v16, %v10879_v31 }
 0x217   :  { %v1856_v52 = vmax.f32 %v1822_v15, 0.0 }
 0x219   :  { %v1872_v10 = vpack.c.bf16 %v1856_v52, %v1855_v8 }
 0x21b   :  { %7614 = vmatmul.mubr.msk.bf16.gmra.mrb[140].mxu1 %vm1907_vm2, %v1872_v10 }
 0x21c   :  { %2917 = vmatprep.mubr.bf16.mxu1 %v13740_v60 }
 0x276   :  { %v1997_v17 = vpop.f32.mrb[80].mxu1 }
 0x277   :  { %v1998_v2 = vadd.f32 %v1997_v17, %v10888_v26  ;;  %v1999_v45 = vpop.f32.mrb[81].mxu1 }
 0x278   :  { %v2000_v4 = vadd.f32 %v1999_v45, %v10891_v46  ;;  %v2001_v7 = vpop.f32.mrb[82].mxu1 }
 0x279   :  { %v2002_v50 = vadd.f32 %v2001_v7, %v10888_v26  ;;  %v2003_v12 = vpop.f32.mrb[83].mxu1  ;;  %v2156_v32 = vmax.f32 %v1998_v2, 0.0 }
 0x27a   :  { %v2004_v22 = vadd.f32 %v2003_v12, %v10891_v46  ;;  %v2157_v27 = vmax.f32 %v2000_v4, 0.0 }
 0x27b   :  { %v2158_v19 = vmax.f32 %v2002_v50, 0.0 }
 0x27c   :  { %v2159_v3 = vmax.f32 %v2004_v22, 0.0 }
 0x27d   :  { %v2220_v59 = vpack.c.bf16 %v2158_v19, %v2156_v32 }
 0x27e   :  { %v2221_v62 = vpack.c.bf16 %v2159_v3, %v2157_v27  ;;  %v2007_v54 = vpop.f32.mrb[84].mxu1 }
 0x27f   :  { %v2008_v44 = vadd.f32 %v2007_v54, %v10888_v26  ;;  %v2009_v56 = vpop.f32.mrb[85].mxu1 }
 0x280   :  { %v2010_v41 = vadd.f32 %v2009_v56, %v10891_v46  ;;  %v2011_v6 = vpop.f32.mrb[86].mxu1  ;;  %7632 = vmatprep.mubr.msk.bf16.mxu0 %vm2386_vm4, %v2221_v62 }
 0x281   :  { %v2012_v47 = vadd.f32 %v2011_v6, %v10888_v26  ;;  %v2013_v40 = vpop.f32.mrb[87].mxu1  ;;  %2472 = vmatmul.mubr.bf16.vlgmr.msra.gmra.mrb[144].mxu0 %v2220_v59  ;;  %v2160_v38 = vmax.f32 %v2008_v44, 0.0 }
 0x282   :  { %v2014_v39 = vadd.f32 %v2013_v40, %v10891_v46  ;;  %v2161_v48 = vmax.f32 %v2010_v41, 0.0 }
 0x283   :  { %v2162_v5 = vmax.f32 %v2012_v47, 0.0 }
 0x284   :  { %v2163_v43 = vmax.f32 %v2014_v39, 0.0 }
 0x285   :  { %v2222_v37 = vpack.c.bf16 %v2162_v5, %v2160_v38 }
 0x286   :  { %v2223_v33 = vpack.c.bf16 %v2163_v43, %v2161_v48  ;;  %v2017_v57 = vpop.f32.mrb[88].mxu1 }
 0x287   :  { %v2018_v18 = vadd.f32 %v2017_v57, %v10888_v26  ;;  %v2019_v42 = vpop.f32.mrb[89].mxu1 }
 0x288   :  { %v2020_v21 = vadd.f32 %v2019_v42, %v10891_v46  ;;  %v2021_v63 = vpop.f32.mrb[90].mxu1  ;;  %7633 = vmatprep.mubr.msk.bf16.mxu0 %vm2386_vm4, %v2223_v33 }
 0x289   :  { %v2022_v30 = vadd.f32 %v2021_v63, %v10888_v26  ;;  %v2023_v55 = vpop.f32.mrb[91].mxu1  ;;  %2480 = vmatmul.mubr.bf16.gmra.mrb[148].mxu0 %v2222_v37  ;;  %v2164_v23 = vmax.f32 %v2018_v18, 0.0 }
 0x28a   :  { %v2024_v11 = vadd.f32 %v2023_v55, %v10891_v46  ;;  %v2165_v61 = vmax.f32 %v2020_v21, 0.0 }
 0x28b   :  { %v2166_v24 = vmax.f32 %v2022_v30, 0.0 }
 0x28c   :  { %v2167_v14 = vmax.f32 %v2024_v11, 0.0 }
 0x28d   :  { %v2224_v29 = vpack.c.bf16 %v2166_v24, %v2164_v23 }
 0x28e   :  { %v2225_v13 = vpack.c.bf16 %v2167_v14, %v2165_v61  ;;  %v2027_v25 = vpop.f32.mrb[92].mxu1 }
 0x28f   :  { %v2028_v0 = vadd.f32 %v2027_v25, %v10888_v26  ;;  %v2029_v53 = vpop.f32.mrb[93].mxu1 }
 0x290   :  { %v2030_v20 = vadd.f32 %v2029_v53, %v10891_v46  ;;  %v2031_v1 = vpop.f32.mrb[94].mxu1  ;;  %7634 = vmatprep.mubr.msk.bf16.mxu0 %vm2386_vm4, %v2225_v13 }
 0x291   :  { %v2032_v9 = vadd.f32 %v2031_v1, %v10888_v26  ;;  %v2033_v34 = vpop.f32.mrb[95].mxu1  ;;  %2488 = vmatmul.mubr.bf16.gmra.mrb[152].mxu0 %v2224_v29  ;;  %v2168_v8 = vmax.f32 %v2028_v0, 0.0 }
 0x292   :  { %v2034_v15 = vadd.f32 %v2033_v34, %v10891_v46  ;;  %v2169_v10 = vmax.f32 %v2030_v20, 0.0 }
 0x293   :  { %v2170_v52 = vmax.f32 %v2032_v9, 0.0 }
 0x294   :  { %v2171_v35 = vmax.f32 %v2034_v15, 0.0 }
 0x295   :  { %v2226_v16 = vpack.c.bf16 %v2170_v52, %v2168_v8 }
 0x296   :  { %v2227_v17 = vpack.c.bf16 %v2171_v35, %v2169_v10  ;;  %v2037_v2 = vpop.f32.mrb[96].mxu1 }
 0x297   :  { %v2038_v45 = vadd.f32 %v2037_v2, %v10888_v26  ;;  %v2039_v4 = vpop.f32.mrb[97].mxu1 }
 0x298   :  { %v2040_v7 = vadd.f32 %v2039_v4, %v10891_v46  ;;  %v2041_v50 = vpop.f32.mrb[98].mxu1  ;;  %7635 = vmatprep.mubr.msk.bf16.mxu0 %vm2386_vm4, %v2227_v17 }
 0x299   :  { %v2042_v12 = vadd.f32 %v2041_v50, %v10888_v26  ;;  %v2043_v22 = vpop.f32.mrb[99].mxu1  ;;  %2496 = vmatmul.mubr.bf16.gmra.mrb[156].mxu0 %v2226_v16  ;;  %v2172_v19 = vmax.f32 %v2038_v45, 0.0 }
 0x29a   :  { %v2044_v32 = vadd.f32 %v2043_v22, %v10891_v46  ;;  %v2173_v27 = vmax.f32 %v2040_v7, 0.0 }
 0x29b   :  { %v2174_v58 = vmax.f32 %v2042_v12, 0.0 }
 0x29c   :  { %v2175_v3 = vmax.f32 %v2044_v32, 0.0 }
 0x29d   :  { %v2228_v51 = vpack.c.bf16 %v2174_v58, %v2172_v19 }
 0x29e   :  { %v2229_v59 = vpack.c.bf16 %v2175_v3, %v2173_v27  ;;  %v2047_v62 = vpop.f32.mrb[100].mxu1 }
 0x29f   :  { %v2048_v54 = vadd.f32 %v2047_v62, %v10888_v26  ;;  %v2049_v49 = vpop.f32.mrb[101].mxu1 }
 0x2a0   :  { %v2050_v44 = vadd.f32 %v2049_v49, %v10891_v46  ;;  %v2051_v56 = vpop.f32.mrb[102].mxu1  ;;  %7636 = vmatprep.mubr.msk.bf16.mxu0 %vm2386_vm4, %v2229_v59 }
 0x2a1   :  { %v2052_v41 = vadd.f32 %v2051_v56, %v10888_v26  ;;  %v2053_v6 = vpop.f32.mrb[103].mxu1  ;;  %2504 = vmatmul.mubr.bf16.gmra.mrb[160].mxu0 %v2228_v51  ;;  %v2176_v40 = vmax.f32 %v2048_v54, 0.0 }
 0x2a2   :  { %v2054_v47 = vadd.f32 %v2053_v6, %v10891_v46  ;;  %v2177_v38 = vmax.f32 %v2050_v44, 0.0 }
 0x2a3   :  { %v2178_v39 = vmax.f32 %v2052_v41, 0.0 }
 0x2a4   :  { %v2179_v5 = vmax.f32 %v2054_v47, 0.0 }
 0x2a5   :  { %v2230_v48 = vpack.c.bf16 %v2178_v39, %v2176_v40 }
 0x2a6   :  { %v2231_v43 = vpack.c.bf16 %v2179_v5, %v2177_v38  ;;  %v2057_v37 = vpop.f32.mrb[104].mxu1 }
 0x2a7   :  { %v2058_v33 = vadd.f32 %v2057_v37, %v10888_v26  ;;  %v2059_v57 = vpop.f32.mrb[105].mxu1 }
 0x2a8   :  { %v2060_v18 = vadd.f32 %v2059_v57, %v10891_v46  ;;  %v2061_v42 = vpop.f32.mrb[106].mxu1  ;;  %7637 = vmatprep.mubr.msk.bf16.mxu0 %vm2386_vm4, %v2231_v43 }
 0x2a9   :  { %v2062_v21 = vadd.f32 %v2061_v42, %v10888_v26  ;;  %v2063_v63 = vpop.f32.mrb[107].mxu1  ;;  %2512 = vmatmul.mubr.bf16.gmra.mrb[164].mxu0 %v2230_v48  ;;  %v2180_v55 = vmax.f32 %v2058_v33, 0.0 }
 0x2aa   :  { %v2064_v30 = vadd.f32 %v2063_v63, %v10891_v46  ;;  %v2181_v23 = vmax.f32 %v2060_v18, 0.0 }
 0x2ab   :  { %v2182_v11 = vmax.f32 %v2062_v21, 0.0 }
 0x2ac   :  { %v2183_v24 = vmax.f32 %v2064_v30, 0.0 }
 0x2ad   :  { %v2232_v61 = vpack.c.bf16 %v2182_v11, %v2180_v55 }
 0x2ae   :  { %v2233_v14 = vpack.c.bf16 %v2183_v24, %v2181_v23  ;;  %v2067_v29 = vpop.f32.mrb[108].mxu1 }
 0x2af   :  { %v2068_v13 = vadd.f32 %v2067_v29, %v10888_v26  ;;  %v2069_v25 = vpop.f32.mrb[109].mxu1 }
 0x2b0   :  { %v2070_v0 = vadd.f32 %v2069_v25, %v10891_v46  ;;  %v2071_v53 = vpop.f32.mrb[110].mxu1  ;;  %7638 = vmatprep.mubr.msk.bf16.mxu0 %vm2386_vm4, %v2233_v14 }
 0x2b1   :  { %v2072_v20 = vadd.f32 %v2071_v53, %v10888_v26  ;;  %v2073_v1 = vpop.f32.mrb[111].mxu1  ;;  %2520 = vmatmul.mubr.bf16.gmra.mrb[168].mxu0 %v2232_v61  ;;  %v2184_v34 = vmax.f32 %v2068_v13, 0.0 }
 0x2b2   :  { %v2074_v9 = vadd.f32 %v2073_v1, %v10891_v46  ;;  %v2185_v8 = vmax.f32 %v2070_v0, 0.0 }
 0x2b3   :  { %v2186_v15 = vmax.f32 %v2072_v20, 0.0 }
 0x2b4   :  { %v2187_v52 = vmax.f32 %v2074_v9, 0.0 }
 0x2b5   :  { %v2234_v10 = vpack.c.bf16 %v2186_v15, %v2184_v34 }
 0x2b6   :  { %v2235_v35 = vpack.c.bf16 %v2187_v52, %v2185_v8  ;;  %v2077_v16 = vpop.f32.mrb[112].mxu1 }
 0x2b7   :  { %v2078_v17 = vadd.f32 %v2077_v16, %v10888_v26  ;;  %v2079_v2 = vpop.f32.mrb[113].mxu1 }
 0x2b8   :  { %v2080_v45 = vadd.f32 %v2079_v2, %v10891_v46  ;;  %v2081_v4 = vpop.f32.mrb[114].mxu1  ;;  %7639 = vmatprep.mubr.msk.bf16.mxu0 %vm2386_vm4, %v2235_v35 }
 0x2b9   :  { %v2082_v7 = vadd.f32 %v2081_v4, %v10888_v26  ;;  %v2083_v50 = vpop.f32.mrb[115].mxu1  ;;  %2528 = vmatmul.mubr.bf16.gmra.mrb[172].mxu0 %v2234_v10  ;;  %v2188_v22 = vmax.f32 %v2078_v17, 0.0 }
 0x2ba   :  { %v2084_v12 = vadd.f32 %v2083_v50, %v10891_v46  ;;  %v2189_v19 = vmax.f32 %v2080_v45, 0.0 }
 0x2bb   :  { %v2190_v32 = vmax.f32 %v2082_v7, 0.0 }
 0x2bc   :  { %v2191_v58 = vmax.f32 %v2084_v12, 0.0 }
 0x2bd   :  { %v2236_v27 = vpack.c.bf16 %v2190_v32, %v2188_v22 }
 0x2be   :  { %v2237_v3 = vpack.c.bf16 %v2191_v58, %v2189_v19  ;;  %v2087_v51 = vpop.f32.mrb[116].mxu1 }
 0x2bf   :  { %v2088_v59 = vadd.f32 %v2087_v51, %v10888_v26  ;;  %v2089_v62 = vpop.f32.mrb[117].mxu1 }
 0x2c0   :  { %v2090_v54 = vadd.f32 %v2089_v62, %v10891_v46  ;;  %v2091_v49 = vpop.f32.mrb[118].mxu1  ;;  %7640 = vmatprep.mubr.msk.bf16.mxu0 %vm2386_vm4, %v2237_v3 }
 0x2c1   :  { %v2092_v44 = vadd.f32 %v2091_v49, %v10888_v26  ;;  %v2093_v56 = vpop.f32.mrb[119].mxu1  ;;  %2536 = vmatmul.mubr.bf16.gmra.mrb[176].mxu0 %v2236_v27  ;;  %v2192_v6 = vmax.f32 %v2088_v59, 0.0 }
 0x2c2   :  { %v2094_v41 = vadd.f32 %v2093_v56, %v10891_v46  ;;  %v2193_v40 = vmax.f32 %v2090_v54, 0.0 }
 0x2c3   :  { %v2194_v47 = vmax.f32 %v2092_v44, 0.0 }
 0x2c4   :  { %v2195_v39 = vmax.f32 %v2094_v41, 0.0 }
 0x2c5   :  { %v2238_v38 = vpack.c.bf16 %v2194_v47, %v2192_v6 }
 0x2c6   :  { %v2239_v5 = vpack.c.bf16 %v2195_v39, %v2193_v40  ;;  %v2097_v48 = vpop.f32.mrb[120].mxu1 }
 0x2c7   :  { %v2098_v43 = vadd.f32 %v2097_v48, %v10888_v26  ;;  %v2099_v37 = vpop.f32.mrb[121].mxu1 }
 0x2c8   :  { %v2100_v33 = vadd.f32 %v2099_v37, %v10891_v46  ;;  %v2101_v57 = vpop.f32.mrb[122].mxu1  ;;  %7641 = vmatprep.mubr.msk.bf16.mxu0 %vm2386_vm4, %v2239_v5 }
 0x2c9   :  { %v2102_v18 = vadd.f32 %v2101_v57, %v10888_v26  ;;  %v2103_v42 = vpop.f32.mrb[123].mxu1  ;;  %2544 = vmatmul.mubr.bf16.gmra.mrb[180].mxu0 %v2238_v38  ;;  %v2196_v63 = vmax.f32 %v2098_v43, 0.0 }
 0x2ca   :  { %v2104_v21 = vadd.f32 %v2103_v42, %v10891_v46  ;;  %v2197_v55 = vmax.f32 %v2100_v33, 0.0 }
 0x2cb   :  { %v2198_v30 = vmax.f32 %v2102_v18, 0.0 }
 0x2cc   :  { %v2199_v11 = vmax.f32 %v2104_v21, 0.0 }
 0x2cd   :  { %v2240_v23 = vpack.c.bf16 %v2198_v30, %v2196_v63 }
 0x2ce   :  { %v2241_v24 = vpack.c.bf16 %v2199_v11, %v2197_v55  ;;  %v2107_v61 = vpop.f32.mrb[124].mxu1 }
 0x2cf   :  { %v2108_v14 = vadd.f32 %v2107_v61, %v10888_v26  ;;  %v2109_v29 = vpop.f32.mrb[125].mxu1 }
 0x2d0   :  { %v2110_v13 = vadd.f32 %v2109_v29, %v10891_v46  ;;  %v2111_v25 = vpop.f32.mrb[126].mxu1  ;;  %7642 = vmatprep.mubr.msk.bf16.mxu0 %vm2386_vm4, %v2241_v24 }
 0x2d1   :  { %v2112_v0 = vadd.f32 %v2111_v25, %v10888_v26  ;;  %v2113_v53 = vpop.f32.mrb[127].mxu1  ;;  %2552 = vmatmul.mubr.bf16.gmra.mrb[184].mxu0 %v2240_v23  ;;  %v2200_v1 = vmax.f32 %v2108_v14, 0.0 }
 0x2d2   :  { %v2114_v20 = vadd.f32 %v2113_v53, %v10891_v46  ;;  %v2201_v34 = vmax.f32 %v2110_v13, 0.0 }
 0x2d3   :  { %v2202_v9 = vmax.f32 %v2112_v0, 0.0 }
 0x2d4   :  { %v2203_v15 = vmax.f32 %v2114_v20, 0.0 }
 0x2d5   :  { %v2242_v8 = vpack.c.bf16 %v2202_v9, %v2200_v1 }
 0x2d6   :  { %v2243_v52 = vpack.c.bf16 %v2203_v15, %v2201_v34  ;;  %v2117_v10 = vpop.f32.mrb[128].mxu1 }
 0x2d7   :  { %v2118_v35 = vadd.f32 %v2117_v10, %v10888_v26  ;;  %v2119_v16 = vpop.f32.mrb[129].mxu1 }
 0x2d8   :  { %v2120_v17 = vadd.f32 %v2119_v16, %v10891_v46  ;;  %v2121_v2 = vpop.f32.mrb[130].mxu1  ;;  %7643 = vmatprep.mubr.msk.bf16.mxu0 %vm2386_vm4, %v2243_v52  ;;  %v10984_v52 = vld [vmem:[%s13675_s6] ss:$0 sm:$0xff] }
 0x2d9   :  { %v2122_v45 = vadd.f32 %v2121_v2, %v10888_v26  ;;  %v2123_v4 = vpop.f32.mrb[131].mxu1  ;;  %2560 = vmatmul.mubr.bf16.gmra.mrb[188].mxu0 %v2242_v8  ;;  %v2204_v50 = vmax.f32 %v2118_v35, 0.0 }
 0x2da   :  { %v2124_v7 = vadd.f32 %v2123_v4, %v10891_v46  ;;  %v2205_v22 = vmax.f32 %v2120_v17, 0.0 }
 0x2db   :  { %v2206_v12 = vmax.f32 %v2122_v45, 0.0 }
 0x2dc   :  { %v2207_v32 = vmax.f32 %v2124_v7, 0.0 }
 0x2dd   :  { %v2244_v19 = vpack.c.bf16 %v2206_v12, %v2204_v50 }
 0x2de   :  { %v2245_v58 = vpack.c.bf16 %v2207_v32, %v2205_v22  ;;  %v2127_v27 = vpop.f32.mrb[132].mxu1 }
 0x2df   :  { %v2128_v3 = vadd.f32 %v2127_v27, %v10888_v26  ;;  %v2129_v51 = vpop.f32.mrb[133].mxu1 }
 0x2e0   :  { %v2130_v59 = vadd.f32 %v2129_v51, %v10891_v46  ;;  %v2131_v62 = vpop.f32.mrb[134].mxu1  ;;  %7644 = vmatprep.mubr.msk.bf16.mxu0 %vm2386_vm4, %v2245_v58 }
 0x2e1   :  { %v2132_v54 = vadd.f32 %v2131_v62, %v10888_v26  ;;  %v2133_v49 = vpop.f32.mrb[135].mxu1  ;;  %2568 = vmatmul.mubr.bf16.gmra.mrb[192].mxu0 %v2244_v19  ;;  %v2208_v56 = vmax.f32 %v2128_v3, 0.0 }
 0x2e2   :  { %v2134_v44 = vadd.f32 %v2133_v49, %v10891_v46  ;;  %v2209_v6 = vmax.f32 %v2130_v59, 0.0 }
 0x2e3   :  { %v2210_v41 = vmax.f32 %v2132_v54, 0.0 }
 0x2e4   :  { %v2211_v47 = vmax.f32 %v2134_v44, 0.0 }
 0x2e5   :  { %v2246_v40 = vpack.c.bf16 %v2210_v41, %v2208_v56 }
 0x2e6   :  { %v2247_v39 = vpack.c.bf16 %v2211_v47, %v2209_v6  ;;  %v2137_v38 = vpop.f32.mrb[136].mxu1 }
 0x2e7   :  { %v2138_v5 = vadd.f32 %v2137_v38, %v10888_v26  ;;  %v2139_v48 = vpop.f32.mrb[137].mxu1 }
 0x2e8   :  { %v2140_v43 = vadd.f32 %v2139_v48, %v10891_v46  ;;  %v2141_v37 = vpop.f32.mrb[138].mxu1  ;;  %7645 = vmatprep.mubr.msk.bf16.mxu0 %vm2386_vm4, %v2247_v39  ;;  %v9418_v39 = vld [vmem:[%s13676_s9 + $0x4] ss:$16 sps:$4 sm:$0xff]  }
 0x2e9   :  { %v2142_v33 = vadd.f32 %v2141_v37, %v10888_v26  ;;  %v2143_v57 = vpop.f32.mrb[139].mxu1  ;;  %2576 = vmatmul.mubr.bf16.gmra.mrb[196].mxu0 %v2246_v40  ;;  %v2212_v42 = vmax.f32 %v2138_v5, 0.0  ;;  %v9416_v40 = vld [vmem:[%s13676_s9] ss:$16 sps:$4 sm:$0xff]   ;;  %3636 = vmatprep.subr.bf16.mxu0 %v9418_v39 }
 0x2ea   :  { %v2144_v18 = vadd.f32 %v2143_v57, %v10891_v46  ;;  %v2213_v63 = vmax.f32 %v2140_v43, 0.0  ;;  %v9421_v43 = vld [vmem:[%s13676_s9 + $0x24] ss:$16 sps:$4 sm:$0xff]   ;;  %3637 = vmatpush1.bf16.msra.mxu0 %v9416_v40 }
 0x2eb   :  { %v2214_v21 = vmax.f32 %v2142_v33, 0.0  ;;  %3638 = vmatprep.subr.bf16.mxu0 %v9421_v43 }
 0x2ec   :  { %v2215_v30 = vmax.f32 %v2144_v18, 0.0 }
 0x2ed   :  { %v2248_v55 = vpack.c.bf16 %v2214_v21, %v2212_v42  ;;  %v9419_v42 = vld [vmem:[%s13676_s9 + $0x20] ss:$16 sps:$4 sm:$0xff]  }
 0x2ee   :  { %v2249_v11 = vpack.c.bf16 %v2215_v30, %v2213_v63  ;;  %v2147_v23 = vpop.f32.mrb[140].mxu1  ;;  %v9424_v63 = vld [vmem:[%s13676_s9 + $0x44] ss:$16 sps:$4 sm:$0xff]   ;;  %3639 = vmatpush1.bf16.msra.mxu0 %v9419_v42 }
 0x2ef   :  { %v2148_v24 = vadd.f32 %v2147_v23, %v10888_v26  ;;  %v2149_v61 = vpop.f32.mrb[141].mxu1  ;;  %v9422_v23 = vld [vmem:[%s13676_s9 + $0x40] ss:$16 sps:$4 sm:$0xff]   ;;  %3640 = vmatprep.subr.bf16.mxu0 %v9424_v63  ;;  %v9439_v63 = vld [vmem:[%s13676_s9 + $0xe4] ss:$16 sps:$4 sm:$0xff]  }
 0x2f0   :  { %v2150_v14 = vadd.f32 %v2149_v61, %v10891_v46  ;;  %v2151_v29 = vpop.f32.mrb[142].mxu1  ;;  %7646 = vmatprep.mubr.msk.bf16.mxu0 %vm2386_vm4, %v2249_v11  ;;  %v9427_v61 = vld [vmem:[%s13676_s9 + $0x64] ss:$16 sps:$4 sm:$0xff]  }
 0x2f1   :  { %v2152_v13 = vadd.f32 %v2151_v29, %v10888_v26  ;;  %v2153_v25 = vpop.f32.mrb[143].mxu1  ;;  %2584 = vmatmul.mubr.bf16.gmra.mrb[200].mxu0 %v2248_v55  ;;  %v2216_v53 = vmax.f32 %v2148_v24, 0.0 }
 0x2f2   :  { %v2154_v0 = vadd.f32 %v2153_v25, %v10891_v46  ;;  %v2217_v1 = vmax.f32 %v2150_v14, 0.0  ;;  %3641 = vmatpush1.bf16.msra.mxu0 %v9422_v23 }
 0x2f3   :  { %v2218_v20 = vmax.f32 %v2152_v13, 0.0  ;;  %3642 = vmatprep.subr.bf16.mxu0 %v9427_v61 }
 0x2f4   :  { %v2219_v9 = vmax.f32 %v2154_v0, 0.0 }
 0x2f5   :  { %v2250_v34 = vpack.c.bf16 %v2218_v20, %v2216_v53 }
 0x2f6   :  { %v2251_v15 = vpack.c.bf16 %v2219_v9, %v2217_v1 }
 0x2f8   :  { %7647 = vmatprep.mubr.msk.bf16.mxu0 %vm2386_vm4, %v2251_v15 }
 0x2f9   :  { %2592 = vmatmul.mubr.bf16.gmra.mrb[204].mxu0 %v2250_v34 }
 0x354   :  { %v8425_v8 = vpop.f32.mrb[144].mxu0 }
 0x355   :  { %v8426_v26 = vpop.f32.mrb[145].mxu0 }
 0x356   :  { %v8427_v10 = vadd.f32 %v8426_v26, %v8425_v8  ;;  %v8428_v35 = vpop.f32.mrb[146].mxu0  ;;  %v9425_v8 = vld [vmem:[%s13676_s9 + $0x60] ss:$16 sps:$4 sm:$0xff]  }
 0x357   :  { %v8429_v16 = vpop.f32.mrb[147].mxu0  ;;  %3643 = vmatpush1.bf16.msra.mxu0 %v9425_v8 }
 0x358   :  { %v2474_v46 = vadd.f32 %v8427_v10, %v10984_v52  ;;  %v8430_v17 = vadd.f32 %v8429_v16, %v8428_v35  ;;  %v9430_v10 = vld [vmem:[%s13676_s9 + $0x84] ss:$16 sps:$4 sm:$0xff]  }
 0x359   :  { %3644 = vmatprep.subr.bf16.mxu0 %v9430_v10 }
 0x35a   :  { %v2600_v2 = vsub.f32 0.0, %v2474_v46  ;;  %v2477_v45 = vadd.f32 %v8430_v17, %v10984_v52 }
 0x35c   :  { %v2632_v4 = vmul.f32 1.442695, %v2600_v2  ;;  %v2601_v7 = vsub.f32 0.0, %v2477_v45  ;;  %v8431_v50 = vpop.f32.mrb[148].mxu0 }
 0x35d   :  { %v8432_v12 = vpop.f32.mrb[149].mxu0 }
 0x35e   :  { %9829 = vpow2.f32 %v2632_v4  ;;  %v2634_v22 = vmul.f32 1.442695, %v2601_v7  ;;  %v8433_v32 = vadd.f32 %v8432_v12, %v8431_v50  ;;  %v8434_v19 = vpop.f32.mrb[150].mxu0  ;;  %v9428_v50 = vld [vmem:[%s13676_s9 + $0x80] ss:$16 sps:$4 sm:$0xff]  }
 0x35f   :  { %v8435_v58 = vpop.f32.mrb[151].mxu0  ;;  %3645 = vmatpush1.bf16.msra.mxu0 %v9428_v50 }
 0x360   :  { %9831 = vpow2.f32 %v2634_v22  ;;  %v2482_v27 = vadd.f32 %v8433_v32, %v10984_v52  ;;  %v8436_v3 = vadd.f32 %v8435_v58, %v8434_v19  ;;  %v9433_v32 = vld [vmem:[%s13676_s9 + $0xa4] ss:$16 sps:$4 sm:$0xff]  }
 0x361   :  { %3646 = vmatprep.subr.bf16.mxu0 %v9433_v32  ;;  %v9463_v32 = vld [vmem:[%s13676_s9 + $0x8c] ss:$16 sps:$4 sm:$0xff]  }
 0x362   :  { %v2602_v51 = vsub.f32 0.0, %v2482_v27  ;;  %v2485_v59 = vadd.f32 %v8436_v3, %v10984_v52 }
 0x364   :  { %v2636_v62 = vmul.f32 1.442695, %v2602_v51  ;;  %v2603_v54 = vsub.f32 0.0, %v2485_v59  ;;  %v8437_v49 = vpop.f32.mrb[152].mxu0  ;;  %v9445_v51 = vld [vmem:[%s13676_s9 + $0xc] ss:$16 sps:$4 sm:$0xff]  }
 0x365   :  { %v8438_v44 = vpop.f32.mrb[153].mxu0  ;;  %3829 = vmatprep.subr.bf16.mxu1 %v9445_v51 }
 0x366   :  { %9833 = vpow2.f32 %v2636_v62  ;;  %v2638_v56 = vmul.f32 1.442695, %v2603_v54  ;;  %v8439_v41 = vadd.f32 %v8438_v44, %v8437_v49  ;;  %v8440_v6 = vpop.f32.mrb[154].mxu0  ;;  %v9443_v62 = vld [vmem:[%s13676_s9 + $0x8] ss:$16 sps:$4 sm:$0xff]  }
 0x367   :  { %v8441_v47 = vpop.f32.mrb[155].mxu0 }
 0x368   :  { %v9830_v38 = vpop.eup %9829  ;;  %9835 = vpow2.f32 %v2638_v56  ;;  %v2490_v5 = vadd.f32 %v8439_v41, %v10984_v52  ;;  %v8442_v48 = vadd.f32 %v8441_v47, %v8440_v6  ;;  %v9431_v56 = vld [vmem:[%s13676_s9 + $0xa0] ss:$16 sps:$4 sm:$0xff]   ;;  %v9448_v41 = vld [vmem:[%s13676_s9 + $0x2c] ss:$16 sps:$4 sm:$0xff]   ;;  %v9436_v47 = vld [vmem:[%s13676_s9 + $0xc4] ss:$16 sps:$4 sm:$0xff]  }
 0x369   :  { %v2696_v37 = vadd.f32 1.0, %v9830_v38  ;;  %3647 = vmatpush1.bf16.msra.mxu0 %v9431_v56 }
 0x36a   :  { %v9832_v33 = vpop.eup %9831  ;;  %v2604_v57 = vsub.f32 0.0, %v2490_v5  ;;  %v2493_v18 = vadd.f32 %v8442_v48, %v10984_v52  ;;  %v9446_v48 = vld [vmem:[%s13676_s9 + $0x28] ss:$16 sps:$4 sm:$0xff]   ;;  %3648 = vmatprep.subr.bf16.mxu0 %v9436_v47 }
 0x36b   :  { %v2697_v21 = vadd.f32 1.0, %v9832_v33  ;;  %9837 = vrcp.f32 %v2696_v37  ;;  %v9464_v47 = vld [vmem:[%s13676_s9 + $0xa8] ss:$16 sps:$4 sm:$0xff]  }
 0x36c   :  { %v2640_v30 = vmul.f32 1.442695, %v2604_v57  ;;  %v2605_v55 = vsub.f32 0.0, %v2493_v18  ;;  %v8443_v11 = vpop.f32.mrb[156].mxu0  ;;  %v9434_v18 = vld [vmem:[%s13676_s9 + $0xc0] ss:$16 sps:$4 sm:$0xff]  }
 0x36d   :  { %9839 = vrcp.f32 %v2697_v21  ;;  %v8444_v24 = vpop.f32.mrb[157].mxu0  ;;  %3649 = vmatpush1.bf16.msra.mxu0 %v9434_v18 }
 0x36e   :  { %9841 = vpow2.f32 %v2640_v30  ;;  %v2642_v14 = vmul.f32 1.442695, %v2605_v55  ;;  %v8445_v29 = vadd.f32 %v8444_v24, %v8443_v11  ;;  %v8446_v13 = vpop.f32.mrb[158].mxu0  ;;  %v9454_v24 = vld [vmem:[%s13676_s9 + $0x4c] ss:$16 sps:$4 sm:$0xff]   ;;  %3650 = vmatprep.subr.bf16.mxu0 %v9439_v63 }
 0x36f   :  { %v8447_v25 = vpop.f32.mrb[159].mxu0  ;;  %v9467_v63 = vld [vmem:[%s13676_s9 + $0x160] ss:$16 sps:$4 sm:$0xff]  }
 0x370   :  { %v9834_v0 = vpop.eup %9833  ;;  %9843 = vpow2.f32 %v2642_v14  ;;  %v2498_v53 = vadd.f32 %v8445_v29, %v10984_v52  ;;  %v8448_v20 = vadd.f32 %v8447_v25, %v8446_v13  ;;  %v9452_v14 = vld [vmem:[%s13676_s9 + $0x48] ss:$16 sps:$4 sm:$0xff]  }
 0x371   :  { %v2698_v1 = vadd.f32 1.0, %v9834_v0  ;;  %v9437_v0 = vld [vmem:[%s13676_s9 + $0xe0] ss:$16 sps:$4 sm:$0xff]  }
 0x372   :  { %v9836_v9 = vpop.eup %9835  ;;  %v2606_v34 = vsub.f32 0.0, %v2498_v53  ;;  %v2501_v15 = vadd.f32 %v8448_v20, %v10984_v52  ;;  %v9457_v53 = vld [vmem:[%s13676_s9 + $0x6c] ss:$16 sps:$4 sm:$0xff]   ;;  %3651 = vmatpush1.bf16.msra.mxu0 %v9437_v0 }
 0x373   :  { %v2699_v26 = vadd.f32 1.0, %v9836_v9  ;;  %9845 = vrcp.f32 %v2698_v1  ;;  %v9442_v1 = vld [vmem:[%s13676_s9 + $0x104] ss:$16 sps:$4 sm:$0xff]  }
 0x374   :  { %v2644_v35 = vmul.f32 1.442695, %v2606_v34  ;;  %v2607_v16 = vsub.f32 0.0, %v2501_v15  ;;  %v8449_v46 = vpop.f32.mrb[160].mxu0  ;;  %3652 = vmatprep.subr.bf16.mxu0 %v9442_v1  ;;  %v9473_v1 = vld [vmem:[%s13676_s9 + $0xe8] ss:$16 sps:$4 sm:$0xff]  }
 0x375   :  { %9847 = vrcp.f32 %v2699_v26  ;;  %v8450_v17 = vpop.f32.mrb[161].mxu0  ;;  %v9838_v2 = vpop.eup %9837  ;;  %v9455_v26 = vld [vmem:[%s13676_s9 + $0x68] ss:$16 sps:$4 sm:$0xff]  }
 0x376   :  { %9849 = vpow2.f32 %v2644_v35  ;;  %v2646_v45 = vmul.f32 1.442695, %v2607_v16  ;;  %v8451_v4 = vadd.f32 %v8450_v17, %v8449_v46  ;;  %v8452_v7 = vpop.f32.mrb[162].mxu0  ;;  %v9440_v17 = vld [vmem:[%s13676_s9 + $0x100] ss:$16 sps:$4 sm:$0xff]  }
 0x377   :  { %v9840_v12 = vpop.eup %9839  ;;  %v8453_v22 = vpop.f32.mrb[163].mxu0  ;;  %3653 = vmatpush1.bf16.msra.mxu0 %v9440_v17 }
 0x378   :  { %v9842_v19 = vpop.eup %9841  ;;  %9851 = vpow2.f32 %v2646_v45  ;;  %v2506_v58 = vadd.f32 %v8451_v4, %v10984_v52  ;;  %v8454_v27 = vadd.f32 %v8453_v22, %v8452_v7  ;;  %v2792_v3 = vpack.c.bf16 %v9840_v12, %v9838_v2  ;;  %v9451_v4 = vld [vmem:[%s13676_s9 + $0x124] ss:$16 sps:$4 sm:$0xff]  }
 0x379   :  { %v2700_v59 = vadd.f32 1.0, %v9842_v19  ;;  %3654 = vmatprep.subr.bf16.mxu0 %v9451_v4  ;;  %v9487_v4 = vld [vmem:[%s13676_s9 + $0x1a4] ss:$16 sps:$4 sm:$0xff]  }
 0x37a   :  { %v9844_v54 = vpop.eup %9843  ;;  %v2608_v49 = vsub.f32 0.0, %v2506_v58  ;;  %v2509_v44 = vadd.f32 %v8454_v27, %v10984_v52  ;;  %7651 = vmatmul.mubr.msk.bf16.vlgmr.msra.gmra.mrb[144].mxu1 %vm2830_vm5, %v2792_v3  ;;  %v9461_v58 = vld [vmem:[%s13676_s9 + $0x88] ss:$16 sps:$4 sm:$0xff]  }
 0x37b   :  { %v2701_v6 = vadd.f32 1.0, %v9844_v54  ;;  %2927 = vmatprep.mubr.bf16.mxu1 %v13740_v60  ;;  %9853 = vrcp.f32 %v2700_v59  ;;  %3830 = vmatpush1.bf16.msra.mxu1 %v9443_v62  ;;  %v9449_v59 = vld [vmem:[%s13676_s9 + $0x120] ss:$16 sps:$4 sm:$0xff]   ;;  %v9466_v62 = vld [vmem:[%s13676_s9 + $0xac] ss:$16 sps:$4 sm:$0xff]  }
 0x37c   :  { %v2648_v40 = vmul.f32 1.442695, %v2608_v49  ;;  %v2609_v39 = vsub.f32 0.0, %v2509_v44  ;;  %v8455_v38 = vpop.f32.mrb[164].mxu0  ;;  %3831 = vmatprep.subr.bf16.mxu1 %v9448_v41  ;;  %v9460_v49 = vld [vmem:[%s13676_s9 + $0x144] ss:$16 sps:$4 sm:$0xff]   ;;  %3655 = vmatpush1.bf16.msra.mxu0 %v9449_v59 }
 0x37d   :  { %9855 = vrcp.f32 %v2701_v6  ;;  %v8456_v5 = vpop.f32.mrb[165].mxu0  ;;  %v9846_v43 = vpop.eup %9845  ;;  %3656 = vmatprep.subr.bf16.mxu0 %v9460_v49  ;;  %v9482_v49 = vld [vmem:[%s13676_s9 + $0x128] ss:$16 sps:$4 sm:$0xff]  }
 0x37e   :  { %9857 = vpow2.f32 %v2648_v40  ;;  %v2650_v37 = vmul.f32 1.442695, %v2609_v39  ;;  %v8457_v33 = vadd.f32 %v8456_v5, %v8455_v38  ;;  %v8458_v57 = vpop.f32.mrb[166].mxu0 }
 0x37f   :  { %v9848_v42 = vpop.eup %9847  ;;  %v8459_v21 = vpop.f32.mrb[167].mxu0  ;;  %3832 = vmatpush1.bf16.msra.mxu1 %v9446_v48  ;;  %v9458_v48 = vld [vmem:[%s13676_s9 + $0x140] ss:$16 sps:$4 sm:$0xff]  }
 0x380   :  { %v9850_v30 = vpop.eup %9849  ;;  %9859 = vpow2.f32 %v2650_v37  ;;  %v2514_v55 = vadd.f32 %v8457_v33, %v10984_v52  ;;  %v8460_v11 = vadd.f32 %v8459_v21, %v8458_v57  ;;  %v2793_v23 = vpack.c.bf16 %v9848_v42, %v9846_v43  ;;  %3833 = vmatprep.subr.bf16.mxu1 %v9454_v24  ;;  %v9469_v33 = vld [vmem:[%s13676_s9 + $0x164] ss:$16 sps:$4 sm:$0xff]   ;;  %3657 = vmatpush1.bf16.msra.mxu0 %v9458_v48 }
 0x381   :  { %v2702_v61 = vadd.f32 1.0, %v9850_v30  ;;  %v9470_v30 = vld [vmem:[%s13676_s9 + $0xc8] ss:$16 sps:$4 sm:$0xff]   ;;  %3658 = vmatprep.subr.bf16.mxu0 %v9469_v33 }
 0x382   :  { %v9852_v29 = vpop.eup %9851  ;;  %v2610_v13 = vsub.f32 0.0, %v2514_v55  ;;  %v2517_v25 = vadd.f32 %v8460_v11, %v10984_v52  ;;  %7652 = vmatmul.mubr.msk.bf16.gmra.mrb[148].mxu1 %vm2830_vm5, %v2793_v23  ;;  %v9472_v55 = vld [vmem:[%s13676_s9 + $0xcc] ss:$16 sps:$4 sm:$0xff]  }
 0x383   :  { %v2703_v20 = vadd.f32 1.0, %v9852_v29  ;;  %2937 = vmatprep.mubr.bf16.mxu1 %v13740_v60  ;;  %9861 = vrcp.f32 %v2702_v61  ;;  %3834 = vmatpush1.bf16.msra.mxu1 %v9452_v14  ;;  %v9475_v11 = vld [vmem:[%s13676_s9 + $0xec] ss:$16 sps:$4 sm:$0xff]  }
 0x384   :  { %v2652_v9 = vmul.f32 1.442695, %v2610_v13  ;;  %v2611_v34 = vsub.f32 0.0, %v2517_v25  ;;  %v8461_v15 = vpop.f32.mrb[168].mxu0  ;;  %3835 = vmatprep.subr.bf16.mxu1 %v9457_v53  ;;  %v9478_v13 = vld [vmem:[%s13676_s9 + $0x184] ss:$16 sps:$4 sm:$0xff]   ;;  %3659 = vmatpush1.bf16.msra.mxu0 %v9467_v63 }
 0x385   :  { %9863 = vrcp.f32 %v2703_v20  ;;  %v8462_v8 = vpop.f32.mrb[169].mxu0  ;;  %v9854_v10 = vpop.eup %9853  ;;  %3660 = vmatprep.subr.bf16.mxu0 %v9478_v13  ;;  %v9493_v63 = vld [vmem:[%s13676_s9 + $0x16c] ss:$16 sps:$4 sm:$0xff]  }
 0x386   :  { %9865 = vpow2.f32 %v2652_v9  ;;  %v2654_v35 = vmul.f32 1.442695, %v2611_v34  ;;  %v8463_v16 = vadd.f32 %v8462_v8, %v8461_v15  ;;  %v8464_v46 = vpop.f32.mrb[170].mxu0 }
 0x387   :  { %v9856_v2 = vpop.eup %9855  ;;  %v8465_v45 = vpop.f32.mrb[171].mxu0  ;;  %3836 = vmatpush1.bf16.msra.mxu1 %v9455_v26  ;;  %v9481_v26 = vld [vmem:[%s13676_s9 + $0x10c] ss:$16 sps:$4 sm:$0xff]  }
 0x388   :  { %v9858_v7 = vpop.eup %9857  ;;  %9867 = vpow2.f32 %v2654_v35  ;;  %v2522_v50 = vadd.f32 %v8463_v16, %v10984_v52  ;;  %v8466_v12 = vadd.f32 %v8465_v45, %v8464_v46  ;;  %v2794_v22 = vpack.c.bf16 %v9856_v2, %v9854_v10  ;;  %3837 = vmatprep.subr.bf16.mxu1 %v9463_v32  ;;  %v9476_v16 = vld [vmem:[%s13676_s9 + $0x180] ss:$16 sps:$4 sm:$0xff]  }
 0x389   :  { %v2704_v19 = vadd.f32 1.0, %v9858_v7  ;;  %3661 = vmatpush1.bf16.msra.mxu0 %v9476_v16 }
 0x38a   :  { %v9860_v27 = vpop.eup %9859  ;;  %v2612_v3 = vsub.f32 0.0, %v2522_v50  ;;  %v2525_v51 = vadd.f32 %v8466_v12, %v10984_v52  ;;  %7653 = vmatmul.mubr.msk.bf16.gmra.mrb[152].mxu1 %vm2830_vm5, %v2794_v22  ;;  %v9479_v50 = vld [vmem:[%s13676_s9 + $0x108] ss:$16 sps:$4 sm:$0xff]   ;;  %3662 = vmatprep.subr.bf16.mxu0 %v9487_v4 }
 0x38b   :  { %v2705_v54 = vadd.f32 1.0, %v9860_v27  ;;  %2947 = vmatprep.mubr.bf16.mxu1 %v13740_v60  ;;  %9869 = vrcp.f32 %v2704_v19  ;;  %3838 = vmatpush1.bf16.msra.mxu1 %v9461_v58  ;;  %v9484_v19 = vld [vmem:[%s13676_s9 + $0x12c] ss:$16 sps:$4 sm:$0xff]   ;;  %v9485_v27 = vld [vmem:[%s13676_s9 + $0x1a0] ss:$16 sps:$4 sm:$0xff]  }
 0x38c   :  { %v2656_v44 = vmul.f32 1.442695, %v2612_v3  ;;  %v2613_v56 = vsub.f32 0.0, %v2525_v51  ;;  %v8467_v41 = vpop.f32.mrb[172].mxu0  ;;  %3839 = vmatprep.subr.bf16.mxu1 %v9466_v62  ;;  %v9496_v62 = vld [vmem:[%s13676_s9 + $0x1c4] ss:$16 sps:$4 sm:$0xff]  }
 0x38d   :  { %9871 = vrcp.f32 %v2705_v54  ;;  %v8468_v6 = vpop.f32.mrb[173].mxu0  ;;  %v9862_v40 = vpop.eup %9861  ;;  %3663 = vmatpush1.bf16.msra.mxu0 %v9485_v27 }
 0x38e   :  { %9873 = vpow2.f32 %v2656_v44  ;;  %v2658_v39 = vmul.f32 1.442695, %v2613_v56  ;;  %v8469_v38 = vadd.f32 %v8468_v6, %v8467_v41  ;;  %v8470_v5 = vpop.f32.mrb[174].mxu0  ;;  %3664 = vmatprep.subr.bf16.mxu0 %v9496_v62 }
 0x38f   :  { %v9864_v43 = vpop.eup %9863  ;;  %v8471_v37 = vpop.f32.mrb[175].mxu0  ;;  %3840 = vmatpush1.bf16.msra.mxu1 %v9464_v47  ;;  %v9490_v47 = vld [vmem:[%s13676_s9 + $0x14c] ss:$16 sps:$4 sm:$0xff]  }
 0x390   :  { %v9866_v57 = vpop.eup %9865  ;;  %9875 = vpow2.f32 %v2658_v39  ;;  %v2530_v18 = vadd.f32 %v8469_v38, %v10984_v52  ;;  %v8472_v42 = vadd.f32 %v8471_v37, %v8470_v5  ;;  %v2795_v21 = vpack.c.bf16 %v9864_v43, %v9862_v40  ;;  %3841 = vmatprep.subr.bf16.mxu1 %v9472_v55  ;;  %v9494_v38 = vld [vmem:[%s13676_s9 + $0x1c0] ss:$16 sps:$4 sm:$0xff]  }
 0x391   :  { %v2706_v23 = vadd.f32 1.0, %v9866_v57  ;;  %v9488_v57 = vld [vmem:[%s13676_s9 + $0x148] ss:$16 sps:$4 sm:$0xff]   ;;  %3665 = vmatpush1.bf16.msra.mxu0 %v9494_v38 }
 0x392   :  { %v9868_v24 = vpop.eup %9867  ;;  %v2614_v61 = vsub.f32 0.0, %v2530_v18  ;;  %v2533_v14 = vadd.f32 %v8472_v42, %v10984_v52  ;;  %7654 = vmatmul.mubr.msk.bf16.gmra.mrb[156].mxu1 %vm2830_vm5, %v2795_v21 }
 0x393   :  { %v2707_v29 = vadd.f32 1.0, %v9868_v24  ;;  %2957 = vmatprep.mubr.bf16.mxu1 %v13740_v60  ;;  %9877 = vrcp.f32 %v2706_v23  ;;  %3842 = vmatpush1.bf16.msra.mxu1 %v9470_v30 }
 0x394   :  { %v2660_v25 = vmul.f32 1.442695, %v2614_v61  ;;  %v2615_v0 = vsub.f32 0.0, %v2533_v14  ;;  %v8473_v53 = vpop.f32.mrb[176].mxu0  ;;  %3843 = vmatprep.subr.bf16.mxu1 %v9475_v11  ;;  %v9491_v61 = vld [vmem:[%s13676_s9 + $0x168] ss:$16 sps:$4 sm:$0xff]  }
 0x395   :  { %9879 = vrcp.f32 %v2707_v29  ;;  %v8474_v20 = vpop.f32.mrb[177].mxu0  ;;  %v9870_v9 = vpop.eup %9869 }
 0x396   :  { %9881 = vpow2.f32 %v2660_v25  ;;  %v2662_v34 = vmul.f32 1.442695, %v2615_v0  ;;  %v8475_v15 = vadd.f32 %v8474_v20, %v8473_v53  ;;  %v8476_v8 = vpop.f32.mrb[178].mxu0  ;;  %v9499_v0 = vld [vmem:[%s13676_s9 + $0x18c] ss:$16 sps:$4 sm:$0xff]  }
 0x397   :  { %v9872_v10 = vpop.eup %9871  ;;  %v8477_v35 = vpop.f32.mrb[179].mxu0  ;;  %3844 = vmatpush1.bf16.msra.mxu1 %v9473_v1 }
 0x398   :  { %v9874_v46 = vpop.eup %9873  ;;  %9883 = vpow2.f32 %v2662_v34  ;;  %v2538_v17 = vadd.f32 %v8475_v15, %v10984_v52  ;;  %v8478_v2 = vadd.f32 %v8477_v35, %v8476_v8  ;;  %v2796_v45 = vpack.c.bf16 %v9872_v10, %v9870_v9  ;;  %3845 = vmatprep.subr.bf16.mxu1 %v9481_v26  ;;  %v9497_v26 = vld [vmem:[%s13676_s9 + $0x188] ss:$16 sps:$4 sm:$0xff]  }
 0x399   :  { %v2708_v7 = vadd.f32 1.0, %v9874_v46  ;;  %v9502_v46 = vld [vmem:[%s13676_s9 + $0x1ac] ss:$16 sps:$4 sm:$0xff]  }
 0x39a   :  { %v9876_v12 = vpop.eup %9875  ;;  %v2616_v22 = vsub.f32 0.0, %v2538_v17  ;;  %v2541_v32 = vadd.f32 %v8478_v2, %v10984_v52  ;;  %7655 = vmatmul.mubr.msk.bf16.gmra.mrb[160].mxu1 %vm2830_vm5, %v2796_v45 }
 0x39b   :  { %v2709_v58 = vadd.f32 1.0, %v9876_v12  ;;  %2967 = vmatprep.mubr.bf16.mxu1 %v13740_v60  ;;  %9885 = vrcp.f32 %v2708_v7  ;;  %3846 = vmatpush1.bf16.msra.mxu1 %v9479_v50  ;;  %v9500_v50 = vld [vmem:[%s13676_s9 + $0x1a8] ss:$16 sps:$4 sm:$0xff]  }
 0x39c   :  { %v2664_v3 = vmul.f32 1.442695, %v2616_v22  ;;  %v2617_v51 = vsub.f32 0.0, %v2541_v32  ;;  %v8479_v59 = vpop.f32.mrb[180].mxu0  ;;  %3847 = vmatprep.subr.bf16.mxu1 %v9484_v19 }
 0x39d   :  { %9887 = vrcp.f32 %v2709_v58  ;;  %v8480_v54 = vpop.f32.mrb[181].mxu0  ;;  %v9878_v44 = vpop.eup %9877 }
 0x39e   :  { %9889 = vpow2.f32 %v2664_v3  ;;  %v2666_v56 = vmul.f32 1.442695, %v2617_v51  ;;  %v8481_v41 = vadd.f32 %v8480_v54, %v8479_v59  ;;  %v8482_v6 = vpop.f32.mrb[182].mxu0 }
 0x39f   :  { %v9880_v40 = vpop.eup %9879  ;;  %v8483_v39 = vpop.f32.mrb[183].mxu0  ;;  %3848 = vmatpush1.bf16.msra.mxu1 %v9482_v49 }
 0x3a0   :  { %v9882_v5 = vpop.eup %9881  ;;  %9891 = vpow2.f32 %v2666_v56  ;;  %v2546_v48 = vadd.f32 %v8481_v41, %v10984_v52  ;;  %v8484_v43 = vadd.f32 %v8483_v39, %v8482_v6  ;;  %v2797_v37 = vpack.c.bf16 %v9880_v40, %v9878_v44  ;;  %3849 = vmatprep.subr.bf16.mxu1 %v9490_v47 }
 0x3a1   :  { %v2710_v33 = vadd.f32 1.0, %v9882_v5 }
 0x3a2   :  { %v9884_v18 = vpop.eup %9883  ;;  %v2618_v42 = vsub.f32 0.0, %v2546_v48  ;;  %v2549_v21 = vadd.f32 %v8484_v43, %v10984_v52  ;;  %7656 = vmatmul.mubr.msk.bf16.gmra.mrb[164].mxu1 %vm2830_vm5, %v2797_v37 }
 0x3a3   :  { %v2711_v30 = vadd.f32 1.0, %v9884_v18  ;;  %2977 = vmatprep.mubr.bf16.mxu1 %v13740_v60  ;;  %9893 = vrcp.f32 %v2710_v33  ;;  %3850 = vmatpush1.bf16.msra.mxu1 %v9488_v57 }
 0x3a4   :  { %v2668_v55 = vmul.f32 1.442695, %v2618_v42  ;;  %v2619_v11 = vsub.f32 0.0, %v2549_v21  ;;  %v8485_v23 = vpop.f32.mrb[184].mxu0  ;;  %3851 = vmatprep.subr.bf16.mxu1 %v9493_v63 }
 0x3a5   :  { %9895 = vrcp.f32 %v2711_v30  ;;  %v8486_v24 = vpop.f32.mrb[185].mxu0  ;;  %v9886_v14 = vpop.eup %9885 }
 0x3a6   :  { %9897 = vpow2.f32 %v2668_v55  ;;  %v2670_v29 = vmul.f32 1.442695, %v2619_v11  ;;  %v8487_v13 = vadd.f32 %v8486_v24, %v8485_v23  ;;  %v8488_v25 = vpop.f32.mrb[186].mxu0 }
 0x3a7   :  { %v9888_v53 = vpop.eup %9887  ;;  %v8489_v20 = vpop.f32.mrb[187].mxu0  ;;  %3852 = vmatpush1.bf16.msra.mxu1 %v9491_v61 }
 0x3a8   :  { %v9890_v1 = vpop.eup %9889  ;;  %9899 = vpow2.f32 %v2670_v29  ;;  %v2554_v9 = vadd.f32 %v8487_v13, %v10984_v52  ;;  %v8490_v34 = vadd.f32 %v8489_v20, %v8488_v25  ;;  %v2798_v15 = vpack.c.bf16 %v9888_v53, %v9886_v14  ;;  %3853 = vmatprep.subr.bf16.mxu1 %v9499_v0 }
 0x3a9   :  { %v2712_v8 = vadd.f32 1.0, %v9890_v1 }
 0x3aa   :  { %v9892_v10 = vpop.eup %9891  ;;  %v2620_v35 = vsub.f32 0.0, %v2554_v9  ;;  %v2557_v16 = vadd.f32 %v8490_v34, %v10984_v52  ;;  %7657 = vmatmul.mubr.msk.bf16.gmra.mrb[168].mxu1 %vm2830_vm5, %v2798_v15 }
 0x3ab   :  { %v2713_v17 = vadd.f32 1.0, %v9892_v10  ;;  %2987 = vmatprep.mubr.bf16.mxu1 %v13740_v60  ;;  %9901 = vrcp.f32 %v2712_v8  ;;  %3854 = vmatpush1.bf16.msra.mxu1 %v9497_v26 }
 0x3ac   :  { %v2672_v2 = vmul.f32 1.442695, %v2620_v35  ;;  %v2621_v45 = vsub.f32 0.0, %v2557_v16  ;;  %v8491_v4 = vpop.f32.mrb[188].mxu0  ;;  %3855 = vmatprep.subr.bf16.mxu1 %v9502_v46 }
 0x3ad   :  { %9903 = vrcp.f32 %v2713_v17  ;;  %v8492_v7 = vpop.f32.mrb[189].mxu0  ;;  %v9894_v12 = vpop.eup %9893 }
 0x3ae   :  { %9905 = vpow2.f32 %v2672_v2  ;;  %v2674_v22 = vmul.f32 1.442695, %v2621_v45  ;;  %v8493_v32 = vadd.f32 %v8492_v7, %v8491_v4  ;;  %v8494_v19 = vpop.f32.mrb[190].mxu0 }
 0x3af   :  { %v9896_v58 = vpop.eup %9895  ;;  %v8495_v27 = vpop.f32.mrb[191].mxu0  ;;  %3856 = vmatpush1.bf16.msra.mxu1 %v9500_v50 }
 0x3b0   :  { %v9898_v3 = vpop.eup %9897  ;;  %9907 = vpow2.f32 %v2674_v22  ;;  %v2562_v51 = vadd.f32 %v8493_v32, %v10984_v52  ;;  %v8496_v59 = vadd.f32 %v8495_v27, %v8494_v19  ;;  %v2799_v62 = vpack.c.bf16 %v9896_v58, %v9894_v12 }
 0x3b1   :  { %v2714_v54 = vadd.f32 1.0, %v9898_v3 }
 0x3b2   :  { %v9900_v49 = vpop.eup %9899  ;;  %v2622_v44 = vsub.f32 0.0, %v2562_v51  ;;  %v2565_v56 = vadd.f32 %v8496_v59, %v10984_v52  ;;  %7658 = vmatmul.mubr.msk.bf16.gmra.mrb[172].mxu1 %vm2830_vm5, %v2799_v62 }
 0x3b3   :  { %v2715_v41 = vadd.f32 1.0, %v9900_v49  ;;  %2997 = vmatprep.mubr.bf16.mxu1 %v13740_v60  ;;  %9909 = vrcp.f32 %v2714_v54  ;;  %v9957_v49 = vld [vmem:[%s13675_s6] ss:$0 sm:$0xff] }
 0x3b4   :  { %v2676_v6 = vmul.f32 1.442695, %v2622_v44  ;;  %v2623_v47 = vsub.f32 0.0, %v2565_v56  ;;  %v8497_v40 = vpop.f32.mrb[192].mxu0 }
 0x3b5   :  { %9911 = vrcp.f32 %v2715_v41  ;;  %v8498_v39 = vpop.f32.mrb[193].mxu0  ;;  %v9902_v38 = vpop.eup %9901 }
 0x3b6   :  { %9913 = vpow2.f32 %v2676_v6  ;;  %v2678_v5 = vmul.f32 1.442695, %v2623_v47  ;;  %v8499_v48 = vadd.f32 %v8498_v39, %v8497_v40  ;;  %v8500_v43 = vpop.f32.mrb[194].mxu0 }
 0x3b7   :  { %v9904_v37 = vpop.eup %9903  ;;  %v8501_v33 = vpop.f32.mrb[195].mxu0 }
 0x3b8   :  { %v9906_v57 = vpop.eup %9905  ;;  %9915 = vpow2.f32 %v2678_v5  ;;  %v2570_v18 = vadd.f32 %v8499_v48, %v10984_v52  ;;  %v8502_v42 = vadd.f32 %v8501_v33, %v8500_v43  ;;  %v2800_v21 = vpack.c.bf16 %v9904_v37, %v9902_v38  ;;  %v9507_v48 = vld [vmem:[%s13676_s9 + $0x1cc] ss:$16 sps:$4 sm:$0xff]   ;;  %v9505_v33 = vld [vmem:[%s13676_s9 + $0x1c8] ss:$16 sps:$4 sm:$0xff]  }
 0x3b9   :  { %v2716_v63 = vadd.f32 1.0, %v9906_v57  ;;  %3857 = vmatprep.subr.bf16.mxu1 %v9507_v48 }
 0x3ba   :  { %v9908_v30 = vpop.eup %9907  ;;  %v2624_v55 = vsub.f32 0.0, %v2570_v18  ;;  %v2573_v11 = vadd.f32 %v8502_v42, %v10984_v52  ;;  %7659 = vmatmul.mubr.msk.bf16.gmra.mrb[176].mxu1 %vm2830_vm5, %v2800_v21 }
 0x3bb   :  { %v2717_v23 = vadd.f32 1.0, %v9908_v30  ;;  %3007 = vmatprep.mubr.bf16.mxu1 %v13740_v60  ;;  %9917 = vrcp.f32 %v2716_v63  ;;  %3858 = vmatpush1.bf16.msra.mxu1 %v9505_v33 }
 0x3bc   :  { %v2680_v24 = vmul.f32 1.442695, %v2624_v55  ;;  %v2625_v61 = vsub.f32 0.0, %v2573_v11  ;;  %v8503_v14 = vpop.f32.mrb[196].mxu0 }
 0x3bd   :  { %9919 = vrcp.f32 %v2717_v23  ;;  %v8504_v29 = vpop.f32.mrb[197].mxu0  ;;  %v9910_v13 = vpop.eup %9909  ;;  %v9503_v23 = vld [vmem:[%s13676_s9 + $0x1e4] ss:$16 sps:$4 sm:$0x1f]  }
 0x3be   :  { %9921 = vpow2.f32 %v2680_v24  ;;  %v2682_v25 = vmul.f32 1.442695, %v2625_v61  ;;  %v8505_v0 = vadd.f32 %v8504_v29, %v8503_v14  ;;  %v8506_v53 = vpop.f32.mrb[198].mxu0  ;;  %v9508_v61 = vld [vmem:[%s13676_s9 + $0x1e0] ss:$16 sps:$4 sm:$0x1f]   ;;  %7731 = vmatprep.subr.msk.bf16.mxu0 %vm2435_vm3, %v9503_v23 }
 0x3bf   :  { %v9912_v20 = vpop.eup %9911  ;;  %v8507_v1 = vpop.f32.mrb[199].mxu0 }
 0x3c0   :  { %v9914_v9 = vpop.eup %9913  ;;  %9923 = vpow2.f32 %v2682_v25  ;;  %v2578_v34 = vadd.f32 %v8505_v0, %v10984_v52  ;;  %v8508_v15 = vadd.f32 %v8507_v1, %v8506_v53  ;;  %v2801_v8 = vpack.c.bf16 %v9912_v20, %v9910_v13  ;;  %v9509_v13 = vld [vmem:[%s13676_s9 + $0x1ec] ss:$16 sps:$4 sm:$0x1f]   ;;  %v9511_v0 = vld [vmem:[%s13676_s9 + $0x1e8] ss:$16 sps:$4 sm:$0x1f]  }
 0x3c1   :  { %v2718_v26 = vadd.f32 1.0, %v9914_v9  ;;  %v3625_v25 = vsel %vm2435_vm3, %v9508_v61, 0  ;;  %7748 = vmatprep.subr.msk.bf16.mxu1 %vm2435_vm3, %v9509_v13  ;;  %v3631_v9 = vsel %vm2435_vm3, %v9511_v0, 0  ;;  %v9526_v61 = vld [vmem:[%s13677_s11 + $0x7c] ss:$28 sps:$4 sm:$0xff]  }
 0x3c2   :  { %v9916_v10 = vpop.eup %9915  ;;  %v2626_v35 = vsub.f32 0.0, %v2578_v34  ;;  %v2581_v16 = vadd.f32 %v8508_v15, %v10984_v52  ;;  %7660 = vmatmul.mubr.msk.bf16.gmra.mrb[180].mxu1 %vm2830_vm5, %v2801_v8  ;;  %3667 = vmatpush1.bf16.msra.mxu0 %v3625_v25  ;;  %v9529_v13 = vld [vmem:[%s13677_s11 + $0x74] ss:$28 sps:$4 sm:$0xff]  }
 0x3c3   :  { %v2719_v46 = vadd.f32 1.0, %v9916_v10  ;;  %3017 = vmatprep.mubr.bf16.mxu1 %v13740_v60  ;;  %9925 = vrcp.f32 %v2718_v26  ;;  %3860 = vmatpush1.bf16.msra.mxu1 %v3631_v9  ;;  %v9524_v9 = vld [vmem:[%s13677_s11 + $0x78] ss:$28 sps:$4 sm:$0xff]  }
 0x3c4   :  { %v2684_v17 = vmul.f32 1.442695, %v2626_v35  ;;  %v2627_v2 = vsub.f32 0.0, %v2581_v16  ;;  %v8509_v45 = vpop.f32.mrb[200].mxu0 }
 0x3c5   :  { %9927 = vrcp.f32 %v2719_v46  ;;  %v8510_v4 = vpop.f32.mrb[201].mxu0  ;;  %v9918_v7 = vpop.eup %9917 }
 0x3c6   :  { %9929 = vpow2.f32 %v2684_v17  ;;  %v2686_v50 = vmul.f32 1.442695, %v2627_v2  ;;  %v8511_v12 = vadd.f32 %v8510_v4, %v8509_v45  ;;  %v8512_v22 = vpop.f32.mrb[202].mxu0 }
 0x3c7   :  { %v9920_v32 = vpop.eup %9919  ;;  %v8513_v19 = vpop.f32.mrb[203].mxu0 }
 0x3c8   :  { %v9922_v58 = vpop.eup %9921  ;;  %9931 = vpow2.f32 %v2686_v50  ;;  %v2586_v27 = vadd.f32 %v8511_v12, %v10984_v52  ;;  %v8514_v3 = vadd.f32 %v8513_v19, %v8512_v22  ;;  %v2802_v51 = vpack.c.bf16 %v9920_v32, %v9918_v7 }
 0x3c9   :  { %v2720_v59 = vadd.f32 1.0, %v9922_v58  ;;  %v9514_v58 = vld [vmem:[%s13677_s11 + $0xc] ss:$28 sps:$4 sm:$0xff]  }
 0x3ca   :  { %v9924_v62 = vpop.eup %9923  ;;  %v2628_v54 = vsub.f32 0.0, %v2586_v27  ;;  %v2589_v44 = vadd.f32 %v9957_v49, %v8514_v3  ;;  %7661 = vmatmul.mubr.msk.bf16.gmra.mrb[184].mxu1 %vm2830_vm5, %v2802_v51  ;;  %6094 = vmatprep.subr.bf16.mxu1 %v9514_v58  ;;  %v9517_v27 = vld [vmem:[%s13677_s11 + $0x4] ss:$28 sps:$4 sm:$0xff]  }
 0x3cb   :  { %v2721_v56 = vadd.f32 1.0, %v9924_v62  ;;  %3027 = vmatprep.mubr.bf16.mxu1 %v13740_v60  ;;  %9933 = vrcp.f32 %v2720_v59  ;;  %5708 = vmatprep.subr.bf16.mxu0 %v9517_v27  ;;  %v2810_v3 = vld [vmem:[%s13678_s8] sm:$0x3]  ;;  %v9536_v27 = vld [vmem:[%s13677_s11 + $0xe8] ss:$28 sps:$4 sm:$0xff]  }
 0x3cc   :  { %v2688_v41 = vmul.f32 1.442695, %v2628_v54  ;;  %v2629_v6 = vsub.f32 0.0, %v2589_v44  ;;  %v8515_v47 = vpop.f32.mrb[204].mxu0  ;;  %v11258_v51 = vrot.slane %v2810_v3, %v10885_v36 }
 0x3cd   :  { %9935 = vrcp.f32 %v2721_v56  ;;  %v8516_v52 = vpop.f32.mrb[205].mxu0  ;;  %v9926_v40 = vpop.eup %9925 }
 0x3ce   :  { %9937 = vpow2.f32 %v2688_v41  ;;  %v2690_v39 = vmul.f32 1.442695, %v2629_v6  ;;  %v8517_v38 = vadd.f32 %v8516_v52, %v8515_v47  ;;  %v8518_v5 = vpop.f32.mrb[206].mxu0 }
 0x3cf   :  { %v9928_v43 = vpop.eup %9927  ;;  %v8519_v37 = vpop.f32.mrb[207].mxu0 }
 0x3d0   :  { %v9930_v57 = vpop.eup %9929  ;;  %9939 = vpow2.f32 %v2690_v39  ;;  %v2594_v18 = vadd.f32 %v9957_v49, %v8517_v38  ;;  %v8520_v42 = vadd.f32 %v8519_v37, %v8518_v5  ;;  %v2803_v21 = vpack.c.bf16 %v9928_v43, %v9926_v40  ;;  %v9512_v43 = vld [vmem:[%s13677_s11 + $0x8] ss:$28 sps:$4 sm:$0xff]   ;;  %v9515_v37 = vld [vmem:[%s13677_s11] ss:$28 sps:$4 sm:$0xff]  }
 0x3d1   :  { %v2722_v63 = vadd.f32 1.0, %v9930_v57 }
 0x3d2   :  { %v9932_v30 = vpop.eup %9931  ;;  %v2630_v55 = vsub.f32 0.0, %v2594_v18  ;;  %v2597_v11 = vadd.f32 %v9957_v49, %v8520_v42  ;;  %7662 = vmatmul.mubr.msk.bf16.gmra.mrb[188].mxu1 %vm2830_vm5, %v2803_v21  ;;  %v9520_v18 = vld [vmem:[%s13677_s11 + $0x44] ss:$28 sps:$4 sm:$0xff]   ;;  %v9523_v42 = vld [vmem:[%s13677_s11 + $0x3c] ss:$28 sps:$4 sm:$0xff]  }
 0x3d3   :  { %v2723_v24 = vadd.f32 1.0, %v9932_v30  ;;  %3037 = vmatprep.mubr.bf16.mxu1 %v13740_v60  ;;  %9941 = vrcp.f32 %v2722_v63 }
 0x3d4   :  { %v2692_v14 = vmul.f32 1.442695, %v2630_v55  ;;  %v2631_v29 = vsub.f32 0.0, %v2597_v11  ;;  %v9518_v11 = vld [vmem:[%s13677_s11 + $0x40] ss:$28 sps:$4 sm:$0xff]  }
 0x3d5   :  { %9943 = vrcp.f32 %v2723_v24  ;;  %v9934_v53 = vpop.eup %9933  ;;  %v9521_v24 = vld [vmem:[%s13677_s11 + $0x38] ss:$28 sps:$4 sm:$0xff]  }
 0x3d6   :  { %9945 = vpow2.f32 %v2692_v14  ;;  %v2694_v20 = vmul.f32 1.442695, %v2631_v29 }
 0x3d7   :  { %v9936_v1 = vpop.eup %9935 }
 0x3d8   :  { %v9938_v34 = vpop.eup %9937  ;;  %9947 = vpow2.f32 %v2694_v20  ;;  %v2804_v15 = vpack.c.bf16 %v9936_v1, %v9934_v53 }
 0x3d9   :  { %v2724_v8 = vadd.f32 1.0, %v9938_v34  ;;  %v9527_v34 = vld [vmem:[%s13677_s11 + $0x70] ss:$28 sps:$4 sm:$0xff]  }
 0x3da   :  { %v9940_v26 = vpop.eup %9939  ;;  %7663 = vmatmul.mubr.msk.bf16.gmra.mrb[192].mxu1 %vm2830_vm5, %v2804_v15 }
 0x3db   :  { %v2725_v10 = vadd.f32 1.0, %v9940_v26  ;;  %3047 = vmatprep.mubr.bf16.mxu1 %v13740_v60  ;;  %9949 = vrcp.f32 %v2724_v8  ;;  %v9532_v26 = vld [vmem:[%s13677_s11 + $0xb4] ss:$28 sps:$4 sm:$0xff]  }
 0x3dd   :  { %9951 = vrcp.f32 %v2725_v10  ;;  %v9942_v35 = vpop.eup %9941  ;;  %v9535_v10 = vld [vmem:[%s13677_s11 + $0xac] ss:$28 sps:$4 sm:$0xff]  }
 0x3df   :  { %v9944_v16 = vpop.eup %9943 }
 0x3e0   :  { %v9946_v46 = vpop.eup %9945  ;;  %v2805_v17 = vpack.c.bf16 %v9944_v16, %v9942_v35 }
 0x3e1   :  { %v2726_v2 = vadd.f32 1.0, %v9946_v46 }
 0x3e2   :  { %v9948_v45 = vpop.eup %9947  ;;  %7664 = vmatmul.mubr.msk.bf16.gmra.mrb[196].mxu1 %vm2830_vm5, %v2805_v17 }
 0x3e3   :  { %v2727_v4 = vadd.f32 1.0, %v9948_v45  ;;  %3057 = vmatprep.mubr.bf16.mxu1 %v13740_v60  ;;  %9953 = vrcp.f32 %v2726_v2  ;;  %v9530_v2 = vld [vmem:[%s13677_s11 + $0xb0] ss:$28 sps:$4 sm:$0xff]  }
 0x3e5   :  { %9955 = vrcp.f32 %v2727_v4  ;;  %v9950_v7 = vpop.eup %9949  ;;  %v9533_v4 = vld [vmem:[%s13677_s11 + $0xa8] ss:$28 sps:$4 sm:$0xff]  }
 0x3e7   :  { %v9952_v50 = vpop.eup %9951 }
 0x3e8   :  { %v2806_v12 = vpack.c.bf16 %v9952_v50, %v9950_v7  ;;  %v9538_v7 = vld [vmem:[%s13677_s11 + $0xec] ss:$28 sps:$4 sm:$0xff]  }
 0x3ea   :  { %7665 = vmatmul.mubr.msk.bf16.gmra.mrb[200].mxu1 %vm2830_vm5, %v2806_v12 }
 0x3eb   :  { %3067 = vmatprep.mubr.bf16.mxu1 %v13740_v60  ;;  %v11255_v60 = vrot.slane %v2810_v3, %v10879_v31  ;;  %v9539_v3 = vld [vmem:[%s13677_s11 + $0xe0] ss:$28 sps:$4 sm:$0xff]  }
 0x3ed   :  { %v9954_v22 = vpop.eup %9953 }
 0x3ef   :  { %v9956_v32 = vpop.eup %9955 }
 0x3f0   :  { %v2807_v19 = vpack.c.bf16 %v9956_v32, %v9954_v22  ;;  %v9541_v22 = vld [vmem:[%s13677_s11 + $0xe4] ss:$28 sps:$4 sm:$0xff]  }
 0x3f2   :  { %7666 = vmatmul.mubr.msk.bf16.gmra.mrb[204].mxu1 %vm2830_vm5, %v2807_v19 }
 0x44d   :  { %v2919_v59 = vpop.f32.mrb[144].mxu1 }
 0x44e   :  { %v2920_v62 = vadd.f32 %v2919_v59, %v11255_v60  ;;  %v2921_v54 = vpop.f32.mrb[145].mxu1 }
 0x44f   :  { %v2922_v49 = vadd.f32 %v2921_v54, %v11258_v51  ;;  %v2923_v44 = vpop.f32.mrb[146].mxu1  ;;  %v9544_v54 = vld [vmem:[%s13677_s11 + $0x124] ss:$28 sps:$4 sm:$0xff]  }
 0x450   :  { %v2924_v56 = vadd.f32 %v2923_v44, %v11255_v60  ;;  %v2925_v41 = vpop.f32.mrb[147].mxu1  ;;  %v3078_v47 = vmax.f32 %v2920_v62, 0.0 }
 0x451   :  { %v2926_v6 = vadd.f32 %v2925_v41, %v11258_v51  ;;  %v3079_v40 = vmax.f32 %v2922_v49, 0.0  ;;  %v9547_v49 = vld [vmem:[%s13677_s11 + $0x11c] ss:$28 sps:$4 sm:$0xff]  }
 0x452   :  { %v3080_v52 = vmax.f32 %v2924_v56, 0.0 }
 0x453   :  { %v3081_v39 = vmax.f32 %v2926_v6, 0.0 }
 0x454   :  { %v3142_v38 = vpack.c.bf16 %v3080_v52, %v3078_v47  ;;  %v9542_v47 = vld [vmem:[%s13677_s11 + $0x120] ss:$28 sps:$4 sm:$0xff]   ;;  %v9545_v52 = vld [vmem:[%s13677_s11 + $0x118] ss:$28 sps:$4 sm:$0xff]  }
 0x455   :  { %v3143_v5 = vpack.c.bf16 %v3081_v39, %v3079_v40  ;;  %v2929_v48 = vpop.f32.mrb[148].mxu1 }
 0x456   :  { %v2930_v33 = vadd.f32 %v2929_v48, %v11255_v60  ;;  %v2931_v57 = vpop.f32.mrb[149].mxu1 }
 0x457   :  { %v2932_v21 = vadd.f32 %v2931_v57, %v11258_v51  ;;  %v2933_v63 = vpop.f32.mrb[150].mxu1  ;;  %7732 = vmatprep.mubr.msk.bf16.mxu0 %vm2386_vm4, %v3143_v5  ;;  %7749 = vmatprep.mubr.msk.bf16.mxu1 %vm2386_vm4, %v3143_v5  ;;  %v9553_v5 = vld [vmem:[%s13677_s11 + $0x154] ss:$28 sps:$4 sm:$0xff]  }
 0x458   :  { %v2934_v30 = vadd.f32 %v2933_v63, %v11255_v60  ;;  %v2935_v55 = vpop.f32.mrb[151].mxu1  ;;  %3669 = vmatmul.mubr.bf16.vlgmr.msra.gmra.mrb[208].mxu0 %v3142_v38  ;;  %3862 = vmatmul.mubr.bf16.vlgmr.msra.gmra.mrb[208].mxu1 %v3142_v38  ;;  %v3082_v14 = vmax.f32 %v2930_v33, 0.0  ;;  %v9550_v38 = vld [vmem:[%s13677_s11 + $0x15c] ss:$28 sps:$4 sm:$0xff]   ;;  %v9556_v63 = vld [vmem:[%s13677_s11 + $0x194] ss:$28 sps:$4 sm:$0xff]  }
 0x459   :  { %v2936_v23 = vadd.f32 %v2935_v55, %v11258_v51  ;;  %6095 = vmatpush1.bf16.msra.mxu1 %v9512_v43  ;;  %5709 = vmatpush1.bf16.msra.mxu0 %v9515_v37  ;;  %v3083_v25 = vmax.f32 %v2932_v21, 0.0 }
 0x45a   :  { %v3084_v29 = vmax.f32 %v2934_v30, 0.0  ;;  %6096 = vmatprep.subr.bf16.mxu1 %v9520_v18  ;;  %5710 = vmatprep.subr.bf16.mxu0 %v9523_v42  ;;  %v9548_v18 = vld [vmem:[%s13677_s11 + $0x158] ss:$28 sps:$4 sm:$0xff]   ;;  %v9551_v42 = vld [vmem:[%s13677_s11 + $0x150] ss:$28 sps:$4 sm:$0xff]  }
 0x45b   :  { %v3085_v0 = vmax.f32 %v2936_v23, 0.0  ;;  %v9559_v30 = vld [vmem:[%s13677_s11 + $0x18c] ss:$28 sps:$4 sm:$0xff]  }
 0x45c   :  { %v3144_v53 = vpack.c.bf16 %v3084_v29, %v3082_v14  ;;  %v9554_v29 = vld [vmem:[%s13677_s11 + $0x190] ss:$28 sps:$4 sm:$0xff]  }
 0x45d   :  { %v3145_v20 = vpack.c.bf16 %v3085_v0, %v3083_v25  ;;  %v2939_v1 = vpop.f32.mrb[152].mxu1  ;;  %6097 = vmatpush1.bf16.msra.mxu1 %v9518_v11  ;;  %5711 = vmatpush1.bf16.msra.mxu0 %v9521_v24 }
 0x45e   :  { %v2940_v15 = vadd.f32 %v2939_v1, %v11255_v60  ;;  %v2941_v8 = vpop.f32.mrb[153].mxu1  ;;  %6098 = vmatprep.subr.bf16.mxu1 %v9526_v61  ;;  %5712 = vmatprep.subr.bf16.mxu0 %v9529_v13  ;;  %v9557_v13 = vld [vmem:[%s13677_s11 + $0x188] ss:$28 sps:$4 sm:$0xff]  }
 0x45f   :  { %v2942_v35 = vadd.f32 %v2941_v8, %v11258_v51  ;;  %v2943_v16 = vpop.f32.mrb[154].mxu1  ;;  %7733 = vmatprep.mubr.msk.bf16.mxu0 %vm2386_vm4, %v3145_v20  ;;  %7750 = vmatprep.mubr.msk.bf16.mxu1 %vm2386_vm4, %v3145_v20  ;;  %v9565_v20 = vld [vmem:[%s13677_s11 + $0x1c4] ss:$28 sps:$4 sm:$0xff]  }
 0x460   :  { %v2944_v46 = vadd.f32 %v2943_v16, %v11255_v60  ;;  %v2945_v17 = vpop.f32.mrb[155].mxu1  ;;  %3679 = vmatmul.mubr.bf16.gmra.mrb[212].mxu0 %v3144_v53  ;;  %3872 = vmatmul.mubr.bf16.gmra.mrb[212].mxu1 %v3144_v53  ;;  %v3086_v50 = vmax.f32 %v2940_v15, 0.0  ;;  %v9562_v53 = vld [vmem:[%s13677_s11 + $0x1cc] ss:$28 sps:$4 sm:$0xff]   ;;  %v9568_v16 = vld [vmem:[%s13677_s11 + $0x204] ss:$28 sps:$4 sm:$0xff]  }
 0x461   :  { %v2946_v45 = vadd.f32 %v2945_v17, %v11258_v51  ;;  %6099 = vmatpush1.bf16.msra.mxu1 %v9524_v9  ;;  %5713 = vmatpush1.bf16.msra.mxu0 %v9527_v34  ;;  %v3087_v32 = vmax.f32 %v2942_v35, 0.0 }
 0x462   :  { %v3088_v12 = vmax.f32 %v2944_v46, 0.0  ;;  %6100 = vmatprep.subr.bf16.mxu1 %v9532_v26  ;;  %5714 = vmatprep.subr.bf16.mxu0 %v9535_v10  ;;  %v9560_v26 = vld [vmem:[%s13677_s11 + $0x1c8] ss:$28 sps:$4 sm:$0xff]   ;;  %v9563_v10 = vld [vmem:[%s13677_s11 + $0x1c0] ss:$28 sps:$4 sm:$0xff]  }
 0x463   :  { %v3089_v19 = vmax.f32 %v2946_v45, 0.0  ;;  %v9571_v46 = vld [vmem:[%s13677_s11 + $0x1fc] ss:$28 sps:$4 sm:$0xff]  }
 0x464   :  { %v3146_v58 = vpack.c.bf16 %v3088_v12, %v3086_v50  ;;  %v9566_v12 = vld [vmem:[%s13677_s11 + $0x200] ss:$28 sps:$4 sm:$0xff]  }
 0x465   :  { %v3147_v59 = vpack.c.bf16 %v3089_v19, %v3087_v32  ;;  %v2949_v62 = vpop.f32.mrb[156].mxu1  ;;  %6101 = vmatpush1.bf16.msra.mxu1 %v9530_v2  ;;  %5715 = vmatpush1.bf16.msra.mxu0 %v9533_v4 }
 0x466   :  { %v2950_v44 = vadd.f32 %v2949_v62, %v11255_v60  ;;  %v2951_v56 = vpop.f32.mrb[157].mxu1  ;;  %6102 = vmatprep.subr.bf16.mxu1 %v9538_v7  ;;  %5716 = vmatprep.subr.bf16.mxu0 %v9541_v22  ;;  %v9569_v22 = vld [vmem:[%s13677_s11 + $0x1f8] ss:$28 sps:$4 sm:$0xff]  }
 0x467   :  { %v2952_v41 = vadd.f32 %v2951_v56, %v11258_v51  ;;  %v2953_v6 = vpop.f32.mrb[158].mxu1  ;;  %7734 = vmatprep.mubr.msk.bf16.mxu0 %vm2386_vm4, %v3147_v59  ;;  %7751 = vmatprep.mubr.msk.bf16.mxu1 %vm2386_vm4, %v3147_v59  ;;  %v9575_v56 = vld [vmem:[%s13677_s11 + $0x230] ss:$28 sps:$4 sm:$0xff]  }
 0x468   :  { %v2954_v40 = vadd.f32 %v2953_v6, %v11255_v60  ;;  %v2955_v39 = vpop.f32.mrb[159].mxu1  ;;  %3689 = vmatmul.mubr.bf16.gmra.mrb[216].mxu0 %v3146_v58  ;;  %3882 = vmatmul.mubr.bf16.gmra.mrb[216].mxu1 %v3146_v58  ;;  %v3090_v43 = vmax.f32 %v2950_v44, 0.0  ;;  %v9574_v58 = vld [vmem:[%s13677_s11 + $0x23c] ss:$28 sps:$4 sm:$0xff]   ;;  %v9580_v6 = vld [vmem:[%s13677_s11 + $0x274] ss:$28 sps:$4 sm:$0xff]  }
 0x469   :  { %v2956_v48 = vadd.f32 %v2955_v39, %v11258_v51  ;;  %6103 = vmatpush1.bf16.msra.mxu1 %v9536_v27  ;;  %5717 = vmatpush1.bf16.msra.mxu0 %v9539_v3  ;;  %v3091_v33 = vmax.f32 %v2952_v41, 0.0  ;;  %v9577_v27 = vld [vmem:[%s13677_s11 + $0x234] ss:$28 sps:$4 sm:$0xff]  }
 0x46a   :  { %v3092_v37 = vmax.f32 %v2954_v40, 0.0  ;;  %6104 = vmatprep.subr.bf16.mxu1 %v9544_v54  ;;  %5718 = vmatprep.subr.bf16.mxu0 %v9547_v49  ;;  %v9572_v44 = vld [vmem:[%s13677_s11 + $0x238] ss:$28 sps:$4 sm:$0xff]  }
 0x46b   :  { %v3093_v57 = vmax.f32 %v2956_v48, 0.0 }
 0x46c   :  { %v3148_v21 = vpack.c.bf16 %v3092_v37, %v3090_v43  ;;  %v9578_v43 = vld [vmem:[%s13677_s11 + $0x270] ss:$28 sps:$4 sm:$0xff]   ;;  %v9581_v37 = vld [vmem:[%s13677_s11 + $0x268] ss:$28 sps:$4 sm:$0xff]  }
 0x46d   :  { %v3149_v55 = vpack.c.bf16 %v3093_v57, %v3091_v33  ;;  %v2959_v11 = vpop.f32.mrb[160].mxu1  ;;  %6105 = vmatpush1.bf16.msra.mxu1 %v9542_v47  ;;  %5719 = vmatpush1.bf16.msra.mxu0 %v9545_v52  ;;  %v9583_v47 = vld [vmem:[%s13677_s11 + $0x26c] ss:$28 sps:$4 sm:$0xff]  }
 0x46e   :  { %v2960_v23 = vadd.f32 %v2959_v11, %v11255_v60  ;;  %v2961_v24 = vpop.f32.mrb[161].mxu1  ;;  %6106 = vmatprep.subr.bf16.mxu1 %v9550_v38  ;;  %5720 = vmatprep.subr.bf16.mxu0 %v9553_v5 }
 0x46f   :  { %v2962_v61 = vadd.f32 %v2961_v24, %v11258_v51  ;;  %v2963_v14 = vpop.f32.mrb[162].mxu1  ;;  %7735 = vmatprep.mubr.msk.bf16.mxu0 %vm2386_vm4, %v3149_v55  ;;  %7752 = vmatprep.mubr.msk.bf16.mxu1 %vm2386_vm4, %v3149_v55  ;;  %v9587_v24 = vld [vmem:[%s13677_s11 + $0x2a0] ss:$28 sps:$4 sm:$0xff]  }
 0x470   :  { %v2964_v25 = vadd.f32 %v2963_v14, %v11255_v60  ;;  %v2965_v0 = vpop.f32.mrb[163].mxu1  ;;  %3699 = vmatmul.mubr.bf16.gmra.mrb[220].mxu0 %v3148_v21  ;;  %3892 = vmatmul.mubr.bf16.gmra.mrb[220].mxu1 %v3148_v21  ;;  %v3094_v9 = vmax.f32 %v2960_v23, 0.0  ;;  %v9584_v23 = vld [vmem:[%s13677_s11 + $0x2a8] ss:$28 sps:$4 sm:$0xff]  }
 0x471   :  { %v2966_v1 = vadd.f32 %v2965_v0, %v11258_v51  ;;  %6107 = vmatpush1.bf16.msra.mxu1 %v9548_v18  ;;  %5721 = vmatpush1.bf16.msra.mxu0 %v9551_v42  ;;  %v3095_v15 = vmax.f32 %v2962_v61, 0.0  ;;  %v9586_v18 = vld [vmem:[%s13677_s11 + $0x2ac] ss:$28 sps:$4 sm:$0xff]   ;;  %v9589_v42 = vld [vmem:[%s13677_s11 + $0x2a4] ss:$28 sps:$4 sm:$0xff]  }
 0x472   :  { %v3096_v34 = vmax.f32 %v2964_v25, 0.0  ;;  %6108 = vmatprep.subr.bf16.mxu1 %v9556_v63  ;;  %5722 = vmatprep.subr.bf16.mxu0 %v9559_v30  ;;  %v9592_v14 = vld [vmem:[%s13677_s11 + $0x2e4] ss:$28 sps:$4 sm:$0xff]  }
 0x473   :  { %v3097_v8 = vmax.f32 %v2966_v1, 0.0 }
 0x474   :  { %v3150_v35 = vpack.c.bf16 %v3096_v34, %v3094_v9  ;;  %v9590_v9 = vld [vmem:[%s13677_s11 + $0x2e0] ss:$28 sps:$4 sm:$0xff]   ;;  %v9593_v34 = vld [vmem:[%s13677_s11 + $0x2d8] ss:$28 sps:$4 sm:$0xff]  }
 0x475   :  { %v3151_v17 = vpack.c.bf16 %v3097_v8, %v3095_v15  ;;  %v2969_v2 = vpop.f32.mrb[164].mxu1  ;;  %6109 = vmatpush1.bf16.msra.mxu1 %v9554_v29  ;;  %5723 = vmatpush1.bf16.msra.mxu0 %v9557_v13  ;;  %v9595_v29 = vld [vmem:[%s13677_s11 + $0x2dc] ss:$28 sps:$4 sm:$0xff]  }
 0x476   :  { %v2970_v45 = vadd.f32 %v2969_v2, %v11255_v60  ;;  %v2971_v4 = vpop.f32.mrb[165].mxu1  ;;  %6110 = vmatprep.subr.bf16.mxu1 %v9562_v53  ;;  %5724 = vmatprep.subr.bf16.mxu0 %v9565_v20 }
 0x477   :  { %v2972_v7 = vadd.f32 %v2971_v4, %v11258_v51  ;;  %v2973_v50 = vpop.f32.mrb[166].mxu1  ;;  %7736 = vmatprep.mubr.msk.bf16.mxu0 %vm2386_vm4, %v3151_v17  ;;  %7753 = vmatprep.mubr.msk.bf16.mxu1 %vm2386_vm4, %v3151_v17  ;;  %v9599_v4 = vld [vmem:[%s13677_s11 + $0x310] ss:$28 sps:$4 sm:$0xff]  }
 0x478   :  { %v2974_v32 = vadd.f32 %v2973_v50, %v11255_v60  ;;  %v2975_v19 = vpop.f32.mrb[167].mxu1  ;;  %3709 = vmatmul.mubr.bf16.gmra.mrb[224].mxu0 %v3150_v35  ;;  %3902 = vmatmul.mubr.bf16.gmra.mrb[224].mxu1 %v3150_v35  ;;  %v3098_v3 = vmax.f32 %v2970_v45, 0.0  ;;  %v9596_v45 = vld [vmem:[%s13677_s11 + $0x318] ss:$28 sps:$4 sm:$0xff]  }
 0x479   :  { %v2976_v59 = vadd.f32 %v2975_v19, %v11258_v51  ;;  %6111 = vmatpush1.bf16.msra.mxu1 %v9560_v26  ;;  %5725 = vmatpush1.bf16.msra.mxu0 %v9563_v10  ;;  %v3099_v62 = vmax.f32 %v2972_v7, 0.0  ;;  %v9598_v26 = vld [vmem:[%s13677_s11 + $0x31c] ss:$28 sps:$4 sm:$0xff]   ;;  %v9601_v10 = vld [vmem:[%s13677_s11 + $0x314] ss:$28 sps:$4 sm:$0xff]  }
 0x47a   :  { %v3100_v54 = vmax.f32 %v2974_v32, 0.0  ;;  %6112 = vmatprep.subr.bf16.mxu1 %v9568_v16  ;;  %5726 = vmatprep.subr.bf16.mxu0 %v9571_v46 }
 0x47b   :  { %v3101_v49 = vmax.f32 %v2976_v59, 0.0 }
 0x47c   :  { %v3152_v41 = vpack.c.bf16 %v3100_v54, %v3098_v3 }
 0x47d   :  { %v3153_v52 = vpack.c.bf16 %v3101_v49, %v3099_v62  ;;  %v2979_v40 = vpop.f32.mrb[168].mxu1  ;;  %6113 = vmatpush1.bf16.msra.mxu1 %v9566_v12  ;;  %5727 = vmatpush1.bf16.msra.mxu0 %v9569_v22 }
 0x47e   :  { %v2980_v39 = vadd.f32 %v2979_v40, %v11255_v60  ;;  %v2981_v38 = vpop.f32.mrb[169].mxu1  ;;  %6114 = vmatprep.subr.bf16.mxu1 %v9574_v58  ;;  %5728 = vmatprep.subr.bf16.mxu0 %v9577_v27 }
 0x47f   :  { %v2982_v5 = vadd.f32 %v2981_v38, %v11258_v51  ;;  %v2983_v48 = vpop.f32.mrb[170].mxu1  ;;  %7737 = vmatprep.mubr.msk.bf16.mxu0 %vm2386_vm4, %v3153_v52  ;;  %7754 = vmatprep.mubr.msk.bf16.mxu1 %vm2386_vm4, %v3153_v52 }
 0x480   :  { %v2984_v33 = vadd.f32 %v2983_v48, %v11255_v60  ;;  %v2985_v57 = vpop.f32.mrb[171].mxu1  ;;  %3719 = vmatmul.mubr.bf16.gmra.mrb[228].mxu0 %v3152_v41  ;;  %3912 = vmatmul.mubr.bf16.gmra.mrb[228].mxu1 %v3152_v41  ;;  %v3102_v21 = vmax.f32 %v2980_v39, 0.0 }
 0x481   :  { %v2986_v63 = vadd.f32 %v2985_v57, %v11258_v51  ;;  %6115 = vmatpush1.bf16.msra.mxu1 %v9572_v44  ;;  %5729 = vmatpush1.bf16.msra.mxu0 %v9575_v56  ;;  %v3103_v30 = vmax.f32 %v2982_v5, 0.0 }
 0x482   :  { %v3104_v55 = vmax.f32 %v2984_v33, 0.0  ;;  %6116 = vmatprep.subr.bf16.mxu1 %v9580_v6  ;;  %5730 = vmatprep.subr.bf16.mxu0 %v9583_v47 }
 0x483   :  { %v3105_v11 = vmax.f32 %v2986_v63, 0.0 }
 0x484   :  { %v3154_v61 = vpack.c.bf16 %v3104_v55, %v3102_v21 }
 0x485   :  { %v3155_v13 = vpack.c.bf16 %v3105_v11, %v3103_v30  ;;  %v2989_v25 = vpop.f32.mrb[172].mxu1  ;;  %6117 = vmatpush1.bf16.msra.mxu1 %v9578_v43  ;;  %5731 = vmatpush1.bf16.msra.mxu0 %v9581_v37 }
 0x486   :  { %v2990_v0 = vadd.f32 %v2989_v25, %v11255_v60  ;;  %v2991_v53 = vpop.f32.mrb[173].mxu1  ;;  %6118 = vmatprep.subr.bf16.mxu1 %v9586_v18  ;;  %5732 = vmatprep.subr.bf16.mxu0 %v9589_v42 }
 0x487   :  { %v2992_v20 = vadd.f32 %v2991_v53, %v11258_v51  ;;  %v2993_v1 = vpop.f32.mrb[174].mxu1  ;;  %7738 = vmatprep.mubr.msk.bf16.mxu0 %vm2386_vm4, %v3155_v13  ;;  %7755 = vmatprep.mubr.msk.bf16.mxu1 %vm2386_vm4, %v3155_v13 }
 0x488   :  { %v2994_v15 = vadd.f32 %v2993_v1, %v11255_v60  ;;  %v2995_v8 = vpop.f32.mrb[175].mxu1  ;;  %3729 = vmatmul.mubr.bf16.gmra.mrb[232].mxu0 %v3154_v61  ;;  %3922 = vmatmul.mubr.bf16.gmra.mrb[232].mxu1 %v3154_v61  ;;  %v3106_v35 = vmax.f32 %v2990_v0, 0.0 }
 0x489   :  { %v2996_v16 = vadd.f32 %v2995_v8, %v11258_v51  ;;  %6119 = vmatpush1.bf16.msra.mxu1 %v9584_v23  ;;  %5733 = vmatpush1.bf16.msra.mxu0 %v9587_v24  ;;  %v3107_v46 = vmax.f32 %v2992_v20, 0.0 }
 0x48a   :  { %v3108_v17 = vmax.f32 %v2994_v15, 0.0  ;;  %6120 = vmatprep.subr.bf16.mxu1 %v9592_v14  ;;  %5734 = vmatprep.subr.bf16.mxu0 %v9595_v29 }
 0x48b   :  { %v3109_v2 = vmax.f32 %v2996_v16, 0.0 }
 0x48c   :  { %v3156_v7 = vpack.c.bf16 %v3108_v17, %v3106_v35 }
 0x48d   :  { %v3157_v50 = vpack.c.bf16 %v3109_v2, %v3107_v46  ;;  %v2999_v12 = vpop.f32.mrb[176].mxu1  ;;  %6121 = vmatpush1.bf16.msra.mxu1 %v9590_v9  ;;  %5735 = vmatpush1.bf16.msra.mxu0 %v9593_v34 }
 0x48e   :  { %v3000_v22 = vadd.f32 %v2999_v12, %v11255_v60  ;;  %v3001_v32 = vpop.f32.mrb[177].mxu1  ;;  %6122 = vmatprep.subr.bf16.mxu1 %v9598_v26  ;;  %5736 = vmatprep.subr.bf16.mxu0 %v9601_v10 }
 0x48f   :  { %v3002_v19 = vadd.f32 %v3001_v32, %v11258_v51  ;;  %v3003_v58 = vpop.f32.mrb[178].mxu1  ;;  %7739 = vmatprep.mubr.msk.bf16.mxu0 %vm2386_vm4, %v3157_v50  ;;  %7756 = vmatprep.mubr.msk.bf16.mxu1 %vm2386_vm4, %v3157_v50 }
 0x490   :  { %v3004_v27 = vadd.f32 %v3003_v58, %v11255_v60  ;;  %v3005_v3 = vpop.f32.mrb[179].mxu1  ;;  %3739 = vmatmul.mubr.bf16.gmra.mrb[236].mxu0 %v3156_v7  ;;  %3932 = vmatmul.mubr.bf16.gmra.mrb[236].mxu1 %v3156_v7  ;;  %v3110_v59 = vmax.f32 %v3000_v22, 0.0  ;;  %v9604_v58 = vld [vmem:[%s13677_s11 + $0x354] ss:$28 sps:$4 sm:$0xff]  }
 0x491   :  { %v3006_v62 = vadd.f32 %v3005_v3, %v11258_v51  ;;  %6123 = vmatpush1.bf16.msra.mxu1 %v9596_v45  ;;  %5737 = vmatpush1.bf16.msra.mxu0 %v9599_v4  ;;  %v3111_v54 = vmax.f32 %v3002_v19, 0.0 }
 0x492   :  { %v3112_v49 = vmax.f32 %v3004_v27, 0.0  ;;  %v9607_v27 = vld [vmem:[%s13677_s11 + $0x34c] ss:$28 sps:$4 sm:$0xff]   ;;  %6124 = vmatprep.subr.bf16.mxu1 %v9604_v58 }
 0x493   :  { %v3113_v44 = vmax.f32 %v3006_v62, 0.0  ;;  %v9605_v62 = vld [vmem:[%s13677_s11 + $0x348] ss:$28 sps:$4 sm:$0xff]   ;;  %5738 = vmatprep.subr.bf16.mxu0 %v9607_v27 }
 0x494   :  { %v3158_v56 = vpack.c.bf16 %v3112_v49, %v3110_v59  ;;  %v9602_v59 = vld [vmem:[%s13677_s11 + $0x350] ss:$28 sps:$4 sm:$0xff]  }
 0x495   :  { %v3159_v41 = vpack.c.bf16 %v3113_v44, %v3111_v54  ;;  %v3009_v6 = vpop.f32.mrb[180].mxu1  ;;  %6125 = vmatpush1.bf16.msra.mxu1 %v9602_v59  ;;  %5739 = vmatpush1.bf16.msra.mxu0 %v9605_v62 }
 0x496   :  { %v3010_v47 = vadd.f32 %v3009_v6, %v11255_v60  ;;  %v3011_v52 = vpop.f32.mrb[181].mxu1 }
 0x497   :  { %v3012_v40 = vadd.f32 %v3011_v52, %v11258_v51  ;;  %v3013_v39 = vpop.f32.mrb[182].mxu1  ;;  %7740 = vmatprep.mubr.msk.bf16.mxu0 %vm2386_vm4, %v3159_v41  ;;  %7757 = vmatprep.mubr.msk.bf16.mxu1 %vm2386_vm4, %v3159_v41 }
 0x498   :  { %v3014_v38 = vadd.f32 %v3013_v39, %v11255_v60  ;;  %v3015_v5 = vpop.f32.mrb[183].mxu1  ;;  %3749 = vmatmul.mubr.bf16.gmra.mrb[240].mxu0 %v3158_v56  ;;  %3942 = vmatmul.mubr.bf16.gmra.mrb[240].mxu1 %v3158_v56  ;;  %v3114_v48 = vmax.f32 %v3010_v47, 0.0 }
 0x499   :  { %v3016_v43 = vadd.f32 %v3015_v5, %v11258_v51  ;;  %v3115_v37 = vmax.f32 %v3012_v40, 0.0 }
 0x49a   :  { %v3116_v33 = vmax.f32 %v3014_v38, 0.0 }
 0x49b   :  { %v3117_v57 = vmax.f32 %v3016_v43, 0.0 }
 0x49c   :  { %v3160_v18 = vpack.c.bf16 %v3116_v33, %v3114_v48 }
 0x49d   :  { %v3161_v42 = vpack.c.bf16 %v3117_v57, %v3115_v37  ;;  %v3019_v21 = vpop.f32.mrb[184].mxu1 }
 0x49e   :  { %v3020_v63 = vadd.f32 %v3019_v21, %v11255_v60  ;;  %v3021_v30 = vpop.f32.mrb[185].mxu1 }
 0x49f   :  { %v3022_v55 = vadd.f32 %v3021_v30, %v11258_v51  ;;  %v3023_v11 = vpop.f32.mrb[186].mxu1  ;;  %7741 = vmatprep.mubr.msk.bf16.mxu0 %vm2386_vm4, %v3161_v42  ;;  %7758 = vmatprep.mubr.msk.bf16.mxu1 %vm2386_vm4, %v3161_v42  ;;  %v9610_v42 = vld [vmem:[%s13677_s11 + $0x38c] ss:$28 sps:$4 sm:$0xff]  }
 0x4a0   :  { %v3024_v23 = vadd.f32 %v3023_v11, %v11255_v60  ;;  %v3025_v24 = vpop.f32.mrb[187].mxu1  ;;  %3759 = vmatmul.mubr.bf16.gmra.mrb[244].mxu0 %v3160_v18  ;;  %3952 = vmatmul.mubr.bf16.gmra.mrb[244].mxu1 %v3160_v18  ;;  %v3118_v14 = vmax.f32 %v3020_v63, 0.0  ;;  %v9613_v63 = vld [vmem:[%s13677_s11 + $0x384] ss:$28 sps:$4 sm:$0xff]  }
 0x4a1   :  { %v3026_v61 = vadd.f32 %v3025_v24, %v11258_v51  ;;  %v3119_v13 = vmax.f32 %v3022_v55, 0.0  ;;  %6287 = vmatprep.subr.bf16.mxu1 %v9610_v42  ;;  %5901 = vmatprep.subr.bf16.mxu0 %v9613_v63 }
 0x4a2   :  { %v3120_v29 = vmax.f32 %v3024_v23, 0.0 }
 0x4a3   :  { %v3121_v25 = vmax.f32 %v3026_v61, 0.0 }
 0x4a4   :  { %v3162_v0 = vpack.c.bf16 %v3120_v29, %v3118_v14 }
 0x4a5   :  { %v3163_v53 = vpack.c.bf16 %v3121_v25, %v3119_v13  ;;  %v3029_v20 = vpop.f32.mrb[188].mxu1 }
 0x4a6   :  { %v3030_v1 = vadd.f32 %v3029_v20, %v11255_v60  ;;  %v3031_v9 = vpop.f32.mrb[189].mxu1 }
 0x4a7   :  { %v3032_v34 = vadd.f32 %v3031_v9, %v11258_v51  ;;  %v3033_v15 = vpop.f32.mrb[190].mxu1  ;;  %7742 = vmatprep.mubr.msk.bf16.mxu0 %vm2386_vm4, %v3163_v53  ;;  %7759 = vmatprep.mubr.msk.bf16.mxu1 %vm2386_vm4, %v3163_v53 }
 0x4a8   :  { %v3034_v8 = vadd.f32 %v3033_v15, %v11255_v60  ;;  %v3035_v26 = vpop.f32.mrb[191].mxu1  ;;  %3769 = vmatmul.mubr.bf16.gmra.mrb[248].mxu0 %v3162_v0  ;;  %3962 = vmatmul.mubr.bf16.gmra.mrb[248].mxu1 %v3162_v0  ;;  %v3122_v35 = vmax.f32 %v3030_v1, 0.0 }
 0x4a9   :  { %v3036_v10 = vadd.f32 %v3035_v26, %v11258_v51  ;;  %v3123_v46 = vmax.f32 %v3032_v34, 0.0 }
 0x4aa   :  { %v3124_v16 = vmax.f32 %v3034_v8, 0.0 }
 0x4ab   :  { %v3125_v17 = vmax.f32 %v3036_v10, 0.0 }
 0x4ac   :  { %v3164_v2 = vpack.c.bf16 %v3124_v16, %v3122_v35 }
 0x4ad   :  { %v3165_v45 = vpack.c.bf16 %v3125_v17, %v3123_v46  ;;  %v3039_v4 = vpop.f32.mrb[192].mxu1 }
 0x4ae   :  { %v3040_v7 = vadd.f32 %v3039_v4, %v11255_v60  ;;  %v3041_v50 = vpop.f32.mrb[193].mxu1 }
 0x4af   :  { %v3042_v12 = vadd.f32 %v3041_v50, %v11258_v51  ;;  %v3043_v22 = vpop.f32.mrb[194].mxu1  ;;  %7743 = vmatprep.mubr.msk.bf16.mxu0 %vm2386_vm4, %v3165_v45  ;;  %7760 = vmatprep.mubr.msk.bf16.mxu1 %vm2386_vm4, %v3165_v45 }
 0x4b0   :  { %v3044_v32 = vadd.f32 %v3043_v22, %v11255_v60  ;;  %v3045_v19 = vpop.f32.mrb[195].mxu1  ;;  %3779 = vmatmul.mubr.bf16.gmra.mrb[252].mxu0 %v3164_v2  ;;  %3972 = vmatmul.mubr.bf16.gmra.mrb[252].mxu1 %v3164_v2  ;;  %v3126_v54 = vmax.f32 %v3040_v7, 0.0 }
 0x4b1   :  { %v3046_v3 = vadd.f32 %v3045_v19, %v11258_v51  ;;  %v3127_v44 = vmax.f32 %v3042_v12, 0.0  ;;  %v13685_v12 = vsub.s32 2, %v10876_v28 }
 0x4b2   :  { %v3128_v49 = vmax.f32 %v3044_v32, 0.0 }
 0x4b3   :  { %v3129_v56 = vmax.f32 %v3046_v3, 0.0 }
 0x4b4   :  { %v3166_v41 = vpack.c.bf16 %v3128_v49, %v3126_v54 }
 0x4b5   :  { %v3167_v6 = vpack.c.bf16 %v3129_v56, %v3127_v44  ;;  %v3049_v47 = vpop.f32.mrb[196].mxu1 }
 0x4b6   :  { %v3050_v52 = vadd.f32 %v3049_v47, %v11255_v60  ;;  %v3051_v40 = vpop.f32.mrb[197].mxu1 }
 0x4b7   :  { %v3052_v39 = vadd.f32 %v3051_v40, %v11258_v51  ;;  %v3053_v38 = vpop.f32.mrb[198].mxu1  ;;  %7744 = vmatprep.mubr.msk.bf16.mxu0 %vm2386_vm4, %v3167_v6  ;;  %7761 = vmatprep.mubr.msk.bf16.mxu1 %vm2386_vm4, %v3167_v6 }
 0x4b8   :  { %v3054_v5 = vadd.f32 %v3053_v38, %v11255_v60  ;;  %v3055_v48 = vpop.f32.mrb[199].mxu1  ;;  %3789 = vmatmul.mubr.bf16.gmra.mrb[0].mxu0 %v3166_v41  ;;  %3982 = vmatmul.mubr.bf16.gmra.mrb[0].mxu1 %v3166_v41  ;;  %v3130_v37 = vmax.f32 %v3050_v52, 0.0 }
 0x4b9   :  { %v3056_v43 = vadd.f32 %v3055_v48, %v11258_v51  ;;  %v3131_v57 = vmax.f32 %v3052_v39, 0.0 }
 0x4ba   :  { %v3132_v33 = vmax.f32 %v3054_v5, 0.0 }
 0x4bb   :  { %v3133_v18 = vmax.f32 %v3056_v43, 0.0 }
 0x4bc   :  { %v3168_v21 = vpack.c.bf16 %v3132_v33, %v3130_v37 }
 0x4bd   :  { %v3169_v30 = vpack.c.bf16 %v3133_v18, %v3131_v57  ;;  %v3059_v55 = vpop.f32.mrb[200].mxu1 }
 0x4be   :  { %v3060_v11 = vadd.f32 %v3059_v55, %v11255_v60  ;;  %v3061_v23 = vpop.f32.mrb[201].mxu1 }
 0x4bf   :  { %v3062_v24 = vadd.f32 %v3061_v23, %v11258_v51  ;;  %v3063_v61 = vpop.f32.mrb[202].mxu1  ;;  %7745 = vmatprep.mubr.msk.bf16.mxu0 %vm2386_vm4, %v3169_v30  ;;  %7762 = vmatprep.mubr.msk.bf16.mxu1 %vm2386_vm4, %v3169_v30 }
 0x4c0   :  { %v3064_v14 = vadd.f32 %v3063_v61, %v11255_v60  ;;  %v3065_v29 = vpop.f32.mrb[203].mxu1  ;;  %3799 = vmatmul.mubr.bf16.gmra.mrb[4].mxu0 %v3168_v21  ;;  %3992 = vmatmul.mubr.bf16.gmra.mrb[4].mxu1 %v3168_v21  ;;  %v3134_v25 = vmax.f32 %v3060_v11, 0.0  ;;  %v9608_v61 = vld [vmem:[%s13677_s11 + $0x388] ss:$28 sps:$4 sm:$0xff]  }
 0x4c1   :  { %v3066_v13 = vadd.f32 %v3065_v29, %v11258_v51  ;;  %v3135_v53 = vmax.f32 %v3062_v24, 0.0 }
 0x4c2   :  { %v3136_v0 = vmax.f32 %v3064_v14, 0.0  ;;  %v9611_v14 = vld [vmem:[%s13677_s11 + $0x380] ss:$28 sps:$4 sm:$0xff]  }
 0x4c3   :  { %v3137_v20 = vmax.f32 %v3066_v13, 0.0 }
 0x4c4   :  { %v3170_v1 = vpack.c.bf16 %v3136_v0, %v3134_v25 }
 0x4c5   :  { %v3171_v9 = vpack.c.bf16 %v3137_v20, %v3135_v53  ;;  %v3069_v34 = vpop.f32.mrb[204].mxu1  ;;  %v9616_v53 = vld [vmem:[%s13677_s11 + $0x3c4] ss:$28 sps:$4 sm:$0xff]   ;;  %v9619_v20 = vld [vmem:[%s13677_s11 + $0x3bc] ss:$28 sps:$4 sm:$0xff]  }
 0x4c6   :  { %v3070_v15 = vadd.f32 %v3069_v34, %v11255_v60  ;;  %v3071_v8 = vpop.f32.mrb[205].mxu1 }
 0x4c7   :  { %v3072_v26 = vadd.f32 %v3071_v8, %v11258_v51  ;;  %v3073_v10 = vpop.f32.mrb[206].mxu1  ;;  %7746 = vmatprep.mubr.msk.bf16.mxu0 %vm2386_vm4, %v3171_v9  ;;  %7763 = vmatprep.mubr.msk.bf16.mxu1 %vm2386_vm4, %v3171_v9 }
 0x4c8   :  { %v3074_v35 = vadd.f32 %v3073_v10, %v11255_v60  ;;  %v3075_v16 = vpop.f32.mrb[207].mxu1  ;;  %3809 = vmatmul.mubr.bf16.gmra.mrb[8].mxu0 %v3170_v1  ;;  %4002 = vmatmul.mubr.bf16.gmra.mrb[8].mxu1 %v3170_v1  ;;  %v3138_v17 = vmax.f32 %v3070_v15, 0.0  ;;  %v3238_v60 = vld [vmem:[%s13679_s10] sm:$0xf] }
 0x4c9   :  { %v3076_v46 = vadd.f32 %v3075_v16, %v11258_v51  ;;  %v3139_v45 = vmax.f32 %v3072_v26, 0.0  ;;  %v13684_v51 = vsub.s32 3, %v10876_v28  ;;  %v11554_v22 = vrot.slane %v3238_v60, %v10879_v31 }
 0x4ca   :  { %v3140_v2 = vmax.f32 %v3074_v35, 0.0  ;;  %v11558_v32 = vrot.slane %v3238_v60, %v13685_v12  ;;  %v11561_v19 = vrot.slane %v3238_v60, %v10885_v36 }
 0x4cb   :  { %v3141_v4 = vmax.f32 %v3076_v46, 0.0  ;;  %v11565_v58 = vrot.slane %v3238_v60, %v13684_v51 }
 0x4cc   :  { %v3172_v7 = vpack.c.bf16 %v3140_v2, %v3138_v17  ;;  %v9614_v17 = vld [vmem:[%s13677_s11 + $0x3c0] ss:$28 sps:$4 sm:$0xff]   ;;  %v9617_v2 = vld [vmem:[%s13677_s11 + $0x3b8] ss:$28 sps:$4 sm:$0xff]  }
 0x4cd   :  { %v3173_v50 = vpack.c.bf16 %v3141_v4, %v3139_v45  ;;  %v9622_v45 = vld [vmem:[%s13677_s11 + $0x3fc] ss:$28 sps:$4 sm:$0xff]  }
 0x4cf   :  { %7747 = vmatprep.mubr.msk.bf16.mxu0 %vm2386_vm4, %v3173_v50  ;;  %7764 = vmatprep.mubr.msk.bf16.mxu1 %vm2386_vm4, %v3173_v50 }
 0x4d0   :  { %3819 = vmatmul.mubr.bf16.gmra.mrb[12].mxu0 %v3172_v7  ;;  %4012 = vmatmul.mubr.bf16.gmra.mrb[12].mxu1 %v3172_v7 }
 0x52b   :  { %v3670_v27 = vpop.f32.mrb[208].mxu0  ;;  %v3863_v3 = vpop.f32.mrb[208].mxu1 }
 0x52c   :  { %v3671_v59 = vadd.f32 %v3670_v27, %v11554_v22  ;;  %v3864_v62 = vadd.f32 %v3863_v3, %v11558_v32  ;;  %v3672_v54 = vpop.f32.mrb[209].mxu0  ;;  %v3865_v49 = vpop.f32.mrb[209].mxu1  ;;  %v9625_v27 = vld [vmem:[%s13677_s11 + $0x3f4] ss:$28 sps:$4 sm:$0xff]  }
 0x52d   :  { %v3673_v44 = vadd.f32 %v3672_v54, %v11561_v19  ;;  %v3866_v56 = vadd.f32 %v3865_v49, %v11565_v58  ;;  %v3674_v41 = vpop.f32.mrb[210].mxu0  ;;  %v3867_v6 = vpop.f32.mrb[210].mxu1 }
 0x52e   :  { %v3675_v47 = vadd.f32 %v3674_v41, %v11554_v22  ;;  %v3868_v52 = vadd.f32 %v3867_v6, %v11558_v32  ;;  %v3676_v40 = vpop.f32.mrb[211].mxu0  ;;  %v3869_v39 = vpop.f32.mrb[211].mxu1  ;;  %v4022_v48 = vmax.f32 %v3671_v59, 0.0  ;;  %v4024_v43 = vmax.f32 %v3864_v62, 0.0 }
 0x52f   :  { %v3677_v38 = vadd.f32 %v3676_v40, %v11561_v19  ;;  %v3870_v5 = vadd.f32 %v3869_v39, %v11565_v58  ;;  %v4023_v57 = vmax.f32 %v3673_v44, 0.0  ;;  %v4025_v18 = vmax.f32 %v3866_v56, 0.0  ;;  %v9623_v40 = vld [vmem:[%s13677_s11 + $0x3f0] ss:$28 sps:$4 sm:$0xff]  }
 0x530   :  { %v4026_v37 = vmax.f32 %v3675_v47, 0.0  ;;  %v4028_v33 = vmax.f32 %v3868_v52, 0.0  ;;  %v9620_v52 = vld [vmem:[%s13677_s11 + $0x3f8] ss:$28 sps:$4 sm:$0xff]  }
 0x531   :  { %v4027_v42 = vmax.f32 %v3677_v38, 0.0  ;;  %v4029_v21 = vmax.f32 %v3870_v5, 0.0 }
 0x532   :  { %v11575_v63 = vpack.c.bf16 %v4026_v37, %v4022_v48  ;;  %v11577_v30 = vpack.c.bf16 %v4028_v33, %v4024_v43  ;;  %v9628_v43 = vld [vmem:[%s13677_s11 + $0x434] ss:$28 sps:$4 sm:$0xff]   ;;  %v9631_v37 = vld [vmem:[%s13677_s11 + $0x42c] ss:$28 sps:$4 sm:$0xff]  }
 0x533   :  { %v11579_v55 = vpack.c.bf16 %v4027_v42, %v4023_v57  ;;  %v11581_v11 = vpack.c.bf16 %v4029_v21, %v4025_v18  ;;  %v3680_v23 = vpop.f32.mrb[212].mxu0  ;;  %v3873_v24 = vpop.f32.mrb[212].mxu1 }
 0x534   :  { %v3681_v29 = vadd.f32 %v3680_v23, %v11554_v22  ;;  %v3874_v13 = vadd.f32 %v3873_v24, %v11558_v32  ;;  %v3682_v25 = vpop.f32.mrb[213].mxu0  ;;  %v3875_v0 = vpop.f32.mrb[213].mxu1 }
 0x535   :  { %v3683_v1 = vadd.f32 %v3682_v25, %v11561_v19  ;;  %v3876_v9 = vadd.f32 %v3875_v0, %v11565_v58  ;;  %v3684_v34 = vpop.f32.mrb[214].mxu0  ;;  %v3877_v15 = vpop.f32.mrb[214].mxu1  ;;  %5740 = vmatprep.mubr.bf16.mxu0 %v11579_v55  ;;  %6126 = vmatprep.mubr.bf16.mxu1 %v11579_v55  ;;  %v9629_v25 = vld [vmem:[%s13677_s11 + $0x428] ss:$28 sps:$4 sm:$0xff]  }
 0x536   :  { %v3685_v8 = vadd.f32 %v3684_v34, %v11554_v22  ;;  %v3878_v26 = vadd.f32 %v3877_v15, %v11558_v32  ;;  %v3686_v10 = vpop.f32.mrb[215].mxu0  ;;  %v3879_v35 = vpop.f32.mrb[215].mxu1  ;;  %5741 = vmatmul.mubr.bf16.vlgmr.msra.gmra.mrb[16].mxu0 %v11575_v63  ;;  %6127 = vmatmul.mubr.bf16.vlgmr.msra.gmra.mrb[16].mxu1 %v11575_v63  ;;  %v4030_v4 = vmax.f32 %v3681_v29, 0.0  ;;  %v4032_v7 = vmax.f32 %v3874_v13, 0.0  ;;  %v9626_v13 = vld [vmem:[%s13677_s11 + $0x430] ss:$28 sps:$4 sm:$0xff]  }
 0x537   :  { %v3687_v16 = vadd.f32 %v3686_v10, %v11561_v19  ;;  %v3880_v46 = vadd.f32 %v3879_v35, %v11565_v58  ;;  %6288 = vmatpush1.bf16.msra.mxu1 %v9608_v61  ;;  %5902 = vmatpush1.bf16.msra.mxu0 %v9611_v14  ;;  %v4031_v3 = vmax.f32 %v3683_v1, 0.0  ;;  %v4033_v59 = vmax.f32 %v3876_v9, 0.0  ;;  %v9634_v0 = vld [vmem:[%s13677_s11 + $0x46c] ss:$28 sps:$4 sm:$0xff]   ;;  %v9637_v34 = vld [vmem:[%s13677_s11 + $0x464] ss:$28 sps:$4 sm:$0xff]  }
 0x538   :  { %v4034_v50 = vmax.f32 %v3685_v8, 0.0  ;;  %v4036_v60 = vmax.f32 %v3878_v26, 0.0  ;;  %6289 = vmatprep.subr.bf16.mxu1 %v9616_v53  ;;  %5903 = vmatprep.subr.bf16.mxu0 %v9619_v20 }
 0x539   :  { %v4035_v62 = vmax.f32 %v3687_v16, 0.0  ;;  %v4037_v54 = vmax.f32 %v3880_v46, 0.0 }
 0x53a   :  { %v11619_v49 = vpack.c.bf16 %v4034_v50, %v4030_v4  ;;  %v11621_v44 = vpack.c.bf16 %v4036_v60, %v4032_v7  ;;  %v9632_v4 = vld [vmem:[%s13677_s11 + $0x468] ss:$28 sps:$4 sm:$0xff]   ;;  %v9635_v7 = vld [vmem:[%s13677_s11 + $0x460] ss:$28 sps:$4 sm:$0xff]  }
 0x53b   :  { %v11623_v56 = vpack.c.bf16 %v4035_v62, %v4031_v3  ;;  %v11625_v41 = vpack.c.bf16 %v4037_v54, %v4033_v59  ;;  %v3690_v6 = vpop.f32.mrb[216].mxu0  ;;  %v3883_v47 = vpop.f32.mrb[216].mxu1  ;;  %6290 = vmatpush1.bf16.msra.mxu1 %v9614_v17  ;;  %5904 = vmatpush1.bf16.msra.mxu0 %v9617_v2  ;;  %v9640_v59 = vld [vmem:[%s13677_s11 + $0x4a4] ss:$28 sps:$4 sm:$0xff]   ;;  %v9643_v62 = vld [vmem:[%s13677_s11 + $0x49c] ss:$28 sps:$4 sm:$0xff]  }
 0x53c   :  { %v3691_v39 = vadd.f32 %v3690_v6, %v11554_v22  ;;  %v3884_v38 = vadd.f32 %v3883_v47, %v11558_v32  ;;  %v3692_v5 = vpop.f32.mrb[217].mxu0  ;;  %v3885_v48 = vpop.f32.mrb[217].mxu1  ;;  %6291 = vmatprep.subr.bf16.mxu1 %v9622_v45  ;;  %5905 = vmatprep.subr.bf16.mxu0 %v9625_v27 }
 0x53d   :  { %v3693_v33 = vadd.f32 %v3692_v5, %v11561_v19  ;;  %v3886_v57 = vadd.f32 %v3885_v48, %v11565_v58  ;;  %v3694_v18 = vpop.f32.mrb[218].mxu0  ;;  %v3887_v42 = vpop.f32.mrb[218].mxu1  ;;  %5750 = vmatprep.mubr.bf16.mxu0 %v11623_v56  ;;  %6136 = vmatprep.mubr.bf16.mxu1 %v11623_v56 }
 0x53e   :  { %v3695_v21 = vadd.f32 %v3694_v18, %v11554_v22  ;;  %v3888_v23 = vadd.f32 %v3887_v42, %v11558_v32  ;;  %v3696_v24 = vpop.f32.mrb[219].mxu0  ;;  %v3889_v61 = vpop.f32.mrb[219].mxu1  ;;  %5751 = vmatmul.mubr.bf16.gmra.mrb[20].mxu0 %v11619_v49  ;;  %6137 = vmatmul.mubr.bf16.gmra.mrb[20].mxu1 %v11619_v49  ;;  %v4038_v53 = vmax.f32 %v3691_v39, 0.0  ;;  %v4040_v20 = vmax.f32 %v3884_v38, 0.0 }
 0x53f   :  { %v3697_v14 = vadd.f32 %v3696_v24, %v11561_v19  ;;  %v3890_v29 = vadd.f32 %v3889_v61, %v11565_v58  ;;  %6292 = vmatpush1.bf16.msra.mxu1 %v9620_v52  ;;  %5906 = vmatpush1.bf16.msra.mxu0 %v9623_v40  ;;  %v4039_v15 = vmax.f32 %v3693_v33, 0.0  ;;  %v4041_v8 = vmax.f32 %v3886_v57, 0.0  ;;  %v9641_v33 = vld [vmem:[%s13677_s11 + $0x498] ss:$28 sps:$4 sm:$0xff]  }
 0x540   :  { %v4042_v1 = vmax.f32 %v3695_v21, 0.0  ;;  %v4044_v9 = vmax.f32 %v3888_v23, 0.0  ;;  %6293 = vmatprep.subr.bf16.mxu1 %v9628_v43  ;;  %5907 = vmatprep.subr.bf16.mxu0 %v9631_v37  ;;  %v9638_v37 = vld [vmem:[%s13677_s11 + $0x4a0] ss:$28 sps:$4 sm:$0xff]   ;;  %v9649_v24 = vld [vmem:[%s13677_s11 + $0x4d4] ss:$28 sps:$4 sm:$0xff]  }
 0x541   :  { %v4043_v26 = vmax.f32 %v3697_v14, 0.0  ;;  %v4045_v10 = vmax.f32 %v3890_v29, 0.0  ;;  %v9646_v57 = vld [vmem:[%s13677_s11 + $0x4dc] ss:$28 sps:$4 sm:$0xff]  }
 0x542   :  { %v11663_v35 = vpack.c.bf16 %v4042_v1, %v4038_v53  ;;  %v11665_v16 = vpack.c.bf16 %v4044_v9, %v4040_v20 }
 0x543   :  { %v11667_v46 = vpack.c.bf16 %v4043_v26, %v4039_v15  ;;  %v11669_v17 = vpack.c.bf16 %v4045_v10, %v4041_v8  ;;  %v3700_v2 = vpop.f32.mrb[220].mxu0  ;;  %v3893_v45 = vpop.f32.mrb[220].mxu1  ;;  %6294 = vmatpush1.bf16.msra.mxu1 %v9626_v13  ;;  %5908 = vmatpush1.bf16.msra.mxu0 %v9629_v25  ;;  %v9647_v15 = vld [vmem:[%s13677_s11 + $0x4d0] ss:$28 sps:$4 sm:$0xff]  }
 0x544   :  { %v3701_v50 = vadd.f32 %v3700_v2, %v11554_v22  ;;  %v3894_v60 = vadd.f32 %v3893_v45, %v11558_v32  ;;  %v3702_v27 = vpop.f32.mrb[221].mxu0  ;;  %v3895_v3 = vpop.f32.mrb[221].mxu1  ;;  %6295 = vmatprep.subr.bf16.mxu1 %v9634_v0  ;;  %5909 = vmatprep.subr.bf16.mxu0 %v9637_v34  ;;  %v9644_v34 = vld [vmem:[%s13677_s11 + $0x4d8] ss:$28 sps:$4 sm:$0xff]  }
 0x545   :  { %v3703_v54 = vadd.f32 %v3702_v27, %v11561_v19  ;;  %v3896_v6 = vadd.f32 %v3895_v3, %v11565_v58  ;;  %v3704_v47 = vpop.f32.mrb[222].mxu0  ;;  %v3897_v52 = vpop.f32.mrb[222].mxu1  ;;  %5760 = vmatprep.mubr.bf16.mxu0 %v11667_v46  ;;  %6146 = vmatprep.mubr.bf16.mxu1 %v11667_v46  ;;  %v9652_v45 = vld [vmem:[%s13677_s11 + $0x514] ss:$28 sps:$4 sm:$0xff]  }
 0x546   :  { %v3705_v40 = vadd.f32 %v3704_v47, %v11554_v22  ;;  %v3898_v39 = vadd.f32 %v3897_v52, %v11558_v32  ;;  %v3706_v38 = vpop.f32.mrb[223].mxu0  ;;  %v3899_v5 = vpop.f32.mrb[223].mxu1  ;;  %5761 = vmatmul.mubr.bf16.gmra.mrb[24].mxu0 %v11663_v35  ;;  %6147 = vmatmul.mubr.bf16.gmra.mrb[24].mxu1 %v11663_v35  ;;  %v4046_v18 = vmax.f32 %v3701_v50, 0.0  ;;  %v4048_v42 = vmax.f32 %v3894_v60, 0.0  ;;  %v9650_v52 = vld [vmem:[%s13677_s11 + $0x510] ss:$28 sps:$4 sm:$0xff]  }
 0x547   :  { %v3707_v48 = vadd.f32 %v3706_v38, %v11561_v19  ;;  %v3900_v43 = vadd.f32 %v3899_v5, %v11565_v58  ;;  %6296 = vmatpush1.bf16.msra.mxu1 %v9632_v4  ;;  %5910 = vmatpush1.bf16.msra.mxu0 %v9635_v7  ;;  %v4047_v61 = vmax.f32 %v3703_v54, 0.0  ;;  %v4049_v14 = vmax.f32 %v3896_v6, 0.0  ;;  %v9655_v4 = vld [vmem:[%s13677_s11 + $0x50c] ss:$28 sps:$4 sm:$0xff]  }
 0x548   :  { %v4050_v21 = vmax.f32 %v3705_v40, 0.0  ;;  %v4052_v23 = vmax.f32 %v3898_v39, 0.0  ;;  %6297 = vmatprep.subr.bf16.mxu1 %v9640_v59  ;;  %5911 = vmatprep.subr.bf16.mxu0 %v9643_v62  ;;  %v9653_v40 = vld [vmem:[%s13677_s11 + $0x508] ss:$28 sps:$4 sm:$0xff]  }
 0x549   :  { %v4051_v29 = vmax.f32 %v3707_v48, 0.0  ;;  %v4053_v13 = vmax.f32 %v3900_v43, 0.0  ;;  %v9658_v39 = vld [vmem:[%s13677_s11 + $0x54c] ss:$28 sps:$4 sm:$0xff]  }
 0x54a   :  { %v11707_v25 = vpack.c.bf16 %v4050_v21, %v4046_v18  ;;  %v11709_v0 = vpack.c.bf16 %v4052_v23, %v4048_v42 }
 0x54b   :  { %v11711_v53 = vpack.c.bf16 %v4051_v29, %v4047_v61  ;;  %v11713_v20 = vpack.c.bf16 %v4053_v13, %v4049_v14  ;;  %v3710_v1 = vpop.f32.mrb[224].mxu0  ;;  %v3903_v9 = vpop.f32.mrb[224].mxu1  ;;  %6298 = vmatpush1.bf16.msra.mxu1 %v9638_v37  ;;  %5912 = vmatpush1.bf16.msra.mxu0 %v9641_v33  ;;  %v9661_v37 = vld [vmem:[%s13677_s11 + $0x544] ss:$28 sps:$4 sm:$0xff]  }
 0x54c   :  { %v3711_v8 = vadd.f32 %v3710_v1, %v11554_v22  ;;  %v3904_v26 = vadd.f32 %v3903_v9, %v11558_v32  ;;  %v3712_v10 = vpop.f32.mrb[225].mxu0  ;;  %v3905_v2 = vpop.f32.mrb[225].mxu1  ;;  %6299 = vmatprep.subr.bf16.mxu1 %v9646_v57  ;;  %5913 = vmatprep.subr.bf16.mxu0 %v9649_v24  ;;  %v9656_v13 = vld [vmem:[%s13677_s11 + $0x548] ss:$28 sps:$4 sm:$0xff]   ;;  %v9659_v1 = vld [vmem:[%s13677_s11 + $0x540] ss:$28 sps:$4 sm:$0xff]  }
 0x54d   :  { %v3713_v7 = vadd.f32 %v3712_v10, %v11561_v19  ;;  %v3906_v50 = vadd.f32 %v3905_v2, %v11565_v58  ;;  %v3714_v60 = vpop.f32.mrb[226].mxu0  ;;  %v3907_v27 = vpop.f32.mrb[226].mxu1  ;;  %5770 = vmatprep.mubr.bf16.mxu0 %v11711_v53  ;;  %6156 = vmatprep.mubr.bf16.mxu1 %v11711_v53  ;;  %v9667_v10 = vld [vmem:[%s13677_s11 + $0x57c] ss:$28 sps:$4 sm:$0xff]  }
 0x54e   :  { %v3715_v3 = vadd.f32 %v3714_v60, %v11554_v22  ;;  %v3908_v59 = vadd.f32 %v3907_v27, %v11558_v32  ;;  %v3716_v62 = vpop.f32.mrb[227].mxu0  ;;  %v3909_v54 = vpop.f32.mrb[227].mxu1  ;;  %5771 = vmatmul.mubr.bf16.gmra.mrb[28].mxu0 %v11707_v25  ;;  %6157 = vmatmul.mubr.bf16.gmra.mrb[28].mxu1 %v11707_v25  ;;  %v4054_v38 = vmax.f32 %v3711_v8, 0.0  ;;  %v4056_v5 = vmax.f32 %v3904_v26, 0.0  ;;  %v9664_v26 = vld [vmem:[%s13677_s11 + $0x584] ss:$28 sps:$4 sm:$0xff]  }
 0x54f   :  { %v3717_v6 = vadd.f32 %v3716_v62, %v11561_v19  ;;  %v3910_v47 = vadd.f32 %v3909_v54, %v11565_v58  ;;  %6300 = vmatpush1.bf16.msra.mxu1 %v9644_v34  ;;  %5914 = vmatpush1.bf16.msra.mxu0 %v9647_v15  ;;  %v4055_v33 = vmax.f32 %v3713_v7, 0.0  ;;  %v4057_v57 = vmax.f32 %v3906_v50, 0.0  ;;  %v9662_v54 = vld [vmem:[%s13677_s11 + $0x580] ss:$28 sps:$4 sm:$0xff]  }
 0x550   :  { %v4058_v48 = vmax.f32 %v3715_v3, 0.0  ;;  %v4060_v43 = vmax.f32 %v3908_v59, 0.0  ;;  %6301 = vmatprep.subr.bf16.mxu1 %v9652_v45  ;;  %5915 = vmatprep.subr.bf16.mxu0 %v9655_v4 }
 0x551   :  { %v4059_v18 = vmax.f32 %v3717_v6, 0.0  ;;  %v4061_v42 = vmax.f32 %v3910_v47, 0.0  ;;  %v9665_v6 = vld [vmem:[%s13677_s11 + $0x578] ss:$28 sps:$4 sm:$0xff]  }
 0x552   :  { %v11751_v21 = vpack.c.bf16 %v4058_v48, %v4054_v38  ;;  %v11753_v23 = vpack.c.bf16 %v4060_v43, %v4056_v5  ;;  %v9670_v47 = vld [vmem:[%s13677_s11 + $0x5bc] ss:$28 sps:$4 sm:$0xff]   ;;  %v9673_v5 = vld [vmem:[%s13677_s11 + $0x5b4] ss:$28 sps:$4 sm:$0xff]  }
 0x553   :  { %v11755_v24 = vpack.c.bf16 %v4059_v18, %v4055_v33  ;;  %v11757_v61 = vpack.c.bf16 %v4061_v42, %v4057_v57  ;;  %v3720_v14 = vpop.f32.mrb[228].mxu0  ;;  %v3913_v29 = vpop.f32.mrb[228].mxu1  ;;  %6302 = vmatpush1.bf16.msra.mxu1 %v9650_v52  ;;  %5916 = vmatpush1.bf16.msra.mxu0 %v9653_v40 }
 0x554   :  { %13754 = vst [vmem:[#allocation9_spill] sm:$0xff] %v11751_v21  ;;  %v3721_v9 = vadd.f32 %v3720_v14, %v11554_v22  ;;  %v3914_v34 = vadd.f32 %v3913_v29, %v11558_v32  ;;  %v3722_v15 = vpop.f32.mrb[229].mxu0  ;;  %v3915_v8 = vpop.f32.mrb[229].mxu1  ;;  %6303 = vmatprep.subr.bf16.mxu1 %v9658_v39  ;;  %5917 = vmatprep.subr.bf16.mxu0 %v9661_v37 }
 0x555   :  { %v3723_v2 = vadd.f32 %v3722_v15, %v11561_v19  ;;  %v3916_v45 = vadd.f32 %v3915_v8, %v11565_v58  ;;  %v3724_v4 = vpop.f32.mrb[230].mxu0  ;;  %v3917_v7 = vpop.f32.mrb[230].mxu1  ;;  %5780 = vmatprep.mubr.bf16.mxu0 %v11755_v24  ;;  %6166 = vmatprep.mubr.bf16.mxu1 %v11755_v24 }
 0x556   :  { %v3725_v50 = vadd.f32 %v3724_v4, %v11554_v22  ;;  %v3918_v60 = vadd.f32 %v3917_v7, %v11558_v32  ;;  %v3726_v27 = vpop.f32.mrb[231].mxu0  ;;  %v3919_v3 = vpop.f32.mrb[231].mxu1  ;;  %5781 = vmatmul.mubr.bf16.gmra.mrb[32].mxu0 %v11751_v21  ;;  %6167 = vmatmul.mubr.bf16.gmra.mrb[32].mxu1 %v11751_v21  ;;  %v4062_v52 = vmax.f32 %v3721_v9, 0.0  ;;  %v4064_v40 = vmax.f32 %v3914_v34, 0.0  ;;  %v9671_v9 = vld [vmem:[%s13677_s11 + $0x5b0] ss:$28 sps:$4 sm:$0xff]  }
 0x557   :  { %v3727_v59 = vadd.f32 %v3726_v27, %v11561_v19  ;;  %v3920_v62 = vadd.f32 %v3919_v3, %v11565_v58  ;;  %6304 = vmatpush1.bf16.msra.mxu1 %v9656_v13  ;;  %5918 = vmatpush1.bf16.msra.mxu0 %v9659_v1  ;;  %v4063_v48 = vmax.f32 %v3723_v2, 0.0  ;;  %v4065_v43 = vmax.f32 %v3916_v45, 0.0  ;;  %v9668_v1 = vld [vmem:[%s13677_s11 + $0x5b8] ss:$28 sps:$4 sm:$0xff]   ;;  %v9679_v2 = vld [vmem:[%s13677_s11 + $0x5ec] ss:$28 sps:$4 sm:$0xff]  }
 0x558   :  { %v4066_v39 = vmax.f32 %v3725_v50, 0.0  ;;  %v4068_v38 = vmax.f32 %v3918_v60, 0.0  ;;  %6305 = vmatprep.subr.bf16.mxu1 %v9664_v26  ;;  %5919 = vmatprep.subr.bf16.mxu0 %v9667_v10  ;;  %v9676_v10 = vld [vmem:[%s13677_s11 + $0x5f4] ss:$28 sps:$4 sm:$0xff]  }
 0x559   :  { %v4067_v37 = vmax.f32 %v3727_v59, 0.0  ;;  %v4069_v33 = vmax.f32 %v3920_v62, 0.0 }
 0x55a   :  { %v11795_v57 = vpack.c.bf16 %v4066_v39, %v4062_v52  ;;  %v11797_v18 = vpack.c.bf16 %v4068_v38, %v4064_v40  ;;  %v9682_v52 = vld [vmem:[%s13677_s11 + $0x62c] ss:$28 sps:$4 sm:$0xff]  }
 0x55b   :  { %v11799_v42 = vpack.c.bf16 %v4067_v37, %v4063_v48  ;;  %v11801_v14 = vpack.c.bf16 %v4069_v33, %v4065_v43  ;;  %v3730_v29 = vpop.f32.mrb[232].mxu0  ;;  %v3923_v13 = vpop.f32.mrb[232].mxu1  ;;  %6306 = vmatpush1.bf16.msra.mxu1 %v9662_v54  ;;  %5920 = vmatpush1.bf16.msra.mxu0 %v9665_v6  ;;  %v9674_v6 = vld [vmem:[%s13677_s11 + $0x5f0] ss:$28 sps:$4 sm:$0xff]   ;;  %v9685_v48 = vld [vmem:[%s13677_s11 + $0x624] ss:$28 sps:$4 sm:$0xff]  }
 0x55c   :  { %13755 = vst [vmem:[#allocation4_spill] sm:$0xff] %v11795_v57  ;;  %v3731_v34 = vadd.f32 %v3730_v29, %v11554_v22  ;;  %v3924_v15 = vadd.f32 %v3923_v13, %v11558_v32  ;;  %v3732_v8 = vpop.f32.mrb[233].mxu0  ;;  %v3925_v26 = vpop.f32.mrb[233].mxu1  ;;  %6307 = vmatprep.subr.bf16.mxu1 %v9670_v47  ;;  %5921 = vmatprep.subr.bf16.mxu0 %v9673_v5  ;;  %v9677_v47 = vld [vmem:[%s13677_s11 + $0x5e8] ss:$28 sps:$4 sm:$0xff]  }
 0x55d   :  { %13756 = vst [vmem:[#allocation10_spill] sm:$0xff] %v11799_v42  ;;  %v3733_v45 = vadd.f32 %v3732_v8, %v11561_v19  ;;  %v3926_v4 = vadd.f32 %v3925_v26, %v11565_v58  ;;  %v3734_v7 = vpop.f32.mrb[234].mxu0  ;;  %v3927_v50 = vpop.f32.mrb[234].mxu1  ;;  %5790 = vmatprep.mubr.bf16.mxu0 %v11799_v42  ;;  %6176 = vmatprep.mubr.bf16.mxu1 %v11799_v42  ;;  %v9680_v26 = vld [vmem:[%s13677_s11 + $0x628] ss:$28 sps:$4 sm:$0xff]  }
 0x55e   :  { %v3735_v60 = vadd.f32 %v3734_v7, %v11554_v22  ;;  %v3928_v27 = vadd.f32 %v3927_v50, %v11558_v32  ;;  %v3736_v3 = vpop.f32.mrb[235].mxu0  ;;  %v3929_v59 = vpop.f32.mrb[235].mxu1  ;;  %5791 = vmatmul.mubr.bf16.gmra.mrb[36].mxu0 %v11795_v57  ;;  %6177 = vmatmul.mubr.bf16.gmra.mrb[36].mxu1 %v11795_v57  ;;  %v4070_v40 = vmax.f32 %v3731_v34, 0.0  ;;  %v4072_v39 = vmax.f32 %v3924_v15, 0.0  ;;  %v9688_v50 = vld [vmem:[%s13677_s11 + $0x664] ss:$28 sps:$4 sm:$0xff]  }
 0x55f   :  { %v3737_v62 = vadd.f32 %v3736_v3, %v11561_v19  ;;  %v3930_v54 = vadd.f32 %v3929_v59, %v11565_v58  ;;  %6308 = vmatpush1.bf16.msra.mxu1 %v9668_v1  ;;  %5922 = vmatpush1.bf16.msra.mxu0 %v9671_v9  ;;  %v4071_v43 = vmax.f32 %v3733_v45, 0.0  ;;  %v4073_v37 = vmax.f32 %v3926_v4, 0.0 }
 0x560   :  { %v4074_v38 = vmax.f32 %v3735_v60, 0.0  ;;  %v4076_v5 = vmax.f32 %v3928_v27, 0.0  ;;  %6309 = vmatprep.subr.bf16.mxu1 %v9676_v10  ;;  %5923 = vmatprep.subr.bf16.mxu0 %v9679_v2  ;;  %v9683_v10 = vld [vmem:[%s13677_s11 + $0x620] ss:$28 sps:$4 sm:$0xff]  }
 0x561   :  { %v4075_v33 = vmax.f32 %v3737_v62, 0.0  ;;  %v4077_v29 = vmax.f32 %v3930_v54, 0.0  ;;  %v9691_v60 = vld [vmem:[%s13677_s11 + $0x65c] ss:$28 sps:$4 sm:$0xff]  }
 0x562   :  { %v11839_v13 = vpack.c.bf16 %v4074_v38, %v4070_v40  ;;  %v11841_v1 = vpack.c.bf16 %v4076_v5, %v4072_v39  ;;  %v9686_v40 = vld [vmem:[%s13677_s11 + $0x660] ss:$28 sps:$4 sm:$0xff]   ;;  %v9689_v39 = vld [vmem:[%s13677_s11 + $0x658] ss:$28 sps:$4 sm:$0xff]  }
 0x563   :  { %v11843_v9 = vpack.c.bf16 %v4075_v33, %v4071_v43  ;;  %v11845_v34 = vpack.c.bf16 %v4077_v29, %v4073_v37  ;;  %v3740_v15 = vpop.f32.mrb[236].mxu0  ;;  %v3933_v8 = vpop.f32.mrb[236].mxu1  ;;  %6310 = vmatpush1.bf16.msra.mxu1 %v9674_v6  ;;  %5924 = vmatpush1.bf16.msra.mxu0 %v9677_v47  ;;  %v9697_v43 = vld [vmem:[%s13677_s11 + $0x694] ss:$28 sps:$4 sm:$0xff]  }
 0x564   :  { %13757 = vst [vmem:[#allocation5_spill] sm:$0xff] %v11839_v13  ;;  %v3741_v2 = vadd.f32 %v3740_v15, %v11554_v22  ;;  %v3934_v45 = vadd.f32 %v3933_v8, %v11558_v32  ;;  %v3742_v4 = vpop.f32.mrb[237].mxu0  ;;  %v3935_v7 = vpop.f32.mrb[237].mxu1  ;;  %6311 = vmatprep.subr.bf16.mxu1 %v9682_v52  ;;  %5925 = vmatprep.subr.bf16.mxu0 %v9685_v48  ;;  %v9694_v48 = vld [vmem:[%s13677_s11 + $0x69c] ss:$28 sps:$4 sm:$0xff]  }
 0x565   :  { %13758 = vst [vmem:[#allocation6_spill] sm:$0xff] %v11843_v9  ;;  %v3743_v27 = vadd.f32 %v3742_v4, %v11561_v19  ;;  %v3936_v3 = vadd.f32 %v3935_v7, %v11565_v58  ;;  %v3744_v59 = vpop.f32.mrb[238].mxu0  ;;  %v3937_v62 = vpop.f32.mrb[238].mxu1  ;;  %5800 = vmatprep.mubr.bf16.mxu0 %v11843_v9  ;;  %6186 = vmatprep.mubr.bf16.mxu1 %v11843_v9  ;;  %v4463_v37 = vld [vmem:[%s13677_s11 + $0x6d0] sm:$0x33] }
 0x566   :  { %v3745_v54 = vadd.f32 %v3744_v59, %v11554_v22  ;;  %v3938_v6 = vadd.f32 %v3937_v62, %v11558_v32  ;;  %v3746_v47 = vpop.f32.mrb[239].mxu0  ;;  %v3939_v52 = vpop.f32.mrb[239].mxu1  ;;  %5801 = vmatmul.mubr.bf16.gmra.mrb[40].mxu0 %v11839_v13  ;;  %6187 = vmatmul.mubr.bf16.gmra.mrb[40].mxu1 %v11839_v13  ;;  %v4078_v33 = vmax.f32 %v3741_v2, 0.0  ;;  %v4080_v29 = vmax.f32 %v3934_v45, 0.0 }
 0x567   :  { %v3747_v38 = vadd.f32 %v3746_v47, %v11561_v19  ;;  %v3940_v5 = vadd.f32 %v3939_v52, %v11565_v58  ;;  %6312 = vmatpush1.bf16.msra.mxu1 %v9680_v26  ;;  %5926 = vmatpush1.bf16.msra.mxu0 %v9683_v10  ;;  %v4462_v26 = vld [vmem:[%s13677_s11 + $0x6c8] sm:$0x33]  ;;  %v4079_v10 = vmax.f32 %v3743_v27, 0.0  ;;  %v4081_v4 = vmax.f32 %v3936_v3, 0.0  ;;  %v9692_v27 = vld [vmem:[%s13677_s11 + $0x698] ss:$28 sps:$4 sm:$0xff]  }
 0x568   :  { %v4082_v15 = vmax.f32 %v3745_v54, 0.0  ;;  %v4084_v8 = vmax.f32 %v3938_v6, 0.0  ;;  %6313 = vmatprep.subr.bf16.mxu1 %v9688_v50  ;;  %5927 = vmatprep.subr.bf16.mxu0 %v9691_v60  ;;  %v7985_v52 = vcombine.high %v4463_v37, %v4463_v37  ;;  %v7984_v51 = vcombine.low %v4463_v37, %v4463_v37  ;;  %v9695_v3 = vld [vmem:[%s13677_s11 + $0x690] ss:$28 sps:$4 sm:$0xff]  }
 0x569   :  { %v4083_v7 = vmax.f32 %v3747_v38, 0.0  ;;  %v4085_v59 = vmax.f32 %v3940_v5, 0.0  ;;  %v7982_v54 = vcombine.low %v4462_v26, %v4462_v26 }
 0x56a   :  { %v11889_v62 = vpack.c.bf16 %v4082_v15, %v4078_v33  ;;  %v11891_v47 = vpack.c.bf16 %v4084_v8, %v4080_v29 }
 0x56b   :  { %v11893_v2 = vpack.c.bf16 %v4083_v7, %v4079_v10  ;;  %v11895_v45 = vpack.c.bf16 %v4085_v59, %v4081_v4  ;;  %v3750_v50 = vpop.f32.mrb[240].mxu0  ;;  %v3943_v60 = vpop.f32.mrb[240].mxu1  ;;  %6314 = vmatpush1.bf16.msra.mxu1 %v9686_v40  ;;  %5928 = vmatpush1.bf16.msra.mxu0 %v9689_v39  ;;  %v7983_v40 = vcombine.high %v4462_v26, %v4462_v26  ;;  %v5694_v26 = vsel %vm5686_vm6, %v7984_v51, 0 }
 0x56c   :  { %13759 = vst [vmem:[#allocation7_spill] sm:$0xff] %v11889_v62  ;;  %v3751_v6 = vadd.f32 %v3750_v50, %v11554_v22  ;;  %v3944_v38 = vadd.f32 %v3943_v60, %v11558_v32  ;;  %v3752_v5 = vpop.f32.mrb[241].mxu0  ;;  %v3945_v37 = vpop.f32.mrb[241].mxu1  ;;  %6315 = vmatprep.subr.bf16.mxu1 %v9694_v48  ;;  %5929 = vmatprep.subr.bf16.mxu0 %v9697_v43  ;;  %v5688_v59 = vsel %vm5686_vm6, %v7982_v54, 0  ;;  %v9702_v50 = vld [vmem:[%s13677_s11 + $0x1d8] ss:$28 sps:$4 sm:$0xff]  }
 0x56d   :  { %13760 = vst [vmem:[#allocation8_spill] sm:$0xff] %v11893_v2  ;;  %v3753_v39 = vadd.f32 %v3752_v5, %v11561_v19  ;;  %v3946_v33 = vadd.f32 %v3945_v37, %v11565_v58  ;;  %v3754_v29 = vpop.f32.mrb[242].mxu0  ;;  %v3947_v15 = vpop.f32.mrb[242].mxu1  ;;  %5810 = vmatprep.mubr.bf16.mxu0 %v11893_v2  ;;  %6196 = vmatprep.mubr.bf16.mxu1 %v11893_v2 }
 0x56e   :  { %v3755_v8 = vadd.f32 %v3754_v29, %v11554_v22  ;;  %v3948_v10 = vadd.f32 %v3947_v15, %v11558_v32  ;;  %v3756_v4 = vpop.f32.mrb[243].mxu0  ;;  %v3949_v7 = vpop.f32.mrb[243].mxu1  ;;  %5811 = vmatmul.mubr.bf16.gmra.mrb[44].mxu0 %v11889_v62  ;;  %6197 = vmatmul.mubr.bf16.gmra.mrb[44].mxu1 %v11889_v62  ;;  %v4086_v60 = vmax.f32 %v3751_v6, 0.0  ;;  %v4088_v5 = vmax.f32 %v3944_v38, 0.0 }
 0x56f   :  { %v3757_v48 = vadd.f32 %v3756_v4, %v11561_v19  ;;  %v3950_v43 = vadd.f32 %v3949_v7, %v11565_v58  ;;  %6316 = vmatpush1.bf16.msra.mxu1 %v9692_v27  ;;  %5930 = vmatpush1.bf16.msra.mxu0 %v9695_v3  ;;  %v9706_v27 = vld [vmem:[%s13677_s11 + $0x14] ss:$28 sps:$4 sm:$0xff]   ;;  %v4087_v3 = vmax.f32 %v3753_v39, 0.0  ;;  %v4089_v51 = vmax.f32 %v3946_v33, 0.0 }
 0x570   :  { %v4090_v37 = vmax.f32 %v3755_v8, 0.0  ;;  %v4092_v29 = vmax.f32 %v3948_v10, 0.0  ;;  %8006 = vmatprep.subr.msk.bf16.mxu1 %vm5686_vm6, %v7985_v52  ;;  %7989 = vmatprep.subr.msk.bf16.mxu0 %vm5686_vm6, %v7983_v40 }
 0x571   :  { %v4091_v15 = vmax.f32 %v3757_v48, 0.0  ;;  %v4093_v54 = vmax.f32 %v3950_v43, 0.0 }
 0x572   :  { %v11925_v4 = vpack.c.bf16 %v4090_v37, %v4086_v60  ;;  %v11927_v7 = vpack.c.bf16 %v4092_v29, %v4088_v5 }
 0x573   :  { %v11929_v6 = vpack.c.bf16 %v4091_v15, %v4087_v3  ;;  %v11931_v38 = vpack.c.bf16 %v4093_v54, %v4089_v51  ;;  %v3760_v8 = vpop.f32.mrb[244].mxu0  ;;  %v3953_v52 = vpop.f32.mrb[244].mxu1  ;;  %6318 = vmatpush1.bf16.msra.mxu1 %v5694_v26  ;;  %5932 = vmatpush1.bf16.msra.mxu0 %v5688_v59 }
 0x574   :  { %13761 = vst [vmem:[#allocation12_spill] sm:$0xff] %v11925_v4  ;;  %v3761_v40 = vadd.f32 %v3760_v8, %v11554_v22  ;;  %v3954_v10 = vadd.f32 %v3953_v52, %v11558_v32  ;;  %v3762_v39 = vpop.f32.mrb[245].mxu0  ;;  %v3955_v33 = vpop.f32.mrb[245].mxu1  ;;  %8521 = vmatprep.subr.bf16.mxu1 %v9702_v50  ;;  %6480 = vmatprep.subr.bf16.mxu0 %v9706_v27 }
 0x575   :  { %13762 = vst [vmem:[#allocation13_spill] sm:$0xff] %v11929_v6  ;;  %v3763_v48 = vadd.f32 %v3762_v39, %v11561_v19  ;;  %v3956_v43 = vadd.f32 %v3955_v33, %v11565_v58  ;;  %v3764_v60 = vpop.f32.mrb[246].mxu0  ;;  %v3957_v5 = vpop.f32.mrb[246].mxu1  ;;  %5820 = vmatprep.mubr.bf16.mxu0 %v11929_v6  ;;  %6206 = vmatprep.mubr.bf16.mxu1 %v11929_v6 }
 0x576   :  { %v3765_v26 = vadd.f32 %v3764_v60, %v11554_v22  ;;  %v3958_v59 = vadd.f32 %v3957_v5, %v11558_v32  ;;  %v3766_v37 = vpop.f32.mrb[247].mxu0  ;;  %v3959_v29 = vpop.f32.mrb[247].mxu1  ;;  %5821 = vmatmul.mubr.bf16.gmra.mrb[48].mxu0 %v11925_v4  ;;  %6207 = vmatmul.mubr.bf16.gmra.mrb[48].mxu1 %v11925_v4  ;;  %v4094_v3 = vmax.f32 %v3761_v40, 0.0  ;;  %v4096_v51 = vmax.f32 %v3954_v10, 0.0 }
 0x577   :  { %v3767_v50 = vadd.f32 %v3766_v37, %v11561_v19  ;;  %v3960_v27 = vadd.f32 %v3959_v29, %v11565_v58  ;;  %v4095_v8 = vmax.f32 %v3763_v48, 0.0  ;;  %v4097_v52 = vmax.f32 %v3956_v43, 0.0 }
 0x578   :  { %v4098_v15 = vmax.f32 %v3765_v26, 0.0  ;;  %v4100_v54 = vmax.f32 %v3958_v59, 0.0 }
 0x579   :  { %v4099_v39 = vmax.f32 %v3767_v50, 0.0  ;;  %v4101_v33 = vmax.f32 %v3960_v27, 0.0 }
 0x57a   :  { %v11945_v60 = vpack.c.bf16 %v4098_v15, %v4094_v3  ;;  %v11947_v5 = vpack.c.bf16 %v4100_v54, %v4096_v51 }
 0x57b   :  { %v11949_v12 = vpack.c.bf16 %v4099_v39, %v4095_v8  ;;  %v11951_v36 = vpack.c.bf16 %v4101_v33, %v4097_v52  ;;  %v3770_v28 = vpop.f32.mrb[248].mxu0  ;;  %v3963_v37 = vpop.f32.mrb[248].mxu1 }
 0x57c   :  { %13763 = vst [vmem:[#allocation14_spill] sm:$0xff] %v11945_v60  ;;  %v3771_v29 = vadd.f32 %v3770_v28, %v11554_v22  ;;  %v3964_v40 = vadd.f32 %v3963_v37, %v11558_v32  ;;  %v3772_v10 = vpop.f32.mrb[249].mxu0  ;;  %v3965_v26 = vpop.f32.mrb[249].mxu1 }
 0x57d   :  { %13764 = vst [vmem:[#allocation15_spill] sm:$0xff] %v11949_v12  ;;  %v3773_v48 = vadd.f32 %v3772_v10, %v11561_v19  ;;  %v3966_v43 = vadd.f32 %v3965_v26, %v11565_v58  ;;  %v3774_v59 = vpop.f32.mrb[250].mxu0  ;;  %v3967_v50 = vpop.f32.mrb[250].mxu1  ;;  %5830 = vmatprep.mubr.bf16.mxu0 %v11949_v12  ;;  %6216 = vmatprep.mubr.bf16.mxu1 %v11949_v12 }
 0x57e   :  { %v3775_v27 = vadd.f32 %v3774_v59, %v11554_v22  ;;  %v3968_v3 = vadd.f32 %v3967_v50, %v11558_v32  ;;  %v3776_v51 = vpop.f32.mrb[251].mxu0  ;;  %v3969_v28 = vpop.f32.mrb[251].mxu1  ;;  %5831 = vmatmul.mubr.bf16.gmra.mrb[52].mxu0 %v11945_v60  ;;  %6217 = vmatmul.mubr.bf16.gmra.mrb[52].mxu1 %v11945_v60  ;;  %v4102_v8 = vmax.f32 %v3771_v29, 0.0  ;;  %v4104_v52 = vmax.f32 %v3964_v40, 0.0 }
 0x57f   :  { %v3777_v15 = vadd.f32 %v3776_v51, %v11561_v19  ;;  %v3970_v54 = vadd.f32 %v3969_v28, %v11565_v58  ;;  %v4103_v37 = vmax.f32 %v3773_v48, 0.0  ;;  %v4105_v10 = vmax.f32 %v3966_v43, 0.0 }
 0x580   :  { %v4106_v39 = vmax.f32 %v3775_v27, 0.0  ;;  %v4108_v33 = vmax.f32 %v3968_v3, 0.0 }
 0x581   :  { %v4107_v26 = vmax.f32 %v3777_v15, 0.0  ;;  %v4109_v59 = vmax.f32 %v3970_v54, 0.0 }
 0x582   :  { %v11965_v31 = vpack.c.bf16 %v4106_v39, %v4102_v8  ;;  %v11967_v50 = vpack.c.bf16 %v4108_v33, %v4104_v52 }
 0x583   :  { %v11969_v12 = vpack.c.bf16 %v4107_v26, %v4103_v37  ;;  %v11971_v4 = vpack.c.bf16 %v4109_v59, %v4105_v10  ;;  %v3780_v60 = vpop.f32.mrb[252].mxu0  ;;  %v3973_v51 = vpop.f32.mrb[252].mxu1 }
 0x584   :  { %13765 = vst [vmem:[#allocation16_spill] sm:$0xff] %v11965_v31  ;;  %v3781_v28 = vadd.f32 %v3780_v60, %v11554_v22  ;;  %v3974_v29 = vadd.f32 %v3973_v51, %v11558_v32  ;;  %v3782_v40 = vpop.f32.mrb[253].mxu0  ;;  %v3975_v27 = vpop.f32.mrb[253].mxu1 }
 0x585   :  { %13766 = vst [vmem:[#allocation17_spill] sm:$0xff] %v11969_v12  ;;  %v3783_v48 = vadd.f32 %v3782_v40, %v11561_v19  ;;  %v3976_v43 = vadd.f32 %v3975_v27, %v11565_v58  ;;  %v3784_v3 = vpop.f32.mrb[254].mxu0  ;;  %v3977_v15 = vpop.f32.mrb[254].mxu1  ;;  %5840 = vmatprep.mubr.bf16.mxu0 %v11969_v12  ;;  %6226 = vmatprep.mubr.bf16.mxu1 %v11969_v12 }
 0x586   :  { %v3785_v54 = vadd.f32 %v3784_v3, %v11554_v22  ;;  %v3978_v8 = vadd.f32 %v3977_v15, %v11558_v32  ;;  %v3786_v52 = vpop.f32.mrb[255].mxu0  ;;  %v3979_v60 = vpop.f32.mrb[255].mxu1  ;;  %5841 = vmatmul.mubr.bf16.gmra.mrb[56].mxu0 %v11965_v31  ;;  %6227 = vmatmul.mubr.bf16.gmra.mrb[56].mxu1 %v11965_v31  ;;  %v4110_v37 = vmax.f32 %v3781_v28, 0.0  ;;  %v4112_v10 = vmax.f32 %v3974_v29, 0.0 }
 0x587   :  { %v3787_v39 = vadd.f32 %v3786_v52, %v11561_v19  ;;  %v3980_v33 = vadd.f32 %v3979_v60, %v11565_v58  ;;  %v4111_v51 = vmax.f32 %v3783_v48, 0.0  ;;  %v4113_v40 = vmax.f32 %v3976_v43, 0.0 }
 0x588   :  { %v4114_v26 = vmax.f32 %v3785_v54, 0.0  ;;  %v4116_v59 = vmax.f32 %v3978_v8, 0.0 }
 0x589   :  { %v4115_v27 = vmax.f32 %v3787_v39, 0.0  ;;  %v4117_v3 = vmax.f32 %v3980_v33, 0.0 }
 0x58a   :  { %v11985_v12 = vpack.c.bf16 %v4114_v26, %v4110_v37  ;;  %v11987_v15 = vpack.c.bf16 %v4116_v59, %v4112_v10 }
 0x58b   :  { %v11989_v6 = vpack.c.bf16 %v4115_v27, %v4111_v51  ;;  %v11991_v62 = vpack.c.bf16 %v4117_v3, %v4113_v40  ;;  %v3790_v31 = vpop.f32.mrb[0].mxu0  ;;  %v3983_v52 = vpop.f32.mrb[0].mxu1 }
 0x58c   :  { %13767 = vst [vmem:[#allocation18_spill] sm:$0xff] %v11985_v12  ;;  %v3791_v60 = vadd.f32 %v3790_v31, %v11554_v22  ;;  %v3984_v28 = vadd.f32 %v3983_v52, %v11558_v32  ;;  %v3792_v29 = vpop.f32.mrb[1].mxu0  ;;  %v3985_v54 = vpop.f32.mrb[1].mxu1 }
 0x58d   :  { %13768 = vst [vmem:[#allocation19_spill] sm:$0xff] %v11989_v6  ;;  %v3793_v48 = vadd.f32 %v3792_v29, %v11561_v19  ;;  %v3986_v43 = vadd.f32 %v3985_v54, %v11565_v58  ;;  %v3794_v8 = vpop.f32.mrb[2].mxu0  ;;  %v3987_v39 = vpop.f32.mrb[2].mxu1  ;;  %5850 = vmatprep.mubr.bf16.mxu0 %v11989_v6  ;;  %6236 = vmatprep.mubr.bf16.mxu1 %v11989_v6 }
 0x58e   :  { %v3795_v33 = vadd.f32 %v3794_v8, %v11554_v22  ;;  %v3988_v37 = vadd.f32 %v3987_v39, %v11558_v32  ;;  %v3796_v10 = vpop.f32.mrb[3].mxu0  ;;  %v3989_v31 = vpop.f32.mrb[3].mxu1  ;;  %5851 = vmatmul.mubr.bf16.gmra.mrb[60].mxu0 %v11985_v12  ;;  %6237 = vmatmul.mubr.bf16.gmra.mrb[60].mxu1 %v11985_v12  ;;  %v4118_v51 = vmax.f32 %v3791_v60, 0.0  ;;  %v4120_v40 = vmax.f32 %v3984_v28, 0.0 }
 0x58f   :  { %v3797_v26 = vadd.f32 %v3796_v10, %v11561_v19  ;;  %v3990_v59 = vadd.f32 %v3989_v31, %v11565_v58  ;;  %v4119_v52 = vmax.f32 %v3793_v48, 0.0  ;;  %v4121_v29 = vmax.f32 %v3986_v43, 0.0 }
 0x590   :  { %v4122_v27 = vmax.f32 %v3795_v33, 0.0  ;;  %v4124_v3 = vmax.f32 %v3988_v37, 0.0 }
 0x591   :  { %v4123_v54 = vmax.f32 %v3797_v26, 0.0  ;;  %v4125_v8 = vmax.f32 %v3990_v59, 0.0 }
 0x592   :  { %v12005_v6 = vpack.c.bf16 %v4122_v27, %v4118_v51  ;;  %v12007_v39 = vpack.c.bf16 %v4124_v3, %v4120_v40 }
 0x593   :  { %v12009_v2 = vpack.c.bf16 %v4123_v54, %v4119_v52  ;;  %v12011_v13 = vpack.c.bf16 %v4125_v8, %v4121_v29  ;;  %v3800_v12 = vpop.f32.mrb[4].mxu0  ;;  %v3993_v10 = vpop.f32.mrb[4].mxu1 }
 0x594   :  { %13769 = vst [vmem:[#allocation20_spill] sm:$0xff] %v12005_v6  ;;  %v3801_v31 = vadd.f32 %v3800_v12, %v11554_v22  ;;  %v3994_v60 = vadd.f32 %v3993_v10, %v11558_v32  ;;  %v3802_v28 = vpop.f32.mrb[5].mxu0  ;;  %v3995_v33 = vpop.f32.mrb[5].mxu1 }
 0x595   :  { %13770 = vst [vmem:[#allocation21_spill] sm:$0xff] %v12009_v2  ;;  %v3803_v48 = vadd.f32 %v3802_v28, %v11561_v19  ;;  %v3996_v43 = vadd.f32 %v3995_v33, %v11565_v58  ;;  %v3804_v37 = vpop.f32.mrb[6].mxu0  ;;  %v3997_v26 = vpop.f32.mrb[6].mxu1  ;;  %5860 = vmatprep.mubr.bf16.mxu0 %v12009_v2  ;;  %6246 = vmatprep.mubr.bf16.mxu1 %v12009_v2 }
 0x596   :  { %v3805_v59 = vadd.f32 %v3804_v37, %v11554_v22  ;;  %v3998_v51 = vadd.f32 %v3997_v26, %v11558_v32  ;;  %v3806_v40 = vpop.f32.mrb[7].mxu0  ;;  %v3999_v12 = vpop.f32.mrb[7].mxu1  ;;  %5861 = vmatmul.mubr.bf16.gmra.mrb[64].mxu0 %v12005_v6  ;;  %6247 = vmatmul.mubr.bf16.gmra.mrb[64].mxu1 %v12005_v6  ;;  %v4126_v52 = vmax.f32 %v3801_v31, 0.0  ;;  %v4128_v29 = vmax.f32 %v3994_v60, 0.0 }
 0x597   :  { %v3807_v27 = vadd.f32 %v3806_v40, %v11561_v19  ;;  %v4000_v3 = vadd.f32 %v3999_v12, %v11565_v58  ;;  %v4127_v10 = vmax.f32 %v3803_v48, 0.0  ;;  %v4129_v28 = vmax.f32 %v3996_v43, 0.0 }
 0x598   :  { %v4130_v54 = vmax.f32 %v3805_v59, 0.0  ;;  %v4132_v8 = vmax.f32 %v3998_v51, 0.0 }
 0x599   :  { %v4131_v33 = vmax.f32 %v3807_v27, 0.0  ;;  %v4133_v37 = vmax.f32 %v4000_v3, 0.0 }
 0x59a   :  { %v12025_v2 = vpack.c.bf16 %v4130_v54, %v4126_v52  ;;  %v12027_v26 = vpack.c.bf16 %v4132_v8, %v4128_v29 }
 0x59b   :  { %v12029_v9 = vpack.c.bf16 %v4131_v33, %v4127_v10  ;;  %v12031_v57 = vpack.c.bf16 %v4133_v37, %v4129_v28  ;;  %v3810_v6 = vpop.f32.mrb[8].mxu0  ;;  %v4003_v40 = vpop.f32.mrb[8].mxu1 }
 0x59c   :  { %13771 = vst [vmem:[#allocation22_spill] sm:$0xff] %v12025_v2  ;;  %v3811_v12 = vadd.f32 %v3810_v6, %v11554_v22  ;;  %v4004_v31 = vadd.f32 %v4003_v40, %v11558_v32  ;;  %v3812_v60 = vpop.f32.mrb[9].mxu0  ;;  %v4005_v59 = vpop.f32.mrb[9].mxu1 }
 0x59d   :  { %13772 = vst [vmem:[#allocation23_spill] sm:$0xff] %v12029_v9  ;;  %v3813_v48 = vadd.f32 %v3812_v60, %v11561_v19  ;;  %v4006_v43 = vadd.f32 %v4005_v59, %v11565_v58  ;;  %v3814_v51 = vpop.f32.mrb[10].mxu0  ;;  %v4007_v27 = vpop.f32.mrb[10].mxu1  ;;  %5870 = vmatprep.mubr.bf16.mxu0 %v12029_v9  ;;  %6256 = vmatprep.mubr.bf16.mxu1 %v12029_v9 }
 0x59e   :  { %v3815_v3 = vadd.f32 %v3814_v51, %v11554_v22  ;;  %v4008_v52 = vadd.f32 %v4007_v27, %v11558_v32  ;;  %v3816_v29 = vpop.f32.mrb[11].mxu0  ;;  %v4009_v6 = vpop.f32.mrb[11].mxu1  ;;  %5871 = vmatmul.mubr.bf16.gmra.mrb[68].mxu0 %v12025_v2  ;;  %6257 = vmatmul.mubr.bf16.gmra.mrb[68].mxu1 %v12025_v2  ;;  %v4134_v10 = vmax.f32 %v3811_v12, 0.0  ;;  %v4136_v28 = vmax.f32 %v4004_v31, 0.0 }
 0x59f   :  { %v3817_v54 = vadd.f32 %v3816_v29, %v11561_v19  ;;  %v4010_v8 = vadd.f32 %v4009_v6, %v11565_v58  ;;  %v4135_v40 = vmax.f32 %v3813_v48, 0.0  ;;  %v4137_v60 = vmax.f32 %v4006_v43, 0.0 }
 0x5a0   :  { %v4138_v33 = vmax.f32 %v3815_v3, 0.0  ;;  %v4140_v37 = vmax.f32 %v4008_v52, 0.0 }
 0x5a1   :  { %v4139_v59 = vmax.f32 %v3817_v54, 0.0  ;;  %v4141_v51 = vmax.f32 %v4010_v8, 0.0 }
 0x5a2   :  { %v12045_v9 = vpack.c.bf16 %v4138_v33, %v4134_v10  ;;  %v12047_v27 = vpack.c.bf16 %v4140_v37, %v4136_v28 }
 0x5a3   :  { %v12049_v42 = vpack.c.bf16 %v4139_v59, %v4135_v40  ;;  %v12051_v21 = vpack.c.bf16 %v4141_v51, %v4137_v60  ;;  %v3820_v2 = vpop.f32.mrb[12].mxu0  ;;  %v4013_v29 = vpop.f32.mrb[12].mxu1 }
 0x5a4   :  { %v3821_v6 = vadd.f32 %v3820_v2, %v11554_v22  ;;  %v4014_v12 = vadd.f32 %v4013_v29, %v11558_v32  ;;  %v3822_v31 = vpop.f32.mrb[13].mxu0  ;;  %v4015_v3 = vpop.f32.mrb[13].mxu1 }
 0x5a5   :  { %13773 = vst [vmem:[#allocation24_spill] sm:$0xff] %v12049_v42  ;;  %v3823_v48 = vadd.f32 %v3822_v31, %v11561_v19  ;;  %v4016_v43 = vadd.f32 %v4015_v3, %v11565_v58  ;;  %v3824_v52 = vpop.f32.mrb[14].mxu0  ;;  %v4017_v54 = vpop.f32.mrb[14].mxu1  ;;  %5880 = vmatprep.mubr.bf16.mxu0 %v12049_v42  ;;  %6266 = vmatprep.mubr.bf16.mxu1 %v12049_v42 }
 0x5a6   :  { %v3825_v8 = vadd.f32 %v3824_v52, %v11554_v22  ;;  %v4018_v10 = vadd.f32 %v4017_v54, %v11558_v32  ;;  %v3826_v28 = vpop.f32.mrb[15].mxu0  ;;  %v4019_v2 = vpop.f32.mrb[15].mxu1  ;;  %5881 = vmatmul.mubr.bf16.gmra.mrb[72].mxu0 %v12045_v9  ;;  %6267 = vmatmul.mubr.bf16.gmra.mrb[72].mxu1 %v12045_v9  ;;  %v4142_v40 = vmax.f32 %v3821_v6, 0.0  ;;  %v4144_v60 = vmax.f32 %v4014_v12, 0.0  ;;  %v9709_v6 = vld [vmem:[%s13677_s11 + $0x4c] ss:$28 sps:$4 sm:$0xff]  }
 0x5a7   :  { %v3827_v33 = vadd.f32 %v3826_v28, %v11561_v19  ;;  %v4020_v37 = vadd.f32 %v4019_v2, %v11565_v58  ;;  %v4143_v29 = vmax.f32 %v3823_v48, 0.0  ;;  %v4145_v31 = vmax.f32 %v4016_v43, 0.0  ;;  %v9703_v19 = vld [vmem:[%s13677_s11 + $0x18] ss:$28 sps:$4 sm:$0xff]   ;;  %v9704_v58 = vld [vmem:[%s13677_s11 + $0x10] ss:$28 sps:$4 sm:$0xff]  }
 0x5a8   :  { %v4146_v59 = vmax.f32 %v3825_v8, 0.0  ;;  %v4148_v51 = vmax.f32 %v4018_v10, 0.0  ;;  %v9710_v12 = vld [vmem:[%s13677_s11 + $0x210] ss:$28 sps:$4 sm:$0xff]   ;;  %v9707_v48 = vld [vmem:[%s13677_s11 + $0x48] ss:$28 sps:$4 sm:$0xff]  }
 0x5a9   :  { %v4147_v3 = vmax.f32 %v3827_v33, 0.0  ;;  %v4149_v22 = vmax.f32 %v4020_v37, 0.0  ;;  %v9711_v43 = vld [vmem:[%s13677_s11 + $0x50] ss:$28 sps:$4 sm:$0xff]   ;;  %v9714_v8 = vld [vmem:[%s13677_s11 + $0x84] ss:$28 sps:$4 sm:$0xff]  }
 0x5aa   :  { %v12065_v52 = vpack.c.bf16 %v4146_v59, %v4142_v40  ;;  %v12067_v32 = vpack.c.bf16 %v4148_v51, %v4144_v60  ;;  %v9718_v10 = vld [vmem:[%s13677_s11 + $0x248] ss:$28 sps:$4 sm:$0xff]   ;;  %v9712_v28 = vld [vmem:[%s13677_s11 + $0x80] ss:$28 sps:$4 sm:$0xff]   ;;  %v9715_v40 = vld [vmem:[%s13677_s11 + $0xb8] ss:$28 sps:$4 sm:$0xff]  }
 0x5ab   :  { %v12069_v54 = vpack.c.bf16 %v4147_v3, %v4143_v29  ;;  %v12071_v42 = vpack.c.bf16 %v4149_v22, %v4145_v31  ;;  %v9719_v2 = vld [vmem:[%s13677_s11 + $0x88] ss:$28 sps:$4 sm:$0xff]   ;;  %v9717_v33 = vld [vmem:[%s13677_s11 + $0xbc] ss:$28 sps:$4 sm:$0xff]   ;;  %v9722_v59 = vld [vmem:[%s13677_s11 + $0xf4] ss:$28 sps:$4 sm:$0xff]  }
 0x5ac   :  { %v9726_v37 = vld [vmem:[%s13677_s11 + $0x280] ss:$28 sps:$4 sm:$0xff]   ;;  %v9734_v51 = vld [vmem:[%s13677_s11 + $0x2b8] ss:$28 sps:$4 sm:$0xff]   ;;  %v9720_v29 = vld [vmem:[%s13677_s11 + $0xf0] ss:$28 sps:$4 sm:$0xff]  }
 0x5ad   :  { %5890 = vmatprep.mubr.bf16.mxu0 %v12069_v54  ;;  %6276 = vmatprep.mubr.bf16.mxu1 %v12069_v54  ;;  %v9727_v60 = vld [vmem:[%s13677_s11 + $0xc0] ss:$28 sps:$4 sm:$0xff]   ;;  %v9735_v31 = vld [vmem:[%s13677_s11 + $0xf8] ss:$28 sps:$4 sm:$0xff]   ;;  %v9725_v3 = vld [vmem:[%s13677_s11 + $0x12c] ss:$28 sps:$4 sm:$0xff]  }
 0x5ae   :  { %5891 = vmatmul.mubr.bf16.gmra.mrb[76].mxu0 %v12065_v52  ;;  %6277 = vmatmul.mubr.bf16.gmra.mrb[76].mxu1 %v12065_v52  ;;  %v9742_v22 = vld [vmem:[%s13677_s11 + $0x2f0] ss:$28 sps:$4 sm:$0xff]  }
 0x5af   :  { %7990 = vmatprep.mubr.msk.bf16.mxu0 %vm5637_vm7, %v11581_v11  ;;  %8007 = vmatprep.mubr.msk.bf16.mxu1 %vm5637_vm7, %v11581_v11 }
 0x5b6   :  { %5934 = vmatmul.mubr.bf16.vlgmr.msra.gmra.mrb[16].mxu0 %v11577_v30  ;;  %6320 = vmatmul.mubr.bf16.vlgmr.msra.gmra.mrb[16].mxu1 %v11577_v30 }
 0x5b7   :  { %7991 = vmatprep.mubr.msk.bf16.mxu0 %vm5637_vm7, %v11625_v41  ;;  %8008 = vmatprep.mubr.msk.bf16.mxu1 %vm5637_vm7, %v11625_v41 }
 0x5b8   :  { %8522 = vmatpush3.bf16.msra.mxu1 %v9703_v19  ;;  %6481 = vmatpush1.bf16.msra.mxu0 %v9704_v58  ;;  %v9723_v19 = vld [vmem:[%s13677_s11 + $0x128] ss:$28 sps:$4 sm:$0xff]   ;;  %v9743_v58 = vld [vmem:[%s13677_s11 + $0x130] ss:$28 sps:$4 sm:$0xff]  }
 0x5b9   :  { %6482 = vmatprep.subr.bf16.mxu0 %v9709_v6  ;;  %8523 = vmatprep.subr.bf16.mxu1 %v9710_v12  ;;  %v9730_v6 = vld [vmem:[%s13677_s11 + $0x164] ss:$28 sps:$4 sm:$0xff]  }
 0x5ba   :  { %v9750_v12 = vld [vmem:[%s13677_s11 + $0x328] ss:$28 sps:$4 sm:$0xff]  }
 0x5bc   :  { %6483 = vmatpush1.bf16.msra.mxu0 %v9707_v48  ;;  %8524 = vmatpush3.bf16.msra.mxu1 %v9711_v43  ;;  %v9728_v48 = vld [vmem:[%s13677_s11 + $0x160] ss:$28 sps:$4 sm:$0xff]   ;;  %v9751_v43 = vld [vmem:[%s13677_s11 + $0x168] ss:$28 sps:$4 sm:$0xff]  }
 0x5bd   :  { %6484 = vmatprep.subr.bf16.mxu0 %v9714_v8  ;;  %8525 = vmatprep.subr.bf16.mxu1 %v9718_v10  ;;  %v9733_v8 = vld [vmem:[%s13677_s11 + $0x19c] ss:$28 sps:$4 sm:$0xff]  }
 0x5be   :  { %5944 = vmatmul.mubr.bf16.gmra.mrb[20].mxu0 %v11621_v44  ;;  %6330 = vmatmul.mubr.bf16.gmra.mrb[20].mxu1 %v11621_v44  ;;  %v9758_v10 = vld [vmem:[%s13677_s11 + $0x360] ss:$28 sps:$4 sm:$0xff]  }
 0x5bf   :  { %7992 = vmatprep.mubr.msk.bf16.mxu0 %vm5637_vm7, %v11669_v17  ;;  %8009 = vmatprep.mubr.msk.bf16.mxu1 %vm5637_vm7, %v11669_v17 }
 0x5c0   :  { %6485 = vmatpush1.bf16.msra.mxu0 %v9712_v28  ;;  %8526 = vmatpush3.bf16.msra.mxu1 %v9719_v2  ;;  %v9731_v28 = vld [vmem:[%s13677_s11 + $0x198] ss:$28 sps:$4 sm:$0xff]   ;;  %v9759_v2 = vld [vmem:[%s13677_s11 + $0x1a0] ss:$28 sps:$4 sm:$0xff]  }
 0x5c1   :  { %6486 = vmatprep.subr.bf16.mxu0 %v9717_v33  ;;  %8527 = vmatprep.subr.bf16.mxu1 %v9726_v37  ;;  %v9738_v33 = vld [vmem:[%s13677_s11 + $0x1d4] ss:$28 sps:$4 sm:$0xff]  }
 0x5c2   :  { %v9766_v37 = vld [vmem:[%s13677_s11 + $0x558] ss:$28 sps:$4 sm:$0xff]  }
 0x5c4   :  { %6487 = vmatpush1.bf16.msra.mxu0 %v9715_v40  ;;  %8528 = vmatpush3.bf16.msra.mxu1 %v9727_v60  ;;  %v9736_v40 = vld [vmem:[%s13677_s11 + $0x1d0] ss:$28 sps:$4 sm:$0xff]  }
 0x5c5   :  { %6488 = vmatprep.subr.bf16.mxu0 %v9722_v59  ;;  %8529 = vmatprep.subr.bf16.mxu1 %v9734_v51  ;;  %v9741_v60 = vld [vmem:[%s13677_s11 + $0x20c] ss:$28 sps:$4 sm:$0xff]   ;;  %v9746_v51 = vld [vmem:[%s13677_s11 + $0x244] ss:$28 sps:$4 sm:$0xff]  }
 0x5c6   :  { %5954 = vmatmul.mubr.bf16.gmra.mrb[24].mxu0 %v11665_v16  ;;  %6340 = vmatmul.mubr.bf16.gmra.mrb[24].mxu1 %v11665_v16  ;;  %v9739_v59 = vld [vmem:[%s13677_s11 + $0x208] ss:$28 sps:$4 sm:$0xff]  }
 0x5c7   :  { %7993 = vmatprep.mubr.msk.bf16.mxu0 %vm5637_vm7, %v11713_v20  ;;  %8010 = vmatprep.mubr.msk.bf16.mxu1 %vm5637_vm7, %v11713_v20 }
 0x5c8   :  { %6489 = vmatpush1.bf16.msra.mxu0 %v9720_v29  ;;  %8530 = vmatpush3.bf16.msra.mxu1 %v9735_v31  ;;  %v9744_v29 = vld [vmem:[%s13677_s11 + $0x240] ss:$28 sps:$4 sm:$0xff]  }
 0x5c9   :  { %6490 = vmatprep.subr.bf16.mxu0 %v9725_v3  ;;  %8531 = vmatprep.subr.bf16.mxu1 %v9742_v22  ;;  %v9749_v31 = vld [vmem:[%s13677_s11 + $0x27c] ss:$28 sps:$4 sm:$0xff]   ;;  %v9754_v22 = vld [vmem:[%s13677_s11 + $0x2b4] ss:$28 sps:$4 sm:$0xff]  }
 0x5ca   :  { %v9747_v3 = vld [vmem:[%s13677_s11 + $0x278] ss:$28 sps:$4 sm:$0xff]  }
 0x5cc   :  { %6491 = vmatpush1.bf16.msra.mxu0 %v9723_v19  ;;  %8532 = vmatpush3.bf16.msra.mxu1 %v9743_v58  ;;  %v9752_v19 = vld [vmem:[%s13677_s11 + $0x2b0] ss:$28 sps:$4 sm:$0xff]  }
 0x5cd   :  { %6492 = vmatprep.subr.bf16.mxu0 %v9730_v6  ;;  %8533 = vmatprep.subr.bf16.mxu1 %v9750_v12  ;;  %v9757_v58 = vld [vmem:[%s13677_s11 + $0x2ec] ss:$28 sps:$4 sm:$0xff]   ;;  %v9762_v12 = vld [vmem:[%s13677_s11 + $0x324] ss:$28 sps:$4 sm:$0xff]  }
 0x5ce   :  { %5964 = vmatmul.mubr.bf16.gmra.mrb[28].mxu0 %v11709_v0  ;;  %6350 = vmatmul.mubr.bf16.gmra.mrb[28].mxu1 %v11709_v0  ;;  %v9755_v6 = vld [vmem:[%s13677_s11 + $0x2e8] ss:$28 sps:$4 sm:$0xff]  }
 0x5cf   :  { %7994 = vmatprep.mubr.msk.bf16.mxu0 %vm5637_vm7, %v11757_v61  ;;  %8011 = vmatprep.mubr.msk.bf16.mxu1 %vm5637_vm7, %v11757_v61 }
 0x5d0   :  { %6493 = vmatpush1.bf16.msra.mxu0 %v9728_v48  ;;  %8534 = vmatpush3.bf16.msra.mxu1 %v9751_v43  ;;  %v9760_v48 = vld [vmem:[%s13677_s11 + $0x320] ss:$28 sps:$4 sm:$0xff]  }
 0x5d1   :  { %6494 = vmatprep.subr.bf16.mxu0 %v9733_v8  ;;  %8535 = vmatprep.subr.bf16.mxu1 %v9758_v10  ;;  %v9765_v43 = vld [vmem:[%s13677_s11 + $0x35c] ss:$28 sps:$4 sm:$0xff]   ;;  %v9770_v10 = vld [vmem:[%s13677_s11 + $0x394] ss:$28 sps:$4 sm:$0xff]  }
 0x5d2   :  { %v9763_v8 = vld [vmem:[%s13677_s11 + $0x358] ss:$28 sps:$4 sm:$0xff]  }
 0x5d4   :  { %6495 = vmatpush1.bf16.msra.mxu0 %v9731_v28  ;;  %8536 = vmatpush3.bf16.msra.mxu1 %v9759_v2  ;;  %v9767_v28 = vld [vmem:[%s13677_s11 + $0x398] ss:$28 sps:$4 sm:$0xff]   ;;  %v9768_v2 = vld [vmem:[%s13677_s11 + $0x390] ss:$28 sps:$4 sm:$0xff]  }
 0x5d5   :  { %6496 = vmatprep.subr.bf16.mxu0 %v9738_v33  ;;  %8633 = vmatprep.subr.bf16.mxu1 %v9766_v37  ;;  %v9773_v33 = vld [vmem:[%s13677_s11 + $0x3cc] ss:$28 sps:$4 sm:$0xff]  }
 0x5d6   :  { %5974 = vmatmul.mubr.bf16.gmra.mrb[32].mxu0 %v11753_v23  ;;  %6360 = vmatmul.mubr.bf16.gmra.mrb[32].mxu1 %v11753_v23  ;;  %v9774_v37 = vld [vmem:[%s13677_s11 + $0x590] ss:$28 sps:$4 sm:$0xff]  }
 0x5d7   :  { %7995 = vmatprep.mubr.msk.bf16.mxu0 %vm5637_vm7, %v11801_v14  ;;  %8012 = vmatprep.mubr.msk.bf16.mxu1 %vm5637_vm7, %v11801_v14 }
 0x5d8   :  { %6497 = vmatpush1.bf16.msra.mxu0 %v9736_v40  ;;  %v9775_v40 = vld [vmem:[%s13677_s11 + $0x3d0] ss:$28 sps:$4 sm:$0xff]  }
 0x5d9   :  { %6498 = vmatprep.subr.bf16.mxu0 %v9741_v60  ;;  %v9776_v60 = vld [vmem:[%s13677_s11 + $0x400] ss:$28 sps:$4 sm:$0xff]  }
 0x5dc   :  { %6499 = vmatpush1.bf16.msra.mxu0 %v9739_v59  ;;  %v9783_v59 = vld [vmem:[%s13677_s11 + $0x408] ss:$28 sps:$4 sm:$0xff]  }
 0x5dd   :  { %6500 = vmatprep.subr.bf16.mxu0 %v9746_v51  ;;  %v9781_v51 = vld [vmem:[%s13677_s11 + $0x43c] ss:$28 sps:$4 sm:$0xff]  }
 0x5de   :  { %5984 = vmatmul.mubr.bf16.gmra.mrb[36].mxu0 %v11797_v18  ;;  %6370 = vmatmul.mubr.bf16.gmra.mrb[36].mxu1 %v11797_v18 }
 0x5df   :  { %7996 = vmatprep.mubr.msk.bf16.mxu0 %vm5637_vm7, %v11845_v34  ;;  %8013 = vmatprep.mubr.msk.bf16.mxu1 %vm5637_vm7, %v11845_v34 }
 0x5e0   :  { %6501 = vmatpush1.bf16.msra.mxu0 %v9744_v29  ;;  %v9790_v29 = vld [vmem:[%s13677_s11 + $0x600] ss:$28 sps:$4 sm:$0xff]  }
 0x5e1   :  { %6502 = vmatprep.subr.bf16.mxu0 %v9749_v31  ;;  %v9779_v31 = vld [vmem:[%s13677_s11 + $0x438] ss:$28 sps:$4 sm:$0xff]  }
 0x5e4   :  { %6503 = vmatpush1.bf16.msra.mxu0 %v9747_v3  ;;  %v9791_v3 = vld [vmem:[%s13677_s11 + $0x440] ss:$28 sps:$4 sm:$0xff]  }
 0x5e5   :  { %6504 = vmatprep.subr.bf16.mxu0 %v9754_v22  ;;  %v9786_v22 = vld [vmem:[%s13677_s11 + $0x474] ss:$28 sps:$4 sm:$0xff]  }
 0x5e6   :  { %5994 = vmatmul.mubr.bf16.gmra.mrb[40].mxu0 %v11841_v1  ;;  %6380 = vmatmul.mubr.bf16.gmra.mrb[40].mxu1 %v11841_v1 }
 0x5e7   :  { %7997 = vmatprep.mubr.msk.bf16.mxu0 %vm5637_vm7, %v11895_v45  ;;  %8014 = vmatprep.mubr.msk.bf16.mxu1 %vm5637_vm7, %v11895_v45 }
 0x5e8   :  { %6505 = vmatpush1.bf16.msra.mxu0 %v9752_v19  ;;  %v9799_v19 = vld [vmem:[%s13677_s11 + $0x478] ss:$28 sps:$4 sm:$0xff]  }
 0x5e9   :  { %6506 = vmatprep.subr.bf16.mxu0 %v9757_v58  ;;  %v9789_v58 = vld [vmem:[%s13677_s11 + $0x4ac] ss:$28 sps:$4 sm:$0xff]  }
 0x5ec   :  { %6507 = vmatpush1.bf16.msra.mxu0 %v9755_v6  ;;  %v9806_v6 = vld [vmem:[%s13677_s11 + $0x670] ss:$28 sps:$4 sm:$0xff]  }
 0x5ed   :  { %6508 = vmatprep.subr.bf16.mxu0 %v9762_v12  ;;  %v9787_v12 = vld [vmem:[%s13677_s11 + $0x4a8] ss:$28 sps:$4 sm:$0xff]  }
 0x5ee   :  { %6004 = vmatmul.mubr.bf16.gmra.mrb[44].mxu0 %v11891_v47  ;;  %6390 = vmatmul.mubr.bf16.gmra.mrb[44].mxu1 %v11891_v47 }
 0x5ef   :  { %7998 = vmatprep.mubr.msk.bf16.mxu0 %vm5637_vm7, %v11931_v38  ;;  %8015 = vmatprep.mubr.msk.bf16.mxu1 %vm5637_vm7, %v11931_v38 }
 0x5f0   :  { %6509 = vmatpush1.bf16.msra.mxu0 %v9760_v48  ;;  %v9807_v48 = vld [vmem:[%s13677_s11 + $0x4b0] ss:$28 sps:$4 sm:$0xff]  }
 0x5f1   :  { %6510 = vmatprep.subr.bf16.mxu0 %v9765_v43  ;;  %v9794_v43 = vld [vmem:[%s13677_s11 + $0x4e4] ss:$28 sps:$4 sm:$0xff]  }
 0x5f4   :  { %6511 = vmatpush1.bf16.msra.mxu0 %v9763_v8  ;;  %v9815_v8 = vld [vmem:[%s13677_s11 + $0x4e8] ss:$28 sps:$4 sm:$0xff]  }
 0x5f5   :  { %6673 = vmatprep.subr.bf16.mxu0 %v9770_v10  ;;  %v9797_v10 = vld [vmem:[%s13677_s11 + $0x51c] ss:$28 sps:$4 sm:$0xff]  }
 0x5f6   :  { %6014 = vmatmul.mubr.bf16.gmra.mrb[48].mxu0 %v11927_v7  ;;  %6400 = vmatmul.mubr.bf16.gmra.mrb[48].mxu1 %v11927_v7 }
 0x5f7   :  { %7999 = vmatprep.mubr.msk.bf16.mxu0 %vm5637_vm7, %v11951_v36  ;;  %8016 = vmatprep.mubr.msk.bf16.mxu1 %vm5637_vm7, %v11951_v36 }
 0x5fe   :  { %6024 = vmatmul.mubr.bf16.gmra.mrb[52].mxu0 %v11947_v5  ;;  %6410 = vmatmul.mubr.bf16.gmra.mrb[52].mxu1 %v11947_v5 }
 0x5ff   :  { %8000 = vmatprep.mubr.msk.bf16.mxu0 %vm5637_vm7, %v11971_v4  ;;  %8017 = vmatprep.mubr.msk.bf16.mxu1 %vm5637_vm7, %v11971_v4 }
 0x606   :  { %6034 = vmatmul.mubr.bf16.gmra.mrb[56].mxu0 %v11967_v50  ;;  %6420 = vmatmul.mubr.bf16.gmra.mrb[56].mxu1 %v11967_v50 }
 0x607   :  { %8001 = vmatprep.mubr.msk.bf16.mxu0 %vm5637_vm7, %v11991_v62  ;;  %8018 = vmatprep.mubr.msk.bf16.mxu1 %vm5637_vm7, %v11991_v62 }
 0x60e   :  { %6044 = vmatmul.mubr.bf16.gmra.mrb[60].mxu0 %v11987_v15  ;;  %6430 = vmatmul.mubr.bf16.gmra.mrb[60].mxu1 %v11987_v15 }
 0x60f   :  { %8002 = vmatprep.mubr.msk.bf16.mxu0 %vm5637_vm7, %v12011_v13  ;;  %8019 = vmatprep.mubr.msk.bf16.mxu1 %vm5637_vm7, %v12011_v13 }
 0x616   :  { %6054 = vmatmul.mubr.bf16.gmra.mrb[64].mxu0 %v12007_v39  ;;  %6440 = vmatmul.mubr.bf16.gmra.mrb[64].mxu1 %v12007_v39 }
 0x617   :  { %8003 = vmatprep.mubr.msk.bf16.mxu0 %vm5637_vm7, %v12031_v57  ;;  %8020 = vmatprep.mubr.msk.bf16.mxu1 %vm5637_vm7, %v12031_v57 }
 0x61e   :  { %6064 = vmatmul.mubr.bf16.gmra.mrb[68].mxu0 %v12027_v26  ;;  %6450 = vmatmul.mubr.bf16.gmra.mrb[68].mxu1 %v12027_v26 }
 0x61f   :  { %8004 = vmatprep.mubr.msk.bf16.mxu0 %vm5637_vm7, %v12051_v21  ;;  %8021 = vmatprep.mubr.msk.bf16.mxu1 %vm5637_vm7, %v12051_v21 }
 0x626   :  { %6074 = vmatmul.mubr.bf16.gmra.mrb[72].mxu0 %v12047_v27  ;;  %6460 = vmatmul.mubr.bf16.gmra.mrb[72].mxu1 %v12047_v27 }
 0x627   :  { %8005 = vmatprep.mubr.msk.bf16.mxu0 %vm5637_vm7, %v12071_v42  ;;  %8022 = vmatprep.mubr.msk.bf16.mxu1 %vm5637_vm7, %v12071_v42 }
 0x62e   :  { %6084 = vmatmul.mubr.bf16.gmra.mrb[76].mxu0 %v12067_v32  ;;  %6470 = vmatmul.mubr.bf16.gmra.mrb[76].mxu1 %v12067_v32 }
 0x62f   :  { %6512 = vmatprep.mubr.bf16.mxu0 %v11579_v55  ;;  %6898 = vmatprep.mubr.bf16.mxu1 %v11579_v55  ;;  %v9771_v55 = vld [vmem:[%s13677_s11 + $0x3c8] ss:$28 sps:$4 sm:$0xff]  }
 0x636   :  { %6513 = vmatmul.mubr.bf16.vlgmr.msra.gmra.mrb[80].mxu0 %v11575_v63  ;;  %6899 = vmatmul.mubr.bf16.vlgmr.msra.gmra.mrb[80].mxu1 %v11575_v63  ;;  %v9778_v63 = vld [vmem:[%s13677_s11 + $0x404] ss:$28 sps:$4 sm:$0xff]  }
 0x637   :  { %6522 = vmatprep.mubr.bf16.mxu0 %v11623_v56  ;;  %6906 = vmatprep.mubr.bf16.mxu1 %v11623_v56  ;;  %v9782_v56 = vld [vmem:[%s13677_s11 + $0x5c8] ss:$28 sps:$4 sm:$0xff]  }
 0x638   :  { %8634 = vmatpush3.bf16.msra.mxu1 %v9767_v28  ;;  %6674 = vmatpush1.bf16.msra.mxu0 %v9768_v2  ;;  %v9822_v28 = vld [vmem:[%s13677_s11 + $0x6e0] ss:$0 sps:$4 sm:$0x33]   ;;  %v9795_v2 = vld [vmem:[%s13677_s11 + $0x518] ss:$28 sps:$4 sm:$0xff]  }
 0x639   :  { %6675 = vmatprep.subr.bf16.mxu0 %v9773_v33  ;;  %8635 = vmatprep.subr.bf16.mxu1 %v9774_v37  ;;  %v9823_v33 = vld [vmem:[%s13677_s11 + $0x520] ss:$28 sps:$4 sm:$0xff]   ;;  %v9802_v37 = vld [vmem:[%s13677_s11 + $0x554] ss:$28 sps:$4 sm:$0xff]  }
 0x63c   :  { %6676 = vmatpush1.bf16.msra.mxu0 %v9771_v55  ;;  %8636 = vmatpush3.bf16.msra.mxu1 %v9775_v40  ;;  %v13774_v55 = vld [vmem:[#allocation9_spill] sm:$0xff]  ;;  %v13775_v40 = vld [vmem:[#allocation10_spill] sm:$0xff] }
 0x63d   :  { %6677 = vmatprep.subr.bf16.mxu0 %v9778_v63  ;;  %8637 = vmatprep.subr.bf16.mxu1 %v9782_v56  ;;  %v9803_v63 = vld [vmem:[%s13677_s11 + $0x588] ss:$28 sps:$4 sm:$0xff]  }
 0x63e   :  { %6523 = vmatmul.mubr.bf16.gmra.mrb[84].mxu0 %v11619_v49  ;;  %6907 = vmatmul.mubr.bf16.gmra.mrb[84].mxu1 %v11619_v49  ;;  %v9798_v49 = vld [vmem:[%s13677_s11 + $0x638] ss:$28 sps:$4 sm:$0xff]   ;;  %v9810_v56 = vld [vmem:[%s13677_s11 + $0x5c4] ss:$28 sps:$4 sm:$0xff]  }
 0x63f   :  { %6532 = vmatprep.mubr.bf16.mxu0 %v11667_v46  ;;  %6914 = vmatprep.mubr.bf16.mxu1 %v11667_v46  ;;  %v9784_v46 = vld [vmem:[%s13677_s11 + $0x470] ss:$28 sps:$4 sm:$0xff]  }
 0x640   :  { %6678 = vmatpush1.bf16.msra.mxu0 %v9776_v60  ;;  %8638 = vmatpush3.bf16.msra.mxu1 %v9783_v59  ;;  %v9808_v60 = vld [vmem:[%s13677_s11 + $0x5c0] ss:$28 sps:$4 sm:$0xff]  }
 0x641   :  { %6679 = vmatprep.subr.bf16.mxu0 %v9781_v51  ;;  %8639 = vmatprep.subr.bf16.mxu1 %v9790_v29  ;;  %v9813_v59 = vld [vmem:[%s13677_s11 + $0x5fc] ss:$28 sps:$4 sm:$0xff]   ;;  %v13776_v51 = vld [vmem:[#allocation4_spill] sm:$0xff]  ;;  %v13777_v29 = vld [vmem:[#allocation6_spill] sm:$0xff] }
 0x644   :  { %6680 = vmatpush1.bf16.msra.mxu0 %v9779_v31  ;;  %8640 = vmatpush3.bf16.msra.mxu1 %v9791_v3  ;;  %v9811_v31 = vld [vmem:[%s13677_s11 + $0x5f8] ss:$28 sps:$4 sm:$0xff]  }
 0x645   :  { %6681 = vmatprep.subr.bf16.mxu0 %v9786_v22  ;;  %8641 = vmatprep.subr.bf16.mxu1 %v9798_v49  ;;  %v9818_v3 = vld [vmem:[%s13677_s11 + $0x634] ss:$28 sps:$4 sm:$0xff]   ;;  %v9821_v49 = vld [vmem:[%s13677_s11 + $0x66c] ss:$28 sps:$4 sm:$0xff]  }
 0x646   :  { %6533 = vmatmul.mubr.bf16.gmra.mrb[88].mxu0 %v11663_v35  ;;  %6915 = vmatmul.mubr.bf16.gmra.mrb[88].mxu1 %v11663_v35  ;;  %v9814_v35 = vld [vmem:[%s13677_s11 + $0x6a8] ss:$28 sps:$4 sm:$0xff]   ;;  %v9816_v22 = vld [vmem:[%s13677_s11 + $0x630] ss:$28 sps:$4 sm:$0xff]  }
 0x647   :  { %6542 = vmatprep.mubr.bf16.mxu0 %v11711_v53  ;;  %6922 = vmatprep.mubr.bf16.mxu1 %v11711_v53  ;;  %v9792_v53 = vld [vmem:[%s13677_s11 + $0x4e0] ss:$28 sps:$4 sm:$0xff]  }
 0x648   :  { %6682 = vmatpush1.bf16.msra.mxu0 %v9784_v46  ;;  %8642 = vmatpush3.bf16.msra.mxu1 %v9799_v19  ;;  %v13778_v46 = vld [vmem:[#allocation5_spill] sm:$0xff]  ;;  %v13779_v19 = vld [vmem:[#allocation8_spill] sm:$0xff] }
 0x649   :  { %6683 = vmatprep.subr.bf16.mxu0 %v9789_v58  ;;  %8643 = vmatprep.subr.bf16.mxu1 %v9806_v6  ;;  %v9819_v58 = vld [vmem:[%s13677_s11 + $0x668] ss:$28 sps:$4 sm:$0xff]  }
 0x64a   :  { %v9826_v6 = vld [vmem:[%s13677_s11 + $0x6a4] ss:$28 sps:$4 sm:$0xff]  }
 0x64c   :  { %6684 = vmatpush1.bf16.msra.mxu0 %v9787_v12  ;;  %8644 = vmatpush3.bf16.msra.mxu1 %v9807_v48  ;;  %v4464_v12 = vld [vmem:[%s13677_s11 + $0x6d8] sm:$0x33] }
 0x64d   :  { %6685 = vmatprep.subr.bf16.mxu0 %v9794_v43  ;;  %8645 = vmatprep.subr.bf16.mxu1 %v9814_v35  ;;  %v9824_v48 = vld [vmem:[%s13677_s11 + $0x6a0] ss:$28 sps:$4 sm:$0xff]   ;;  %v7987_v43 = vcombine.high %v4464_v12, %v4464_v12  ;;  %v7986_v35 = vcombine.low %v4464_v12, %v4464_v12 }
 0x64e   :  { %6543 = vmatmul.mubr.bf16.gmra.mrb[92].mxu0 %v11707_v25  ;;  %6923 = vmatmul.mubr.bf16.gmra.mrb[92].mxu1 %v11707_v25  ;;  %v9800_v25 = vld [vmem:[%s13677_s11 + $0x550] ss:$28 sps:$4 sm:$0xff]  }
 0x64f   :  { %6552 = vmatprep.mubr.bf16.mxu0 %v11755_v24  ;;  %6930 = vmatprep.mubr.bf16.mxu1 %v11755_v24  ;;  %v9805_v24 = vld [vmem:[%s13677_s11 + $0x58c] ss:$28 sps:$4 sm:$0xff]  }
 0x650   :  { %6686 = vmatpush1.bf16.msra.mxu0 %v9792_v53  ;;  %8646 = vmatpush3.bf16.msra.mxu1 %v9815_v8  ;;  %v13780_v53 = vld [vmem:[#allocation7_spill] sm:$0xff]  ;;  %v13781_v8 = vld [vmem:[#allocation13_spill] sm:$0xff] }
 0x651   :  { %6687 = vmatprep.subr.bf16.mxu0 %v9797_v10  ;;  %9180 = vmatprep.subr.msk.bf16.mxu1 %vm5686_vm6, %v9822_v28  ;;  %v5700_v10 = vsel %vm5686_vm6, %v7986_v35, 0  ;;  %v13782_v28 = vld [vmem:[#allocation12_spill] sm:$0xff] }
 0x654   :  { %6688 = vmatpush1.bf16.msra.mxu0 %v9795_v2  ;;  %8648 = vmatpush3.bf16.msra.mxu1 %v9823_v33  ;;  %v13783_v2 = vld [vmem:[#allocation15_spill] sm:$0xff]  ;;  %v13784_v33 = vld [vmem:[#allocation14_spill] sm:$0xff] }
 0x655   :  { %6689 = vmatprep.subr.bf16.mxu0 %v9802_v37  ;;  %v13785_v37 = vld [vmem:[#allocation17_spill] sm:$0xff] }
 0x656   :  { %6553 = vmatmul.mubr.bf16.gmra.mrb[96].mxu0 %v13774_v55  ;;  %6931 = vmatmul.mubr.bf16.gmra.mrb[96].mxu1 %v13774_v55  ;;  %v13787_v55 = vld [vmem:[#allocation11_spill] sm:$0xff] }
 0x657   :  { %6562 = vmatprep.mubr.bf16.mxu0 %v13775_v40  ;;  %6938 = vmatprep.mubr.bf16.mxu1 %v13775_v40 }
 0x658   :  { %6690 = vmatpush1.bf16.msra.mxu0 %v9800_v25  ;;  %v4466_v25 = vld [vmem:[%s13680_s12] sm:$0x7f] }
 0x659   :  { %6691 = vmatprep.subr.bf16.mxu0 %v9805_v24  ;;  %v13786_v24 = vld [vmem:[#allocation16_spill] sm:$0xff]  ;;  %v12503_v40 = vrot.slane %v4466_v25, %v13787_v55 }
 0x65c   :  { %6692 = vmatpush1.bf16.msra.mxu0 %v9803_v63  ;;  %v13788_v63 = vld [vmem:[#allocation2_spill] sm:$0xff] }
 0x65d   :  { %6693 = vmatprep.subr.bf16.mxu0 %v9810_v56  ;;  %v13789_v56 = vsub.s32 2, %v13788_v63 }
 0x65e   :  { %6563 = vmatmul.mubr.bf16.gmra.mrb[100].mxu0 %v13776_v51  ;;  %6939 = vmatmul.mubr.bf16.gmra.mrb[100].mxu1 %v13776_v51  ;;  %v13791_v51 = vld [vmem:[#allocation3_spill] sm:$0xff] }
 0x65f   :  { %6572 = vmatprep.mubr.bf16.mxu0 %v13777_v29  ;;  %6946 = vmatprep.mubr.bf16.mxu1 %v13777_v29  ;;  %v12512_v29 = vrot.slane %v4466_v25, %v13791_v51 }
 0x660   :  { %6694 = vmatpush1.bf16.msra.mxu0 %v9808_v60  ;;  %v12507_v60 = vrot.slane %v4466_v25, %v13789_v56 }
 0x661   :  { %6695 = vmatprep.subr.bf16.mxu0 %v9813_v59  ;;  %v13790_v59 = vld [vmem:[#allocation19_spill] sm:$0xff] }
 0x664   :  { %6696 = vmatpush1.bf16.msra.mxu0 %v9811_v31  ;;  %v13792_v31 = vsub.s32 3, %v13788_v63 }
 0x665   :  { %6697 = vmatprep.subr.bf16.mxu0 %v9818_v3 }
 0x666   :  { %6573 = vmatmul.mubr.bf16.gmra.mrb[104].mxu0 %v13778_v46  ;;  %6947 = vmatmul.mubr.bf16.gmra.mrb[104].mxu1 %v13778_v46  ;;  %v12516_v3 = vrot.slane %v4466_v25, %v13792_v31  ;;  %v13794_v25 = vld [vmem:[#allocation21_spill] sm:$0xff] }
 0x667   :  { %6582 = vmatprep.mubr.bf16.mxu0 %v13779_v19  ;;  %6954 = vmatprep.mubr.bf16.mxu1 %v13779_v19 }
 0x668   :  { %6698 = vmatpush1.bf16.msra.mxu0 %v9816_v22 }
 0x669   :  { %6699 = vmatprep.subr.bf16.mxu0 %v9821_v49 }
 0x66c   :  { %6700 = vmatpush1.bf16.msra.mxu0 %v9819_v58 }
 0x66d   :  { %6701 = vmatprep.subr.bf16.mxu0 %v9826_v6 }
 0x66e   :  { %6583 = vmatmul.mubr.bf16.gmra.mrb[108].mxu0 %v13780_v53  ;;  %6955 = vmatmul.mubr.bf16.gmra.mrb[108].mxu1 %v13780_v53 }
 0x66f   :  { %6592 = vmatprep.mubr.bf16.mxu0 %v13781_v8  ;;  %6962 = vmatprep.mubr.bf16.mxu1 %v13781_v8 }
 0x670   :  { %6702 = vmatpush1.bf16.msra.mxu0 %v9824_v48 }
 0x671   :  { %8023 = vmatprep.subr.msk.bf16.mxu0 %vm5686_vm6, %v7987_v43 }
 0x674   :  { %6704 = vmatpush1.bf16.msra.mxu0 %v5700_v10 }
 0x676   :  { %6593 = vmatmul.mubr.bf16.gmra.mrb[112].mxu0 %v13782_v28  ;;  %6963 = vmatmul.mubr.bf16.gmra.mrb[112].mxu1 %v13782_v28 }
 0x677   :  { %6602 = vmatprep.mubr.bf16.mxu0 %v13783_v2  ;;  %6970 = vmatprep.mubr.bf16.mxu1 %v13783_v2 }
 0x67e   :  { %6603 = vmatmul.mubr.bf16.gmra.mrb[116].mxu0 %v13784_v33  ;;  %6971 = vmatmul.mubr.bf16.gmra.mrb[116].mxu1 %v13784_v33 }
 0x67f   :  { %6612 = vmatprep.mubr.bf16.mxu0 %v13785_v37  ;;  %6978 = vmatprep.mubr.bf16.mxu1 %v13785_v37  ;;  %v13793_v37 = vld [vmem:[#allocation18_spill] sm:$0xff] }
 0x686   :  { %6613 = vmatmul.mubr.bf16.gmra.mrb[120].mxu0 %v13786_v24  ;;  %6979 = vmatmul.mubr.bf16.gmra.mrb[120].mxu1 %v13786_v24 }
 0x687   :  { %6622 = vmatprep.mubr.bf16.mxu0 %v13790_v59  ;;  %6986 = vmatprep.mubr.bf16.mxu1 %v13790_v59 }
 0x689   :  { %v5935_v22 = vpop.f32.mrb[16].mxu0  ;;  %v6321_v49 = vpop.f32.mrb[16].mxu1 }
 0x68a   :  { %v8795_v46 = vadd.f32 %v5935_v22, %v12503_v40  ;;  %v8859_v19 = vadd.f32 %v6321_v49, %v12507_v60  ;;  %v5937_v58 = vpop.f32.mrb[17].mxu0  ;;  %v6323_v6 = vpop.f32.mrb[17].mxu1 }
 0x68b   :  { %v8796_v12 = vadd.f32 %v5937_v58, %v12512_v29  ;;  %v8860_v48 = vadd.f32 %v6323_v6, %v12516_v3  ;;  %v5939_v43 = vpop.f32.mrb[18].mxu0  ;;  %v6325_v35 = vpop.f32.mrb[18].mxu1 }
 0x68c   :  { %7188 = vst [vmem:[%s13681_s13] sm:$0xff] %v8795_v46  ;;  %7190 = vst [vmem:[%s13681_s13 + $0x10] sm:$0xff] %v8859_v19  ;;  %v8797_v53 = vadd.f32 %v5939_v43, %v12503_v40  ;;  %v8861_v8 = vadd.f32 %v6325_v35, %v12507_v60  ;;  %v5941_v10 = vpop.f32.mrb[19].mxu0  ;;  %v6327_v28 = vpop.f32.mrb[19].mxu1 }
 0x68d   :  { %7189 = vst [vmem:[%s13681_s13 + $0x8] sm:$0xff] %v8796_v12  ;;  %7191 = vst [vmem:[%s13681_s13 + $0x18] sm:$0xff] %v8860_v48  ;;  %v8798_v2 = vadd.f32 %v5941_v10, %v12512_v29  ;;  %v8862_v33 = vadd.f32 %v6327_v28, %v12516_v3 }
 0x68e   :  { %7195 = vst [vmem:[%s13681_s13 + $0x38] sm:$0xff] %v8797_v53  ;;  %7197 = vst [vmem:[%s13681_s13 + $0x48] sm:$0xff] %v8861_v8  ;;  %6623 = vmatmul.mubr.bf16.gmra.mrb[124].mxu0 %v13793_v37  ;;  %6987 = vmatmul.mubr.bf16.gmra.mrb[124].mxu1 %v13793_v37  ;;  %v13795_v53 = vld [vmem:[#allocation20_spill] sm:$0xff]  ;;  %v13796_v8 = vld [vmem:[#allocation23_spill] sm:$0xff] }
 0x68f   :  { %7196 = vst [vmem:[%s13681_s13 + $0x40] sm:$0xff] %v8798_v2  ;;  %7198 = vst [vmem:[%s13681_s13 + $0x50] sm:$0xff] %v8862_v33  ;;  %6632 = vmatprep.mubr.bf16.mxu0 %v13794_v25  ;;  %6994 = vmatprep.mubr.bf16.mxu1 %v13794_v25 }
 0x691   :  { %v5945_v24 = vpop.f32.mrb[20].mxu0  ;;  %v6331_v55 = vpop.f32.mrb[20].mxu1 }
 0x692   :  { %v8799_v56 = vadd.f32 %v5945_v24, %v12503_v40  ;;  %v8863_v59 = vadd.f32 %v6331_v55, %v12507_v60  ;;  %v5947_v51 = vpop.f32.mrb[21].mxu0  ;;  %v6333_v31 = vpop.f32.mrb[21].mxu1 }
 0x693   :  { %v8800_v22 = vadd.f32 %v5947_v51, %v12512_v29  ;;  %v8864_v49 = vadd.f32 %v6333_v31, %v12516_v3  ;;  %v5949_v46 = vpop.f32.mrb[22].mxu0  ;;  %v6335_v19 = vpop.f32.mrb[22].mxu1 }
 0x694   :  { %7202 = vst [vmem:[%s13681_s13 + $0x70] sm:$0xff] %v8799_v56  ;;  %7204 = vst [vmem:[%s13681_s13 + $0x80] sm:$0xff] %v8863_v59  ;;  %v8801_v58 = vadd.f32 %v5949_v46, %v12503_v40  ;;  %v8865_v6 = vadd.f32 %v6335_v19, %v12507_v60  ;;  %v5951_v12 = vpop.f32.mrb[23].mxu0  ;;  %v6337_v48 = vpop.f32.mrb[23].mxu1 }
 0x695   :  { %7203 = vst [vmem:[%s13681_s13 + $0x78] sm:$0xff] %v8800_v22  ;;  %7205 = vst [vmem:[%s13681_s13 + $0x88] sm:$0xff] %v8864_v49  ;;  %v8802_v43 = vadd.f32 %v5951_v12, %v12512_v29  ;;  %v8866_v35 = vadd.f32 %v6337_v48, %v12516_v3 }
 0x696   :  { %7209 = vst [vmem:[%s13681_s13 + $0xa8] sm:$0xff] %v8801_v58  ;;  %7211 = vst [vmem:[%s13681_s13 + $0xb8] sm:$0xff] %v8865_v6  ;;  %6633 = vmatmul.mubr.bf16.gmra.mrb[128].mxu0 %v13795_v53  ;;  %6995 = vmatmul.mubr.bf16.gmra.mrb[128].mxu1 %v13795_v53  ;;  %v13797_v58 = vld [vmem:[#allocation22_spill] sm:$0xff]  ;;  %v13798_v6 = vld [vmem:[#allocation24_spill] sm:$0xff] }
 0x697   :  { %7210 = vst [vmem:[%s13681_s13 + $0xb0] sm:$0xff] %v8802_v43  ;;  %7212 = vst [vmem:[%s13681_s13 + $0xc0] sm:$0xff] %v8866_v35  ;;  %6642 = vmatprep.mubr.bf16.mxu0 %v13796_v8  ;;  %7002 = vmatprep.mubr.bf16.mxu1 %v13796_v8 }
 0x699   :  { %v5955_v10 = vpop.f32.mrb[24].mxu0  ;;  %v6341_v28 = vpop.f32.mrb[24].mxu1 }
 0x69a   :  { %v8803_v2 = vadd.f32 %v5955_v10, %v12503_v40  ;;  %v8867_v33 = vadd.f32 %v6341_v28, %v12507_v60  ;;  %v5957_v37 = vpop.f32.mrb[25].mxu0  ;;  %v6343_v25 = vpop.f32.mrb[25].mxu1 }
 0x69b   :  { %v8804_v24 = vadd.f32 %v5957_v37, %v12512_v29  ;;  %v8868_v55 = vadd.f32 %v6343_v25, %v12516_v3  ;;  %v5959_v56 = vpop.f32.mrb[26].mxu0  ;;  %v6345_v59 = vpop.f32.mrb[26].mxu1 }
 0x69c   :  { %7216 = vst [vmem:[%s13681_s13 + $0xe0] sm:$0xff] %v8803_v2  ;;  %7218 = vst [vmem:[%s13681_s13 + $0xf0] sm:$0xff] %v8867_v33  ;;  %v8805_v51 = vadd.f32 %v5959_v56, %v12503_v40  ;;  %v8869_v31 = vadd.f32 %v6345_v59, %v12507_v60  ;;  %v5961_v22 = vpop.f32.mrb[27].mxu0  ;;  %v6347_v49 = vpop.f32.mrb[27].mxu1 }
 0x69d   :  { %7217 = vst [vmem:[%s13681_s13 + $0xe8] sm:$0xff] %v8804_v24  ;;  %7219 = vst [vmem:[%s13681_s13 + $0xf8] sm:$0xff] %v8868_v55  ;;  %v8806_v46 = vadd.f32 %v5961_v22, %v12512_v29  ;;  %v8870_v19 = vadd.f32 %v6347_v49, %v12516_v3 }
 0x69e   :  { %7223 = vst [vmem:[%s13681_s13 + $0x118] sm:$0xff] %v8805_v51  ;;  %7225 = vst [vmem:[%s13681_s13 + $0x128] sm:$0xff] %v8869_v31  ;;  %6643 = vmatmul.mubr.bf16.gmra.mrb[132].mxu0 %v13797_v58  ;;  %7003 = vmatmul.mubr.bf16.gmra.mrb[132].mxu1 %v13797_v58 }
 0x69f   :  { %7224 = vst [vmem:[%s13681_s13 + $0x120] sm:$0xff] %v8806_v46  ;;  %7226 = vst [vmem:[%s13681_s13 + $0x130] sm:$0xff] %v8870_v19  ;;  %6652 = vmatprep.mubr.bf16.mxu0 %v13798_v6  ;;  %7010 = vmatprep.mubr.bf16.mxu1 %v13798_v6 }
 0x6a1   :  { %v5965_v12 = vpop.f32.mrb[28].mxu0  ;;  %v6351_v48 = vpop.f32.mrb[28].mxu1 }
 0x6a2   :  { %v8807_v43 = vadd.f32 %v5965_v12, %v12503_v40  ;;  %v8871_v35 = vadd.f32 %v6351_v48, %v12507_v60  ;;  %v5967_v53 = vpop.f32.mrb[29].mxu0  ;;  %v6353_v8 = vpop.f32.mrb[29].mxu1 }
 0x6a3   :  { %v8808_v10 = vadd.f32 %v5967_v53, %v12512_v29  ;;  %v8872_v28 = vadd.f32 %v6353_v8, %v12516_v3  ;;  %v5969_v2 = vpop.f32.mrb[30].mxu0  ;;  %v6355_v33 = vpop.f32.mrb[30].mxu1 }
 0x6a4   :  { %7230 = vst [vmem:[%s13681_s13 + $0x150] sm:$0xff] %v8807_v43  ;;  %7232 = vst [vmem:[%s13681_s13 + $0x160] sm:$0xff] %v8871_v35  ;;  %v8809_v37 = vadd.f32 %v5969_v2, %v12503_v40  ;;  %v8873_v25 = vadd.f32 %v6355_v33, %v12507_v60  ;;  %v5971_v24 = vpop.f32.mrb[31].mxu0  ;;  %v6357_v55 = vpop.f32.mrb[31].mxu1 }
 0x6a5   :  { %7231 = vst [vmem:[%s13681_s13 + $0x158] sm:$0xff] %v8808_v10  ;;  %7233 = vst [vmem:[%s13681_s13 + $0x168] sm:$0xff] %v8872_v28  ;;  %v8810_v56 = vadd.f32 %v5971_v24, %v12512_v29  ;;  %v8874_v59 = vadd.f32 %v6357_v55, %v12516_v3 }
 0x6a6   :  { %7237 = vst [vmem:[%s13681_s13 + $0x188] sm:$0xff] %v8809_v37  ;;  %7239 = vst [vmem:[%s13681_s13 + $0x198] sm:$0xff] %v8873_v25  ;;  %6653 = vmatmul.mubr.bf16.gmra.mrb[136].mxu0 %v12045_v9  ;;  %7011 = vmatmul.mubr.bf16.gmra.mrb[136].mxu1 %v12045_v9 }
 0x6a7   :  { %7238 = vst [vmem:[%s13681_s13 + $0x190] sm:$0xff] %v8810_v56  ;;  %7240 = vst [vmem:[%s13681_s13 + $0x1a0] sm:$0xff] %v8874_v59  ;;  %6662 = vmatprep.mubr.bf16.mxu0 %v12069_v54  ;;  %7018 = vmatprep.mubr.bf16.mxu1 %v12069_v54 }
 0x6a9   :  { %v5975_v51 = vpop.f32.mrb[32].mxu0  ;;  %v6361_v31 = vpop.f32.mrb[32].mxu1 }
 0x6aa   :  { %v8811_v22 = vadd.f32 %v5975_v51, %v12503_v40  ;;  %v8875_v49 = vadd.f32 %v6361_v31, %v12507_v60  ;;  %v5977_v46 = vpop.f32.mrb[33].mxu0  ;;  %v6363_v9 = vpop.f32.mrb[33].mxu1 }
 0x6ab   :  { %v8812_v19 = vadd.f32 %v5977_v46, %v12512_v29  ;;  %v8876_v58 = vadd.f32 %v6363_v9, %v12516_v3  ;;  %v5979_v6 = vpop.f32.mrb[34].mxu0  ;;  %v6365_v12 = vpop.f32.mrb[34].mxu1 }
 0x6ac   :  { %7244 = vst [vmem:[%s13681_s13 + $0x1c0] sm:$0xff] %v8811_v22  ;;  %7246 = vst [vmem:[%s13681_s13 + $0x1d0] sm:$0xff] %v8875_v49  ;;  %v8813_v54 = vadd.f32 %v5979_v6, %v12503_v40  ;;  %v8877_v48 = vadd.f32 %v6365_v12, %v12507_v60  ;;  %v5981_v43 = vpop.f32.mrb[35].mxu0  ;;  %v6367_v35 = vpop.f32.mrb[35].mxu1 }
 0x6ad   :  { %7245 = vst [vmem:[%s13681_s13 + $0x1c8] sm:$0xff] %v8812_v19  ;;  %7247 = vst [vmem:[%s13681_s13 + $0x1d8] sm:$0xff] %v8876_v58  ;;  %v8814_v53 = vadd.f32 %v5981_v43, %v12512_v29  ;;  %v8878_v8 = vadd.f32 %v6367_v35, %v12516_v3 }
 0x6ae   :  { %7251 = vst [vmem:[%s13681_s13 + $0x1f8] sm:$0xff] %v8813_v54  ;;  %7253 = vst [vmem:[%s13681_s13 + $0x208] sm:$0xff] %v8877_v48  ;;  %6663 = vmatmul.mubr.bf16.gmra.mrb[140].mxu0 %v12065_v52  ;;  %7019 = vmatmul.mubr.bf16.gmra.mrb[140].mxu1 %v12065_v52 }
 0x6af   :  { %7252 = vst [vmem:[%s13681_s13 + $0x200] sm:$0xff] %v8814_v53  ;;  %7254 = vst [vmem:[%s13681_s13 + $0x210] sm:$0xff] %v8878_v8  ;;  %8024 = vmatprep.mubr.msk.bf16.mxu0 %vm5637_vm7, %v11581_v11  ;;  %8040 = vmatprep.mubr.msk.bf16.mxu1 %vm5637_vm7, %v11581_v11 }
 0x6b1   :  { %v5985_v10 = vpop.f32.mrb[36].mxu0  ;;  %v6371_v28 = vpop.f32.mrb[36].mxu1 }
 0x6b2   :  { %v8815_v2 = vadd.f32 %v5985_v10, %v12503_v40  ;;  %v8879_v52 = vadd.f32 %v6371_v28, %v12507_v60  ;;  %v5987_v33 = vpop.f32.mrb[37].mxu0  ;;  %v6373_v37 = vpop.f32.mrb[37].mxu1 }
 0x6b3   :  { %v8816_v25 = vadd.f32 %v5987_v33, %v12512_v29  ;;  %v8880_v24 = vadd.f32 %v6373_v37, %v12516_v3  ;;  %v5989_v55 = vpop.f32.mrb[38].mxu0  ;;  %v6375_v56 = vpop.f32.mrb[38].mxu1 }
 0x6b4   :  { %7258 = vst [vmem:[%s13681_s13 + $0x230] sm:$0xff] %v8815_v2  ;;  %7260 = vst [vmem:[%s13681_s13 + $0x240] sm:$0xff] %v8879_v52  ;;  %v8817_v11 = vadd.f32 %v5989_v55, %v12503_v40  ;;  %v8881_v59 = vadd.f32 %v6375_v56, %v12507_v60  ;;  %v5991_v51 = vpop.f32.mrb[39].mxu0  ;;  %v6377_v31 = vpop.f32.mrb[39].mxu1 }
 0x6b5   :  { %7259 = vst [vmem:[%s13681_s13 + $0x238] sm:$0xff] %v8816_v25  ;;  %7261 = vst [vmem:[%s13681_s13 + $0x248] sm:$0xff] %v8880_v24  ;;  %v8818_v22 = vadd.f32 %v5991_v51, %v12512_v29  ;;  %v8882_v49 = vadd.f32 %v6377_v31, %v12516_v3 }
 0x6b6   :  { %7265 = vst [vmem:[%s13681_s13 + $0x268] sm:$0xff] %v8817_v11  ;;  %7267 = vst [vmem:[%s13681_s13 + $0x278] sm:$0xff] %v8881_v59  ;;  %6706 = vmatmul.mubr.bf16.vlgmr.msra.gmra.mrb[80].mxu0 %v11577_v30  ;;  %7060 = vmatmul.mubr.bf16.vlgmr.msra.gmra.mrb[144].mxu1 %v11577_v30 }
 0x6b7   :  { %7266 = vst [vmem:[%s13681_s13 + $0x270] sm:$0xff] %v8818_v22  ;;  %7268 = vst [vmem:[%s13681_s13 + $0x280] sm:$0xff] %v8882_v49  ;;  %8025 = vmatprep.mubr.msk.bf16.mxu0 %vm5637_vm7, %v11625_v41  ;;  %8041 = vmatprep.mubr.msk.bf16.mxu1 %vm5637_vm7, %v11625_v41 }
 0x6b9   :  { %v5995_v46 = vpop.f32.mrb[40].mxu0  ;;  %v6381_v9 = vpop.f32.mrb[40].mxu1 }
 0x6ba   :  { %v8819_v19 = vadd.f32 %v5995_v46, %v12503_v40  ;;  %v8883_v30 = vadd.f32 %v6381_v9, %v12507_v60  ;;  %v5997_v58 = vpop.f32.mrb[41].mxu0  ;;  %v6383_v6 = vpop.f32.mrb[41].mxu1 }
 0x6bb   :  { %v8820_v12 = vadd.f32 %v5997_v58, %v12512_v29  ;;  %v8884_v54 = vadd.f32 %v6383_v6, %v12516_v3  ;;  %v5999_v48 = vpop.f32.mrb[42].mxu0  ;;  %v6385_v43 = vpop.f32.mrb[42].mxu1 }
 0x6bc   :  { %7272 = vst [vmem:[%s13681_s13 + $0x2a0] sm:$0xff] %v8819_v19  ;;  %7274 = vst [vmem:[%s13681_s13 + $0x2b0] sm:$0xff] %v8883_v30  ;;  %v8821_v41 = vadd.f32 %v5999_v48, %v12503_v40  ;;  %v8885_v35 = vadd.f32 %v6385_v43, %v12507_v60  ;;  %v6001_v53 = vpop.f32.mrb[43].mxu0  ;;  %v6387_v8 = vpop.f32.mrb[43].mxu1 }
 0x6bd   :  { %7273 = vst [vmem:[%s13681_s13 + $0x2a8] sm:$0xff] %v8820_v12  ;;  %7275 = vst [vmem:[%s13681_s13 + $0x2b8] sm:$0xff] %v8884_v54  ;;  %v8822_v10 = vadd.f32 %v6001_v53, %v12512_v29  ;;  %v8886_v28 = vadd.f32 %v6387_v8, %v12516_v3 }
 0x6be   :  { %7279 = vst [vmem:[%s13681_s13 + $0x2d8] sm:$0xff] %v8821_v41  ;;  %7281 = vst [vmem:[%s13681_s13 + $0x2e8] sm:$0xff] %v8885_v35  ;;  %6716 = vmatmul.mubr.bf16.gmra.mrb[84].mxu0 %v11621_v44  ;;  %7068 = vmatmul.mubr.bf16.gmra.mrb[148].mxu1 %v11621_v44 }
 0x6bf   :  { %7280 = vst [vmem:[%s13681_s13 + $0x2e0] sm:$0xff] %v8822_v10  ;;  %7282 = vst [vmem:[%s13681_s13 + $0x2f0] sm:$0xff] %v8886_v28  ;;  %8026 = vmatprep.mubr.msk.bf16.mxu0 %vm5637_vm7, %v11669_v17  ;;  %8042 = vmatprep.mubr.msk.bf16.mxu1 %vm5637_vm7, %v11669_v17 }
 0x6c1   :  { %v6005_v2 = vpop.f32.mrb[44].mxu0  ;;  %v6391_v52 = vpop.f32.mrb[44].mxu1 }
 0x6c2   :  { %v8823_v33 = vadd.f32 %v6005_v2, %v12503_v40  ;;  %v8887_v44 = vadd.f32 %v6391_v52, %v12507_v60  ;;  %v6007_v37 = vpop.f32.mrb[45].mxu0  ;;  %v6393_v25 = vpop.f32.mrb[45].mxu1 }
 0x6c3   :  { %v8824_v24 = vadd.f32 %v6007_v37, %v12512_v29  ;;  %v8888_v55 = vadd.f32 %v6393_v25, %v12516_v3  ;;  %v6009_v56 = vpop.f32.mrb[46].mxu0  ;;  %v6395_v11 = vpop.f32.mrb[46].mxu1 }
 0x6c4   :  { %7286 = vst [vmem:[%s13681_s13 + $0x310] sm:$0xff] %v8823_v33  ;;  %7288 = vst [vmem:[%s13681_s13 + $0x320] sm:$0xff] %v8887_v44  ;;  %v8825_v17 = vadd.f32 %v6009_v56, %v12503_v40  ;;  %v8889_v59 = vadd.f32 %v6395_v11, %v12507_v60  ;;  %v6011_v51 = vpop.f32.mrb[47].mxu0  ;;  %v6397_v31 = vpop.f32.mrb[47].mxu1 }
 0x6c5   :  { %7287 = vst [vmem:[%s13681_s13 + $0x318] sm:$0xff] %v8824_v24  ;;  %7289 = vst [vmem:[%s13681_s13 + $0x328] sm:$0xff] %v8888_v55  ;;  %v8826_v22 = vadd.f32 %v6011_v51, %v12512_v29  ;;  %v8890_v49 = vadd.f32 %v6397_v31, %v12516_v3 }
 0x6c6   :  { %7293 = vst [vmem:[%s13681_s13 + $0x348] sm:$0xff] %v8825_v17  ;;  %7295 = vst [vmem:[%s13681_s13 + $0x358] sm:$0xff] %v8889_v59  ;;  %6726 = vmatmul.mubr.bf16.gmra.mrb[88].mxu0 %v11665_v16  ;;  %7076 = vmatmul.mubr.bf16.gmra.mrb[152].mxu1 %v11665_v16 }
 0x6c7   :  { %7294 = vst [vmem:[%s13681_s13 + $0x350] sm:$0xff] %v8826_v22  ;;  %7296 = vst [vmem:[%s13681_s13 + $0x360] sm:$0xff] %v8890_v49  ;;  %8027 = vmatprep.mubr.msk.bf16.mxu0 %vm5637_vm7, %v11713_v20  ;;  %8043 = vmatprep.mubr.msk.bf16.mxu1 %vm5637_vm7, %v11713_v20 }
 0x6c9   :  { %v6015_v46 = vpop.f32.mrb[48].mxu0  ;;  %v6401_v9 = vpop.f32.mrb[48].mxu1 }
 0x6ca   :  { %v8827_v19 = vadd.f32 %v6015_v46, %v12503_v40  ;;  %v8891_v16 = vadd.f32 %v6401_v9, %v12507_v60  ;;  %v6017_v30 = vpop.f32.mrb[49].mxu0  ;;  %v6403_v58 = vpop.f32.mrb[49].mxu1 }
 0x6cb   :  { %v8828_v6 = vadd.f32 %v6017_v30, %v12512_v29  ;;  %v8892_v12 = vadd.f32 %v6403_v58, %v12516_v3  ;;  %v6019_v54 = vpop.f32.mrb[50].mxu0  ;;  %v6405_v48 = vpop.f32.mrb[50].mxu1 }
 0x6cc   :  { %7300 = vst [vmem:[%s13681_s13 + $0x380] sm:$0xff] %v8827_v19  ;;  %7302 = vst [vmem:[%s13681_s13 + $0x390] sm:$0xff] %v8891_v16  ;;  %v8829_v20 = vadd.f32 %v6019_v54, %v12503_v40  ;;  %v8893_v43 = vadd.f32 %v6405_v48, %v12507_v60  ;;  %v6021_v41 = vpop.f32.mrb[51].mxu0  ;;  %v6407_v35 = vpop.f32.mrb[51].mxu1 }
 0x6cd   :  { %7301 = vst [vmem:[%s13681_s13 + $0x388] sm:$0xff] %v8828_v6  ;;  %7303 = vst [vmem:[%s13681_s13 + $0x398] sm:$0xff] %v8892_v12  ;;  %v8830_v53 = vadd.f32 %v6021_v41, %v12512_v29  ;;  %v8894_v8 = vadd.f32 %v6407_v35, %v12516_v3 }
 0x6ce   :  { %7307 = vst [vmem:[%s13681_s13 + $0x3b8] sm:$0xff] %v8829_v20  ;;  %7309 = vst [vmem:[%s13681_s13 + $0x3c8] sm:$0xff] %v8893_v43  ;;  %6736 = vmatmul.mubr.bf16.gmra.mrb[92].mxu0 %v11709_v0  ;;  %7084 = vmatmul.mubr.bf16.gmra.mrb[156].mxu1 %v11709_v0 }
 0x6cf   :  { %7308 = vst [vmem:[%s13681_s13 + $0x3c0] sm:$0xff] %v8830_v53  ;;  %7310 = vst [vmem:[%s13681_s13 + $0x3d0] sm:$0xff] %v8894_v8  ;;  %8028 = vmatprep.mubr.msk.bf16.mxu0 %vm5637_vm7, %v11757_v61  ;;  %8044 = vmatprep.mubr.msk.bf16.mxu1 %vm5637_vm7, %v11757_v61 }
 0x6d1   :  { %v6025_v10 = vpop.f32.mrb[52].mxu0  ;;  %v6411_v28 = vpop.f32.mrb[52].mxu1 }
 0x6d2   :  { %v8831_v2 = vadd.f32 %v6025_v10, %v12503_v40  ;;  %v8895_v0 = vadd.f32 %v6411_v28, %v12507_v60  ;;  %v6027_v52 = vpop.f32.mrb[53].mxu0  ;;  %v6413_v33 = vpop.f32.mrb[53].mxu1 }
 0x6d3   :  { %v8832_v44 = vadd.f32 %v6027_v52, %v12512_v29  ;;  %v8896_v37 = vadd.f32 %v6413_v33, %v12516_v3  ;;  %v6029_v25 = vpop.f32.mrb[54].mxu0  ;;  %v6415_v24 = vpop.f32.mrb[54].mxu1 }
 0x6d4   :  { %7314 = vst [vmem:[%s13681_s13 + $0x3f0] sm:$0xff] %v8831_v2  ;;  %7316 = vst [vmem:[%s13681_s13 + $0x400] sm:$0xff] %v8895_v0  ;;  %v8833_v61 = vadd.f32 %v6029_v25, %v12503_v40  ;;  %v8897_v55 = vadd.f32 %v6415_v24, %v12507_v60  ;;  %v6031_v56 = vpop.f32.mrb[55].mxu0  ;;  %v6417_v11 = vpop.f32.mrb[55].mxu1 }
 0x6d5   :  { %7315 = vst [vmem:[%s13681_s13 + $0x3f8] sm:$0xff] %v8832_v44  ;;  %7317 = vst [vmem:[%s13681_s13 + $0x408] sm:$0xff] %v8896_v37  ;;  %v8834_v17 = vadd.f32 %v6031_v56, %v12512_v29  ;;  %v8898_v59 = vadd.f32 %v6417_v11, %v12516_v3 }
 0x6d6   :  { %7321 = vst [vmem:[%s13681_s13 + $0x428] sm:$0xff] %v8833_v61  ;;  %7323 = vst [vmem:[%s13681_s13 + $0x438] sm:$0xff] %v8897_v55  ;;  %6746 = vmatmul.mubr.bf16.gmra.mrb[96].mxu0 %v11753_v23  ;;  %7092 = vmatmul.mubr.bf16.gmra.mrb[160].mxu1 %v11753_v23 }
 0x6d7   :  { %7322 = vst [vmem:[%s13681_s13 + $0x430] sm:$0xff] %v8834_v17  ;;  %7324 = vst [vmem:[%s13681_s13 + $0x440] sm:$0xff] %v8898_v59  ;;  %8029 = vmatprep.mubr.msk.bf16.mxu0 %vm5637_vm7, %v11801_v14  ;;  %8045 = vmatprep.mubr.msk.bf16.mxu1 %vm5637_vm7, %v11801_v14 }
 0x6d9   :  { %v6035_v51 = vpop.f32.mrb[56].mxu0  ;;  %v6421_v31 = vpop.f32.mrb[56].mxu1 }
 0x6da   :  { %v8835_v22 = vadd.f32 %v6035_v51, %v12503_v40  ;;  %v8899_v23 = vadd.f32 %v6421_v31, %v12507_v60  ;;  %v6037_v49 = vpop.f32.mrb[57].mxu0  ;;  %v6423_v46 = vpop.f32.mrb[57].mxu1 }
 0x6db   :  { %v8836_v9 = vadd.f32 %v6037_v49, %v12512_v29  ;;  %v8900_v19 = vadd.f32 %v6423_v46, %v12516_v3  ;;  %v6039_v16 = vpop.f32.mrb[58].mxu0  ;;  %v6425_v30 = vpop.f32.mrb[58].mxu1 }
 0x6dc   :  { %7328 = vst [vmem:[%s13681_s13 + $0x460] sm:$0xff] %v8835_v22  ;;  %7330 = vst [vmem:[%s13681_s13 + $0x470] sm:$0xff] %v8899_v23  ;;  %v8837_v14 = vadd.f32 %v6039_v16, %v12503_v40  ;;  %v8901_v58 = vadd.f32 %v6425_v30, %v12507_v60  ;;  %v6041_v6 = vpop.f32.mrb[59].mxu0  ;;  %v6427_v12 = vpop.f32.mrb[59].mxu1 }
 0x6dd   :  { %7329 = vst [vmem:[%s13681_s13 + $0x468] sm:$0xff] %v8836_v9  ;;  %7331 = vst [vmem:[%s13681_s13 + $0x478] sm:$0xff] %v8900_v19  ;;  %v8838_v54 = vadd.f32 %v6041_v6, %v12512_v29  ;;  %v8902_v48 = vadd.f32 %v6427_v12, %v12516_v3 }
 0x6de   :  { %7335 = vst [vmem:[%s13681_s13 + $0x498] sm:$0xff] %v8837_v14  ;;  %7337 = vst [vmem:[%s13681_s13 + $0x4a8] sm:$0xff] %v8901_v58  ;;  %6756 = vmatmul.mubr.bf16.gmra.mrb[100].mxu0 %v11797_v18  ;;  %7100 = vmatmul.mubr.bf16.gmra.mrb[164].mxu1 %v11797_v18 }
 0x6df   :  { %7336 = vst [vmem:[%s13681_s13 + $0x4a0] sm:$0xff] %v8838_v54  ;;  %7338 = vst [vmem:[%s13681_s13 + $0x4b0] sm:$0xff] %v8902_v48  ;;  %8030 = vmatprep.mubr.msk.bf16.mxu0 %vm5637_vm7, %v11845_v34  ;;  %8046 = vmatprep.mubr.msk.bf16.mxu1 %vm5637_vm7, %v11845_v34 }
 0x6e1   :  { %v6045_v20 = vpop.f32.mrb[60].mxu0  ;;  %v6431_v43 = vpop.f32.mrb[60].mxu1 }
 0x6e2   :  { %v8839_v41 = vadd.f32 %v6045_v20, %v12503_v40  ;;  %v8903_v18 = vadd.f32 %v6431_v43, %v12507_v60  ;;  %v6047_v35 = vpop.f32.mrb[61].mxu0  ;;  %v6433_v53 = vpop.f32.mrb[61].mxu1 }
 0x6e3   :  { %v8840_v8 = vadd.f32 %v6047_v35, %v12512_v29  ;;  %v8904_v10 = vadd.f32 %v6433_v53, %v12516_v3  ;;  %v6049_v28 = vpop.f32.mrb[62].mxu0  ;;  %v6435_v2 = vpop.f32.mrb[62].mxu1 }
 0x6e4   :  { %7342 = vst [vmem:[%s13681_s13 + $0x4d0] sm:$0xff] %v8839_v41  ;;  %7344 = vst [vmem:[%s13681_s13 + $0x4e0] sm:$0xff] %v8903_v18  ;;  %v8841_v34 = vadd.f32 %v6049_v28, %v12503_v40  ;;  %v8905_v0 = vadd.f32 %v6435_v2, %v12507_v60  ;;  %v6051_v52 = vpop.f32.mrb[63].mxu0  ;;  %v6437_v33 = vpop.f32.mrb[63].mxu1 }
 0x6e5   :  { %7343 = vst [vmem:[%s13681_s13 + $0x4d8] sm:$0xff] %v8840_v8  ;;  %7345 = vst [vmem:[%s13681_s13 + $0x4e8] sm:$0xff] %v8904_v10  ;;  %v8842_v44 = vadd.f32 %v6051_v52, %v12512_v29  ;;  %v8906_v37 = vadd.f32 %v6437_v33, %v12516_v3 }
 0x6e6   :  { %7349 = vst [vmem:[%s13681_s13 + $0x508] sm:$0xff] %v8841_v34  ;;  %7351 = vst [vmem:[%s13681_s13 + $0x518] sm:$0xff] %v8905_v0  ;;  %6766 = vmatmul.mubr.bf16.gmra.mrb[104].mxu0 %v11841_v1  ;;  %7108 = vmatmul.mubr.bf16.gmra.mrb[168].mxu1 %v11841_v1 }
 0x6e7   :  { %7350 = vst [vmem:[%s13681_s13 + $0x510] sm:$0xff] %v8842_v44  ;;  %7352 = vst [vmem:[%s13681_s13 + $0x520] sm:$0xff] %v8906_v37  ;;  %8031 = vmatprep.mubr.msk.bf16.mxu0 %vm5637_vm7, %v11895_v45  ;;  %8047 = vmatprep.mubr.msk.bf16.mxu1 %vm5637_vm7, %v11895_v45 }
 0x6e9   :  { %v6055_v25 = vpop.f32.mrb[64].mxu0  ;;  %v6441_v24 = vpop.f32.mrb[64].mxu1 }
 0x6ea   :  { %v8843_v61 = vadd.f32 %v6055_v25, %v12503_v40  ;;  %v8907_v1 = vadd.f32 %v6441_v24, %v12507_v60  ;;  %v6057_v55 = vpop.f32.mrb[65].mxu0  ;;  %v6443_v56 = vpop.f32.mrb[65].mxu1 }
 0x6eb   :  { %v8844_v11 = vadd.f32 %v6057_v55, %v12512_v29  ;;  %v8908_v17 = vadd.f32 %v6443_v56, %v12516_v3  ;;  %v6059_v59 = vpop.f32.mrb[66].mxu0  ;;  %v6445_v51 = vpop.f32.mrb[66].mxu1 }
 0x6ec   :  { %7356 = vst [vmem:[%s13681_s13 + $0x540] sm:$0xff] %v8843_v61  ;;  %7358 = vst [vmem:[%s13681_s13 + $0x550] sm:$0xff] %v8907_v1  ;;  %v8845_v45 = vadd.f32 %v6059_v59, %v12503_v40  ;;  %v8909_v31 = vadd.f32 %v6445_v51, %v12507_v60  ;;  %v6061_v22 = vpop.f32.mrb[67].mxu0  ;;  %v6447_v23 = vpop.f32.mrb[67].mxu1 }
 0x6ed   :  { %7357 = vst [vmem:[%s13681_s13 + $0x548] sm:$0xff] %v8844_v11  ;;  %7359 = vst [vmem:[%s13681_s13 + $0x558] sm:$0xff] %v8908_v17  ;;  %v8846_v49 = vadd.f32 %v6061_v22, %v12512_v29  ;;  %v8910_v46 = vadd.f32 %v6447_v23, %v12516_v3 }
 0x6ee   :  { %7363 = vst [vmem:[%s13681_s13 + $0x578] sm:$0xff] %v8845_v45  ;;  %7365 = vst [vmem:[%s13681_s13 + $0x588] sm:$0xff] %v8909_v31  ;;  %6776 = vmatmul.mubr.bf16.gmra.mrb[108].mxu0 %v11891_v47  ;;  %7116 = vmatmul.mubr.bf16.gmra.mrb[172].mxu1 %v11891_v47 }
 0x6ef   :  { %7364 = vst [vmem:[%s13681_s13 + $0x580] sm:$0xff] %v8846_v49  ;;  %7366 = vst [vmem:[%s13681_s13 + $0x590] sm:$0xff] %v8910_v46  ;;  %8032 = vmatprep.mubr.msk.bf16.mxu0 %vm5637_vm7, %v11931_v38  ;;  %8048 = vmatprep.mubr.msk.bf16.mxu1 %vm5637_vm7, %v11931_v38 }
 0x6f1   :  { %v6065_v9 = vpop.f32.mrb[68].mxu0  ;;  %v6451_v19 = vpop.f32.mrb[68].mxu1 }
 0x6f2   :  { %v8847_v16 = vadd.f32 %v6065_v9, %v12503_v40  ;;  %v8911_v47 = vadd.f32 %v6451_v19, %v12507_v60  ;;  %v6067_v30 = vpop.f32.mrb[69].mxu0  ;;  %v6453_v14 = vpop.f32.mrb[69].mxu1 }
 0x6f3   :  { %v8848_v58 = vadd.f32 %v6067_v30, %v12512_v29  ;;  %v8912_v6 = vadd.f32 %v6453_v14, %v12516_v3  ;;  %v6069_v12 = vpop.f32.mrb[70].mxu0  ;;  %v6455_v54 = vpop.f32.mrb[70].mxu1 }
 0x6f4   :  { %7370 = vst [vmem:[%s13681_s13 + $0x5b0] sm:$0xff] %v8847_v16  ;;  %7372 = vst [vmem:[%s13681_s13 + $0x5c0] sm:$0xff] %v8911_v47  ;;  %v8849_v38 = vadd.f32 %v6069_v12, %v12503_v40  ;;  %v8913_v48 = vadd.f32 %v6455_v54, %v12507_v60  ;;  %v6071_v20 = vpop.f32.mrb[71].mxu0  ;;  %v6457_v43 = vpop.f32.mrb[71].mxu1 }
 0x6f5   :  { %7371 = vst [vmem:[%s13681_s13 + $0x5b8] sm:$0xff] %v8848_v58  ;;  %7373 = vst [vmem:[%s13681_s13 + $0x5c8] sm:$0xff] %v8912_v6  ;;  %v8850_v41 = vadd.f32 %v6071_v20, %v12512_v29  ;;  %v8914_v18 = vadd.f32 %v6457_v43, %v12516_v3 }
 0x6f6   :  { %7377 = vst [vmem:[%s13681_s13 + $0x5e8] sm:$0xff] %v8849_v38  ;;  %7379 = vst [vmem:[%s13681_s13 + $0x5f8] sm:$0xff] %v8913_v48  ;;  %6786 = vmatmul.mubr.bf16.gmra.mrb[112].mxu0 %v11927_v7  ;;  %7124 = vmatmul.mubr.bf16.gmra.mrb[176].mxu1 %v11927_v7 }
 0x6f7   :  { %7378 = vst [vmem:[%s13681_s13 + $0x5f0] sm:$0xff] %v8850_v41  ;;  %7380 = vst [vmem:[%s13681_s13 + $0x600] sm:$0xff] %v8914_v18  ;;  %8033 = vmatprep.mubr.msk.bf16.mxu0 %vm5637_vm7, %v11951_v36  ;;  %8049 = vmatprep.mubr.msk.bf16.mxu1 %vm5637_vm7, %v11951_v36 }
 0x6f9   :  { %v6075_v35 = vpop.f32.mrb[72].mxu0  ;;  %v6461_v53 = vpop.f32.mrb[72].mxu1 }
 0x6fa   :  { %v8851_v8 = vadd.f32 %v6075_v35, %v12503_v40  ;;  %v8915_v7 = vadd.f32 %v6461_v53, %v12507_v60  ;;  %v6077_v10 = vpop.f32.mrb[73].mxu0  ;;  %v6463_v28 = vpop.f32.mrb[73].mxu1 }
 0x6fb   :  { %v8852_v2 = vadd.f32 %v6077_v10, %v12512_v29  ;;  %v8916_v34 = vadd.f32 %v6463_v28, %v12516_v3  ;;  %v6079_v0 = vpop.f32.mrb[74].mxu0  ;;  %v6465_v52 = vpop.f32.mrb[74].mxu1 }
 0x6fc   :  { %7384 = vst [vmem:[%s13681_s13 + $0x620] sm:$0xff] %v8851_v8  ;;  %7386 = vst [vmem:[%s13681_s13 + $0x630] sm:$0xff] %v8915_v7  ;;  %v8853_v36 = vadd.f32 %v6079_v0, %v12503_v40  ;;  %v8917_v33 = vadd.f32 %v6465_v52, %v12507_v60  ;;  %v6081_v44 = vpop.f32.mrb[75].mxu0  ;;  %v6467_v37 = vpop.f32.mrb[75].mxu1 }
 0x6fd   :  { %7385 = vst [vmem:[%s13681_s13 + $0x628] sm:$0xff] %v8852_v2  ;;  %7387 = vst [vmem:[%s13681_s13 + $0x638] sm:$0xff] %v8916_v34  ;;  %v8854_v25 = vadd.f32 %v6081_v44, %v12512_v29  ;;  %v8918_v24 = vadd.f32 %v6467_v37, %v12516_v3 }
 0x6fe   :  { %7391 = vst [vmem:[%s13681_s13 + $0x658] sm:$0xff] %v8853_v36  ;;  %7393 = vst [vmem:[%s13681_s13 + $0x668] sm:$0xff] %v8917_v33  ;;  %6796 = vmatmul.mubr.bf16.gmra.mrb[116].mxu0 %v11947_v5  ;;  %7132 = vmatmul.mubr.bf16.gmra.mrb[180].mxu1 %v11947_v5 }
 0x6ff   :  { %7392 = vst [vmem:[%s13681_s13 + $0x660] sm:$0xff] %v8854_v25  ;;  %7394 = vst [vmem:[%s13681_s13 + $0x670] sm:$0xff] %v8918_v24  ;;  %8034 = vmatprep.mubr.msk.bf16.mxu0 %vm5637_vm7, %v11971_v4  ;;  %8050 = vmatprep.mubr.msk.bf16.mxu1 %vm5637_vm7, %v11971_v4 }
 0x701   :  { %v6085_v61 = vpop.f32.mrb[76].mxu0  ;;  %v6471_v1 = vpop.f32.mrb[76].mxu1 }
 0x702   :  { %v8855_v55 = vadd.f32 %v6085_v61, %v12503_v40  ;;  %v8919_v5 = vadd.f32 %v6471_v1, %v12507_v60  ;;  %v6087_v56 = vpop.f32.mrb[77].mxu0  ;;  %v6473_v11 = vpop.f32.mrb[77].mxu1 }
 0x703   :  { %v8856_v17 = vadd.f32 %v6087_v56, %v12512_v29  ;;  %v8920_v59 = vadd.f32 %v6473_v11, %v12516_v3  ;;  %v6089_v51 = vpop.f32.mrb[78].mxu0  ;;  %v6475_v45 = vpop.f32.mrb[78].mxu1 }
 0x704   :  { %7398 = vst [vmem:[%s13681_s13 + $0x690] sm:$0xff] %v8855_v55  ;;  %7400 = vst [vmem:[%s13681_s13 + $0x6a0] sm:$0xff] %v8919_v5  ;;  %v8857_v4 = vadd.f32 %v6089_v51, %v12503_v40  ;;  %v8921_v31 = vadd.f32 %v6475_v45, %v12507_v60  ;;  %v6091_v22 = vpop.f32.mrb[79].mxu0  ;;  %v6477_v23 = vpop.f32.mrb[79].mxu1 }
 0x705   :  { %7399 = vst [vmem:[%s13681_s13 + $0x698] sm:$0xff] %v8856_v17  ;;  %7401 = vst [vmem:[%s13681_s13 + $0x6a8] sm:$0xff] %v8920_v59  ;;  %v8858_v49 = vadd.f32 %v6091_v22, %v12512_v29  ;;  %v8922_v46 = vadd.f32 %v6477_v23, %v12516_v3 }
 0x706   :  { %7405 = vst [vmem:[%s13681_s13 + $0x6c8] sm:$0xff] %v8857_v4  ;;  %7407 = vst [vmem:[%s13681_s13 + $0x6d8] sm:$0xff] %v8921_v31  ;;  %6806 = vmatmul.mubr.bf16.gmra.mrb[120].mxu0 %v11967_v50  ;;  %7140 = vmatmul.mubr.bf16.gmra.mrb[184].mxu1 %v11967_v50 }
 0x707   :  { %7406 = vst [vmem:[%s13681_s13 + $0x6d0] sm:$0xff] %v8858_v49  ;;  %7408 = vst [vmem:[%s13681_s13 + $0x6e0] sm:$0xff] %v8922_v46  ;;  %8035 = vmatprep.mubr.msk.bf16.mxu0 %vm5637_vm7, %v11991_v62  ;;  %8051 = vmatprep.mubr.msk.bf16.mxu1 %vm5637_vm7, %v11991_v62 }
 0x709   :  { %v8537_v40 = vpop.f32.mrb[80].mxu1 }
 0x70a   :  { %v8538_v60 = vpop.f32.mrb[81].mxu1 }
 0x70b   :  { %v13118_v29 = vadd.f32 %v8538_v60, %v8537_v40  ;;  %v8540_v3 = vpop.f32.mrb[82].mxu1 }
 0x70c   :  { %v8541_v50 = vpop.f32.mrb[83].mxu1 }
 0x70d   :  { %v13120_v9 = vadd.f32 %v8541_v50, %v8540_v3 }
 0x70e   :  { %6816 = vmatmul.mubr.bf16.gmra.mrb[124].mxu0 %v11987_v15  ;;  %7148 = vmatmul.mubr.bf16.gmra.mrb[188].mxu1 %v11987_v15 }
 0x70f   :  { %8036 = vmatprep.mubr.msk.bf16.mxu0 %vm5637_vm7, %v12011_v13  ;;  %8052 = vmatprep.mubr.msk.bf16.mxu1 %vm5637_vm7, %v12011_v13 }
 0x711   :  { %v8543_v19 = vpop.f32.mrb[84].mxu1 }
 0x712   :  { %v8544_v62 = vpop.f32.mrb[85].mxu1 }
 0x713   :  { %v13128_v16 = vadd.f32 %v8544_v62, %v8543_v19  ;;  %v8546_v47 = vpop.f32.mrb[86].mxu1 }
 0x714   :  { %v8547_v30 = vpop.f32.mrb[87].mxu1 }
 0x715   :  { %v13130_v14 = vadd.f32 %v8547_v30, %v8546_v47 }
 0x716   :  { %6826 = vmatmul.mubr.bf16.gmra.mrb[128].mxu0 %v12007_v39  ;;  %7156 = vmatmul.mubr.bf16.gmra.mrb[192].mxu1 %v12007_v39 }
 0x717   :  { %8037 = vmatprep.mubr.msk.bf16.mxu0 %vm5637_vm7, %v12031_v57  ;;  %8053 = vmatprep.mubr.msk.bf16.mxu1 %vm5637_vm7, %v12031_v57 }
 0x719   :  { %v8549_v15 = vpop.f32.mrb[88].mxu1 }
 0x71a   :  { %v8550_v13 = vpop.f32.mrb[89].mxu1 }
 0x71b   :  { %v13138_v58 = vadd.f32 %v8550_v13, %v8549_v15  ;;  %v8552_v6 = vpop.f32.mrb[90].mxu1 }
 0x71c   :  { %v8553_v12 = vpop.f32.mrb[91].mxu1 }
 0x71d   :  { %v13140_v54 = vadd.f32 %v8553_v12, %v8552_v6 }
 0x71e   :  { %6836 = vmatmul.mubr.bf16.gmra.mrb[132].mxu0 %v12027_v26  ;;  %7164 = vmatmul.mubr.bf16.gmra.mrb[196].mxu1 %v12027_v26 }
 0x71f   :  { %8038 = vmatprep.mubr.msk.bf16.mxu0 %vm5637_vm7, %v12051_v21  ;;  %8054 = vmatprep.mubr.msk.bf16.mxu1 %vm5637_vm7, %v12051_v21 }
 0x721   :  { %v8555_v39 = vpop.f32.mrb[92].mxu1 }
 0x722   :  { %v8556_v57 = vpop.f32.mrb[93].mxu1 }
 0x723   :  { %v13148_v38 = vadd.f32 %v8556_v57, %v8555_v39  ;;  %v8558_v48 = vpop.f32.mrb[94].mxu1 }
 0x724   :  { %v8559_v20 = vpop.f32.mrb[95].mxu1 }
 0x725   :  { %v13150_v43 = vadd.f32 %v8559_v20, %v8558_v48 }
 0x726   :  { %6846 = vmatmul.mubr.bf16.gmra.mrb[136].mxu0 %v12047_v27  ;;  %7172 = vmatmul.mubr.bf16.gmra.mrb[200].mxu1 %v12047_v27 }
 0x727   :  { %8039 = vmatprep.mubr.msk.bf16.mxu0 %vm5637_vm7, %v12071_v42  ;;  %8055 = vmatprep.mubr.msk.bf16.mxu1 %vm5637_vm7, %v12071_v42 }
 0x729   :  { %v8561_v26 = vpop.f32.mrb[96].mxu1 }
 0x72a   :  { %v8562_v21 = vpop.f32.mrb[97].mxu1 }
 0x72b   :  { %v13158_v41 = vadd.f32 %v8562_v21, %v8561_v26  ;;  %v8564_v18 = vpop.f32.mrb[98].mxu1 }
 0x72c   :  { %v8565_v35 = vpop.f32.mrb[99].mxu1 }
 0x72d   :  { %v13160_v53 = vadd.f32 %v8565_v35, %v8564_v18 }
 0x72e   :  { %6856 = vmatmul.mubr.bf16.gmra.mrb[140].mxu0 %v12067_v32  ;;  %7180 = vmatmul.mubr.bf16.gmra.mrb[204].mxu1 %v12067_v32 }
 0x731   :  { %v8567_v8 = vpop.f32.mrb[100].mxu1 }
 0x732   :  { %v8568_v27 = vpop.f32.mrb[101].mxu1 }
 0x733   :  { %v13164_v7 = vadd.f32 %v8568_v27, %v8567_v8  ;;  %v8570_v10 = vpop.f32.mrb[102].mxu1 }
 0x734   :  { %v8571_v28 = vpop.f32.mrb[103].mxu1 }
 0x735   :  { %v13166_v2 = vadd.f32 %v8571_v28, %v8570_v10 }
 0x739   :  { %v8573_v42 = vpop.f32.mrb[104].mxu1 }
 0x73a   :  { %v8574_v34 = vpop.f32.mrb[105].mxu1 }
 0x73b   :  { %v13168_v0 = vadd.f32 %v8574_v34, %v8573_v42  ;;  %v8576_v52 = vpop.f32.mrb[106].mxu1 }
 0x73c   :  { %v8577_v36 = vpop.f32.mrb[107].mxu1 }
 0x73d   :  { %v13170_v33 = vadd.f32 %v8577_v36, %v8576_v52 }
 0x741   :  { %v8579_v44 = vpop.f32.mrb[108].mxu1 }
 0x742   :  { %v8580_v37 = vpop.f32.mrb[109].mxu1 }
 0x743   :  { %v13172_v25 = vadd.f32 %v8580_v37, %v8579_v44  ;;  %v8582_v32 = vpop.f32.mrb[110].mxu1  ;;  %v4486_v37 = vsub.s32 4, %v13788_v63 }
 0x744   :  { %v8583_v24 = vpop.f32.mrb[111].mxu1 }
 0x745   :  { %v13174_v61 = vadd.f32 %v8583_v24, %v8582_v32  ;;  %v4494_v32 = vsub.s32 6, %v13788_v63 }
 0x749   :  { %v8585_v1 = vpop.f32.mrb[112].mxu1 }
 0x74a   :  { %v8586_v55 = vpop.f32.mrb[113].mxu1 }
 0x74b   :  { %v13176_v5 = vadd.f32 %v8586_v55, %v8585_v1  ;;  %v8588_v56 = vpop.f32.mrb[114].mxu1  ;;  %v4490_v55 = vsub.s32 5, %v13788_v63 }
 0x74c   :  { %v8589_v11 = vpop.f32.mrb[115].mxu1 }
 0x74d   :  { %v13178_v17 = vadd.f32 %v8589_v11, %v8588_v56 }
 0x751   :  { %v8591_v59 = vpop.f32.mrb[116].mxu1 }
 0x752   :  { %v8592_v51 = vpop.f32.mrb[117].mxu1 }
 0x753   :  { %v13180_v45 = vadd.f32 %v8592_v51, %v8591_v59  ;;  %v8594_v4 = vpop.f32.mrb[118].mxu1  ;;  %v9958_v59 = vld [vmem:[%s13680_s12] sm:$0x7f] }
 0x754   :  { %v8595_v31 = vpop.f32.mrb[119].mxu1  ;;  %v13214_v51 = vrot.slane %v9958_v59, %v4486_v37 }
 0x755   :  { %v13182_v22 = vadd.f32 %v8595_v31, %v8594_v4  ;;  %v13216_v4 = vrot.slane %v9958_v59, %v4494_v32  ;;  %v13218_v31 = vrot.slane %v9958_v59, %v4490_v55 }
 0x757   :  { %v6901_v63 = vadd.f32 %v13118_v29, %v13216_v4 }
 0x759   :  { %v8597_v23 = vpop.f32.mrb[120].mxu1 }
 0x75a   :  { %v8598_v49 = vpop.f32.mrb[121].mxu1 }
 0x75b   :  { %v13184_v46 = vadd.f32 %v8598_v49, %v8597_v23  ;;  %v8600_v40 = vpop.f32.mrb[122].mxu1 }
 0x75c   :  { %v8601_v60 = vpop.f32.mrb[123].mxu1 }
 0x75d   :  { %v13186_v3 = vadd.f32 %v8601_v60, %v8600_v40 }
 0x761   :  { %v8603_v50 = vpop.f32.mrb[124].mxu1 }
 0x762   :  { %v8604_v19 = vpop.f32.mrb[125].mxu1 }
 0x763   :  { %v13188_v62 = vadd.f32 %v8604_v19, %v8603_v50  ;;  %v8606_v47 = vpop.f32.mrb[126].mxu1 }
 0x764   :  { %v8607_v30 = vpop.f32.mrb[127].mxu1 }
 0x765   :  { %v13190_v15 = vadd.f32 %v8607_v30, %v8606_v47 }
 0x769   :  { %v8609_v13 = vpop.f32.mrb[128].mxu1 }
 0x76a   :  { %v8610_v6 = vpop.f32.mrb[129].mxu1 }
 0x76b   :  { %v13192_v12 = vadd.f32 %v8610_v6, %v8609_v13  ;;  %v8612_v39 = vpop.f32.mrb[130].mxu1 }
 0x76c   :  { %v8613_v57 = vpop.f32.mrb[131].mxu1 }
 0x76d   :  { %v13194_v48 = vadd.f32 %v8613_v57, %v8612_v39 }
 0x771   :  { %v8615_v20 = vpop.f32.mrb[132].mxu1 }
 0x772   :  { %v8616_v26 = vpop.f32.mrb[133].mxu1 }
 0x773   :  { %v13196_v21 = vadd.f32 %v8616_v26, %v8615_v20  ;;  %v8618_v18 = vpop.f32.mrb[134].mxu1  ;;  %v6904_v20 = vadd.f32 %v13120_v9, %v13216_v4 }
 0x774   :  { %v8619_v35 = vpop.f32.mrb[135].mxu1 }
 0x775   :  { %v13198_v8 = vadd.f32 %v8619_v35, %v8618_v18 }
 0x779   :  { %v8621_v27 = vpop.f32.mrb[136].mxu1 }
 0x77a   :  { %v8622_v10 = vpop.f32.mrb[137].mxu1 }
 0x77b   :  { %v13200_v28 = vadd.f32 %v8622_v10, %v8621_v27  ;;  %v8624_v42 = vpop.f32.mrb[138].mxu1 }
 0x77c   :  { %v8625_v34 = vpop.f32.mrb[139].mxu1 }
 0x77d   :  { %v13202_v52 = vadd.f32 %v8625_v34, %v8624_v42 }
 0x781   :  { %v8627_v36 = vpop.f32.mrb[140].mxu1 }
 0x782   :  { %v8628_v44 = vpop.f32.mrb[141].mxu1 }
 0x783   :  { %v13206_v24 = vadd.f32 %v8628_v44, %v8627_v36  ;;  %v8630_v1 = vpop.f32.mrb[142].mxu1  ;;  %v6909_v36 = vadd.f32 %v13128_v16, %v13216_v4 }
 0x784   :  { %v8631_v56 = vpop.f32.mrb[143].mxu1 }
 0x785   :  { %v13209_v11 = vadd.f32 %v8631_v56, %v8630_v1 }
 0x789   :  { %v6707_v23 = vpop.f32.mrb[80].mxu0  ;;  %v8649_v49 = vpop.f32.mrb[144].mxu1 }
 0x78a   :  { %v8923_v40 = vadd.f32 %v6707_v23, %v13214_v51  ;;  %v6709_v60 = vpop.f32.mrb[81].mxu0  ;;  %v8650_v50 = vpop.f32.mrb[145].mxu1  ;;  %v6912_v23 = vadd.f32 %v13130_v14, %v13216_v4 }
 0x78b   :  { %v8924_v19 = vadd.f32 %v6709_v60, %v13218_v31  ;;  %v8651_v47 = vadd.f32 %v8650_v50, %v8649_v49  ;;  %v6711_v30 = vpop.f32.mrb[82].mxu0  ;;  %v8652_v13 = vpop.f32.mrb[146].mxu1 }
 0x78c   :  { %7192 = vst [vmem:[%s13681_s13 + $0x20] sm:$0xff] %v8923_v40  ;;  %v8925_v6 = vadd.f32 %v6711_v30, %v13214_v51  ;;  %v6713_v39 = vpop.f32.mrb[83].mxu0  ;;  %v8653_v57 = vpop.f32.mrb[147].mxu1  ;;  %v6917_v30 = vadd.f32 %v13138_v58, %v13216_v4 }
 0x78d   :  { %7193 = vst [vmem:[%s13681_s13 + $0x28] sm:$0xff] %v8924_v19  ;;  %v7062_v29 = vadd.f32 %v8651_v47, %v6901_v63  ;;  %v8926_v26 = vadd.f32 %v6713_v39, %v13218_v31  ;;  %v8654_v18 = vadd.f32 %v8653_v57, %v8652_v13 }
 0x78e   :  { %7199 = vst [vmem:[%s13681_s13 + $0x58] sm:$0xff] %v8925_v6 }
 0x78f   :  { %7194 = vst.msk [vmem:[%s13681_s13 + $0x30] sm:$0xff] %vm1132_vm0, %v7062_v29  ;;  %7200 = vst [vmem:[%s13681_s13 + $0x60] sm:$0xff] %v8926_v26  ;;  %v7065_v9 = vadd.f32 %v8654_v18, %v6904_v20  ;;  %v6920_v18 = vadd.f32 %v13140_v54, %v13216_v4 }
 0x791   :  { %7201 = vst.msk [vmem:[%s13681_s13 + $0x68] sm:$0xff] %vm1132_vm0, %v7065_v9  ;;  %v6717_v35 = vpop.f32.mrb[84].mxu0  ;;  %v8655_v27 = vpop.f32.mrb[148].mxu1 }
 0x792   :  { %v8927_v10 = vadd.f32 %v6717_v35, %v13214_v51  ;;  %v6719_v42 = vpop.f32.mrb[85].mxu0  ;;  %v8656_v34 = vpop.f32.mrb[149].mxu1 }
 0x793   :  { %v8928_v44 = vadd.f32 %v6719_v42, %v13218_v31  ;;  %v8657_v37 = vadd.f32 %v8656_v34, %v8655_v27  ;;  %v6721_v32 = vpop.f32.mrb[86].mxu0  ;;  %v8658_v1 = vpop.f32.mrb[150].mxu1 }
 0x794   :  { %7206 = vst [vmem:[%s13681_s13 + $0x90] sm:$0xff] %v8927_v10  ;;  %v8929_v55 = vadd.f32 %v6721_v32, %v13214_v51  ;;  %v6723_v56 = vpop.f32.mrb[87].mxu0  ;;  %v8659_v59 = vpop.f32.mrb[151].mxu1 }
 0x795   :  { %7207 = vst [vmem:[%s13681_s13 + $0x98] sm:$0xff] %v8928_v44  ;;  %v7070_v16 = vadd.f32 %v8657_v37, %v6909_v36  ;;  %v8930_v49 = vadd.f32 %v6723_v56, %v13218_v31  ;;  %v8660_v40 = vadd.f32 %v8659_v59, %v8658_v1  ;;  %v6925_v44 = vadd.f32 %v13148_v38, %v13216_v4 }
 0x796   :  { %7213 = vst [vmem:[%s13681_s13 + $0xc8] sm:$0xff] %v8929_v55 }
 0x797   :  { %7208 = vst.msk [vmem:[%s13681_s13 + $0xa0] sm:$0xff] %vm1132_vm0, %v7070_v16  ;;  %7214 = vst [vmem:[%s13681_s13 + $0xd0] sm:$0xff] %v8930_v49  ;;  %v7073_v14 = vadd.f32 %v8660_v40, %v6912_v23  ;;  %v6928_v16 = vadd.f32 %v13150_v43, %v13216_v4 }
 0x799   :  { %7215 = vst.msk [vmem:[%s13681_s13 + $0xd8] sm:$0xff] %vm1132_vm0, %v7073_v14  ;;  %v6727_v60 = vpop.f32.mrb[88].mxu0  ;;  %v8661_v50 = vpop.f32.mrb[152].mxu1 }
 0x79a   :  { %v8931_v63 = vadd.f32 %v6727_v60, %v13214_v51  ;;  %v6729_v19 = vpop.f32.mrb[89].mxu0  ;;  %v8662_v47 = vpop.f32.mrb[153].mxu1 }
 0x79b   :  { %v8932_v13 = vadd.f32 %v6729_v19, %v13218_v31  ;;  %v8663_v6 = vadd.f32 %v8662_v47, %v8661_v50  ;;  %v6731_v39 = vpop.f32.mrb[90].mxu0  ;;  %v8664_v57 = vpop.f32.mrb[154].mxu1  ;;  %v6933_v47 = vadd.f32 %v13158_v41, %v13216_v4 }
 0x79c   :  { %7220 = vst [vmem:[%s13681_s13 + $0x100] sm:$0xff] %v8931_v63  ;;  %v8933_v20 = vadd.f32 %v6731_v39, %v13214_v51  ;;  %v6733_v29 = vpop.f32.mrb[91].mxu0  ;;  %v8665_v26 = vpop.f32.mrb[155].mxu1 }
 0x79d   :  { %7221 = vst [vmem:[%s13681_s13 + $0x108] sm:$0xff] %v8932_v13  ;;  %v7078_v58 = vadd.f32 %v8663_v6, %v6917_v30  ;;  %v8934_v9 = vadd.f32 %v6733_v29, %v13218_v31  ;;  %v8666_v35 = vadd.f32 %v8665_v26, %v8664_v57  ;;  %v6936_v26 = vadd.f32 %v13160_v53, %v13216_v4 }
 0x79e   :  { %7227 = vst [vmem:[%s13681_s13 + $0x138] sm:$0xff] %v8933_v20 }
 0x79f   :  { %7222 = vst.msk [vmem:[%s13681_s13 + $0x110] sm:$0xff] %vm1132_vm0, %v7078_v58  ;;  %7228 = vst [vmem:[%s13681_s13 + $0x140] sm:$0xff] %v8934_v9  ;;  %v7081_v54 = vadd.f32 %v8666_v35, %v6920_v18 }
 0x7a1   :  { %7229 = vst.msk [vmem:[%s13681_s13 + $0x148] sm:$0xff] %vm1132_vm0, %v7081_v54  ;;  %v6737_v27 = vpop.f32.mrb[92].mxu0  ;;  %v8667_v10 = vpop.f32.mrb[156].mxu1 }
 0x7a2   :  { %v8935_v42 = vadd.f32 %v6737_v27, %v13214_v51  ;;  %v6739_v34 = vpop.f32.mrb[93].mxu0  ;;  %v8668_v36 = vpop.f32.mrb[157].mxu1 }
 0x7a3   :  { %v8936_v37 = vadd.f32 %v6739_v34, %v13218_v31  ;;  %v8669_v32 = vadd.f32 %v8668_v36, %v8667_v10  ;;  %v6741_v1 = vpop.f32.mrb[94].mxu0  ;;  %v8670_v55 = vpop.f32.mrb[158].mxu1 }
 0x7a4   :  { %7234 = vst [vmem:[%s13681_s13 + $0x170] sm:$0xff] %v8935_v42  ;;  %v8937_v56 = vadd.f32 %v6741_v1, %v13214_v51  ;;  %v6743_v59 = vpop.f32.mrb[95].mxu0  ;;  %v8671_v23 = vpop.f32.mrb[159].mxu1  ;;  %v6941_v42 = vadd.f32 %v13164_v7, %v13216_v4 }
 0x7a5   :  { %7235 = vst [vmem:[%s13681_s13 + $0x178] sm:$0xff] %v8936_v37  ;;  %v7086_v38 = vadd.f32 %v8669_v32, %v6925_v44  ;;  %v8938_v49 = vadd.f32 %v6743_v59, %v13218_v31  ;;  %v8672_v40 = vadd.f32 %v8671_v23, %v8670_v55 }
 0x7a6   :  { %7241 = vst [vmem:[%s13681_s13 + $0x1a8] sm:$0xff] %v8937_v56  ;;  %v6944_v56 = vadd.f32 %v13166_v2, %v13216_v4 }
 0x7a7   :  { %7236 = vst.msk [vmem:[%s13681_s13 + $0x180] sm:$0xff] %vm1132_vm0, %v7086_v38  ;;  %7242 = vst [vmem:[%s13681_s13 + $0x1b0] sm:$0xff] %v8938_v49  ;;  %v7089_v43 = vadd.f32 %v8672_v40, %v6928_v16 }
 0x7a9   :  { %7243 = vst.msk [vmem:[%s13681_s13 + $0x1b8] sm:$0xff] %vm1132_vm0, %v7089_v43  ;;  %v6747_v14 = vpop.f32.mrb[96].mxu0  ;;  %v8673_v60 = vpop.f32.mrb[160].mxu1 }
 0x7aa   :  { %v8939_v50 = vadd.f32 %v6747_v14, %v13214_v51  ;;  %v6749_v63 = vpop.f32.mrb[97].mxu0  ;;  %v8674_v19 = vpop.f32.mrb[161].mxu1  ;;  %v6949_v14 = vadd.f32 %v13168_v0, %v13216_v4 }
 0x7ab   :  { %v8940_v30 = vadd.f32 %v6749_v63, %v13218_v31  ;;  %v8675_v13 = vadd.f32 %v8674_v19, %v8673_v60  ;;  %v6751_v6 = vpop.f32.mrb[98].mxu0  ;;  %v8676_v39 = vpop.f32.mrb[162].mxu1 }
 0x7ac   :  { %7248 = vst [vmem:[%s13681_s13 + $0x1e0] sm:$0xff] %v8939_v50  ;;  %v8941_v57 = vadd.f32 %v6751_v6, %v13214_v51  ;;  %v6753_v20 = vpop.f32.mrb[99].mxu0  ;;  %v8677_v29 = vpop.f32.mrb[163].mxu1  ;;  %v6952_v6 = vadd.f32 %v13170_v33, %v13216_v4 }
 0x7ad   :  { %7249 = vst [vmem:[%s13681_s13 + $0x1e8] sm:$0xff] %v8940_v30  ;;  %v7094_v41 = vadd.f32 %v8675_v13, %v6933_v47  ;;  %v8942_v18 = vadd.f32 %v6753_v20, %v13218_v31  ;;  %v8678_v58 = vadd.f32 %v8677_v29, %v8676_v39 }
 0x7ae   :  { %7255 = vst [vmem:[%s13681_s13 + $0x218] sm:$0xff] %v8941_v57 }
 0x7af   :  { %7250 = vst.msk [vmem:[%s13681_s13 + $0x1f0] sm:$0xff] %vm1132_vm0, %v7094_v41  ;;  %7256 = vst [vmem:[%s13681_s13 + $0x220] sm:$0xff] %v8942_v18  ;;  %v7097_v53 = vadd.f32 %v8678_v58, %v6936_v26  ;;  %v6957_v58 = vadd.f32 %v13172_v25, %v13216_v4 }
 0x7b1   :  { %7257 = vst.msk [vmem:[%s13681_s13 + $0x228] sm:$0xff] %vm1132_vm0, %v7097_v53  ;;  %v6757_v9 = vpop.f32.mrb[100].mxu0  ;;  %v8679_v35 = vpop.f32.mrb[164].mxu1 }
 0x7b2   :  { %v8943_v54 = vadd.f32 %v6757_v9, %v13214_v51  ;;  %v6759_v27 = vpop.f32.mrb[101].mxu0  ;;  %v8680_v10 = vpop.f32.mrb[165].mxu1 }
 0x7b3   :  { %v8944_v34 = vadd.f32 %v6759_v27, %v13218_v31  ;;  %v8681_v36 = vadd.f32 %v8680_v10, %v8679_v35  ;;  %v6761_v44 = vpop.f32.mrb[102].mxu0  ;;  %v8682_v37 = vpop.f32.mrb[166].mxu1 }
 0x7b4   :  { %7262 = vst [vmem:[%s13681_s13 + $0x250] sm:$0xff] %v8943_v54  ;;  %v8945_v32 = vadd.f32 %v6761_v44, %v13214_v51  ;;  %v6763_v1 = vpop.f32.mrb[103].mxu0  ;;  %v8683_v55 = vpop.f32.mrb[167].mxu1 }
 0x7b5   :  { %7263 = vst [vmem:[%s13681_s13 + $0x258] sm:$0xff] %v8944_v34  ;;  %v7102_v7 = vadd.f32 %v8681_v36, %v6941_v42  ;;  %v8946_v59 = vadd.f32 %v6763_v1, %v13218_v31  ;;  %v8684_v23 = vadd.f32 %v8683_v55, %v8682_v37  ;;  %v6960_v34 = vadd.f32 %v13174_v61, %v13216_v4 }
 0x7b6   :  { %7269 = vst [vmem:[%s13681_s13 + $0x288] sm:$0xff] %v8945_v32 }
 0x7b7   :  { %7264 = vst.msk [vmem:[%s13681_s13 + $0x260] sm:$0xff] %vm1132_vm0, %v7102_v7  ;;  %7270 = vst [vmem:[%s13681_s13 + $0x290] sm:$0xff] %v8946_v59  ;;  %v7105_v2 = vadd.f32 %v8684_v23, %v6944_v56  ;;  %v6965_v7 = vadd.f32 %v13176_v5, %v13216_v4 }
 0x7b9   :  { %7271 = vst.msk [vmem:[%s13681_s13 + $0x298] sm:$0xff] %vm1132_vm0, %v7105_v2  ;;  %v6767_v16 = vpop.f32.mrb[104].mxu0  ;;  %v8685_v38 = vpop.f32.mrb[168].mxu1 }
 0x7ba   :  { %v8947_v49 = vadd.f32 %v6767_v16, %v13214_v51  ;;  %v6769_v40 = vpop.f32.mrb[105].mxu0  ;;  %v8686_v43 = vpop.f32.mrb[169].mxu1 }
 0x7bb   :  { %v8948_v60 = vadd.f32 %v6769_v40, %v13218_v31  ;;  %v8687_v50 = vadd.f32 %v8686_v43, %v8685_v38  ;;  %v6771_v63 = vpop.f32.mrb[106].mxu0  ;;  %v8688_v19 = vpop.f32.mrb[170].mxu1  ;;  %v6968_v43 = vadd.f32 %v13178_v17, %v13216_v4 }
 0x7bc   :  { %7276 = vst [vmem:[%s13681_s13 + $0x2c0] sm:$0xff] %v8947_v49  ;;  %v8949_v47 = vadd.f32 %v6771_v63, %v13214_v51  ;;  %v6773_v30 = vpop.f32.mrb[107].mxu0  ;;  %v8689_v13 = vpop.f32.mrb[171].mxu1 }
 0x7bd   :  { %7277 = vst [vmem:[%s13681_s13 + $0x2c8] sm:$0xff] %v8948_v60  ;;  %v7110_v0 = vadd.f32 %v8687_v50, %v6949_v14  ;;  %v8950_v39 = vadd.f32 %v6773_v30, %v13218_v31  ;;  %v8690_v57 = vadd.f32 %v8689_v13, %v8688_v19  ;;  %v6973_v13 = vadd.f32 %v13180_v45, %v13216_v4 }
 0x7be   :  { %7283 = vst [vmem:[%s13681_s13 + $0x2f8] sm:$0xff] %v8949_v47 }
 0x7bf   :  { %7278 = vst.msk [vmem:[%s13681_s13 + $0x2d0] sm:$0xff] %vm1132_vm0, %v7110_v0  ;;  %7284 = vst [vmem:[%s13681_s13 + $0x300] sm:$0xff] %v8950_v39  ;;  %v7113_v33 = vadd.f32 %v8690_v57, %v6952_v6 }
 0x7c1   :  { %7285 = vst.msk [vmem:[%s13681_s13 + $0x308] sm:$0xff] %vm1132_vm0, %v7113_v33  ;;  %v6777_v20 = vpop.f32.mrb[108].mxu0  ;;  %v8691_v29 = vpop.f32.mrb[172].mxu1 }
 0x7c2   :  { %v8951_v26 = vadd.f32 %v6777_v20, %v13214_v51  ;;  %v6779_v41 = vpop.f32.mrb[109].mxu0  ;;  %v8692_v18 = vpop.f32.mrb[173].mxu1 }
 0x7c3   :  { %v8952_v53 = vadd.f32 %v6779_v41, %v13218_v31  ;;  %v8693_v9 = vadd.f32 %v8692_v18, %v8691_v29  ;;  %v6781_v35 = vpop.f32.mrb[110].mxu0  ;;  %v8694_v54 = vpop.f32.mrb[174].mxu1 }
 0x7c4   :  { %7290 = vst [vmem:[%s13681_s13 + $0x330] sm:$0xff] %v8951_v26  ;;  %v8953_v27 = vadd.f32 %v6781_v35, %v13214_v51  ;;  %v6783_v10 = vpop.f32.mrb[111].mxu0  ;;  %v8695_v42 = vpop.f32.mrb[175].mxu1  ;;  %v6976_v26 = vadd.f32 %v13182_v22, %v13216_v4 }
 0x7c5   :  { %7291 = vst [vmem:[%s13681_s13 + $0x338] sm:$0xff] %v8952_v53  ;;  %v7118_v25 = vadd.f32 %v8693_v9, %v6957_v58  ;;  %v8954_v36 = vadd.f32 %v6783_v10, %v13218_v31  ;;  %v8696_v44 = vadd.f32 %v8695_v42, %v8694_v54 }
 0x7c6   :  { %7297 = vst [vmem:[%s13681_s13 + $0x368] sm:$0xff] %v8953_v27  ;;  %v6981_v27 = vadd.f32 %v13184_v46, %v13216_v4 }
 0x7c7   :  { %7292 = vst.msk [vmem:[%s13681_s13 + $0x340] sm:$0xff] %vm1132_vm0, %v7118_v25  ;;  %7298 = vst [vmem:[%s13681_s13 + $0x370] sm:$0xff] %v8954_v36  ;;  %v7121_v61 = vadd.f32 %v8696_v44, %v6960_v34 }
 0x7c9   :  { %7299 = vst.msk [vmem:[%s13681_s13 + $0x378] sm:$0xff] %vm1132_vm0, %v7121_v61  ;;  %v6787_v37 = vpop.f32.mrb[112].mxu0  ;;  %v8697_v32 = vpop.f32.mrb[176].mxu1 }
 0x7ca   :  { %v8955_v1 = vadd.f32 %v6787_v37, %v13214_v51  ;;  %v6789_v55 = vpop.f32.mrb[113].mxu0  ;;  %v8698_v56 = vpop.f32.mrb[177].mxu1  ;;  %v6984_v37 = vadd.f32 %v13186_v3, %v13216_v4 }
 0x7cb   :  { %v8956_v59 = vadd.f32 %v6789_v55, %v13218_v31  ;;  %v8699_v23 = vadd.f32 %v8698_v56, %v8697_v32  ;;  %v6791_v2 = vpop.f32.mrb[114].mxu0  ;;  %v8700_v16 = vpop.f32.mrb[178].mxu1 }
 0x7cc   :  { %7304 = vst [vmem:[%s13681_s13 + $0x3a0] sm:$0xff] %v8955_v1  ;;  %v8957_v38 = vadd.f32 %v6791_v2, %v13214_v51  ;;  %v6793_v49 = vpop.f32.mrb[115].mxu0  ;;  %v8701_v40 = vpop.f32.mrb[179].mxu1  ;;  %v6989_v2 = vadd.f32 %v13188_v62, %v13216_v4 }
 0x7cd   :  { %7305 = vst [vmem:[%s13681_s13 + $0x3a8] sm:$0xff] %v8956_v59  ;;  %v7126_v5 = vadd.f32 %v8699_v23, %v6965_v7  ;;  %v8958_v14 = vadd.f32 %v6793_v49, %v13218_v31  ;;  %v8702_v60 = vadd.f32 %v8701_v40, %v8700_v16 }
 0x7ce   :  { %7311 = vst [vmem:[%s13681_s13 + $0x3d8] sm:$0xff] %v8957_v38 }
 0x7cf   :  { %7306 = vst.msk [vmem:[%s13681_s13 + $0x3b0] sm:$0xff] %vm1132_vm0, %v7126_v5  ;;  %7312 = vst [vmem:[%s13681_s13 + $0x3e0] sm:$0xff] %v8958_v14  ;;  %v7129_v17 = vadd.f32 %v8702_v60, %v6968_v43  ;;  %v6992_v60 = vadd.f32 %v13190_v15, %v13216_v4 }
 0x7d1   :  { %7313 = vst.msk [vmem:[%s13681_s13 + $0x3e8] sm:$0xff] %vm1132_vm0, %v7129_v17  ;;  %v6797_v50 = vpop.f32.mrb[116].mxu0  ;;  %v8703_v63 = vpop.f32.mrb[180].mxu1 }
 0x7d2   :  { %v8959_v19 = vadd.f32 %v6797_v50, %v13214_v51  ;;  %v6799_v47 = vpop.f32.mrb[117].mxu0  ;;  %v8704_v30 = vpop.f32.mrb[181].mxu1 }
 0x7d3   :  { %v8960_v6 = vadd.f32 %v6799_v47, %v13218_v31  ;;  %v8705_v0 = vadd.f32 %v8704_v30, %v8703_v63  ;;  %v6801_v39 = vpop.f32.mrb[118].mxu0  ;;  %v8706_v57 = vpop.f32.mrb[182].mxu1 }
 0x7d4   :  { %7318 = vst [vmem:[%s13681_s13 + $0x410] sm:$0xff] %v8959_v19  ;;  %v8961_v33 = vadd.f32 %v6801_v39, %v13214_v51  ;;  %v6803_v20 = vpop.f32.mrb[119].mxu0  ;;  %v8707_v29 = vpop.f32.mrb[183].mxu1 }
 0x7d5   :  { %7319 = vst [vmem:[%s13681_s13 + $0x418] sm:$0xff] %v8960_v6  ;;  %v7134_v45 = vadd.f32 %v8705_v0, %v6973_v13  ;;  %v8962_v41 = vadd.f32 %v6803_v20, %v13218_v31  ;;  %v8708_v18 = vadd.f32 %v8707_v29, %v8706_v57  ;;  %v6997_v6 = vadd.f32 %v13192_v12, %v13216_v4 }
 0x7d6   :  { %7325 = vst [vmem:[%s13681_s13 + $0x448] sm:$0xff] %v8961_v33 }
 0x7d7   :  { %7320 = vst.msk [vmem:[%s13681_s13 + $0x420] sm:$0xff] %vm1132_vm0, %v7134_v45  ;;  %7326 = vst [vmem:[%s13681_s13 + $0x450] sm:$0xff] %v8962_v41  ;;  %v7137_v22 = vadd.f32 %v8708_v18, %v6976_v26  ;;  %v7000_v45 = vadd.f32 %v13194_v48, %v13216_v4 }
 0x7d9   :  { %7327 = vst.msk [vmem:[%s13681_s13 + $0x458] sm:$0xff] %vm1132_vm0, %v7137_v22  ;;  %v6807_v58 = vpop.f32.mrb[120].mxu0  ;;  %v8709_v53 = vpop.f32.mrb[184].mxu1 }
 0x7da   :  { %v8963_v9 = vadd.f32 %v6807_v58, %v13214_v51  ;;  %v6809_v35 = vpop.f32.mrb[121].mxu0  ;;  %v8710_v54 = vpop.f32.mrb[185].mxu1 }
 0x7db   :  { %v8964_v10 = vadd.f32 %v6809_v35, %v13218_v31  ;;  %v8711_v42 = vadd.f32 %v8710_v54, %v8709_v53  ;;  %v6811_v34 = vpop.f32.mrb[122].mxu0  ;;  %v8712_v25 = vpop.f32.mrb[186].mxu1  ;;  %v7005_v54 = vadd.f32 %v13196_v21, %v13216_v4 }
 0x7dc   :  { %7332 = vst [vmem:[%s13681_s13 + $0x480] sm:$0xff] %v8963_v9  ;;  %v8965_v36 = vadd.f32 %v6811_v34, %v13214_v51  ;;  %v6813_v44 = vpop.f32.mrb[123].mxu0  ;;  %v8713_v61 = vpop.f32.mrb[187].mxu1 }
 0x7dd   :  { %7333 = vst [vmem:[%s13681_s13 + $0x488] sm:$0xff] %v8964_v10  ;;  %v7142_v46 = vadd.f32 %v8711_v42, %v6981_v27  ;;  %v8966_v32 = vadd.f32 %v6813_v44, %v13218_v31  ;;  %v8714_v1 = vadd.f32 %v8713_v61, %v8712_v25  ;;  %v7008_v61 = vadd.f32 %v13198_v8, %v13216_v4 }
 0x7de   :  { %7339 = vst [vmem:[%s13681_s13 + $0x4b8] sm:$0xff] %v8965_v36 }
 0x7df   :  { %7334 = vst.msk [vmem:[%s13681_s13 + $0x490] sm:$0xff] %vm1132_vm0, %v7142_v46  ;;  %7340 = vst [vmem:[%s13681_s13 + $0x4c0] sm:$0xff] %v8966_v32  ;;  %v7145_v3 = vadd.f32 %v8714_v1, %v6984_v37 }
 0x7e1   :  { %7341 = vst.msk [vmem:[%s13681_s13 + $0x4c8] sm:$0xff] %vm1132_vm0, %v7145_v3  ;;  %v6817_v55 = vpop.f32.mrb[124].mxu0  ;;  %v8715_v56 = vpop.f32.mrb[188].mxu1 }
 0x7e2   :  { %v8967_v7 = vadd.f32 %v6817_v55, %v13214_v51  ;;  %v6819_v59 = vpop.f32.mrb[125].mxu0  ;;  %v8716_v23 = vpop.f32.mrb[189].mxu1 }
 0x7e3   :  { %v8968_v16 = vadd.f32 %v6819_v59, %v13218_v31  ;;  %v8717_v38 = vadd.f32 %v8716_v23, %v8715_v56  ;;  %v6821_v49 = vpop.f32.mrb[126].mxu0  ;;  %v8718_v40 = vpop.f32.mrb[190].mxu1 }
 0x7e4   :  { %7346 = vst [vmem:[%s13681_s13 + $0x4f0] sm:$0xff] %v8967_v7  ;;  %v8969_v43 = vadd.f32 %v6821_v49, %v13214_v51  ;;  %v6823_v5 = vpop.f32.mrb[127].mxu0  ;;  %v8719_v14 = vpop.f32.mrb[191].mxu1  ;;  %v7013_v7 = vadd.f32 %v13200_v28, %v13216_v4 }
 0x7e5   :  { %7347 = vst [vmem:[%s13681_s13 + $0x4f8] sm:$0xff] %v8968_v16  ;;  %v7150_v62 = vadd.f32 %v8717_v38, %v6989_v2  ;;  %v8970_v17 = vadd.f32 %v6823_v5, %v13218_v31  ;;  %v8720_v50 = vadd.f32 %v8719_v14, %v8718_v40 }
 0x7e6   :  { %7353 = vst [vmem:[%s13681_s13 + $0x528] sm:$0xff] %v8969_v43  ;;  %v7016_v43 = vadd.f32 %v13202_v52, %v13216_v4 }
 0x7e7   :  { %7348 = vst.msk [vmem:[%s13681_s13 + $0x500] sm:$0xff] %vm1132_vm0, %v7150_v62  ;;  %7354 = vst [vmem:[%s13681_s13 + $0x530] sm:$0xff] %v8970_v17  ;;  %v7153_v15 = vadd.f32 %v8720_v50, %v6992_v60 }
 0x7e9   :  { %7355 = vst.msk [vmem:[%s13681_s13 + $0x538] sm:$0xff] %vm1132_vm0, %v7153_v15  ;;  %v6827_v63 = vpop.f32.mrb[128].mxu0  ;;  %v8721_v19 = vpop.f32.mrb[192].mxu1 }
 0x7ea   :  { %v8971_v47 = vadd.f32 %v6827_v63, %v13214_v51  ;;  %v6829_v30 = vpop.f32.mrb[129].mxu0  ;;  %v8722_v13 = vpop.f32.mrb[193].mxu1  ;;  %v7021_v63 = vadd.f32 %v13206_v24, %v13216_v4 }
 0x7eb   :  { %v8972_v0 = vadd.f32 %v6829_v30, %v13218_v31  ;;  %v8723_v39 = vadd.f32 %v8722_v13, %v8721_v19  ;;  %v6831_v57 = vpop.f32.mrb[130].mxu0  ;;  %v8724_v33 = vpop.f32.mrb[194].mxu1 }
 0x7ec   :  { %7360 = vst [vmem:[%s13681_s13 + $0x560] sm:$0xff] %v8971_v47  ;;  %v8973_v20 = vadd.f32 %v6831_v57, %v13214_v51  ;;  %v6833_v29 = vpop.f32.mrb[131].mxu0  ;;  %v8725_v26 = vpop.f32.mrb[195].mxu1  ;;  %v7024_v57 = vadd.f32 %v13209_v11, %v13216_v4 }
 0x7ed   :  { %7361 = vst [vmem:[%s13681_s13 + $0x568] sm:$0xff] %v8972_v0  ;;  %v7158_v12 = vadd.f32 %v8723_v39, %v6997_v6  ;;  %v8974_v41 = vadd.f32 %v6833_v29, %v13218_v31  ;;  %v8726_v18 = vadd.f32 %v8725_v26, %v8724_v33 }
 0x7ee   :  { %7367 = vst [vmem:[%s13681_s13 + $0x598] sm:$0xff] %v8973_v20 }
 0x7ef   :  { %7362 = vst.msk [vmem:[%s13681_s13 + $0x570] sm:$0xff] %vm1132_vm0, %v7158_v12  ;;  %7368 = vst [vmem:[%s13681_s13 + $0x5a0] sm:$0xff] %v8974_v41  ;;  %v7161_v48 = vadd.f32 %v8726_v18, %v7000_v45 }
 0x7f1   :  { %7369 = vst.msk [vmem:[%s13681_s13 + $0x5a8] sm:$0xff] %vm1132_vm0, %v7161_v48  ;;  %v6837_v22 = vpop.f32.mrb[132].mxu0  ;;  %v8727_v58 = vpop.f32.mrb[196].mxu1 }
 0x7f2   :  { %v8975_v53 = vadd.f32 %v6837_v22, %v13214_v51  ;;  %v6839_v9 = vpop.f32.mrb[133].mxu0  ;;  %v8728_v35 = vpop.f32.mrb[197].mxu1 }
 0x7f3   :  { %v8976_v27 = vadd.f32 %v6839_v9, %v13218_v31  ;;  %v8729_v10 = vadd.f32 %v8728_v35, %v8727_v58  ;;  %v6841_v42 = vpop.f32.mrb[134].mxu0  ;;  %v8730_v34 = vpop.f32.mrb[198].mxu1 }
 0x7f4   :  { %7374 = vst [vmem:[%s13681_s13 + $0x5d0] sm:$0xff] %v8975_v53  ;;  %v8977_v25 = vadd.f32 %v6841_v42, %v13214_v51  ;;  %v6843_v36 = vpop.f32.mrb[135].mxu0  ;;  %v8731_v44 = vpop.f32.mrb[199].mxu1 }
 0x7f5   :  { %7375 = vst [vmem:[%s13681_s13 + $0x5d8] sm:$0xff] %v8976_v27  ;;  %v7166_v21 = vadd.f32 %v8729_v10, %v7005_v54  ;;  %v8978_v37 = vadd.f32 %v6843_v36, %v13218_v31  ;;  %v8732_v46 = vadd.f32 %v8731_v44, %v8730_v34 }
 0x7f6   :  { %7381 = vst [vmem:[%s13681_s13 + $0x608] sm:$0xff] %v8977_v25 }
 0x7f7   :  { %7376 = vst.msk [vmem:[%s13681_s13 + $0x5e0] sm:$0xff] %vm1132_vm0, %v7166_v21  ;;  %7382 = vst [vmem:[%s13681_s13 + $0x610] sm:$0xff] %v8978_v37  ;;  %v7169_v8 = vadd.f32 %v8732_v46, %v7008_v61 }
 0x7f9   :  { %7383 = vst.msk [vmem:[%s13681_s13 + $0x618] sm:$0xff] %vm1132_vm0, %v7169_v8  ;;  %v6847_v32 = vpop.f32.mrb[136].mxu0  ;;  %v8733_v1 = vpop.f32.mrb[200].mxu1 }
 0x7fa   :  { %v8979_v3 = vadd.f32 %v6847_v32, %v13214_v51  ;;  %v6849_v55 = vpop.f32.mrb[137].mxu0  ;;  %v8734_v56 = vpop.f32.mrb[201].mxu1 }
 0x7fb   :  { %v8980_v59 = vadd.f32 %v6849_v55, %v13218_v31  ;;  %v8735_v23 = vadd.f32 %v8734_v56, %v8733_v1  ;;  %v6851_v2 = vpop.f32.mrb[138].mxu0  ;;  %v8736_v16 = vpop.f32.mrb[202].mxu1 }
 0x7fc   :  { %7388 = vst [vmem:[%s13681_s13 + $0x640] sm:$0xff] %v8979_v3  ;;  %v8981_v38 = vadd.f32 %v6851_v2, %v13214_v51  ;;  %v6853_v49 = vpop.f32.mrb[139].mxu0  ;;  %v8737_v40 = vpop.f32.mrb[203].mxu1 }
 0x7fd   :  { %7389 = vst [vmem:[%s13681_s13 + $0x648] sm:$0xff] %v8980_v59  ;;  %v7174_v28 = vadd.f32 %v8735_v23, %v7013_v7  ;;  %v8982_v5 = vadd.f32 %v6853_v49, %v13218_v31  ;;  %v8738_v14 = vadd.f32 %v8737_v40, %v8736_v16 }
 0x7fe   :  { %7395 = vst [vmem:[%s13681_s13 + $0x678] sm:$0xff] %v8981_v38 }
 0x7ff   :  { %7390 = vst.msk [vmem:[%s13681_s13 + $0x650] sm:$0xff] %vm1132_vm0, %v7174_v28  ;;  %7396 = vst [vmem:[%s13681_s13 + $0x680] sm:$0xff] %v8982_v5  ;;  %v7177_v52 = vadd.f32 %v8738_v14, %v7016_v43 }
 0x801   :  { %7397 = vst.msk [vmem:[%s13681_s13 + $0x688] sm:$0xff] %vm1132_vm0, %v7177_v52  ;;  %v6857_v60 = vpop.f32.mrb[140].mxu0  ;;  %v8739_v62 = vpop.f32.mrb[204].mxu1 }
 0x802   :  { %v8983_v17 = vadd.f32 %v6857_v60, %v13214_v51  ;;  %v6859_v50 = vpop.f32.mrb[141].mxu0  ;;  %v8740_v15 = vpop.f32.mrb[205].mxu1 }
 0x803   :  { %v8984_v19 = vadd.f32 %v6859_v50, %v13218_v31  ;;  %v8741_v47 = vadd.f32 %v8740_v15, %v8739_v62  ;;  %v6861_v30 = vpop.f32.mrb[142].mxu0  ;;  %v8742_v13 = vpop.f32.mrb[206].mxu1 }
 0x804   :  { %7402 = vst [vmem:[%s13681_s13 + $0x6b0] sm:$0xff] %v8983_v17  ;;  %v8985_v6 = vadd.f32 %v6861_v30, %v13214_v51  ;;  %v6863_v0 = vpop.f32.mrb[143].mxu0  ;;  %v8743_v39 = vpop.f32.mrb[207].mxu1 }
 0x805   :  { %7403 = vst [vmem:[%s13681_s13 + $0x6b8] sm:$0xff] %v8984_v19  ;;  %v7182_v24 = vadd.f32 %v8741_v47, %v7021_v63  ;;  %v8986_v33 = vadd.f32 %v6863_v0, %v13218_v31  ;;  %v8744_v20 = vadd.f32 %v8743_v39, %v8742_v13 }
 0x806   :  { %7409 = vst [vmem:[%s13681_s13 + $0x6e8] sm:$0xff] %v8985_v6 }
 0x807   :  { %7404 = vst.msk [vmem:[%s13681_s13 + $0x6c0] sm:$0xff] %vm1132_vm0, %v7182_v24  ;;  %7410 = vst [vmem:[%s13681_s13 + $0x6f0] sm:$0xff] %v8986_v33  ;;  %v7185_v11 = vadd.f32 %v8744_v20, %v7024_v57 }
 0x809   :  { %7411 = vst.msk [vmem:[%s13681_s13 + $0x6f8] sm:$0xff] %vm1132_vm0, %v7185_v11 }

</bundles_post_ra>
